<compile_context>
chip_gen: v7x
topology: tpu7x:2x2x1
jax: 0.10.0
libtpu: 0.0.40
codegen_flags: <defaults>
</compile_context>

<pallas_src>
import jax
import jax.numpy as jnp
from jax.experimental import pallas as pl
from jax.experimental.pallas import tpu as pltpu


# ----------------------------------------------------------------------------
# Kernel 1: fused 3x3 "SAME" conv + bias + ReLU + 2x2 max-pool (stride 2).
# Input is already im2col'd per pooling quadrant by the wrapper:
#   x_ref : (4*M, K)   M = B*hp*wp, K = 9*cin ; rows ordered quadrant-major
#   w_ref : (K, cout)  (3,3,cin,cout) collapsed row-major -> matches tap concat order
#   b_ref : (1, cout)
#   o_ref : (M, cout)  pooled output, NHWC-flattened rows (b, i, j)
# ----------------------------------------------------------------------------
def conv_relu_pool_kernel(x_ref, w_ref, b_ref, o_ref):
    m = o_ref.shape[0]                                   # static rows per quadrant
    acc = jnp.dot(x_ref[...], w_ref[...],
                  preferred_element_type=jnp.float32)    # single MXU dot (4*M, cout)
    q = jnp.maximum(acc + b_ref[...], 0.0)
    # 2x2 max-pool == elementwise max across the 4 quadrant row-slabs (static slices,
    # M is a multiple of 8 so sublane-aligned).
    pooled = jnp.maximum(jnp.maximum(q[0 * m:1 * m], q[1 * m:2 * m]),
                         jnp.maximum(q[2 * m:3 * m], q[3 * m:4 * m]))
    o_ref[...] = pooled.astype(o_ref.dtype)


def conv_relu_pool(x_nhwc, w_cat, bias_2d):
    """x_nhwc: (B,H,W,cin) f32; w_cat: (9*cin, cout); bias_2d: (1, cout)."""
    B, H, W, cin = x_nhwc.shape
    K, cout = w_cat.shape
    hp, wp = H // 2, W // 2
    M = B * hp * wp

    # Wrapper-side im2col: zero-pad (padding=1) and, for each of the 4 pooling-window
    # offsets (py,px), concatenate the 9 conv taps along the channel (lane) dim.
    xpad = jnp.pad(x_nhwc, ((0, 0), (1, 1), (1, 1), (0, 0)))
    quads = []
    for py in range(2):
        for px in range(2):
            taps = [xpad[:, py + dy::2, px + dx::2, :][:, :hp, :wp, :]
                    for dy in range(3) for dx in range(3)]
            quads.append(jnp.concatenate(taps, axis=-1).reshape(M, K))
    xcat = jnp.concatenate(quads, axis=0)                # (4*M, 9*cin), quadrant-major

    out = pl.pallas_call(
        conv_relu_pool_kernel,
        out_shape=jax.ShapeDtypeStruct((M, cout), jnp.float32),
        grid=(1,),
        in_specs=[
            pl.BlockSpec((4 * M, K), lambda i: (0, 0)),
            pl.BlockSpec((K, cout), lambda i: (0, 0)),
            pl.BlockSpec((1, cout), lambda i: (0, 0)),
        ],
        out_specs=pl.BlockSpec((M, cout), lambda i: (0, 0)),
        compiler_params=pltpu.CompilerParams(dimension_semantics=("arbitrary",)),
    )(xcat, w_cat, bias_2d)
    return out.reshape(B, hp, wp, cout)


# ----------------------------------------------------------------------------
# Kernel 2: fused fc1 + ReLU + fc2.  Weights are bf16 (HBM traffic halved),
# activations cast to bf16 at the matmul, accumulation in f32.
# ----------------------------------------------------------------------------
def mlp_kernel(x_ref, w1_ref, b1_ref, w2_ref, b2_ref, o_ref):
    x = x_ref[...].astype(jnp.bfloat16)
    h = jnp.dot(x, w1_ref[...], preferred_element_type=jnp.float32) + b1_ref[...]
    h = jnp.maximum(h, 0.0).astype(jnp.bfloat16)
    o = jnp.dot(h, w2_ref[...], preferred_element_type=jnp.float32) + b2_ref[...]
    o_ref[...] = o.astype(o_ref.dtype)


def mlp(feat, w1, b1, w2, b2):
    B, fin = feat.shape
    hidden = w1.shape[1]
    nclass = w2.shape[1]
    return pl.pallas_call(
        mlp_kernel,
        out_shape=jax.ShapeDtypeStruct((B, nclass), jnp.float32),
        grid=(1,),
        in_specs=[
            pl.BlockSpec((B, fin), lambda i: (0, 0)),
            pl.BlockSpec((fin, hidden), lambda i: (0, 0)),
            pl.BlockSpec((1, hidden), lambda i: (0, 0)),
            pl.BlockSpec((hidden, nclass), lambda i: (0, 0)),
            pl.BlockSpec((1, nclass), lambda i: (0, 0)),
        ],
        out_specs=pl.BlockSpec((B, nclass), lambda i: (0, 0)),
        compiler_params=pltpu.CompilerParams(dimension_semantics=("arbitrary",)),
    )(feat, w1, b1, w2, b2)


# ----------------------------------------------------------------------------
# One-time parameter preparation (host-side shuffle / dtype cast).
#  - conv weights HWIO -> (9*cin, cout) to match the kernel's tap-concat order.
#  - fc1_w rows permuted from NCHW-flatten order (PyTorch view) to NHWC-flatten
#    order so the conv2 output can be flattened with a free reshape.
#  - fc weights cast to bf16.
# ----------------------------------------------------------------------------
def prepare_params(params, H, W):
    h2p, w2p = H // 4, W // 4
    c2 = params["conv2_w"].shape[-1]
    fc1_w = params["fc1_w"]                                   # (c2*h2p*w2p, 512), NCHW rows
    fc1_w_nhwc = (fc1_w.reshape(c2, h2p, w2p, -1)
                       .transpose(1, 2, 0, 3)
                       .reshape(h2p * w2p * c2, -1))
    return {
        "conv1_w": params["conv1_w"].reshape(-1, params["conv1_w"].shape[-1]),  # (27, 32)
        "conv1_b": params["conv1_b"].reshape(1, -1),
        "conv2_w": params["conv2_w"].reshape(-1, params["conv2_w"].shape[-1]),  # (288, 64)
        "conv2_b": params["conv2_b"].reshape(1, -1),
        "fc1_w": fc1_w_nhwc.astype(jnp.bfloat16),
        "fc1_b": params["fc1_b"].reshape(1, -1),
        "fc2_w": params["fc2_w"].astype(jnp.bfloat16),
        "fc2_b": params["fc2_b"].reshape(1, -1),
    }


def card_cnn_forward(x_nchw, kp):
    x = jnp.transpose(x_nchw, (0, 2, 3, 1)).astype(jnp.float32)   # NCHW -> NHWC (tiny)
    h1 = conv_relu_pool(x, kp["conv1_w"], kp["conv1_b"])          # (B, H/2, W/2, 32)
    h2 = conv_relu_pool(h1, kp["conv2_w"], kp["conv2_b"])         # (B, H/4, W/4, 64)
    B = x.shape[0]
    # NHWC flatten is a free row-major reshape; fc1_w rows were pre-permuted to match
    # PyTorch's x.view(-1, C*H*W) semantics.
    feat = h2.reshape(B, -1)
    return mlp(feat, kp["fc1_w"], kp["fc1_b"], kp["fc2_w"], kp["fc2_b"])


# ----------------------------------------------------------------------------
# Pure-JAX f32 reference (same math as the PyTorch module) for correctness.
# ----------------------------------------------------------------------------
def reference_forward(x_nchw, params):
    x = jnp.transpose(x_nchw, (0, 2, 3, 1)).astype(jnp.float32)

    def block(x, w, b):
        y = jax.lax.conv_general_dilated(
            x, w, (1, 1), "SAME",
            dimension_numbers=("NHWC", "HWIO", "NHWC"),
            precision=jax.lax.Precision.HIGHEST) + b
        y = jnp.maximum(y, 0.0)
        return jax.lax.reduce_window(y, -jnp.inf, jax.lax.max,
                                     (1, 2, 2, 1), (1, 2, 2, 1), "VALID")

    h = block(x, params["conv1_w"], params["conv1_b"])
    h = block(h, params["conv2_w"], params["conv2_b"])
    B = x.shape[0]
    feat = jnp.transpose(h, (0, 3, 1, 2)).reshape(B, -1)          # NCHW flatten (PyTorch view)
    h = jnp.maximum(feat @ params["fc1_w"] + params["fc1_b"], 0.0)
    return h @ params["fc2_w"] + params["fc2_b"]


if __name__ == "__main__":
    B, C, H, W = 2, 3, 32, 32   # small spatial size (original module implies 224x224)
    NUM_CLASSES = 10
    fc1_in = 64 * (H // 4) * (W // 4)

    key = jax.random.PRNGKey(0)
    ks = jax.random.split(key, 9)

    def init(k, shape, fan_in):
        return (jax.random.normal(k, shape, jnp.float32) /
                jnp.sqrt(jnp.float32(fan_in))).astype(jnp.float32)

    params = {
        # conv weights stored HWIO (PyTorch OIHW transposed to (kh, kw, in, out))
        "conv1_w": init(ks[0], (3, 3, 3, 32), 3 * 9),
        "conv1_b": init(ks[1], (32,), 32),
        "conv2_w": init(ks[2], (3, 3, 32, 64), 32 * 9),
        "conv2_b": init(ks[3], (64,), 64),
        # fc weights stored (in, out) == PyTorch Linear weight.T, NCHW-flatten row order
        "fc1_w": init(ks[4], (fc1_in, 512), fc1_in),
        "fc1_b": init(ks[5], (512,), 512),
        "fc2_w": init(ks[6], (512, NUM_CLASSES), 512),
        "fc2_b": init(ks[7], (NUM_CLASSES,), NUM_CLASSES),
    }
    x = jax.random.normal(ks[8], (B, C, H, W), jnp.float32)

    kp = prepare_params(params, H, W)          # one-time weight shuffle / bf16 cast
    fwd = jax.jit(card_cnn_forward)

    out = jax.block_until_ready(fwd(x, kp))
    ref = jax.block_until_ready(reference_forward(x, params))

    assert out.shape == (B, NUM_CLASSES)
    if not bool(jnp.allclose(out, ref, atol=5e-2, rtol=5e-2)):
        raise AssertionError(
            f"mismatch: max abs diff = {float(jnp.max(jnp.abs(out - ref)))}")
    print("KERNEL_OK")
</pallas_src>

<mosaic_0001>
module attributes {stable_mosaic.version = 11 : i64} {
  func.func @conv_relu_pool_kernel(%arg0: i32, %arg1: memref<2048x27xf32, #tpu.memory_space<vmem>>, %arg2: memref<27x32xf32, #tpu.memory_space<vmem>>, %arg3: memref<1x32xf32, #tpu.memory_space<vmem>>, %arg4: memref<512x32xf32, #tpu.memory_space<vmem>>) attributes {dimension_semantics = [#tpu.dimension_semantics<arbitrary>], iteration_bounds = array<i64: 1>, scalar_prefetch = 0 : i64, scratch_operands = 0 : i64, tpu.core_type = #tpu.core_type<tc>, window_params = [{pipeline_mode = #tpu.pipeline_mode<synchronous>, transform_indices = @transform_0, window_bounds = array<i64: 2048, 27>}, {pipeline_mode = #tpu.pipeline_mode<synchronous>, transform_indices = @transform_1, window_bounds = array<i64: 27, 32>}, {pipeline_mode = #tpu.pipeline_mode<synchronous>, transform_indices = @transform_2, window_bounds = array<i64: 1, 32>}, {pipeline_mode = #tpu.pipeline_mode<synchronous>, transform_indices = @transform_3, window_bounds = array<i64: 512, 32>}]} {
    %c0 = arith.constant 0 : index
    %c0_0 = arith.constant 0 : index
    %0 = vector.load %arg1[%c0, %c0_0] : memref<2048x27xf32, #tpu.memory_space<vmem>>, vector<2048x27xf32>
    %c0_1 = arith.constant 0 : index
    %c0_2 = arith.constant 0 : index
    %1 = vector.load %arg2[%c0_1, %c0_2] : memref<27x32xf32, #tpu.memory_space<vmem>>, vector<27x32xf32>
    %cst = arith.constant dense<0.000000e+00> : vector<2048x32xf32>
    %2 = tpu.matmul %0, %1, %cst {dimension_numbers = #tpu.dot_dimension_numbers<[1], [0], [0], [1], [0, 0, 1, 1], [], []>} : vector<2048x27xf32>, vector<27x32xf32>, vector<2048x32xf32> -> vector<2048x32xf32>
    %c0_3 = arith.constant 0 : index
    %c0_4 = arith.constant 0 : index
    %3 = vector.load %arg3[%c0_3, %c0_4] : memref<1x32xf32, #tpu.memory_space<vmem>>, vector<1x32xf32>
    %4 = vector.broadcast %3 : vector<1x32xf32> to vector<2048x32xf32>
    %5 = arith.addf %2, %4 : vector<2048x32xf32>
    %cst_5 = arith.constant 0.000000e+00 : f32
    %6 = vector.broadcast %cst_5 : f32 to vector<2048x32xf32>
    %7 = arith.maximumf %5, %6 : vector<2048x32xf32>
    %8 = vector.extract_strided_slice %7 {offsets = [0, 0], sizes = [512, 32], strides = [1, 1]} : vector<2048x32xf32> to vector<512x32xf32>
    %9 = vector.extract_strided_slice %7 {offsets = [512, 0], sizes = [512, 32], strides = [1, 1]} : vector<2048x32xf32> to vector<512x32xf32>
    %10 = arith.maximumf %8, %9 : vector<512x32xf32>
    %11 = vector.extract_strided_slice %7 {offsets = [1024, 0], sizes = [512, 32], strides = [1, 1]} : vector<2048x32xf32> to vector<512x32xf32>
    %12 = vector.extract_strided_slice %7 {offsets = [1536, 0], sizes = [512, 32], strides = [1, 1]} : vector<2048x32xf32> to vector<512x32xf32>
    %13 = arith.maximumf %11, %12 : vector<512x32xf32>
    %14 = arith.maximumf %10, %13 : vector<512x32xf32>
    %c0_6 = arith.constant 0 : index
    %c0_7 = arith.constant 0 : index
    %15 = vector.load %arg4[%c0_6, %c0_7] : memref<512x32xf32, #tpu.memory_space<vmem>>, vector<512x32xf32>
    tpu.vector_store %arg4[%c0_6, %c0_7], %14 {strides = array<i32>} : memref<512x32xf32, #tpu.memory_space<vmem>>, vector<512x32xf32>,
    return
  }
  func.func @transform_0(%arg0: i32) -> (i32, i32) {
    %c0_i32 = arith.constant 0 : i32
    %c0_i32_0 = arith.constant 0 : i32
    %c0_i32_1 = arith.constant 0 : i32
    return %c0_i32, %c0_i32_0 : i32, i32
  }
  func.func @transform_1(%arg0: i32) -> (i32, i32) {
    %c0_i32 = arith.constant 0 : i32
    %c0_i32_0 = arith.constant 0 : i32
    %c0_i32_1 = arith.constant 0 : i32
    return %c0_i32, %c0_i32_0 : i32, i32
  }
  func.func @transform_2(%arg0: i32) -> (i32, i32) {
    %c0_i32 = arith.constant 0 : i32
    %c0_i32_0 = arith.constant 0 : i32
    %c0_i32_1 = arith.constant 0 : i32
    return %c0_i32, %c0_i32_0 : i32, i32
  }
  func.func @transform_3(%arg0: i32) -> (i32, i32) {
    %c0_i32 = arith.constant 0 : i32
    %c0_i32_0 = arith.constant 0 : i32
    %c0_i32_1 = arith.constant 0 : i32
    return %c0_i32, %c0_i32_0 : i32, i32
  }
}

module attributes {stable_mosaic.version = 11 : i64} {
  func.func @conv_relu_pool_kernel(%arg0: i32, %arg1: memref<512x288xf32, #tpu.memory_space<vmem>>, %arg2: memref<288x64xf32, #tpu.memory_space<vmem>>, %arg3: memref<1x64xf32, #tpu.memory_space<vmem>>, %arg4: memref<128x64xf32, #tpu.memory_space<vmem>>) attributes {dimension_semantics = [#tpu.dimension_semantics<arbitrary>], iteration_bounds = array<i64: 1>, scalar_prefetch = 0 : i64, scratch_operands = 0 : i64, tpu.core_type = #tpu.core_type<tc>, window_params = [{pipeline_mode = #tpu.pipeline_mode<synchronous>, transform_indices = @transform_0, window_bounds = array<i64: 512, 288>}, {pipeline_mode = #tpu.pipeline_mode<synchronous>, transform_indices = @transform_1, window_bounds = array<i64: 288, 64>}, {pipeline_mode = #tpu.pipeline_mode<synchronous>, transform_indices = @transform_2, window_bounds = array<i64: 1, 64>}, {pipeline_mode = #tpu.pipeline_mode<synchronous>, transform_indices = @transform_3, window_bounds = array<i64: 128, 64>}]} {
    %c0 = arith.constant 0 : index
    %c0_0 = arith.constant 0 : index
    %0 = vector.load %arg1[%c0, %c0_0] : memref<512x288xf32, #tpu.memory_space<vmem>>, vector<512x288xf32>
    %c0_1 = arith.constant 0 : index
    %c0_2 = arith.constant 0 : index
    %1 = vector.load %arg2[%c0_1, %c0_2] : memref<288x64xf32, #tpu.memory_space<vmem>>, vector<288x64xf32>
    %cst = arith.constant dense<0.000000e+00> : vector<512x64xf32>
    %2 = tpu.matmul %0, %1, %cst {dimension_numbers = #tpu.dot_dimension_numbers<[1], [0], [0], [1], [0, 0, 1, 1], [], []>} : vector<512x288xf32>, vector<288x64xf32>, vector<512x64xf32> -> vector<512x64xf32>
    %c0_3 = arith.constant 0 : index
    %c0_4 = arith.constant 0 : index
    %3 = vector.load %arg3[%c0_3, %c0_4] : memref<1x64xf32, #tpu.memory_space<vmem>>, vector<1x64xf32>
    %4 = vector.broadcast %3 : vector<1x64xf32> to vector<512x64xf32>
    %5 = arith.addf %2, %4 : vector<512x64xf32>
    %cst_5 = arith.constant 0.000000e+00 : f32
    %6 = vector.broadcast %cst_5 : f32 to vector<512x64xf32>
    %7 = arith.maximumf %5, %6 : vector<512x64xf32>
    %8 = vector.extract_strided_slice %7 {offsets = [0, 0], sizes = [128, 64], strides = [1, 1]} : vector<512x64xf32> to vector<128x64xf32>
    %9 = vector.extract_strided_slice %7 {offsets = [128, 0], sizes = [128, 64], strides = [1, 1]} : vector<512x64xf32> to vector<128x64xf32>
    %10 = arith.maximumf %8, %9 : vector<128x64xf32>
    %11 = vector.extract_strided_slice %7 {offsets = [256, 0], sizes = [128, 64], strides = [1, 1]} : vector<512x64xf32> to vector<128x64xf32>
    %12 = vector.extract_strided_slice %7 {offsets = [384, 0], sizes = [128, 64], strides = [1, 1]} : vector<512x64xf32> to vector<128x64xf32>
    %13 = arith.maximumf %11, %12 : vector<128x64xf32>
    %14 = arith.maximumf %10, %13 : vector<128x64xf32>
    %c0_6 = arith.constant 0 : index
    %c0_7 = arith.constant 0 : index
    %15 = vector.load %arg4[%c0_6, %c0_7] : memref<128x64xf32, #tpu.memory_space<vmem>>, vector<128x64xf32>
    tpu.vector_store %arg4[%c0_6, %c0_7], %14 {strides = array<i32>} : memref<128x64xf32, #tpu.memory_space<vmem>>, vector<128x64xf32>,
    return
  }
  func.func @transform_0(%arg0: i32) -> (i32, i32) {
    %c0_i32 = arith.constant 0 : i32
    %c0_i32_0 = arith.constant 0 : i32
    %c0_i32_1 = arith.constant 0 : i32
    return %c0_i32, %c0_i32_0 : i32, i32
  }
  func.func @transform_1(%arg0: i32) -> (i32, i32) {
    %c0_i32 = arith.constant 0 : i32
    %c0_i32_0 = arith.constant 0 : i32
    %c0_i32_1 = arith.constant 0 : i32
    return %c0_i32, %c0_i32_0 : i32, i32
  }
  func.func @transform_2(%arg0: i32) -> (i32, i32) {
    %c0_i32 = arith.constant 0 : i32
    %c0_i32_0 = arith.constant 0 : i32
    %c0_i32_1 = arith.constant 0 : i32
    return %c0_i32, %c0_i32_0 : i32, i32
  }
  func.func @transform_3(%arg0: i32) -> (i32, i32) {
    %c0_i32 = arith.constant 0 : i32
    %c0_i32_0 = arith.constant 0 : i32
    %c0_i32_1 = arith.constant 0 : i32
    return %c0_i32, %c0_i32_0 : i32, i32
  }
}

module attributes {stable_mosaic.version = 11 : i64} {
  func.func @mlp_kernel(%arg0: i32, %arg1: memref<2x4096xf32, #tpu.memory_space<vmem>>, %arg2: memref<4096x512xbf16, #tpu.memory_space<vmem>>, %arg3: memref<1x512xf32, #tpu.memory_space<vmem>>, %arg4: memref<512x10xbf16, #tpu.memory_space<vmem>>, %arg5: memref<1x10xf32, #tpu.memory_space<vmem>>, %arg6: memref<2x10xf32, #tpu.memory_space<vmem>>) attributes {dimension_semantics = [#tpu.dimension_semantics<arbitrary>], iteration_bounds = array<i64: 1>, scalar_prefetch = 0 : i64, scratch_operands = 0 : i64, tpu.core_type = #tpu.core_type<tc>, window_params = [{pipeline_mode = #tpu.pipeline_mode<synchronous>, transform_indices = @transform_0, window_bounds = array<i64: 2, 4096>}, {pipeline_mode = #tpu.pipeline_mode<synchronous>, transform_indices = @transform_1, window_bounds = array<i64: 4096, 512>}, {pipeline_mode = #tpu.pipeline_mode<synchronous>, transform_indices = @transform_2, window_bounds = array<i64: 1, 512>}, {pipeline_mode = #tpu.pipeline_mode<synchronous>, transform_indices = @transform_3, window_bounds = array<i64: 512, 10>}, {pipeline_mode = #tpu.pipeline_mode<synchronous>, transform_indices = @transform_4, window_bounds = array<i64: 1, 10>}, {pipeline_mode = #tpu.pipeline_mode<synchronous>, transform_indices = @transform_5, window_bounds = array<i64: 2, 10>}]} {
    %c0 = arith.constant 0 : index
    %c0_0 = arith.constant 0 : index
    %0 = vector.load %arg1[%c0, %c0_0] : memref<2x4096xf32, #tpu.memory_space<vmem>>, vector<2x4096xf32>
    %1 = arith.truncf %0 : vector<2x4096xf32> to vector<2x4096xbf16>
    %c0_1 = arith.constant 0 : index
    %c0_2 = arith.constant 0 : index
    %2 = vector.load %arg2[%c0_1, %c0_2] : memref<4096x512xbf16, #tpu.memory_space<vmem>>, vector<4096x512xbf16>
    %cst = arith.constant dense<0.000000e+00> : vector<2x512xf32>
    %3 = tpu.matmul %1, %2, %cst {dimension_numbers = #tpu.dot_dimension_numbers<[1], [0], [0], [1], [0, 0, 1, 1], [], []>} : vector<2x4096xbf16>, vector<4096x512xbf16>, vector<2x512xf32> -> vector<2x512xf32>
    %c0_3 = arith.constant 0 : index
    %c0_4 = arith.constant 0 : index
    %4 = vector.load %arg3[%c0_3, %c0_4] : memref<1x512xf32, #tpu.memory_space<vmem>>, vector<1x512xf32>
    %5 = vector.broadcast %4 : vector<1x512xf32> to vector<2x512xf32>
    %6 = arith.addf %3, %5 : vector<2x512xf32>
    %cst_5 = arith.constant 0.000000e+00 : f32
    %7 = vector.broadcast %cst_5 : f32 to vector<2x512xf32>
    %8 = arith.maximumf %6, %7 : vector<2x512xf32>
    %9 = arith.truncf %8 : vector<2x512xf32> to vector<2x512xbf16>
    %c0_6 = arith.constant 0 : index
    %c0_7 = arith.constant 0 : index
    %10 = vector.load %arg4[%c0_6, %c0_7] : memref<512x10xbf16, #tpu.memory_space<vmem>>, vector<512x10xbf16>
    %cst_8 = arith.constant dense<0.000000e+00> : vector<2x10xf32>
    %11 = tpu.matmul %9, %10, %cst_8 {dimension_numbers = #tpu.dot_dimension_numbers<[1], [0], [0], [1], [0, 0, 1, 1], [], []>} : vector<2x512xbf16>, vector<512x10xbf16>, vector<2x10xf32> -> vector<2x10xf32>
    %c0_9 = arith.constant 0 : index
    %c0_10 = arith.constant 0 : index
    %12 = vector.load %arg5[%c0_9, %c0_10] : memref<1x10xf32, #tpu.memory_space<vmem>>, vector<1x10xf32>
    %13 = vector.broadcast %12 : vector<1x10xf32> to vector<2x10xf32>
    %14 = arith.addf %11, %13 : vector<2x10xf32>
    %c0_11 = arith.constant 0 : index
    %c0_12 = arith.constant 0 : index
    %15 = vector.load %arg6[%c0_11, %c0_12] : memref<2x10xf32, #tpu.memory_space<vmem>>, vector<2x10xf32>
    tpu.vector_store %arg6[%c0_11, %c0_12], %14 {strides = array<i32>} : memref<2x10xf32, #tpu.memory_space<vmem>>, vector<2x10xf32>,
    return
  }
  func.func @transform_0(%arg0: i32) -> (i32, i32) {
    %c0_i32 = arith.constant 0 : i32
    %c0_i32_0 = arith.constant 0 : i32
    %c0_i32_1 = arith.constant 0 : i32
    return %c0_i32, %c0_i32_0 : i32, i32
  }
  func.func @transform_1(%arg0: i32) -> (i32, i32) {
    %c0_i32 = arith.constant 0 : i32
    %c0_i32_0 = arith.constant 0 : i32
    %c0_i32_1 = arith.constant 0 : i32
    return %c0_i32, %c0_i32_0 : i32, i32
  }
  func.func @transform_2(%arg0: i32) -> (i32, i32) {
    %c0_i32 = arith.constant 0 : i32
    %c0_i32_0 = arith.constant 0 : i32
    %c0_i32_1 = arith.constant 0 : i32
    return %c0_i32, %c0_i32_0 : i32, i32
  }
  func.func @transform_3(%arg0: i32) -> (i32, i32) {
    %c0_i32 = arith.constant 0 : i32
    %c0_i32_0 = arith.constant 0 : i32
    %c0_i32_1 = arith.constant 0 : i32
    return %c0_i32, %c0_i32_0 : i32, i32
  }
  func.func @transform_4(%arg0: i32) -> (i32, i32) {
    %c0_i32 = arith.constant 0 : i32
    %c0_i32_0 = arith.constant 0 : i32
    %c0_i32_1 = arith.constant 0 : i32
    return %c0_i32, %c0_i32_0 : i32, i32
  }
  func.func @transform_5(%arg0: i32) -> (i32, i32) {
    %c0_i32 = arith.constant 0 : i32
    %c0_i32_0 = arith.constant 0 : i32
    %c0_i32_1 = arith.constant 0 : i32
    return %c0_i32, %c0_i32_0 : i32, i32
  }
}

</mosaic_0001>

<bundles_post_ra>
// kernel: card_cnn_forward.3
= control target key start
LH: loop header
LB: loop body
LE: loop exit
PB: predicated region body
PF: predicated region fallthrough
CT: control target
= control target key end

     0   :  { %vm1050_vm0 = vcmask 1042432   ;;  %vm281_vm1 = vcmask 220160   ;;  %vm3842_vm2 = vmmov 1   ;;  %vm2847_vm4 = vcmask 261120   ;;  %s6431_s1 = inlined_call_operand.vmem [shape: f32[27,32], index: 1, kind: input, shape index: {}]   ;;  %s6432_s0 = inlined_call_operand.vmem [shape: f32[2048,27], index: 0, kind: input, shape index: {}]   ;;  %s6433_s2 = inlined_call_operand.vmem [shape: f32[1,32], index: 2, kind: input, shape index: {}]   ;;  %s6434_s3 = inlined_call_operand.vmem [shape: f32[512,32], index: 3, kind: output, shape index: {}]  }
   0x1   :  { %v270_v0 = vld [vmem:[%s6431_s1] sm:$0xff]  ;;  %v271_v1 = vld [vmem:[%s6431_s1 + $0x8] sm:$0xff]  ;;  %v272_v2 = vld [vmem:[%s6431_s1 + $0x10] sm:$0xff] }
   0x2   :  { %v3826_v3 = vpack.c.bf16 %v271_v1, %v270_v0  ;;  %v273_v4 = vld [vmem:[%s6431_s1 + $0x18] sm:$0x7]  ;;  %v14_v5 = vld [vmem:[%s6432_s0] sm:$0xff]  ;;  %vm3831_vm3 = vmpackc.low %vm1050_vm0, %vm3842_vm2 }
   0x3   :  { %v3830_v6 = vpack.c.bf16 %v273_v4, %v272_v2  ;;  %3442 = vmatprep.mubr.msk.f32.mxu0 %vm281_vm1, %v14_v5  ;;  %v142_v7 = vld [vmem:[%s6432_s0 + $0x400] sm:$0xff]  ;;  %v15_v8 = vld [vmem:[%s6432_s0 + $0x8] sm:$0xff]  ;;  %v16_v10 = vld [vmem:[%s6432_s0 + $0x10] sm:$0xff] }
   0x4   :  { %3827 = vmatprep.subr.bf16.mxu0 %v3826_v3  ;;  %3836 = vmatprep.subr.bf16.mxu1 %v3826_v3  ;;  %v143_v9 = vld [vmem:[%s6432_s0 + $0x408] sm:$0xff]  ;;  %v144_v11 = vld [vmem:[%s6432_s0 + $0x410] sm:$0xff]  ;;  %v17_v12 = vld [vmem:[%s6432_s0 + $0x18] sm:$0xff] }
   0x5   :  { %3829 = vmatpush3.bf16.msra.mxu0 %v3826_v3  ;;  %3838 = vmatpush3.bf16.msra.mxu1 %v3826_v3  ;;  %v145_v13 = vld [vmem:[%s6432_s0 + $0x418] sm:$0xff]  ;;  %v18_v14 = vld [vmem:[%s6432_s0 + $0x20] sm:$0xff]  ;;  %v19_v16 = vld [vmem:[%s6432_s0 + $0x28] sm:$0xff] }
   0x6   :  { %3832 = vmatprep.subr.msk.bf16.mxu0 %vm3831_vm3, %v3830_v6  ;;  %3837 = vmatprep.subr.msk.bf16.mxu1 %vm3831_vm3, %v3830_v6  ;;  %v146_v15 = vld [vmem:[%s6432_s0 + $0x420] sm:$0xff]  ;;  %v147_v17 = vld [vmem:[%s6432_s0 + $0x428] sm:$0xff]  ;;  %v20_v18 = vld [vmem:[%s6432_s0 + $0x30] sm:$0xff] }
   0x7   :  { %3634 = vmatprep.mubr.msk.f32.mxu1 %vm281_vm1, %v142_v7  ;;  %v148_v19 = vld [vmem:[%s6432_s0 + $0x430] sm:$0xff]  ;;  %v21_v20 = vld [vmem:[%s6432_s0 + $0x38] sm:$0xff]  ;;  %v22_v22 = vld [vmem:[%s6432_s0 + $0x40] sm:$0xff] }
   0x8   :  { %v149_v21 = vld [vmem:[%s6432_s0 + $0x438] sm:$0xff]  ;;  %v150_v23 = vld [vmem:[%s6432_s0 + $0x440] sm:$0xff]  ;;  %v23_v24 = vld [vmem:[%s6432_s0 + $0x48] sm:$0xff] }
   0x9   :  { %3835 = vmatpush3.bf16.msk.msra.mxu0 %vm3831_vm3, %v3830_v6  ;;  %3839 = vmatpush3.bf16.msk.msra.mxu1 %vm3831_vm3, %v3830_v6  ;;  %v151_v25 = vld [vmem:[%s6432_s0 + $0x448] sm:$0xff]  ;;  %v24_v26 = vld [vmem:[%s6432_s0 + $0x50] sm:$0xff]  ;;  %v25_v28 = vld [vmem:[%s6432_s0 + $0x58] sm:$0xff] }
   0xa   :  { %v152_v27 = vld [vmem:[%s6432_s0 + $0x450] sm:$0xff]  ;;  %v153_v29 = vld [vmem:[%s6432_s0 + $0x458] sm:$0xff]  ;;  %v26_v30 = vld [vmem:[%s6432_s0 + $0x60] sm:$0xff] }
   0xb   :  { %v154_v31 = vld [vmem:[%s6432_s0 + $0x460] sm:$0xff]  ;;  %v27_v32 = vld [vmem:[%s6432_s0 + $0x68] sm:$0xff]  ;;  %v28_v34 = vld [vmem:[%s6432_s0 + $0x70] sm:$0xff] }
   0xc   :  { %3443 = vmatmul.mubr.msk.f32.vlgmr.msra.gmra.mrb[0].mxu0 %vm281_vm1, %v15_v8  ;;  %3635 = vmatmul.mubr.msk.f32.vlgmr.msra.gmra.mrb[0].mxu1 %vm281_vm1, %v143_v9  ;;  %v155_v33 = vld [vmem:[%s6432_s0 + $0x468] sm:$0xff]  ;;  %v156_v35 = vld [vmem:[%s6432_s0 + $0x470] sm:$0xff]  ;;  %v29_v36 = vld [vmem:[%s6432_s0 + $0x78] sm:$0xff] }
   0xd   :  { %3445 = vmatprep.mubr.msk.f32.mxu0 %vm281_vm1, %v16_v10  ;;  %3637 = vmatprep.mubr.msk.f32.mxu1 %vm281_vm1, %v144_v11  ;;  %v157_v37 = vld [vmem:[%s6432_s0 + $0x478] sm:$0xff]  ;;  %v30_v38 = vld [vmem:[%s6432_s0 + $0x80] sm:$0xff]  ;;  %v31_v40 = vld [vmem:[%s6432_s0 + $0x88] sm:$0xff] }
   0xe   :  { %v158_v39 = vld [vmem:[%s6432_s0 + $0x480] sm:$0xff]  ;;  %v159_v41 = vld [vmem:[%s6432_s0 + $0x488] sm:$0xff]  ;;  %v32_v42 = vld [vmem:[%s6432_s0 + $0x90] sm:$0xff] }
   0xf   :  { %v160_v43 = vld [vmem:[%s6432_s0 + $0x490] sm:$0xff]  ;;  %v33_v44 = vld [vmem:[%s6432_s0 + $0x98] sm:$0xff]  ;;  %v34_v46 = vld [vmem:[%s6432_s0 + $0xa0] sm:$0xff] }
  0x10   :  { %3446 = vmatmul.mubr.msk.f32.gmra.mrb[2].mxu0 %vm281_vm1, %v17_v12  ;;  %3638 = vmatmul.mubr.msk.f32.gmra.mrb[2].mxu1 %vm281_vm1, %v145_v13  ;;  %v161_v45 = vld [vmem:[%s6432_s0 + $0x498] sm:$0xff]  ;;  %v162_v47 = vld [vmem:[%s6432_s0 + $0x4a0] sm:$0xff]  ;;  %v35_v48 = vld [vmem:[%s6432_s0 + $0xa8] sm:$0xff] }
  0x11   :  { %3448 = vmatprep.mubr.msk.f32.mxu0 %vm281_vm1, %v18_v14  ;;  %3640 = vmatprep.mubr.msk.f32.mxu1 %vm281_vm1, %v146_v15  ;;  %v163_v49 = vld [vmem:[%s6432_s0 + $0x4a8] sm:$0xff]  ;;  %v36_v50 = vld [vmem:[%s6432_s0 + $0xb0] sm:$0xff]  ;;  %v37_v52 = vld [vmem:[%s6432_s0 + $0xb8] sm:$0xff] }
  0x12   :  { %v164_v51 = vld [vmem:[%s6432_s0 + $0x4b0] sm:$0xff]  ;;  %v165_v53 = vld [vmem:[%s6432_s0 + $0x4b8] sm:$0xff]  ;;  %v38_v54 = vld [vmem:[%s6432_s0 + $0xc0] sm:$0xff] }
  0x13   :  { %v166_v55 = vld [vmem:[%s6432_s0 + $0x4c0] sm:$0xff]  ;;  %v39_v56 = vld [vmem:[%s6432_s0 + $0xc8] sm:$0xff]  ;;  %v40_v58 = vld [vmem:[%s6432_s0 + $0xd0] sm:$0xff] }
  0x14   :  { %3449 = vmatmul.mubr.msk.f32.gmra.mrb[4].mxu0 %vm281_vm1, %v19_v16  ;;  %3641 = vmatmul.mubr.msk.f32.gmra.mrb[4].mxu1 %vm281_vm1, %v147_v17  ;;  %v167_v57 = vld [vmem:[%s6432_s0 + $0x4c8] sm:$0xff]  ;;  %v168_v59 = vld [vmem:[%s6432_s0 + $0x4d0] sm:$0xff]  ;;  %v41_v60 = vld [vmem:[%s6432_s0 + $0xd8] sm:$0xff] }
  0x15   :  { %3451 = vmatprep.mubr.msk.f32.mxu0 %vm281_vm1, %v20_v18  ;;  %3643 = vmatprep.mubr.msk.f32.mxu1 %vm281_vm1, %v148_v19  ;;  %v169_v61 = vld [vmem:[%s6432_s0 + $0x4d8] sm:$0xff]  ;;  %v42_v62 = vld [vmem:[%s6432_s0 + $0xe0] sm:$0xff]  ;;  %v43_v0 = vld [vmem:[%s6432_s0 + $0xe8] sm:$0xff] }
  0x16   :  { %v170_v63 = vld [vmem:[%s6432_s0 + $0x4e0] sm:$0xff]  ;;  %v171_v1 = vld [vmem:[%s6432_s0 + $0x4e8] sm:$0xff]  ;;  %v44_v2 = vld [vmem:[%s6432_s0 + $0xf0] sm:$0xff] }
  0x17   :  { %v172_v3 = vld [vmem:[%s6432_s0 + $0x4f0] sm:$0xff]  ;;  %v45_v4 = vld [vmem:[%s6432_s0 + $0xf8] sm:$0xff]  ;;  %v46_v6 = vld [vmem:[%s6432_s0 + $0x100] sm:$0xff] }
  0x18   :  { %3452 = vmatmul.mubr.msk.f32.gmra.mrb[6].mxu0 %vm281_vm1, %v21_v20  ;;  %3644 = vmatmul.mubr.msk.f32.gmra.mrb[6].mxu1 %vm281_vm1, %v149_v21  ;;  %v173_v5 = vld [vmem:[%s6432_s0 + $0x4f8] sm:$0xff]  ;;  %v174_v7 = vld [vmem:[%s6432_s0 + $0x500] sm:$0xff]  ;;  %v47_v8 = vld [vmem:[%s6432_s0 + $0x108] sm:$0xff] }
  0x19   :  { %3454 = vmatprep.mubr.msk.f32.mxu0 %vm281_vm1, %v22_v22  ;;  %3646 = vmatprep.mubr.msk.f32.mxu1 %vm281_vm1, %v150_v23  ;;  %v175_v9 = vld [vmem:[%s6432_s0 + $0x508] sm:$0xff]  ;;  %v48_v10 = vld [vmem:[%s6432_s0 + $0x110] sm:$0xff]  ;;  %v49_v12 = vld [vmem:[%s6432_s0 + $0x118] sm:$0xff] }
  0x1a   :  { %v176_v11 = vld [vmem:[%s6432_s0 + $0x510] sm:$0xff]  ;;  %v177_v13 = vld [vmem:[%s6432_s0 + $0x518] sm:$0xff]  ;;  %v50_v14 = vld [vmem:[%s6432_s0 + $0x120] sm:$0xff] }
  0x1b   :  { %v178_v15 = vld [vmem:[%s6432_s0 + $0x520] sm:$0xff]  ;;  %v51_v16 = vld [vmem:[%s6432_s0 + $0x128] sm:$0xff]  ;;  %v52_v18 = vld [vmem:[%s6432_s0 + $0x130] sm:$0xff] }
  0x1c   :  { %3455 = vmatmul.mubr.msk.f32.gmra.mrb[8].mxu0 %vm281_vm1, %v23_v24  ;;  %3647 = vmatmul.mubr.msk.f32.gmra.mrb[8].mxu1 %vm281_vm1, %v151_v25  ;;  %v179_v17 = vld [vmem:[%s6432_s0 + $0x528] sm:$0xff]  ;;  %v180_v19 = vld [vmem:[%s6432_s0 + $0x530] sm:$0xff]  ;;  %v53_v20 = vld [vmem:[%s6432_s0 + $0x138] sm:$0xff] }
  0x1d   :  { %3457 = vmatprep.mubr.msk.f32.mxu0 %vm281_vm1, %v24_v26  ;;  %3649 = vmatprep.mubr.msk.f32.mxu1 %vm281_vm1, %v152_v27  ;;  %v181_v21 = vld [vmem:[%s6432_s0 + $0x538] sm:$0xff]  ;;  %v54_v22 = vld [vmem:[%s6432_s0 + $0x140] sm:$0xff]  ;;  %v55_v24 = vld [vmem:[%s6432_s0 + $0x148] sm:$0xff] }
  0x1e   :  { %v182_v23 = vld [vmem:[%s6432_s0 + $0x540] sm:$0xff]  ;;  %v183_v25 = vld [vmem:[%s6432_s0 + $0x548] sm:$0xff]  ;;  %v56_v26 = vld [vmem:[%s6432_s0 + $0x150] sm:$0xff] }
  0x1f   :  { %v184_v27 = vld [vmem:[%s6432_s0 + $0x550] sm:$0xff] }
  0x20   :  { %3458 = vmatmul.mubr.msk.f32.gmra.mrb[10].mxu0 %vm281_vm1, %v25_v28  ;;  %3650 = vmatmul.mubr.msk.f32.gmra.mrb[10].mxu1 %vm281_vm1, %v153_v29  ;;  %v57_v28 = vld [vmem:[%s6432_s0 + $0x158] sm:$0xff] }
  0x21   :  { %3460 = vmatprep.mubr.msk.f32.mxu0 %vm281_vm1, %v26_v30  ;;  %3652 = vmatprep.mubr.msk.f32.mxu1 %vm281_vm1, %v154_v31  ;;  %v185_v29 = vld [vmem:[%s6432_s0 + $0x558] sm:$0xff]  ;;  %v58_v30 = vld [vmem:[%s6432_s0 + $0x160] sm:$0xff] }
  0x22   :  { %v186_v31 = vld [vmem:[%s6432_s0 + $0x560] sm:$0xff] }
  0x24   :  { %3461 = vmatmul.mubr.msk.f32.gmra.mrb[12].mxu0 %vm281_vm1, %v27_v32  ;;  %3653 = vmatmul.mubr.msk.f32.gmra.mrb[12].mxu1 %vm281_vm1, %v155_v33  ;;  %v59_v32 = vld [vmem:[%s6432_s0 + $0x168] sm:$0xff] }
  0x25   :  { %3463 = vmatprep.mubr.msk.f32.mxu0 %vm281_vm1, %v28_v34  ;;  %3655 = vmatprep.mubr.msk.f32.mxu1 %vm281_vm1, %v156_v35  ;;  %v187_v33 = vld [vmem:[%s6432_s0 + $0x568] sm:$0xff]  ;;  %v60_v34 = vld [vmem:[%s6432_s0 + $0x170] sm:$0xff] }
  0x26   :  { %v188_v35 = vld [vmem:[%s6432_s0 + $0x570] sm:$0xff] }
  0x28   :  { %3464 = vmatmul.mubr.msk.f32.gmra.mrb[14].mxu0 %vm281_vm1, %v29_v36  ;;  %3656 = vmatmul.mubr.msk.f32.gmra.mrb[14].mxu1 %vm281_vm1, %v157_v37  ;;  %v61_v36 = vld [vmem:[%s6432_s0 + $0x178] sm:$0xff] }
  0x29   :  { %3466 = vmatprep.mubr.msk.f32.mxu0 %vm281_vm1, %v30_v38  ;;  %3658 = vmatprep.mubr.msk.f32.mxu1 %vm281_vm1, %v158_v39  ;;  %v189_v37 = vld [vmem:[%s6432_s0 + $0x578] sm:$0xff]  ;;  %v62_v38 = vld [vmem:[%s6432_s0 + $0x180] sm:$0xff] }
  0x2a   :  { %v190_v39 = vld [vmem:[%s6432_s0 + $0x580] sm:$0xff] }
  0x2c   :  { %3467 = vmatmul.mubr.msk.f32.gmra.mrb[16].mxu0 %vm281_vm1, %v31_v40  ;;  %3659 = vmatmul.mubr.msk.f32.gmra.mrb[16].mxu1 %vm281_vm1, %v159_v41  ;;  %v63_v40 = vld [vmem:[%s6432_s0 + $0x188] sm:$0xff] }
  0x2d   :  { %3469 = vmatprep.mubr.msk.f32.mxu0 %vm281_vm1, %v32_v42  ;;  %3661 = vmatprep.mubr.msk.f32.mxu1 %vm281_vm1, %v160_v43  ;;  %v191_v41 = vld [vmem:[%s6432_s0 + $0x588] sm:$0xff]  ;;  %v64_v42 = vld [vmem:[%s6432_s0 + $0x190] sm:$0xff] }
  0x2e   :  { %v192_v43 = vld [vmem:[%s6432_s0 + $0x590] sm:$0xff] }
  0x30   :  { %3470 = vmatmul.mubr.msk.f32.gmra.mrb[18].mxu0 %vm281_vm1, %v33_v44  ;;  %3662 = vmatmul.mubr.msk.f32.gmra.mrb[18].mxu1 %vm281_vm1, %v161_v45  ;;  %v65_v44 = vld [vmem:[%s6432_s0 + $0x198] sm:$0xff] }
  0x31   :  { %3472 = vmatprep.mubr.msk.f32.mxu0 %vm281_vm1, %v34_v46  ;;  %3664 = vmatprep.mubr.msk.f32.mxu1 %vm281_vm1, %v162_v47  ;;  %v193_v45 = vld [vmem:[%s6432_s0 + $0x598] sm:$0xff]  ;;  %v66_v46 = vld [vmem:[%s6432_s0 + $0x1a0] sm:$0xff] }
  0x32   :  { %v194_v47 = vld [vmem:[%s6432_s0 + $0x5a0] sm:$0xff] }
  0x34   :  { %3473 = vmatmul.mubr.msk.f32.gmra.mrb[20].mxu0 %vm281_vm1, %v35_v48  ;;  %3665 = vmatmul.mubr.msk.f32.gmra.mrb[20].mxu1 %vm281_vm1, %v163_v49  ;;  %v67_v48 = vld [vmem:[%s6432_s0 + $0x1a8] sm:$0xff] }
  0x35   :  { %3475 = vmatprep.mubr.msk.f32.mxu0 %vm281_vm1, %v36_v50  ;;  %3667 = vmatprep.mubr.msk.f32.mxu1 %vm281_vm1, %v164_v51  ;;  %v195_v49 = vld [vmem:[%s6432_s0 + $0x5a8] sm:$0xff]  ;;  %v68_v50 = vld [vmem:[%s6432_s0 + $0x1b0] sm:$0xff] }
  0x36   :  { %v196_v51 = vld [vmem:[%s6432_s0 + $0x5b0] sm:$0xff] }
  0x38   :  { %3476 = vmatmul.mubr.msk.f32.gmra.mrb[22].mxu0 %vm281_vm1, %v37_v52  ;;  %3668 = vmatmul.mubr.msk.f32.gmra.mrb[22].mxu1 %vm281_vm1, %v165_v53  ;;  %v69_v52 = vld [vmem:[%s6432_s0 + $0x1b8] sm:$0xff] }
  0x39   :  { %3478 = vmatprep.mubr.msk.f32.mxu0 %vm281_vm1, %v38_v54  ;;  %3670 = vmatprep.mubr.msk.f32.mxu1 %vm281_vm1, %v166_v55  ;;  %v197_v53 = vld [vmem:[%s6432_s0 + $0x5b8] sm:$0xff]  ;;  %v70_v54 = vld [vmem:[%s6432_s0 + $0x1c0] sm:$0xff] }
  0x3a   :  { %v198_v55 = vld [vmem:[%s6432_s0 + $0x5c0] sm:$0xff] }
  0x3c   :  { %3479 = vmatmul.mubr.msk.f32.gmra.mrb[24].mxu0 %vm281_vm1, %v39_v56  ;;  %3671 = vmatmul.mubr.msk.f32.gmra.mrb[24].mxu1 %vm281_vm1, %v167_v57  ;;  %v71_v56 = vld [vmem:[%s6432_s0 + $0x1c8] sm:$0xff] }
  0x3d   :  { %3481 = vmatprep.mubr.msk.f32.mxu0 %vm281_vm1, %v40_v58  ;;  %3673 = vmatprep.mubr.msk.f32.mxu1 %vm281_vm1, %v168_v59  ;;  %v199_v57 = vld [vmem:[%s6432_s0 + $0x5c8] sm:$0xff]  ;;  %v72_v58 = vld [vmem:[%s6432_s0 + $0x1d0] sm:$0xff] }
  0x3e   :  { %v200_v59 = vld [vmem:[%s6432_s0 + $0x5d0] sm:$0xff] }
  0x40   :  { %3482 = vmatmul.mubr.msk.f32.gmra.mrb[26].mxu0 %vm281_vm1, %v41_v60  ;;  %3674 = vmatmul.mubr.msk.f32.gmra.mrb[26].mxu1 %vm281_vm1, %v169_v61  ;;  %v73_v60 = vld [vmem:[%s6432_s0 + $0x1d8] sm:$0xff] }
  0x41   :  { %3484 = vmatprep.mubr.msk.f32.mxu0 %vm281_vm1, %v42_v62  ;;  %3676 = vmatprep.mubr.msk.f32.mxu1 %vm281_vm1, %v170_v63  ;;  %v201_v61 = vld [vmem:[%s6432_s0 + $0x5d8] sm:$0xff]  ;;  %v74_v62 = vld [vmem:[%s6432_s0 + $0x1e0] sm:$0xff] }
  0x42   :  { %v202_v63 = vld [vmem:[%s6432_s0 + $0x5e0] sm:$0xff] }
  0x44   :  { %3485 = vmatmul.mubr.msk.f32.gmra.mrb[28].mxu0 %vm281_vm1, %v43_v0  ;;  %3677 = vmatmul.mubr.msk.f32.gmra.mrb[28].mxu1 %vm281_vm1, %v171_v1  ;;  %v75_v0 = vld [vmem:[%s6432_s0 + $0x1e8] sm:$0xff] }
  0x45   :  { %3487 = vmatprep.mubr.msk.f32.mxu0 %vm281_vm1, %v44_v2  ;;  %3679 = vmatprep.mubr.msk.f32.mxu1 %vm281_vm1, %v172_v3  ;;  %v203_v1 = vld [vmem:[%s6432_s0 + $0x5e8] sm:$0xff]  ;;  %v76_v2 = vld [vmem:[%s6432_s0 + $0x1f0] sm:$0xff] }
  0x46   :  { %v204_v3 = vld [vmem:[%s6432_s0 + $0x5f0] sm:$0xff] }
  0x48   :  { %3488 = vmatmul.mubr.msk.f32.gmra.mrb[30].mxu0 %vm281_vm1, %v45_v4  ;;  %3680 = vmatmul.mubr.msk.f32.gmra.mrb[30].mxu1 %vm281_vm1, %v173_v5  ;;  %v77_v4 = vld [vmem:[%s6432_s0 + $0x1f8] sm:$0xff] }
  0x49   :  { %3490 = vmatprep.mubr.msk.f32.mxu0 %vm281_vm1, %v46_v6  ;;  %3682 = vmatprep.mubr.msk.f32.mxu1 %vm281_vm1, %v174_v7  ;;  %v205_v5 = vld [vmem:[%s6432_s0 + $0x5f8] sm:$0xff]  ;;  %v78_v6 = vld [vmem:[%s6432_s0 + $0x200] sm:$0xff] }
  0x4a   :  { %v206_v7 = vld [vmem:[%s6432_s0 + $0x600] sm:$0xff] }
  0x4c   :  { %3491 = vmatmul.mubr.msk.f32.gmra.mrb[32].mxu0 %vm281_vm1, %v47_v8  ;;  %3683 = vmatmul.mubr.msk.f32.gmra.mrb[32].mxu1 %vm281_vm1, %v175_v9  ;;  %v79_v8 = vld [vmem:[%s6432_s0 + $0x208] sm:$0xff] }
  0x4d   :  { %3493 = vmatprep.mubr.msk.f32.mxu0 %vm281_vm1, %v48_v10  ;;  %3685 = vmatprep.mubr.msk.f32.mxu1 %vm281_vm1, %v176_v11  ;;  %v207_v9 = vld [vmem:[%s6432_s0 + $0x608] sm:$0xff]  ;;  %v80_v10 = vld [vmem:[%s6432_s0 + $0x210] sm:$0xff] }
  0x4e   :  { %v208_v11 = vld [vmem:[%s6432_s0 + $0x610] sm:$0xff] }
  0x50   :  { %3494 = vmatmul.mubr.msk.f32.gmra.mrb[34].mxu0 %vm281_vm1, %v49_v12  ;;  %3686 = vmatmul.mubr.msk.f32.gmra.mrb[34].mxu1 %vm281_vm1, %v177_v13  ;;  %v81_v12 = vld [vmem:[%s6432_s0 + $0x218] sm:$0xff] }
  0x51   :  { %3496 = vmatprep.mubr.msk.f32.mxu0 %vm281_vm1, %v50_v14  ;;  %3688 = vmatprep.mubr.msk.f32.mxu1 %vm281_vm1, %v178_v15  ;;  %v209_v13 = vld [vmem:[%s6432_s0 + $0x618] sm:$0xff]  ;;  %v82_v14 = vld [vmem:[%s6432_s0 + $0x220] sm:$0xff] }
  0x52   :  { %v210_v15 = vld [vmem:[%s6432_s0 + $0x620] sm:$0xff] }
  0x54   :  { %3497 = vmatmul.mubr.msk.f32.gmra.mrb[36].mxu0 %vm281_vm1, %v51_v16  ;;  %3689 = vmatmul.mubr.msk.f32.gmra.mrb[36].mxu1 %vm281_vm1, %v179_v17  ;;  %v83_v16 = vld [vmem:[%s6432_s0 + $0x228] sm:$0xff] }
  0x55   :  { %3499 = vmatprep.mubr.msk.f32.mxu0 %vm281_vm1, %v52_v18  ;;  %3691 = vmatprep.mubr.msk.f32.mxu1 %vm281_vm1, %v180_v19  ;;  %v211_v17 = vld [vmem:[%s6432_s0 + $0x628] sm:$0xff]  ;;  %v84_v18 = vld [vmem:[%s6432_s0 + $0x230] sm:$0xff] }
  0x56   :  { %v212_v19 = vld [vmem:[%s6432_s0 + $0x630] sm:$0xff] }
  0x58   :  { %3500 = vmatmul.mubr.msk.f32.gmra.mrb[38].mxu0 %vm281_vm1, %v53_v20  ;;  %3692 = vmatmul.mubr.msk.f32.gmra.mrb[38].mxu1 %vm281_vm1, %v181_v21  ;;  %v85_v20 = vld [vmem:[%s6432_s0 + $0x238] sm:$0xff] }
  0x59   :  { %3502 = vmatprep.mubr.msk.f32.mxu0 %vm281_vm1, %v54_v22  ;;  %3694 = vmatprep.mubr.msk.f32.mxu1 %vm281_vm1, %v182_v23  ;;  %v213_v21 = vld [vmem:[%s6432_s0 + $0x638] sm:$0xff]  ;;  %v86_v22 = vld [vmem:[%s6432_s0 + $0x240] sm:$0xff] }
  0x5a   :  { %v214_v23 = vld [vmem:[%s6432_s0 + $0x640] sm:$0xff] }
  0x5c   :  { %3503 = vmatmul.mubr.msk.f32.gmra.mrb[40].mxu0 %vm281_vm1, %v55_v24  ;;  %3695 = vmatmul.mubr.msk.f32.gmra.mrb[40].mxu1 %vm281_vm1, %v183_v25  ;;  %v87_v24 = vld [vmem:[%s6432_s0 + $0x248] sm:$0xff] }
  0x5d   :  { %3505 = vmatprep.mubr.msk.f32.mxu0 %vm281_vm1, %v56_v26  ;;  %3697 = vmatprep.mubr.msk.f32.mxu1 %vm281_vm1, %v184_v27  ;;  %v215_v25 = vld [vmem:[%s6432_s0 + $0x648] sm:$0xff]  ;;  %v88_v26 = vld [vmem:[%s6432_s0 + $0x250] sm:$0xff] }
  0x5e   :  { %v216_v27 = vld [vmem:[%s6432_s0 + $0x650] sm:$0xff] }
  0x60   :  { %3506 = vmatmul.mubr.msk.f32.gmra.mrb[42].mxu0 %vm281_vm1, %v57_v28  ;;  %3698 = vmatmul.mubr.msk.f32.gmra.mrb[42].mxu1 %vm281_vm1, %v185_v29  ;;  %v89_v28 = vld [vmem:[%s6432_s0 + $0x258] sm:$0xff] }
  0x61   :  { %3508 = vmatprep.mubr.msk.f32.mxu0 %vm281_vm1, %v58_v30  ;;  %3700 = vmatprep.mubr.msk.f32.mxu1 %vm281_vm1, %v186_v31  ;;  %v217_v29 = vld [vmem:[%s6432_s0 + $0x658] sm:$0xff]  ;;  %v90_v30 = vld [vmem:[%s6432_s0 + $0x260] sm:$0xff] }
  0x62   :  { %v218_v31 = vld [vmem:[%s6432_s0 + $0x660] sm:$0xff] }
  0x64   :  { %3509 = vmatmul.mubr.msk.f32.gmra.mrb[44].mxu0 %vm281_vm1, %v59_v32  ;;  %3701 = vmatmul.mubr.msk.f32.gmra.mrb[44].mxu1 %vm281_vm1, %v187_v33  ;;  %v91_v32 = vld [vmem:[%s6432_s0 + $0x268] sm:$0xff] }
  0x65   :  { %3511 = vmatprep.mubr.msk.f32.mxu0 %vm281_vm1, %v60_v34  ;;  %3703 = vmatprep.mubr.msk.f32.mxu1 %vm281_vm1, %v188_v35  ;;  %v219_v33 = vld [vmem:[%s6432_s0 + $0x668] sm:$0xff]  ;;  %v92_v34 = vld [vmem:[%s6432_s0 + $0x270] sm:$0xff] }
  0x66   :  { %v220_v35 = vld [vmem:[%s6432_s0 + $0x670] sm:$0xff] }
  0x68   :  { %3512 = vmatmul.mubr.msk.f32.gmra.mrb[46].mxu0 %vm281_vm1, %v61_v36  ;;  %3704 = vmatmul.mubr.msk.f32.gmra.mrb[46].mxu1 %vm281_vm1, %v189_v37  ;;  %v93_v36 = vld [vmem:[%s6432_s0 + $0x278] sm:$0xff] }
  0x69   :  { %3514 = vmatprep.mubr.msk.f32.mxu0 %vm281_vm1, %v62_v38  ;;  %3706 = vmatprep.mubr.msk.f32.mxu1 %vm281_vm1, %v190_v39  ;;  %v221_v37 = vld [vmem:[%s6432_s0 + $0x678] sm:$0xff]  ;;  %v94_v38 = vld [vmem:[%s6432_s0 + $0x280] sm:$0xff] }
  0x6a   :  { %v222_v39 = vld [vmem:[%s6432_s0 + $0x680] sm:$0xff] }
  0x6c   :  { %3515 = vmatmul.mubr.msk.f32.gmra.mrb[48].mxu0 %vm281_vm1, %v63_v40  ;;  %3707 = vmatmul.mubr.msk.f32.gmra.mrb[48].mxu1 %vm281_vm1, %v191_v41  ;;  %v95_v40 = vld [vmem:[%s6432_s0 + $0x288] sm:$0xff] }
  0x6d   :  { %3517 = vmatprep.mubr.msk.f32.mxu0 %vm281_vm1, %v64_v42  ;;  %3709 = vmatprep.mubr.msk.f32.mxu1 %vm281_vm1, %v192_v43  ;;  %v223_v41 = vld [vmem:[%s6432_s0 + $0x688] sm:$0xff]  ;;  %v96_v42 = vld [vmem:[%s6432_s0 + $0x290] sm:$0xff] }
  0x6e   :  { %v224_v43 = vld [vmem:[%s6432_s0 + $0x690] sm:$0xff] }
  0x70   :  { %3518 = vmatmul.mubr.msk.f32.gmra.mrb[50].mxu0 %vm281_vm1, %v65_v44  ;;  %3710 = vmatmul.mubr.msk.f32.gmra.mrb[50].mxu1 %vm281_vm1, %v193_v45  ;;  %v97_v44 = vld [vmem:[%s6432_s0 + $0x298] sm:$0xff] }
  0x71   :  { %3520 = vmatprep.mubr.msk.f32.mxu0 %vm281_vm1, %v66_v46  ;;  %3712 = vmatprep.mubr.msk.f32.mxu1 %vm281_vm1, %v194_v47  ;;  %v225_v45 = vld [vmem:[%s6432_s0 + $0x698] sm:$0xff]  ;;  %v98_v46 = vld [vmem:[%s6432_s0 + $0x2a0] sm:$0xff] }
  0x72   :  { %v226_v47 = vld [vmem:[%s6432_s0 + $0x6a0] sm:$0xff] }
  0x74   :  { %3521 = vmatmul.mubr.msk.f32.gmra.mrb[52].mxu0 %vm281_vm1, %v67_v48  ;;  %3713 = vmatmul.mubr.msk.f32.gmra.mrb[52].mxu1 %vm281_vm1, %v195_v49  ;;  %v99_v48 = vld [vmem:[%s6432_s0 + $0x2a8] sm:$0xff] }
  0x75   :  { %3523 = vmatprep.mubr.msk.f32.mxu0 %vm281_vm1, %v68_v50  ;;  %3715 = vmatprep.mubr.msk.f32.mxu1 %vm281_vm1, %v196_v51  ;;  %v227_v49 = vld [vmem:[%s6432_s0 + $0x6a8] sm:$0xff]  ;;  %v100_v50 = vld [vmem:[%s6432_s0 + $0x2b0] sm:$0xff] }
  0x76   :  { %v228_v51 = vld [vmem:[%s6432_s0 + $0x6b0] sm:$0xff] }
  0x78   :  { %3524 = vmatmul.mubr.msk.f32.gmra.mrb[54].mxu0 %vm281_vm1, %v69_v52  ;;  %3716 = vmatmul.mubr.msk.f32.gmra.mrb[54].mxu1 %vm281_vm1, %v197_v53  ;;  %v101_v52 = vld [vmem:[%s6432_s0 + $0x2b8] sm:$0xff] }
  0x79   :  { %3526 = vmatprep.mubr.msk.f32.mxu0 %vm281_vm1, %v70_v54  ;;  %3718 = vmatprep.mubr.msk.f32.mxu1 %vm281_vm1, %v198_v55  ;;  %v229_v53 = vld [vmem:[%s6432_s0 + $0x6b8] sm:$0xff]  ;;  %v102_v54 = vld [vmem:[%s6432_s0 + $0x2c0] sm:$0xff] }
  0x7a   :  { %v230_v55 = vld [vmem:[%s6432_s0 + $0x6c0] sm:$0xff] }
  0x7c   :  { %3527 = vmatmul.mubr.msk.f32.gmra.mrb[56].mxu0 %vm281_vm1, %v71_v56  ;;  %3719 = vmatmul.mubr.msk.f32.gmra.mrb[56].mxu1 %vm281_vm1, %v199_v57  ;;  %v103_v56 = vld [vmem:[%s6432_s0 + $0x2c8] sm:$0xff] }
  0x7d   :  { %3529 = vmatprep.mubr.msk.f32.mxu0 %vm281_vm1, %v72_v58  ;;  %3721 = vmatprep.mubr.msk.f32.mxu1 %vm281_vm1, %v200_v59  ;;  %v231_v57 = vld [vmem:[%s6432_s0 + $0x6c8] sm:$0xff]  ;;  %v104_v58 = vld [vmem:[%s6432_s0 + $0x2d0] sm:$0xff] }
  0x7e   :  { %v232_v59 = vld [vmem:[%s6432_s0 + $0x6d0] sm:$0xff] }
  0x80   :  { %3530 = vmatmul.mubr.msk.f32.gmra.mrb[58].mxu0 %vm281_vm1, %v73_v60  ;;  %3722 = vmatmul.mubr.msk.f32.gmra.mrb[58].mxu1 %vm281_vm1, %v201_v61  ;;  %v105_v60 = vld [vmem:[%s6432_s0 + $0x2d8] sm:$0xff] }
  0x81   :  { %3532 = vmatprep.mubr.msk.f32.mxu0 %vm281_vm1, %v74_v62  ;;  %3724 = vmatprep.mubr.msk.f32.mxu1 %vm281_vm1, %v202_v63  ;;  %v233_v61 = vld [vmem:[%s6432_s0 + $0x6d8] sm:$0xff]  ;;  %v106_v62 = vld [vmem:[%s6432_s0 + $0x2e0] sm:$0xff] }
  0x82   :  { %v234_v63 = vld [vmem:[%s6432_s0 + $0x6e0] sm:$0xff] }
  0x84   :  { %3533 = vmatmul.mubr.msk.f32.gmra.mrb[60].mxu0 %vm281_vm1, %v75_v0  ;;  %3725 = vmatmul.mubr.msk.f32.gmra.mrb[60].mxu1 %vm281_vm1, %v203_v1  ;;  %v107_v0 = vld [vmem:[%s6432_s0 + $0x2e8] sm:$0xff] }
  0x85   :  { %3535 = vmatprep.mubr.msk.f32.mxu0 %vm281_vm1, %v76_v2  ;;  %3727 = vmatprep.mubr.msk.f32.mxu1 %vm281_vm1, %v204_v3  ;;  %v235_v1 = vld [vmem:[%s6432_s0 + $0x6e8] sm:$0xff]  ;;  %v108_v2 = vld [vmem:[%s6432_s0 + $0x2f0] sm:$0xff] }
  0x86   :  { %v236_v3 = vld [vmem:[%s6432_s0 + $0x6f0] sm:$0xff] }
  0x88   :  { %3536 = vmatmul.mubr.msk.f32.gmra.mrb[62].mxu0 %vm281_vm1, %v77_v4  ;;  %3728 = vmatmul.mubr.msk.f32.gmra.mrb[62].mxu1 %vm281_vm1, %v205_v5  ;;  %v109_v4 = vld [vmem:[%s6432_s0 + $0x2f8] sm:$0xff] }
  0x89   :  { %3538 = vmatprep.mubr.msk.f32.mxu0 %vm281_vm1, %v78_v6  ;;  %3730 = vmatprep.mubr.msk.f32.mxu1 %vm281_vm1, %v206_v7  ;;  %v237_v5 = vld [vmem:[%s6432_s0 + $0x6f8] sm:$0xff]  ;;  %v110_v6 = vld [vmem:[%s6432_s0 + $0x300] sm:$0xff] }
  0x8a   :  { %v238_v7 = vld [vmem:[%s6432_s0 + $0x700] sm:$0xff] }
  0x8c   :  { %3539 = vmatmul.mubr.msk.f32.gmra.mrb[64].mxu0 %vm281_vm1, %v79_v8  ;;  %3731 = vmatmul.mubr.msk.f32.gmra.mrb[64].mxu1 %vm281_vm1, %v207_v9  ;;  %v111_v8 = vld [vmem:[%s6432_s0 + $0x308] sm:$0xff] }
  0x8d   :  { %3541 = vmatprep.mubr.msk.f32.mxu0 %vm281_vm1, %v80_v10  ;;  %3733 = vmatprep.mubr.msk.f32.mxu1 %vm281_vm1, %v208_v11  ;;  %v239_v9 = vld [vmem:[%s6432_s0 + $0x708] sm:$0xff]  ;;  %v112_v10 = vld [vmem:[%s6432_s0 + $0x310] sm:$0xff] }
  0x8e   :  { %v240_v11 = vld [vmem:[%s6432_s0 + $0x710] sm:$0xff] }
  0x90   :  { %3542 = vmatmul.mubr.msk.f32.gmra.mrb[66].mxu0 %vm281_vm1, %v81_v12  ;;  %3734 = vmatmul.mubr.msk.f32.gmra.mrb[66].mxu1 %vm281_vm1, %v209_v13  ;;  %v113_v12 = vld [vmem:[%s6432_s0 + $0x318] sm:$0xff] }
  0x91   :  { %3544 = vmatprep.mubr.msk.f32.mxu0 %vm281_vm1, %v82_v14  ;;  %3736 = vmatprep.mubr.msk.f32.mxu1 %vm281_vm1, %v210_v15  ;;  %v241_v13 = vld [vmem:[%s6432_s0 + $0x718] sm:$0xff]  ;;  %v114_v14 = vld [vmem:[%s6432_s0 + $0x320] sm:$0xff] }
  0x92   :  { %v242_v15 = vld [vmem:[%s6432_s0 + $0x720] sm:$0xff] }
  0x94   :  { %3545 = vmatmul.mubr.msk.f32.gmra.mrb[68].mxu0 %vm281_vm1, %v83_v16  ;;  %3737 = vmatmul.mubr.msk.f32.gmra.mrb[68].mxu1 %vm281_vm1, %v211_v17  ;;  %v115_v16 = vld [vmem:[%s6432_s0 + $0x328] sm:$0xff] }
  0x95   :  { %3547 = vmatprep.mubr.msk.f32.mxu0 %vm281_vm1, %v84_v18  ;;  %3739 = vmatprep.mubr.msk.f32.mxu1 %vm281_vm1, %v212_v19  ;;  %v243_v17 = vld [vmem:[%s6432_s0 + $0x728] sm:$0xff]  ;;  %v116_v18 = vld [vmem:[%s6432_s0 + $0x330] sm:$0xff] }
  0x96   :  { %v244_v19 = vld [vmem:[%s6432_s0 + $0x730] sm:$0xff] }
  0x98   :  { %3548 = vmatmul.mubr.msk.f32.gmra.mrb[70].mxu0 %vm281_vm1, %v85_v20  ;;  %3740 = vmatmul.mubr.msk.f32.gmra.mrb[70].mxu1 %vm281_vm1, %v213_v21  ;;  %v117_v20 = vld [vmem:[%s6432_s0 + $0x338] sm:$0xff] }
  0x99   :  { %3550 = vmatprep.mubr.msk.f32.mxu0 %vm281_vm1, %v86_v22  ;;  %3742 = vmatprep.mubr.msk.f32.mxu1 %vm281_vm1, %v214_v23  ;;  %v245_v21 = vld [vmem:[%s6432_s0 + $0x738] sm:$0xff]  ;;  %v118_v22 = vld [vmem:[%s6432_s0 + $0x340] sm:$0xff] }
  0x9a   :  { %v246_v23 = vld [vmem:[%s6432_s0 + $0x740] sm:$0xff] }
  0x9c   :  { %3551 = vmatmul.mubr.msk.f32.gmra.mrb[72].mxu0 %vm281_vm1, %v87_v24  ;;  %3743 = vmatmul.mubr.msk.f32.gmra.mrb[72].mxu1 %vm281_vm1, %v215_v25  ;;  %v119_v24 = vld [vmem:[%s6432_s0 + $0x348] sm:$0xff] }
  0x9d   :  { %3553 = vmatprep.mubr.msk.f32.mxu0 %vm281_vm1, %v88_v26  ;;  %3745 = vmatprep.mubr.msk.f32.mxu1 %vm281_vm1, %v216_v27  ;;  %v247_v25 = vld [vmem:[%s6432_s0 + $0x748] sm:$0xff]  ;;  %v120_v26 = vld [vmem:[%s6432_s0 + $0x350] sm:$0xff] }
  0x9e   :  { %v248_v27 = vld [vmem:[%s6432_s0 + $0x750] sm:$0xff] }
  0xa0   :  { %3554 = vmatmul.mubr.msk.f32.gmra.mrb[74].mxu0 %vm281_vm1, %v89_v28  ;;  %3746 = vmatmul.mubr.msk.f32.gmra.mrb[74].mxu1 %vm281_vm1, %v217_v29  ;;  %v121_v28 = vld [vmem:[%s6432_s0 + $0x358] sm:$0xff] }
  0xa1   :  { %3556 = vmatprep.mubr.msk.f32.mxu0 %vm281_vm1, %v90_v30  ;;  %3748 = vmatprep.mubr.msk.f32.mxu1 %vm281_vm1, %v218_v31  ;;  %v249_v29 = vld [vmem:[%s6432_s0 + $0x758] sm:$0xff]  ;;  %v122_v30 = vld [vmem:[%s6432_s0 + $0x360] sm:$0xff] }
  0xa2   :  { %v250_v31 = vld [vmem:[%s6432_s0 + $0x760] sm:$0xff] }
  0xa4   :  { %3557 = vmatmul.mubr.msk.f32.gmra.mrb[76].mxu0 %vm281_vm1, %v91_v32  ;;  %3749 = vmatmul.mubr.msk.f32.gmra.mrb[76].mxu1 %vm281_vm1, %v219_v33 }
  0xa5   :  { %3559 = vmatprep.mubr.msk.f32.mxu0 %vm281_vm1, %v92_v34  ;;  %3751 = vmatprep.mubr.msk.f32.mxu1 %vm281_vm1, %v220_v35 }
  0xa8   :  { %3560 = vmatmul.mubr.msk.f32.gmra.mrb[78].mxu0 %vm281_vm1, %v93_v36  ;;  %3752 = vmatmul.mubr.msk.f32.gmra.mrb[78].mxu1 %vm281_vm1, %v221_v37  ;;  %v123_v36 = vld [vmem:[%s6432_s0 + $0x368] sm:$0xff] }
  0xa9   :  { %3562 = vmatprep.mubr.msk.f32.mxu0 %vm281_vm1, %v94_v38  ;;  %3754 = vmatprep.mubr.msk.f32.mxu1 %vm281_vm1, %v222_v39  ;;  %v251_v37 = vld [vmem:[%s6432_s0 + $0x768] sm:$0xff]  ;;  %v124_v38 = vld [vmem:[%s6432_s0 + $0x370] sm:$0xff] }
  0xaa   :  { %v252_v39 = vld [vmem:[%s6432_s0 + $0x770] sm:$0xff] }
  0xac   :  { %3563 = vmatmul.mubr.msk.f32.gmra.mrb[80].mxu0 %vm281_vm1, %v95_v40  ;;  %3755 = vmatmul.mubr.msk.f32.gmra.mrb[80].mxu1 %vm281_vm1, %v223_v41 }
  0xad   :  { %3565 = vmatprep.mubr.msk.f32.mxu0 %vm281_vm1, %v96_v42  ;;  %3757 = vmatprep.mubr.msk.f32.mxu1 %vm281_vm1, %v224_v43 }
  0xb0   :  { %3566 = vmatmul.mubr.msk.f32.gmra.mrb[82].mxu0 %vm281_vm1, %v97_v44  ;;  %3758 = vmatmul.mubr.msk.f32.gmra.mrb[82].mxu1 %vm281_vm1, %v225_v45  ;;  %v125_v44 = vld [vmem:[%s6432_s0 + $0x378] sm:$0xff] }
  0xb1   :  { %3568 = vmatprep.mubr.msk.f32.mxu0 %vm281_vm1, %v98_v46  ;;  %3760 = vmatprep.mubr.msk.f32.mxu1 %vm281_vm1, %v226_v47  ;;  %v253_v45 = vld [vmem:[%s6432_s0 + $0x778] sm:$0xff]  ;;  %v126_v46 = vld [vmem:[%s6432_s0 + $0x380] sm:$0xff] }
  0xb2   :  { %v254_v47 = vld [vmem:[%s6432_s0 + $0x780] sm:$0xff] }
  0xb4   :  { %3569 = vmatmul.mubr.msk.f32.gmra.mrb[84].mxu0 %vm281_vm1, %v99_v48  ;;  %3761 = vmatmul.mubr.msk.f32.gmra.mrb[84].mxu1 %vm281_vm1, %v227_v49 }
  0xb5   :  { %3571 = vmatprep.mubr.msk.f32.mxu0 %vm281_vm1, %v100_v50  ;;  %3763 = vmatprep.mubr.msk.f32.mxu1 %vm281_vm1, %v228_v51 }
  0xb8   :  { %3572 = vmatmul.mubr.msk.f32.gmra.mrb[86].mxu0 %vm281_vm1, %v101_v52  ;;  %3764 = vmatmul.mubr.msk.f32.gmra.mrb[86].mxu1 %vm281_vm1, %v229_v53  ;;  %v127_v52 = vld [vmem:[%s6432_s0 + $0x388] sm:$0xff] }
  0xb9   :  { %3574 = vmatprep.mubr.msk.f32.mxu0 %vm281_vm1, %v102_v54  ;;  %3766 = vmatprep.mubr.msk.f32.mxu1 %vm281_vm1, %v230_v55  ;;  %v255_v53 = vld [vmem:[%s6432_s0 + $0x788] sm:$0xff]  ;;  %v128_v54 = vld [vmem:[%s6432_s0 + $0x390] sm:$0xff] }
  0xba   :  { %v256_v55 = vld [vmem:[%s6432_s0 + $0x790] sm:$0xff] }
  0xbc   :  { %3575 = vmatmul.mubr.msk.f32.gmra.mrb[88].mxu0 %vm281_vm1, %v103_v56  ;;  %3767 = vmatmul.mubr.msk.f32.gmra.mrb[88].mxu1 %vm281_vm1, %v231_v57 }
  0xbd   :  { %3577 = vmatprep.mubr.msk.f32.mxu0 %vm281_vm1, %v104_v58  ;;  %3769 = vmatprep.mubr.msk.f32.mxu1 %vm281_vm1, %v232_v59 }
  0xc0   :  { %3578 = vmatmul.mubr.msk.f32.gmra.mrb[90].mxu0 %vm281_vm1, %v105_v60  ;;  %3770 = vmatmul.mubr.msk.f32.gmra.mrb[90].mxu1 %vm281_vm1, %v233_v61  ;;  %v129_v60 = vld [vmem:[%s6432_s0 + $0x398] sm:$0xff] }
  0xc1   :  { %3580 = vmatprep.mubr.msk.f32.mxu0 %vm281_vm1, %v106_v62  ;;  %3772 = vmatprep.mubr.msk.f32.mxu1 %vm281_vm1, %v234_v63  ;;  %v257_v61 = vld [vmem:[%s6432_s0 + $0x798] sm:$0xff]  ;;  %v130_v62 = vld [vmem:[%s6432_s0 + $0x3a0] sm:$0xff] }
  0xc2   :  { %v258_v63 = vld [vmem:[%s6432_s0 + $0x7a0] sm:$0xff] }
  0xc4   :  { %3581 = vmatmul.mubr.msk.f32.gmra.mrb[92].mxu0 %vm281_vm1, %v107_v0  ;;  %3773 = vmatmul.mubr.msk.f32.gmra.mrb[92].mxu1 %vm281_vm1, %v235_v1 }
  0xc5   :  { %3583 = vmatprep.mubr.msk.f32.mxu0 %vm281_vm1, %v108_v2  ;;  %3775 = vmatprep.mubr.msk.f32.mxu1 %vm281_vm1, %v236_v3 }
  0xc8   :  { %3584 = vmatmul.mubr.msk.f32.gmra.mrb[94].mxu0 %vm281_vm1, %v109_v4  ;;  %3776 = vmatmul.mubr.msk.f32.gmra.mrb[94].mxu1 %vm281_vm1, %v237_v5  ;;  %v131_v4 = vld [vmem:[%s6432_s0 + $0x3a8] sm:$0xff] }
  0xc9   :  { %3586 = vmatprep.mubr.msk.f32.mxu0 %vm281_vm1, %v110_v6  ;;  %3778 = vmatprep.mubr.msk.f32.mxu1 %vm281_vm1, %v238_v7  ;;  %v259_v5 = vld [vmem:[%s6432_s0 + $0x7a8] sm:$0xff]  ;;  %v132_v6 = vld [vmem:[%s6432_s0 + $0x3b0] sm:$0xff] }
  0xca   :  { %v260_v7 = vld [vmem:[%s6432_s0 + $0x7b0] sm:$0xff] }
  0xcc   :  { %3587 = vmatmul.mubr.msk.f32.gmra.mrb[96].mxu0 %vm281_vm1, %v111_v8  ;;  %3779 = vmatmul.mubr.msk.f32.gmra.mrb[96].mxu1 %vm281_vm1, %v239_v9 }
  0xcd   :  { %3589 = vmatprep.mubr.msk.f32.mxu0 %vm281_vm1, %v112_v10  ;;  %3781 = vmatprep.mubr.msk.f32.mxu1 %vm281_vm1, %v240_v11 }
  0xd0   :  { %3590 = vmatmul.mubr.msk.f32.gmra.mrb[98].mxu0 %vm281_vm1, %v113_v12  ;;  %3782 = vmatmul.mubr.msk.f32.gmra.mrb[98].mxu1 %vm281_vm1, %v241_v13  ;;  %v133_v12 = vld [vmem:[%s6432_s0 + $0x3b8] sm:$0xff] }
  0xd1   :  { %3592 = vmatprep.mubr.msk.f32.mxu0 %vm281_vm1, %v114_v14  ;;  %3784 = vmatprep.mubr.msk.f32.mxu1 %vm281_vm1, %v242_v15  ;;  %v261_v13 = vld [vmem:[%s6432_s0 + $0x7b8] sm:$0xff]  ;;  %v134_v14 = vld [vmem:[%s6432_s0 + $0x3c0] sm:$0xff] }
  0xd2   :  { %v262_v15 = vld [vmem:[%s6432_s0 + $0x7c0] sm:$0xff] }
  0xd4   :  { %3593 = vmatmul.mubr.msk.f32.gmra.mrb[100].mxu0 %vm281_vm1, %v115_v16  ;;  %3785 = vmatmul.mubr.msk.f32.gmra.mrb[100].mxu1 %vm281_vm1, %v243_v17 }
  0xd5   :  { %3595 = vmatprep.mubr.msk.f32.mxu0 %vm281_vm1, %v116_v18  ;;  %3787 = vmatprep.mubr.msk.f32.mxu1 %vm281_vm1, %v244_v19 }
  0xd8   :  { %3596 = vmatmul.mubr.msk.f32.gmra.mrb[102].mxu0 %vm281_vm1, %v117_v20  ;;  %3788 = vmatmul.mubr.msk.f32.gmra.mrb[102].mxu1 %vm281_vm1, %v245_v21  ;;  %v135_v20 = vld [vmem:[%s6432_s0 + $0x3c8] sm:$0xff] }
  0xd9   :  { %3598 = vmatprep.mubr.msk.f32.mxu0 %vm281_vm1, %v118_v22  ;;  %3790 = vmatprep.mubr.msk.f32.mxu1 %vm281_vm1, %v246_v23  ;;  %v263_v21 = vld [vmem:[%s6432_s0 + $0x7c8] sm:$0xff]  ;;  %v136_v22 = vld [vmem:[%s6432_s0 + $0x3d0] sm:$0xff] }
  0xda   :  { %v264_v23 = vld [vmem:[%s6432_s0 + $0x7d0] sm:$0xff] }
  0xdc   :  { %3599 = vmatmul.mubr.msk.f32.gmra.mrb[104].mxu0 %vm281_vm1, %v119_v24  ;;  %3791 = vmatmul.mubr.msk.f32.gmra.mrb[104].mxu1 %vm281_vm1, %v247_v25 }
  0xdd   :  { %3601 = vmatprep.mubr.msk.f32.mxu0 %vm281_vm1, %v120_v26  ;;  %3793 = vmatprep.mubr.msk.f32.mxu1 %vm281_vm1, %v248_v27 }
  0xdf   :  { %v4743_v32 = vpop.f32.mrb[0].mxu0  ;;  %v4745_v33 = vpop.f32.mrb[0].mxu1 }
  0xe0   :  { %v4747_v34 = vpop.f32.mrb[1].mxu0  ;;  %3602 = vmatmul.mubr.msk.f32.gmra.mrb[106].mxu0 %vm281_vm1, %v121_v28  ;;  %v4750_v35 = vpop.f32.mrb[1].mxu1  ;;  %3794 = vmatmul.mubr.msk.f32.gmra.mrb[106].mxu1 %vm281_vm1, %v249_v29  ;;  %v137_v28 = vld [vmem:[%s6432_s0 + $0x3d8] sm:$0xff] }
  0xe1   :  { %3604 = vmatprep.mubr.msk.f32.mxu0 %vm281_vm1, %v122_v30  ;;  %3796 = vmatprep.mubr.msk.f32.mxu1 %vm281_vm1, %v250_v31  ;;  %v265_v29 = vld [vmem:[%s6432_s0 + $0x7d8] sm:$0xff]  ;;  %v138_v30 = vld [vmem:[%s6432_s0 + $0x3e0] sm:$0xff] }
  0xe2   :  { %v266_v31 = vld [vmem:[%s6432_s0 + $0x7e0] sm:$0xff] }
  0xe3   :  { %v4767_v40 = vpop.f32.mrb[2].mxu0  ;;  %v4769_v41 = vpop.f32.mrb[2].mxu1 }
  0xe4   :  { %v4771_v42 = vpop.f32.mrb[3].mxu0  ;;  %3605 = vmatmul.mubr.msk.f32.gmra.mrb[108].mxu0 %vm281_vm1, %v123_v36  ;;  %v4774_v43 = vpop.f32.mrb[3].mxu1  ;;  %3797 = vmatmul.mubr.msk.f32.gmra.mrb[108].mxu1 %vm281_vm1, %v251_v37 }
  0xe5   :  { %3607 = vmatprep.mubr.msk.f32.mxu0 %vm281_vm1, %v124_v38  ;;  %3799 = vmatprep.mubr.msk.f32.mxu1 %vm281_vm1, %v252_v39 }
  0xe7   :  { %v4791_v48 = vpop.f32.mrb[4].mxu0  ;;  %v4793_v49 = vpop.f32.mrb[4].mxu1 }
  0xe8   :  { %v4795_v50 = vpop.f32.mrb[5].mxu0  ;;  %3608 = vmatmul.mubr.msk.f32.gmra.mrb[110].mxu0 %vm281_vm1, %v125_v44  ;;  %v4798_v51 = vpop.f32.mrb[5].mxu1  ;;  %3800 = vmatmul.mubr.msk.f32.gmra.mrb[110].mxu1 %vm281_vm1, %v253_v45  ;;  %v139_v44 = vld [vmem:[%s6432_s0 + $0x3e8] sm:$0xff] }
  0xe9   :  { %3610 = vmatprep.mubr.msk.f32.mxu0 %vm281_vm1, %v126_v46  ;;  %3802 = vmatprep.mubr.msk.f32.mxu1 %vm281_vm1, %v254_v47  ;;  %v267_v45 = vld [vmem:[%s6432_s0 + $0x7e8] sm:$0xff]  ;;  %v140_v46 = vld [vmem:[%s6432_s0 + $0x3f0] sm:$0xff] }
  0xea   :  { %v268_v47 = vld [vmem:[%s6432_s0 + $0x7f0] sm:$0xff] }
  0xeb   :  { %v4815_v56 = vpop.f32.mrb[6].mxu0  ;;  %v4817_v57 = vpop.f32.mrb[6].mxu1 }
  0xec   :  { %v4819_v58 = vpop.f32.mrb[7].mxu0  ;;  %3611 = vmatmul.mubr.msk.f32.gmra.mrb[112].mxu0 %vm281_vm1, %v127_v52  ;;  %v4822_v59 = vpop.f32.mrb[7].mxu1  ;;  %3803 = vmatmul.mubr.msk.f32.gmra.mrb[112].mxu1 %vm281_vm1, %v255_v53 }
  0xed   :  { %3613 = vmatprep.mubr.msk.f32.mxu0 %vm281_vm1, %v128_v54  ;;  %3805 = vmatprep.mubr.msk.f32.mxu1 %vm281_vm1, %v256_v55 }
  0xef   :  { %v4839_v0 = vpop.f32.mrb[8].mxu0  ;;  %v4841_v1 = vpop.f32.mrb[8].mxu1 }
  0xf0   :  { %v4843_v2 = vpop.f32.mrb[9].mxu0  ;;  %3614 = vmatmul.mubr.msk.f32.gmra.mrb[114].mxu0 %vm281_vm1, %v129_v60  ;;  %v4846_v3 = vpop.f32.mrb[9].mxu1  ;;  %3806 = vmatmul.mubr.msk.f32.gmra.mrb[114].mxu1 %vm281_vm1, %v257_v61  ;;  %v141_v60 = vld [vmem:[%s6432_s0 + $0x3f8] sm:$0xff] }
  0xf1   :  { %3616 = vmatprep.mubr.msk.f32.mxu0 %vm281_vm1, %v130_v62  ;;  %3808 = vmatprep.mubr.msk.f32.mxu1 %vm281_vm1, %v258_v63  ;;  %v269_v61 = vld [vmem:[%s6432_s0 + $0x7f8] sm:$0xff] }
  0xf3   :  { %v4863_v8 = vpop.f32.mrb[10].mxu0  ;;  %v4865_v9 = vpop.f32.mrb[10].mxu1 }
  0xf4   :  { %v4867_v10 = vpop.f32.mrb[11].mxu0  ;;  %3617 = vmatmul.mubr.msk.f32.gmra.mrb[116].mxu0 %vm281_vm1, %v131_v4  ;;  %v4870_v11 = vpop.f32.mrb[11].mxu1  ;;  %3809 = vmatmul.mubr.msk.f32.gmra.mrb[116].mxu1 %vm281_vm1, %v259_v5 }
  0xf5   :  { %3619 = vmatprep.mubr.msk.f32.mxu0 %vm281_vm1, %v132_v6  ;;  %3811 = vmatprep.mubr.msk.f32.mxu1 %vm281_vm1, %v260_v7 }
  0xf7   :  { %v4887_v16 = vpop.f32.mrb[12].mxu0  ;;  %v4889_v17 = vpop.f32.mrb[12].mxu1 }
  0xf8   :  { %v4891_v18 = vpop.f32.mrb[13].mxu0  ;;  %3620 = vmatmul.mubr.msk.f32.gmra.mrb[118].mxu0 %vm281_vm1, %v133_v12  ;;  %v4894_v19 = vpop.f32.mrb[13].mxu1  ;;  %3812 = vmatmul.mubr.msk.f32.gmra.mrb[118].mxu1 %vm281_vm1, %v261_v13 }
  0xf9   :  { %3622 = vmatprep.mubr.msk.f32.mxu0 %vm281_vm1, %v134_v14  ;;  %3814 = vmatprep.mubr.msk.f32.mxu1 %vm281_vm1, %v262_v15 }
  0xfb   :  { %v4911_v24 = vpop.f32.mrb[14].mxu0  ;;  %v4913_v25 = vpop.f32.mrb[14].mxu1 }
  0xfc   :  { %v4915_v26 = vpop.f32.mrb[15].mxu0  ;;  %3623 = vmatmul.mubr.msk.f32.gmra.mrb[120].mxu0 %vm281_vm1, %v135_v20  ;;  %v4918_v27 = vpop.f32.mrb[15].mxu1  ;;  %3815 = vmatmul.mubr.msk.f32.gmra.mrb[120].mxu1 %vm281_vm1, %v263_v21 }
  0xfd   :  { %3625 = vmatprep.mubr.msk.f32.mxu0 %vm281_vm1, %v136_v22  ;;  %3817 = vmatprep.mubr.msk.f32.mxu1 %vm281_vm1, %v264_v23 }
  0xff   :  { %v4935_v36 = vpop.f32.mrb[16].mxu0  ;;  %v4937_v37 = vpop.f32.mrb[16].mxu1 }
 0x100   :  { %v4939_v38 = vpop.f32.mrb[17].mxu0  ;;  %3626 = vmatmul.mubr.msk.f32.gmra.mrb[122].mxu0 %vm281_vm1, %v137_v28  ;;  %v4942_v39 = vpop.f32.mrb[17].mxu1  ;;  %3818 = vmatmul.mubr.msk.f32.gmra.mrb[122].mxu1 %vm281_vm1, %v265_v29 }
 0x101   :  { %3628 = vmatprep.mubr.msk.f32.mxu0 %vm281_vm1, %v138_v30  ;;  %3820 = vmatprep.mubr.msk.f32.mxu1 %vm281_vm1, %v266_v31 }
 0x103   :  { %v4959_v52 = vpop.f32.mrb[18].mxu0  ;;  %v4961_v53 = vpop.f32.mrb[18].mxu1 }
 0x104   :  { %v4963_v54 = vpop.f32.mrb[19].mxu0  ;;  %3629 = vmatmul.mubr.msk.f32.gmra.mrb[124].mxu0 %vm281_vm1, %v139_v44  ;;  %v4966_v55 = vpop.f32.mrb[19].mxu1  ;;  %3821 = vmatmul.mubr.msk.f32.gmra.mrb[124].mxu1 %vm281_vm1, %v267_v45 }
 0x105   :  { %3631 = vmatprep.mubr.msk.f32.mxu0 %vm281_vm1, %v140_v46  ;;  %3823 = vmatprep.mubr.msk.f32.mxu1 %vm281_vm1, %v268_v47 }
 0x107   :  { %v4977_v62 = vpop.f32.mrb[20].mxu0  ;;  %v4979_v63 = vpop.f32.mrb[20].mxu1 }
 0x108   :  { %v4981_v4 = vpop.f32.mrb[21].mxu0  ;;  %3632 = vmatmul.mubr.msk.f32.gmra.mrb[126].mxu0 %vm281_vm1, %v141_v60  ;;  %v4984_v5 = vpop.f32.mrb[21].mxu1  ;;  %3824 = vmatmul.mubr.msk.f32.gmra.mrb[126].mxu1 %vm281_vm1, %v269_v61 }
 0x10b   :  { %v4987_v6 = vpop.f32.mrb[22].mxu0  ;;  %v4989_v7 = vpop.f32.mrb[22].mxu1 }
 0x10c   :  { %v4991_v12 = vpop.f32.mrb[23].mxu0  ;;  %v4993_v13 = vpop.f32.mrb[23].mxu1 }
 0x10f   :  { %v4995_v14 = vpop.f32.mrb[24].mxu0  ;;  %v4997_v15 = vpop.f32.mrb[24].mxu1 }
 0x110   :  { %v4999_v20 = vpop.f32.mrb[25].mxu0  ;;  %v5001_v21 = vpop.f32.mrb[25].mxu1 }
 0x113   :  { %v5003_v22 = vpop.f32.mrb[26].mxu0  ;;  %v5005_v23 = vpop.f32.mrb[26].mxu1 }
 0x114   :  { %6502 = vst [vmem:[#allocation2_spill] sm:$0xff] %v5005_v23  ;;  %v5007_v28 = vpop.f32.mrb[27].mxu0  ;;  %v5009_v29 = vpop.f32.mrb[27].mxu1 }
 0x115   :  { %6503 = vst [vmem:[#allocation3_spill] sm:$0xff] %v5007_v28  ;;  %6504 = vst [vmem:[#allocation4_spill] sm:$0xff] %v5009_v29 }
 0x117   :  { %v5011_v30 = vpop.f32.mrb[28].mxu0  ;;  %v5013_v31 = vpop.f32.mrb[28].mxu1 }
 0x118   :  { %6505 = vst [vmem:[#allocation5_spill] sm:$0xff] %v5011_v30  ;;  %6506 = vst [vmem:[#allocation6_spill] sm:$0xff] %v5013_v31  ;;  %v5015_v44 = vpop.f32.mrb[29].mxu0  ;;  %v5017_v45 = vpop.f32.mrb[29].mxu1 }
 0x119   :  { %6507 = vst [vmem:[#allocation7_spill] sm:$0xff] %v5015_v44  ;;  %6508 = vst [vmem:[#allocation8_spill] sm:$0xff] %v5017_v45 }
 0x11b   :  { %v5019_v46 = vpop.f32.mrb[30].mxu0  ;;  %v5021_v47 = vpop.f32.mrb[30].mxu1 }
 0x11c   :  { %6509 = vst [vmem:[#allocation9_spill] sm:$0xff] %v5019_v46  ;;  %6510 = vst [vmem:[#allocation10_spill] sm:$0xff] %v5021_v47  ;;  %v5023_v60 = vpop.f32.mrb[31].mxu0  ;;  %v5025_v61 = vpop.f32.mrb[31].mxu1 }
 0x11d   :  { %6511 = vst [vmem:[#allocation11_spill] sm:$0xff] %v5023_v60  ;;  %6512 = vst [vmem:[#allocation12_spill] sm:$0xff] %v5025_v61 }
 0x11f   :  { %v5027_v23 = vpop.f32.mrb[32].mxu0  ;;  %v5029_v28 = vpop.f32.mrb[32].mxu1 }
 0x120   :  { %6513 = vst [vmem:[#allocation13_spill] sm:$0xff] %v5027_v23  ;;  %6514 = vst [vmem:[#allocation14_spill] sm:$0xff] %v5029_v28  ;;  %v5031_v29 = vpop.f32.mrb[33].mxu0  ;;  %v5033_v30 = vpop.f32.mrb[33].mxu1 }
 0x121   :  { %6515 = vst [vmem:[#allocation15_spill] sm:$0xff] %v5031_v29  ;;  %6516 = vst [vmem:[#allocation16_spill] sm:$0xff] %v5033_v30 }
 0x123   :  { %v5035_v31 = vpop.f32.mrb[34].mxu0  ;;  %v5037_v44 = vpop.f32.mrb[34].mxu1 }
 0x124   :  { %6517 = vst [vmem:[#allocation17_spill] sm:$0xff] %v5035_v31  ;;  %v5039_v45 = vpop.f32.mrb[35].mxu0  ;;  %v5041_v46 = vpop.f32.mrb[35].mxu1 }
 0x125   :  { %6518 = vst [vmem:[#allocation18_spill] sm:$0xff] %v5041_v46  ;;  %v5062_v46 = vld [vmem:[%s6433_s2] ss:$0 sm:$0xff] }
 0x127   :  { %v5043_v47 = vpop.f32.mrb[36].mxu0  ;;  %v5045_v60 = vpop.f32.mrb[36].mxu1 }
 0x128   :  { %6519 = vst [vmem:[#allocation19_spill] sm:$0xff] %v5043_v47  ;;  %6520 = vst [vmem:[#allocation20_spill] sm:$0xff] %v5045_v60  ;;  %v5047_v61 = vpop.f32.mrb[37].mxu0  ;;  %v5049_v23 = vpop.f32.mrb[37].mxu1 }
 0x129   :  { %6521 = vst [vmem:[#allocation21_spill] sm:$0xff] %v5047_v61  ;;  %6522 = vst [vmem:[#allocation22_spill] sm:$0xff] %v5049_v23  ;;  %v5070_v23 = vadd.f32 %v4743_v32, %v5062_v46  ;;  %v5090_v32 = vadd.f32 %v4767_v40, %v5062_v46  ;;  %v5110_v40 = vadd.f32 %v4793_v49, %v5062_v46 }
 0x12b   :  { %v5051_v28 = vpop.f32.mrb[38].mxu0  ;;  %v5053_v29 = vpop.f32.mrb[38].mxu1  ;;  %6534 = vst [vmem:[#allocation34_spill] sm:$0xff] %v5110_v40  ;;  %v5230_v40 = vadd.f32 %v4911_v24, %v5062_v46 }
 0x12c   :  { %6523 = vst [vmem:[#allocation23_spill] sm:$0xff] %v5051_v28  ;;  %6524 = vst [vmem:[#allocation24_spill] sm:$0xff] %v5053_v29  ;;  %v5055_v30 = vpop.f32.mrb[39].mxu0  ;;  %v5057_v31 = vpop.f32.mrb[39].mxu1  ;;  %v5074_v29 = vadd.f32 %v4745_v33, %v5062_v46  ;;  %v5082_v28 = vadd.f32 %v5062_v46, %v4747_v34  ;;  %v5094_v33 = vadd.f32 %v4769_v41, %v5062_v46 }
 0x12d   :  { %6525 = vst [vmem:[#allocation25_spill] sm:$0xff] %v5055_v30  ;;  %6526 = vst [vmem:[#allocation26_spill] sm:$0xff] %v5057_v31  ;;  %v5102_v34 = vadd.f32 %v5062_v46, %v4774_v43  ;;  %v5120_v43 = vadd.f32 %v5062_v46, %v4795_v50  ;;  %v5138_v50 = vadd.f32 %v4817_v57, %v5062_v46 }
 0x12e   :  { %6529 = vst [vmem:[#allocation29_spill] sm:$0xff] %v5074_v29  ;;  %6532 = vst [vmem:[#allocation32_spill] sm:$0xff] %v5082_v28  ;;  %v5144_v29 = vadd.f32 %v5062_v46, %v4819_v58  ;;  %v5190_v57 = vadd.f32 %v4865_v9, %v5062_v46  ;;  %v5202_v58 = vadd.f32 %v4887_v16, %v5062_v46 }
 0x12f   :  { %v5064_v47 = vpop.f32.mrb[40].mxu0  ;;  %v5066_v60 = vpop.f32.mrb[40].mxu1  ;;  %6538 = vst [vmem:[#allocation38_spill] sm:$0xff] %v5138_v50  ;;  %v5220_v16 = vadd.f32 %v5062_v46, %v4894_v19  ;;  %v5262_v50 = vadd.f32 %v4937_v37, %v5062_v46  ;;  %v5272_v19 = vadd.f32 %v5062_v46, %v4939_v38  ;;  %v5290_v38 = vadd.f32 %v5062_v46, %v4963_v54 }
 0x130   :  { %6527 = vst [vmem:[#allocation27_spill] sm:$0xff] %v5064_v47  ;;  %6528 = vst [vmem:[#allocation28_spill] sm:$0xff] %v5066_v60  ;;  %v5076_v30 = vpop.f32.mrb[41].mxu0  ;;  %v5078_v31 = vpop.f32.mrb[41].mxu1  ;;  %v5086_v47 = vadd.f32 %v5062_v46, %v4750_v35  ;;  %v5106_v35 = vadd.f32 %v4791_v48, %v5062_v46  ;;  %v5124_v48 = vadd.f32 %v5062_v46, %v4798_v51 }
 0x131   :  { %6530 = vst [vmem:[#allocation30_spill] sm:$0xff] %v5076_v30  ;;  %6531 = vst [vmem:[#allocation31_spill] sm:$0xff] %v5078_v31  ;;  %v5098_v30 = vadd.f32 %v5062_v46, %v4771_v42  ;;  %v5134_v60 = vadd.f32 %v4815_v56, %v5062_v46  ;;  %v5176_v51 = vadd.f32 %v5062_v46, %v4843_v2 }
 0x132   :  { %6533 = vst [vmem:[#allocation33_spill] sm:$0xff] %v5086_v47  ;;  %6537 = vst [vmem:[#allocation37_spill] sm:$0xff] %v5124_v48  ;;  %v5186_v48 = vadd.f32 %v4863_v8, %v5062_v46  ;;  %v5194_v2 = vadd.f32 %v5062_v46, %v4867_v10  ;;  %v5206_v8 = vadd.f32 %v4889_v17, %v5062_v46 }
 0x133   :  { %v5112_v31 = vpop.f32.mrb[42].mxu0  ;;  %v5114_v41 = vpop.f32.mrb[42].mxu1  ;;  %6539 = vst [vmem:[#allocation39_spill] sm:$0xff] %v5144_v29  ;;  %6542 = vst [vmem:[#allocation42_spill] sm:$0xff] %v5176_v51  ;;  %v5244_v29 = vadd.f32 %v5062_v46, %v4918_v27  ;;  %v5258_v27 = vadd.f32 %v4935_v36, %v5062_v46  ;;  %v5276_v36 = vadd.f32 %v5062_v46, %v4942_v39 }
 0x134   :  { %6535 = vst [vmem:[#allocation35_spill] sm:$0xff] %v5112_v31  ;;  %6536 = vst [vmem:[#allocation36_spill] sm:$0xff] %v5114_v41  ;;  %v5126_v61 = vpop.f32.mrb[43].mxu0  ;;  %v5128_v49 = vpop.f32.mrb[43].mxu1  ;;  %v5148_v31 = vadd.f32 %v5062_v46, %v4822_v59  ;;  %v5162_v59 = vadd.f32 %v4839_v0, %v5062_v46  ;;  %v5166_v41 = vadd.f32 %v4841_v1, %v5062_v46 }
 0x135   :  { %v5180_v0 = vadd.f32 %v5062_v46, %v4846_v3  ;;  %v5198_v3 = vadd.f32 %v5062_v46, %v4870_v11  ;;  %6544 = vst [vmem:[#allocation44_spill] sm:$0xff] %v5206_v8  ;;  %v5216_v11 = vadd.f32 %v5062_v46, %v4891_v18  ;;  %6545 = vst [vmem:[#allocation45_spill] sm:$0xff] %v5220_v16 }
 0x136   :  { %6540 = vst [vmem:[#allocation40_spill] sm:$0xff] %v5148_v31  ;;  %6541 = vst [vmem:[#allocation41_spill] sm:$0xff] %v5166_v41  ;;  %v5234_v18 = vadd.f32 %v4913_v25, %v5062_v46  ;;  %v5240_v41 = vadd.f32 %v5062_v46, %v4915_v26  ;;  %v5282_v16 = vadd.f32 %v4959_v52, %v5062_v46 }
 0x137   :  { %v5154_v28 = vpop.f32.mrb[44].mxu0  ;;  %v5156_v42 = vpop.f32.mrb[44].mxu1  ;;  %6543 = vst [vmem:[#allocation43_spill] sm:$0xff] %v5180_v0  ;;  %6548 = vst [vmem:[#allocation48_spill] sm:$0xff] %v5244_v29  ;;  %v5286_v25 = vadd.f32 %v4961_v53, %v5062_v46  ;;  %v5294_v39 = vadd.f32 %v5062_v46, %v4966_v55  ;;  %v5298_v26 = vadd.f32 %v4977_v62, %v5062_v46 }
 0x138   :  { %v5168_v56 = vpop.f32.mrb[45].mxu0  ;;  %v5170_v47 = vpop.f32.mrb[45].mxu1  ;;  %6546 = vst [vmem:[#allocation46_spill] sm:$0xff] %v5234_v18  ;;  %6547 = vst [vmem:[#allocation47_spill] sm:$0xff] %v5240_v41  ;;  %v5302_v52 = vadd.f32 %v4979_v63, %v5062_v46  ;;  %v5312_v55 = vadd.f32 %v5062_v46, %v4981_v4  ;;  %v5316_v62 = vadd.f32 %v5062_v46, %v4984_v5 }
 0x139   :  { %6549 = vst [vmem:[#allocation49_spill] sm:$0xff] %v5262_v50  ;;  %6550 = vst [vmem:[#allocation50_spill] sm:$0xff] %v5272_v19  ;;  %v5326_v8 = vadd.f32 %v4987_v6, %v5062_v46  ;;  %v5330_v4 = vadd.f32 %v4989_v7, %v5062_v46  ;;  %v5336_v50 = vadd.f32 %v5062_v46, %v4991_v12  ;;  %v6567_v7 = vld [vmem:[#allocation2_spill] sm:$0xff]  ;;  %v6572_v12 = vld [vmem:[#allocation5_spill] sm:$0xff] }
 0x13a   :  { %6551 = vst [vmem:[#allocation51_spill] sm:$0xff] %v5276_v36  ;;  %6552 = vst [vmem:[#allocation52_spill] sm:$0xff] %v5286_v25  ;;  %v5340_v41 = vadd.f32 %v5062_v46, %v4993_v13  ;;  %v5354_v13 = vadd.f32 %v4995_v14, %v5062_v46  ;;  %v5358_v18 = vadd.f32 %v4997_v15, %v5062_v46  ;;  %v6574_v15 = vld [vmem:[#allocation6_spill] sm:$0xff]  ;;  %v6588_v25 = vld [vmem:[#allocation11_spill] sm:$0xff] }
 0x13b   :  { %v5208_v1 = vpop.f32.mrb[46].mxu0  ;;  %v5210_v9 = vpop.f32.mrb[46].mxu1  ;;  %6553 = vst [vmem:[#allocation53_spill] sm:$0xff] %v5290_v38  ;;  %6554 = vst [vmem:[#allocation54_spill] sm:$0xff] %v5294_v39  ;;  %v5368_v5 = vadd.f32 %v5062_v46, %v4999_v20  ;;  %v5372_v14 = vadd.f32 %v5062_v46, %v5001_v21  ;;  %v6580_v39 = vld [vmem:[#allocation8_spill] sm:$0xff] }
 0x13c   :  { %v5222_v31 = vpop.f32.mrb[47].mxu0  ;;  %v5224_v17 = vpop.f32.mrb[47].mxu1  ;;  %6555 = vst [vmem:[#allocation55_spill] sm:$0xff] %v5298_v26  ;;  %6556 = vst [vmem:[#allocation56_spill] sm:$0xff] %v5302_v52  ;;  %v6569_v52 = vld [vmem:[#allocation3_spill] sm:$0xff] }
 0x13d   :  { %6557 = vst [vmem:[#allocation57_spill] sm:$0xff] %v5312_v55  ;;  %6558 = vst [vmem:[#allocation58_spill] sm:$0xff] %v5316_v62  ;;  %v5378_v62 = vadd.f32 %v5003_v22, %v5062_v46  ;;  %v5386_v20 = vadd.f32 %v5062_v46, %v6569_v52  ;;  %v5398_v22 = vadd.f32 %v6574_v15, %v5062_v46  ;;  %v6578_v26 = vld [vmem:[#allocation7_spill] sm:$0xff]  ;;  %v6584_v55 = vld [vmem:[#allocation9_spill] sm:$0xff] }
 0x13e   :  { %6559 = vst [vmem:[#allocation59_spill] sm:$0xff] %v5326_v8  ;;  %6560 = vst [vmem:[#allocation60_spill] sm:$0xff] %v5330_v4  ;;  %v5382_v8 = vadd.f32 %v6567_v7, %v5062_v46  ;;  %v6571_v4 = vld [vmem:[#allocation4_spill] sm:$0xff]  ;;  %v6586_v52 = vld [vmem:[#allocation10_spill] sm:$0xff] }
 0x13f   :  { %v5250_v51 = vpop.f32.mrb[48].mxu0  ;;  %v5252_v10 = vpop.f32.mrb[48].mxu1  ;;  %6561 = vst [vmem:[#allocation61_spill] sm:$0xff] %v5336_v50  ;;  %6562 = vst [vmem:[#allocation62_spill] sm:$0xff] %v5340_v41  ;;  %v5390_v21 = vadd.f32 %v5062_v46, %v6571_v4  ;;  %v5394_v50 = vadd.f32 %v6572_v12, %v5062_v46  ;;  %v5408_v4 = vadd.f32 %v5062_v46, %v6578_v26 }
 0x140   :  { %v5264_v24 = vpop.f32.mrb[49].mxu0  ;;  %v5266_v0 = vpop.f32.mrb[49].mxu1  ;;  %6563 = vst [vmem:[#allocation63_spill] sm:$0xff] %v5354_v13  ;;  %6564 = vst [vmem:[#allocation64_spill] sm:$0xff] %v5358_v18  ;;  %v5412_v12 = vadd.f32 %v5062_v46, %v6580_v39  ;;  %v5422_v13 = vadd.f32 %v6584_v55, %v5062_v46  ;;  %v5426_v26 = vadd.f32 %v6586_v52, %v5062_v46 }
 0x141   :  { %6565 = vst [vmem:[#allocation65_spill] sm:$0xff] %v5368_v5  ;;  %6566 = vst [vmem:[#allocation66_spill] sm:$0xff] %v5372_v14  ;;  %v5478_v52 = vadd.f32 %v5037_v44, %v5062_v46 }
 0x142   :  { %6568 = vst [vmem:[#allocation2_spill] sm:$0xff] %v5382_v8  ;;  %6570 = vst [vmem:[#allocation3_spill] sm:$0xff] %v5386_v20  ;;  %v6594_v8 = vld [vmem:[#allocation13_spill] sm:$0xff] }
 0x143   :  { %v5304_v37 = vpop.f32.mrb[50].mxu0  ;;  %v5306_v53 = vpop.f32.mrb[50].mxu1  ;;  %6573 = vst [vmem:[#allocation4_spill] sm:$0xff] %v5394_v50  ;;  %6575 = vst [vmem:[#allocation5_spill] sm:$0xff] %v5398_v22  ;;  %v6620_v50 = vld [vmem:[#allocation25_spill] sm:$0xff] }
 0x144   :  { %v5318_v29 = vpop.f32.mrb[51].mxu0  ;;  %v5320_v63 = vpop.f32.mrb[51].mxu1  ;;  %6579 = vst [vmem:[#allocation7_spill] sm:$0xff] %v5408_v4  ;;  %6581 = vst [vmem:[#allocation8_spill] sm:$0xff] %v5412_v12  ;;  %v6608_v12 = vld [vmem:[#allocation19_spill] sm:$0xff] }
 0x145   :  { %6585 = vst [vmem:[#allocation9_spill] sm:$0xff] %v5422_v13  ;;  %6587 = vst [vmem:[#allocation10_spill] sm:$0xff] %v5426_v26  ;;  %v6612_v26 = vld [vmem:[#allocation21_spill] sm:$0xff]  ;;  %v6614_v13 = vld [vmem:[#allocation22_spill] sm:$0xff] }
 0x147   :  { %v5346_v19 = vpop.f32.mrb[52].mxu0  ;;  %v5348_v54 = vpop.f32.mrb[52].mxu1 }
 0x148   :  { %v5360_v6 = vpop.f32.mrb[53].mxu0  ;;  %v5362_v36 = vpop.f32.mrb[53].mxu1 }
 0x14b   :  { %v5400_v41 = vpop.f32.mrb[54].mxu0  ;;  %v5402_v7 = vpop.f32.mrb[54].mxu1 }
 0x14c   :  { %6576 = vst [vmem:[#allocation6_spill] sm:$0xff] %v5400_v41  ;;  %6577 = vst [vmem:[#allocation67_spill] sm:$0xff] %v5402_v7  ;;  %v5414_v38 = vpop.f32.mrb[55].mxu0  ;;  %v5416_v15 = vpop.f32.mrb[55].mxu1  ;;  %v6596_v7 = vld [vmem:[#allocation14_spill] sm:$0xff] }
 0x14d   :  { %6582 = vst [vmem:[#allocation68_spill] sm:$0xff] %v5414_v38  ;;  %6583 = vst [vmem:[#allocation69_spill] sm:$0xff] %v5416_v15  ;;  %v5432_v38 = vadd.f32 %v5062_v46, %v6588_v25  ;;  %v6590_v15 = vld [vmem:[#allocation12_spill] sm:$0xff]  ;;  %v5454_v20 = vadd.f32 %v6596_v7, %v5062_v46 }
 0x14e   :  { %v5436_v41 = vadd.f32 %v5062_v46, %v6590_v15  ;;  %v5450_v15 = vadd.f32 %v6594_v8, %v5062_v46  ;;  %v6602_v25 = vld [vmem:[#allocation16_spill] sm:$0xff] }
 0x14f   :  { %6589 = vst [vmem:[#allocation11_spill] sm:$0xff] %v5432_v38  ;;  %v5442_v5 = vpop.f32.mrb[56].mxu0  ;;  %v5444_v18 = vpop.f32.mrb[56].mxu1  ;;  %6597 = vst [vmem:[#allocation14_spill] sm:$0xff] %v5454_v20  ;;  %v5468_v8 = vadd.f32 %v5062_v46, %v6602_v25  ;;  %v6609_v7 = vld [vmem:[#allocation20_spill] sm:$0xff]  ;;  %v6618_v38 = vld [vmem:[#allocation23_spill] sm:$0xff] }
 0x150   :  { %6591 = vst [vmem:[#allocation12_spill] sm:$0xff] %v5436_v41  ;;  %6592 = vst [vmem:[#allocation70_spill] sm:$0xff] %v5442_v5  ;;  %v5456_v55 = vpop.f32.mrb[57].mxu0  ;;  %v5458_v14 = vpop.f32.mrb[57].mxu1  ;;  %v6600_v5 = vld [vmem:[#allocation15_spill] sm:$0xff] }
 0x151   :  { %6593 = vst [vmem:[#allocation71_spill] sm:$0xff] %v5444_v18  ;;  %6595 = vst [vmem:[#allocation13_spill] sm:$0xff] %v5450_v15  ;;  %v5464_v39 = vadd.f32 %v5062_v46, %v6600_v5  ;;  %v5482_v5 = vadd.f32 %v5062_v46, %v5039_v45  ;;  %v6607_v18 = vld [vmem:[#allocation18_spill] sm:$0xff]  ;;  %v5518_v15 = vadd.f32 %v6618_v38, %v5062_v46  ;;  %v6619_v45 = vld [vmem:[#allocation24_spill] sm:$0xff] }
 0x152   :  { %6598 = vst [vmem:[#allocation72_spill] sm:$0xff] %v5456_v55  ;;  %6599 = vst [vmem:[#allocation73_spill] sm:$0xff] %v5458_v14  ;;  %v6604_v55 = vld [vmem:[#allocation17_spill] sm:$0xff]  ;;  %v5486_v25 = vadd.f32 %v5062_v46, %v6607_v18  ;;  %v5490_v14 = vadd.f32 %v6608_v12, %v5062_v46  ;;  %v5504_v18 = vadd.f32 %v5062_v46, %v6612_v26 }
 0x153   :  { %6601 = vst [vmem:[#allocation15_spill] sm:$0xff] %v5464_v39  ;;  %6603 = vst [vmem:[#allocation16_spill] sm:$0xff] %v5468_v8  ;;  %v5474_v4 = vadd.f32 %v6604_v55, %v5062_v46  ;;  %v5494_v55 = vadd.f32 %v6609_v7, %v5062_v46  ;;  %v5496_v41 = vpop.f32.mrb[58].mxu0  ;;  %v5498_v44 = vpop.f32.mrb[58].mxu1  ;;  %v5508_v12 = vadd.f32 %v5062_v46, %v6614_v13 }
 0x154   :  { %6605 = vst [vmem:[#allocation17_spill] sm:$0xff] %v5478_v52  ;;  %6606 = vst [vmem:[#allocation74_spill] sm:$0xff] %v5482_v5  ;;  %v5510_v22 = vpop.f32.mrb[59].mxu0  ;;  %v5512_v7 = vpop.f32.mrb[59].mxu1  ;;  %v5522_v26 = vadd.f32 %v6619_v45, %v5062_v46  ;;  %v6625_v52 = vld [vmem:[#allocation27_spill] sm:$0xff]  ;;  %v6635_v45 = vld [vmem:[#allocation36_spill] sm:$0xff] }
 0x155   :  { %6610 = vst [vmem:[#allocation18_spill] sm:$0xff] %v5496_v41  ;;  %6611 = vst [vmem:[#allocation19_spill] sm:$0xff] %v5498_v44  ;;  %v6626_v44 = vld [vmem:[#allocation28_spill] sm:$0xff] }
 0x156   :  { %6613 = vst [vmem:[#allocation20_spill] sm:$0xff] %v5504_v18  ;;  %6615 = vst [vmem:[#allocation21_spill] sm:$0xff] %v5508_v12  ;;  %v5550_v5 = vadd.f32 %v6626_v44, %v5062_v46  ;;  %v5586_v12 = vadd.f32 %v5154_v28, %v5062_v46  ;;  %v5604_v28 = vadd.f32 %v5062_v46, %v5170_v47 }
 0x157   :  { %6616 = vst [vmem:[#allocation22_spill] sm:$0xff] %v5510_v22  ;;  %6617 = vst [vmem:[#allocation75_spill] sm:$0xff] %v5512_v7  ;;  %v5528_v22 = vadd.f32 %v5062_v46, %v6620_v50  ;;  %v6621_v7 = vld [vmem:[#allocation26_spill] sm:$0xff]  ;;  %v5538_v39 = vpop.f32.mrb[60].mxu0  ;;  %v5540_v20 = vpop.f32.mrb[60].mxu1  ;;  %v6631_v50 = vld [vmem:[#allocation31_spill] sm:$0xff] }
 0x158   :  { %v5532_v41 = vadd.f32 %v5062_v46, %v6621_v7  ;;  %6623 = vst [vmem:[#allocation24_spill] sm:$0xff] %v5538_v39  ;;  %6624 = vst [vmem:[#allocation25_spill] sm:$0xff] %v5540_v20  ;;  %v5546_v7 = vadd.f32 %v6625_v52, %v5062_v46  ;;  %v5552_v38 = vpop.f32.mrb[61].mxu0  ;;  %v5554_v8 = vpop.f32.mrb[61].mxu1  ;;  %v6629_v39 = vld [vmem:[#allocation30_spill] sm:$0xff]  ;;  %v5564_v52 = vadd.f32 %v5062_v46, %v6631_v50 }
 0x159   :  { %6627 = vst [vmem:[#allocation26_spill] sm:$0xff] %v5552_v38  ;;  %6628 = vst [vmem:[#allocation27_spill] sm:$0xff] %v5554_v8  ;;  %v5560_v13 = vadd.f32 %v5062_v46, %v6629_v39  ;;  %v6633_v38 = vld [vmem:[#allocation35_spill] sm:$0xff]  ;;  %v5574_v8 = vadd.f32 %v6635_v45, %v5062_v46  ;;  %v5578_v39 = vadd.f32 %v5062_v46, %v5126_v61 }
 0x15a   :  { %6622 = vst [vmem:[#allocation23_spill] sm:$0xff] %v5532_v41  ;;  %6632 = vst [vmem:[#allocation30_spill] sm:$0xff] %v5564_v52  ;;  %v5570_v18 = vadd.f32 %v6633_v38, %v5062_v46  ;;  %v5582_v50 = vadd.f32 %v5062_v46, %v5128_v49  ;;  %v5590_v38 = vadd.f32 %v5156_v42, %v5062_v46 }
 0x15b   :  { %6630 = vst [vmem:[#allocation28_spill] sm:$0xff] %v5560_v13  ;;  %6636 = vst [vmem:[#allocation35_spill] sm:$0xff] %v5574_v8  ;;  %v5592_v44 = vpop.f32.mrb[62].mxu0  ;;  %v5594_v45 = vpop.f32.mrb[62].mxu1  ;;  %v5600_v49 = vadd.f32 %v5062_v46, %v5168_v56  ;;  %v5614_v20 = vadd.f32 %v5208_v1, %v5062_v46  ;;  %v5618_v56 = vadd.f32 %v5210_v9, %v5062_v46 }
 0x15c   :  { %6634 = vst [vmem:[#allocation31_spill] sm:$0xff] %v5570_v18  ;;  %6637 = vst [vmem:[#allocation36_spill] sm:$0xff] %v5578_v39  ;;  %v5606_v41 = vpop.f32.mrb[63].mxu0  ;;  %v5608_v42 = vpop.f32.mrb[63].mxu1 }
 0x15d   :  { %6638 = vst [vmem:[#allocation76_spill] sm:$0xff] %v5582_v50  ;;  %6639 = vst [vmem:[#allocation77_spill] sm:$0xff] %v5586_v12  ;;  %v6656_v50 = vld [vmem:[#allocation33_spill] sm:$0xff] }
 0x15e   :  { %6640 = vst [vmem:[#allocation78_spill] sm:$0xff] %v5590_v38  ;;  %6641 = vst [vmem:[#allocation79_spill] sm:$0xff] %v5592_v44  ;;  %v6652_v38 = vld [vmem:[#allocation29_spill] sm:$0xff] }
 0x15f   :  { %6642 = vst [vmem:[#allocation80_spill] sm:$0xff] %v5594_v45  ;;  %6643 = vst [vmem:[#allocation81_spill] sm:$0xff] %v5600_v49  ;;  %v5628_v45 = vadd.f32 %v5062_v46, %v5224_v17  ;;  %v3540_v52 = vpop.f32.mrb[64].mxu0  ;;  %v3732_v47 = vpop.f32.mrb[64].mxu1 }
 0x160   :  { %6644 = vst [vmem:[#allocation82_spill] sm:$0xff] %v5604_v28  ;;  %6645 = vst [vmem:[#allocation83_spill] sm:$0xff] %v5606_v41  ;;  %v2086_v18 = vadd.f32 %v3732_v47, %v5062_v46  ;;  %v1440_v17 = vpop.f32.mrb[65].mxu0  ;;  %v2080_v13 = vpop.f32.mrb[65].mxu1  ;;  %v5650_v47 = vadd.f32 %v5252_v10, %v5062_v46  ;;  %v6654_v28 = vld [vmem:[#allocation32_spill] sm:$0xff] }
 0x161   :  { %6646 = vst [vmem:[#allocation84_spill] sm:$0xff] %v5608_v42  ;;  %6647 = vst [vmem:[#allocation85_spill] sm:$0xff] %v5614_v20  ;;  %v5624_v42 = vadd.f32 %v5062_v46, %v5222_v31  ;;  %v1446_v31 = vadd.f32 %v3540_v52, %v5062_v46  ;;  %v1441_v9 = vadd.f32 %v5062_v46, %v1440_v17  ;;  %v6655_v12 = vmax.f32 %v6654_v28, 0.0 }
 0x162   :  { %6648 = vst [vmem:[#allocation86_spill] sm:$0xff] %v5618_v56  ;;  %6650 = vst [vmem:[#allocation88_spill] sm:$0xff] %v5628_v45  ;;  %v2081_v41 = vadd.f32 %v5062_v46, %v2080_v13  ;;  %v2592_v8 = vmax.f32 %v2086_v18, 0.0  ;;  %v5646_v52 = vadd.f32 %v5250_v51, %v5062_v46  ;;  %v6651_v13 = vmax.f32 %v5070_v23, 0.0 }
 0x163   :  { %6649 = vst [vmem:[#allocation87_spill] sm:$0xff] %v5624_v42  ;;  %v2464_v49 = vmax.f32 %v1446_v31, 0.0  ;;  %v2463_v1 = vmax.f32 %v1441_v9, 0.0  ;;  %v3543_v56 = vpop.f32.mrb[66].mxu0  ;;  %v3735_v17 = vpop.f32.mrb[66].mxu1  ;;  %v6653_v42 = vmax.f32 %v6652_v38, 0.0  ;;  %v5666_v38 = vadd.f32 %v5062_v46, %v5264_v24 }
 0x164   :  { %v2591_v44 = vmax.f32 %v2081_v41, 0.0  ;;  %v1456_v18 = vadd.f32 %v3543_v56, %v5062_v46  ;;  %v2096_v31 = vadd.f32 %v3735_v17, %v5062_v46  ;;  %v1450_v51 = vpop.f32.mrb[67].mxu0  ;;  %v2090_v45 = vpop.f32.mrb[67].mxu1  ;;  %v6657_v9 = vmax.f32 %v6656_v50, 0.0 }
 0x165   :  { %v2656_v20 = vmax.f32 %v6651_v13, %v2464_v49  ;;  %v2720_v61 = vmax.f32 %v6653_v42, %v2592_v8  ;;  %v2655_v10 = vmax.f32 %v6655_v12, %v2463_v1  ;;  %v1451_v39 = vadd.f32 %v5062_v46, %v1450_v51 }
 0x166   :  { %v2719_v41 = vmax.f32 %v6657_v9, %v2591_v44  ;;  %v2091_v23 = vadd.f32 %v5062_v46, %v2090_v45  ;;  %v2466_v49 = vmax.f32 %v1456_v18, 0.0  ;;  %v2594_v42 = vmax.f32 %v2096_v31, 0.0 }
 0x167   :  { %v2784_v8 = vmax.f32 %v2656_v20, %v2720_v61  ;;  %v5670_v56 = vadd.f32 %v5062_v46, %v5266_v0  ;;  %v2465_v12 = vmax.f32 %v1451_v39, 0.0  ;;  %v3546_v50 = vpop.f32.mrb[68].mxu0  ;;  %v3738_v44 = vpop.f32.mrb[68].mxu1  ;;  %v6658_v24 = vmax.f32 %v5090_v32, 0.0 }
 0x168   :  { %v2783_v28 = vmax.f32 %v2655_v10, %v2719_v41  ;;  %v2593_v1 = vmax.f32 %v2091_v23, 0.0  ;;  %v6659_v20 = vmax.f32 %v5094_v33, 0.0  ;;  %v1466_v17 = vadd.f32 %v3546_v50, %v5062_v46  ;;  %v1460_v13 = vpop.f32.mrb[69].mxu0  ;;  %v2100_v39 = vpop.f32.mrb[69].mxu1 }
 0x169   :  { %2849 = vst.msk [vmem:[%s6434_s3 + $0x8] sm:$0xff] %vm2847_vm4, %v2784_v8  ;;  %v2658_v45 = vmax.f32 %v6658_v24, %v2466_v49  ;;  %v2106_v0 = vadd.f32 %v3738_v44, %v5062_v46  ;;  %v6660_v18 = vmax.f32 %v5098_v30, 0.0  ;;  %v6661_v32 = vmax.f32 %v5102_v34, 0.0 }
 0x16a   :  { %v2722_v61 = vmax.f32 %v6659_v20, %v2594_v42  ;;  %2848 = vst.msk [vmem:[%s6434_s3] sm:$0xff] %vm2847_vm4, %v2783_v28  ;;  %v1461_v33 = vadd.f32 %v5062_v46, %v1460_v13  ;;  %v2101_v10 = vadd.f32 %v5062_v46, %v2100_v39  ;;  %v2448_v9 = vmax.f32 %v5646_v52, 0.0 }
 0x16b   :  { %v2657_v31 = vmax.f32 %v6660_v18, %v2465_v12  ;;  %v2721_v51 = vmax.f32 %v6661_v32, %v2593_v1  ;;  %v2468_v23 = vmax.f32 %v1466_v17, 0.0  ;;  %v2596_v8 = vmax.f32 %v2106_v0, 0.0  ;;  %v3549_v44 = vpop.f32.mrb[70].mxu0  ;;  %v3741_v30 = vpop.f32.mrb[70].mxu1  ;;  %v6663_v1 = vld [vmem:[#allocation34_spill] sm:$0xff]  ;;  %v6666_v18 = vld [vmem:[#allocation37_spill] sm:$0xff] }
 0x16c   :  { %v2786_v41 = vmax.f32 %v2658_v45, %v2722_v61  ;;  %v2576_v49 = vmax.f32 %v5650_v47, 0.0  ;;  %v2467_v50 = vmax.f32 %v1461_v33, 0.0  ;;  %v2595_v28 = vmax.f32 %v2101_v10, 0.0  ;;  %v1470_v17 = vpop.f32.mrb[71].mxu0  ;;  %v2110_v0 = vpop.f32.mrb[71].mxu1 }
 0x16d   :  { %v2785_v42 = vmax.f32 %v2657_v31, %v2721_v51  ;;  %v6662_v34 = vmax.f32 %v5106_v35, 0.0  ;;  %v6664_v24 = vmax.f32 %v6663_v1, 0.0  ;;  %v1476_v20 = vadd.f32 %v3549_v44, %v5062_v46  ;;  %v6669_v1 = vld [vmem:[#allocation38_spill] sm:$0xff] }
 0x16e   :  { %2851 = vst.msk [vmem:[%s6434_s3 + $0x18] sm:$0xff] %vm2847_vm4, %v2786_v41  ;;  %v2116_v61 = vadd.f32 %v3741_v30, %v5062_v46  ;;  %v6665_v13 = vmax.f32 %v5120_v43, 0.0  ;;  %v6667_v35 = vmax.f32 %v6666_v18, 0.0  ;;  %v1471_v32 = vadd.f32 %v5062_v46, %v1470_v17  ;;  %v6673_v18 = vld [vmem:[#allocation40_spill] sm:$0xff] }
 0x16f   :  { %v2660_v12 = vmax.f32 %v6662_v34, %v2468_v23  ;;  %v2724_v45 = vmax.f32 %v6664_v24, %v2596_v8  ;;  %2850 = vst.msk [vmem:[%s6434_s3 + $0x10] sm:$0xff] %vm2847_vm4, %v2785_v42  ;;  %v2111_v51 = vadd.f32 %v5062_v46, %v2110_v0  ;;  %v2447_v33 = vmax.f32 %v5666_v38, 0.0  ;;  %v3552_v34 = vpop.f32.mrb[72].mxu0  ;;  %v3744_v43 = vpop.f32.mrb[72].mxu1  ;;  %v6671_v0 = vld [vmem:[#allocation39_spill] sm:$0xff] }
 0x170   :  { %v2659_v39 = vmax.f32 %v6665_v13, %v2467_v50  ;;  %v2723_v31 = vmax.f32 %v6667_v35, %v2595_v28  ;;  %v2470_v41 = vmax.f32 %v1476_v20, 0.0  ;;  %v2598_v23 = vmax.f32 %v2116_v61, 0.0  ;;  %v1480_v61 = vpop.f32.mrb[73].mxu0  ;;  %v2120_v17 = vpop.f32.mrb[73].mxu1 }
 0x171   :  { %v2788_v10 = vmax.f32 %v2660_v12, %v2724_v45  ;;  %v2575_v8 = vmax.f32 %v5670_v56, 0.0  ;;  %v2469_v30 = vmax.f32 %v1471_v32, 0.0  ;;  %v2597_v42 = vmax.f32 %v2111_v51, 0.0 }
 0x172   :  { %v2787_v44 = vmax.f32 %v2659_v39, %v2723_v31  ;;  %v6668_v50 = vmax.f32 %v5134_v60, 0.0  ;;  %v6670_v24 = vmax.f32 %v6669_v1, 0.0  ;;  %v1486_v45 = vadd.f32 %v3552_v34, %v5062_v46 }
 0x173   :  { %2853 = vst.msk [vmem:[%s6434_s3 + $0x28] sm:$0xff] %vm2847_vm4, %v2788_v10  ;;  %v2126_v20 = vadd.f32 %v3744_v43, %v5062_v46  ;;  %v6672_v13 = vmax.f32 %v6671_v0, 0.0  ;;  %v6674_v60 = vmax.f32 %v6673_v18, 0.0  ;;  %v1481_v31 = vadd.f32 %v5062_v46, %v1480_v61 }
 0x174   :  { %v2662_v28 = vmax.f32 %v6668_v50, %v2470_v41  ;;  %v2726_v12 = vmax.f32 %v6670_v24, %v2598_v23  ;;  %2852 = vst.msk [vmem:[%s6434_s3 + $0x20] sm:$0xff] %vm2847_vm4, %v2787_v44  ;;  %v2121_v32 = vadd.f32 %v5062_v46, %v2120_v17  ;;  %v5738_v51 = vadd.f32 %v5304_v37, %v5062_v46  ;;  %v3555_v50 = vpop.f32.mrb[74].mxu0  ;;  %v6678_v17 = vld [vmem:[#allocation42_spill] sm:$0xff] }
 0x175   :  { %v2661_v39 = vmax.f32 %v6672_v13, %v2469_v30  ;;  %v2725_v35 = vmax.f32 %v6674_v60, %v2597_v42  ;;  %v2472_v41 = vmax.f32 %v1486_v45, 0.0  ;;  %v2600_v23 = vmax.f32 %v2126_v20, 0.0  ;;  %v3747_v42 = vpop.f32.mrb[74].mxu1  ;;  %v1490_v20 = vpop.f32.mrb[75].mxu0 }
 0x176   :  { %v2790_v10 = vmax.f32 %v2662_v28, %v2726_v12  ;;  %v5742_v44 = vadd.f32 %v5306_v53, %v5062_v46  ;;  %v2471_v30 = vmax.f32 %v1481_v31, 0.0  ;;  %v2599_v43 = vmax.f32 %v2121_v32, 0.0  ;;  %v6676_v28 = vld [vmem:[#allocation41_spill] sm:$0xff]  ;;  %v2130_v61 = vpop.f32.mrb[75].mxu1 }
 0x177   :  { %v2789_v34 = vmax.f32 %v2661_v39, %v2725_v35  ;;  %v6675_v37 = vmax.f32 %v5162_v59, 0.0  ;;  %v6677_v24 = vmax.f32 %v6676_v28, 0.0  ;;  %v1496_v45 = vadd.f32 %v3555_v50, %v5062_v46  ;;  %v6680_v39 = vld [vmem:[#allocation43_spill] sm:$0xff] }
 0x178   :  { %2855 = vst.msk [vmem:[%s6434_s3 + $0x38] sm:$0xff] %vm2847_vm4, %v2790_v10  ;;  %v2136_v53 = vadd.f32 %v3747_v42, %v5062_v46  ;;  %v6679_v0 = vmax.f32 %v6678_v17, 0.0  ;;  %v6681_v59 = vmax.f32 %v6680_v39, 0.0  ;;  %v1491_v60 = vadd.f32 %v5062_v46, %v1490_v20  ;;  %v3558_v42 = vpop.f32.mrb[76].mxu0 }
 0x179   :  { %v2664_v1 = vmax.f32 %v6675_v37, %v2472_v41  ;;  %v2728_v12 = vmax.f32 %v6677_v24, %v2600_v23  ;;  %2854 = vst.msk [vmem:[%s6434_s3 + $0x30] sm:$0xff] %vm2847_vm4, %v2789_v34  ;;  %v2131_v35 = vadd.f32 %v5062_v46, %v2130_v61  ;;  %v5766_v31 = vadd.f32 %v5062_v46, %v5318_v29 }
 0x17a   :  { %v2663_v13 = vmax.f32 %v6679_v0, %v2471_v30  ;;  %v2727_v18 = vmax.f32 %v6681_v59, %v2599_v43  ;;  %v2474_v10 = vmax.f32 %v1496_v45, 0.0  ;;  %v2602_v41 = vmax.f32 %v2136_v53, 0.0  ;;  %v3750_v43 = vpop.f32.mrb[76].mxu1 }
 0x17b   :  { %v2792_v32 = vmax.f32 %v2664_v1, %v2728_v12  ;;  %v5770_v23 = vadd.f32 %v5062_v46, %v5320_v63  ;;  %v2473_v30 = vmax.f32 %v1491_v60, 0.0  ;;  %v2601_v50 = vmax.f32 %v2131_v35, 0.0  ;;  %v1500_v12 = vpop.f32.mrb[77].mxu0  ;;  %v2140_v45 = vpop.f32.mrb[77].mxu1 }
 0x17c   :  { %v2791_v34 = vmax.f32 %v2663_v13, %v2727_v18  ;;  %v6682_v29 = vmax.f32 %v5186_v48, 0.0  ;;  %v6683_v1 = vmax.f32 %v5190_v57, 0.0  ;;  %v1506_v24 = vadd.f32 %v3558_v42, %v5062_v46 }
 0x17d   :  { %2857 = vst.msk [vmem:[%s6434_s3 + $0x48] sm:$0xff] %vm2847_vm4, %v2792_v32  ;;  %v2146_v63 = vadd.f32 %v3750_v43, %v5062_v46  ;;  %v6684_v53 = vmax.f32 %v5194_v2, 0.0  ;;  %v6685_v48 = vmax.f32 %v5198_v3, 0.0  ;;  %v1501_v57 = vadd.f32 %v5062_v46, %v1500_v12  ;;  %v3753_v2 = vpop.f32.mrb[78].mxu1 }
 0x17e   :  { %v2666_v37 = vmax.f32 %v6682_v29, %v2474_v10  ;;  %v2730_v28 = vmax.f32 %v6683_v1, %v2602_v41  ;;  %2856 = vst.msk [vmem:[%s6434_s3 + $0x40] sm:$0xff] %vm2847_vm4, %v2791_v34  ;;  %v2141_v17 = vadd.f32 %v5062_v46, %v2140_v45  ;;  %v2450_v0 = vmax.f32 %v5738_v51, 0.0  ;;  %v3561_v10 = vpop.f32.mrb[78].mxu0  ;;  %v6687_v34 = vld [vmem:[#allocation44_spill] sm:$0xff] }
 0x17f   :  { %v2665_v20 = vmax.f32 %v6684_v53, %v2473_v30  ;;  %v2729_v61 = vmax.f32 %v6685_v48, %v2601_v50  ;;  %v2476_v39 = vmax.f32 %v1506_v24, 0.0  ;;  %v2604_v59 = vmax.f32 %v2146_v63, 0.0  ;;  %v1510_v29 = vpop.f32.mrb[79].mxu0  ;;  %v6690_v24 = vld [vmem:[#allocation45_spill] sm:$0xff] }
 0x180   :  { %v2794_v13 = vmax.f32 %v2666_v37, %v2730_v28  ;;  %v2578_v18 = vmax.f32 %v5742_v44, 0.0  ;;  %v2475_v35 = vmax.f32 %v1501_v57, 0.0  ;;  %v2603_v32 = vmax.f32 %v2141_v17, 0.0  ;;  %v2150_v37 = vpop.f32.mrb[79].mxu1 }
 0x181   :  { %v2793_v60 = vmax.f32 %v2665_v20, %v2729_v61  ;;  %v6686_v3 = vmax.f32 %v5202_v58, 0.0  ;;  %v6688_v30 = vmax.f32 %v6687_v34, 0.0  ;;  %v1516_v42 = vadd.f32 %v3561_v10, %v5062_v46 }
 0x182   :  { %2859 = vst.msk [vmem:[%s6434_s3 + $0x58] sm:$0xff] %vm2847_vm4, %v2794_v13  ;;  %v2156_v43 = vadd.f32 %v3753_v2, %v5062_v46  ;;  %v6689_v1 = vmax.f32 %v5216_v11, 0.0  ;;  %v6691_v58 = vmax.f32 %v6690_v24, 0.0  ;;  %v1511_v12 = vadd.f32 %v5062_v46, %v1510_v29  ;;  %v3756_v11 = vpop.f32.mrb[80].mxu1  ;;  %v6697_v29 = vld [vmem:[#allocation48_spill] sm:$0xff] }
 0x183   :  { %v2668_v41 = vmax.f32 %v6686_v3, %v2476_v39  ;;  %v2732_v50 = vmax.f32 %v6688_v30, %v2604_v59  ;;  %2858 = vst.msk [vmem:[%s6434_s3 + $0x50] sm:$0xff] %vm2847_vm4, %v2793_v60  ;;  %v2151_v45 = vadd.f32 %v5062_v46, %v2150_v37  ;;  %v2449_v53 = vmax.f32 %v5766_v31, 0.0  ;;  %v3564_v59 = vpop.f32.mrb[80].mxu0  ;;  %v2160_v30 = vpop.f32.mrb[81].mxu1 }
 0x184   :  { %v2667_v28 = vmax.f32 %v6689_v1, %v2475_v35  ;;  %v2731_v63 = vmax.f32 %v6691_v58, %v2603_v32  ;;  %v2478_v48 = vmax.f32 %v1516_v42, 0.0  ;;  %v2606_v61 = vmax.f32 %v2156_v43, 0.0  ;;  %v6693_v32 = vld [vmem:[#allocation46_spill] sm:$0xff]  ;;  %v1520_v34 = vpop.f32.mrb[81].mxu0 }
 0x185   :  { %v2796_v20 = vmax.f32 %v2668_v41, %v2732_v50  ;;  %v2577_v57 = vmax.f32 %v5770_v23, 0.0  ;;  %v2477_v13 = vmax.f32 %v1511_v12, 0.0  ;;  %v2605_v39 = vmax.f32 %v2151_v45, 0.0  ;;  %v6695_v50 = vld [vmem:[#allocation47_spill] sm:$0xff] }
 0x186   :  { %v2795_v17 = vmax.f32 %v2667_v28, %v2731_v63  ;;  %v6692_v60 = vmax.f32 %v5230_v40, 0.0  ;;  %v6694_v10 = vmax.f32 %v6693_v32, 0.0  ;;  %v1526_v3 = vadd.f32 %v3564_v59, %v5062_v46  ;;  %v6700_v59 = vld [vmem:[#allocation49_spill] sm:$0xff] }
 0x187   :  { %2861 = vst.msk [vmem:[%s6434_s3 + $0x68] sm:$0xff] %vm2847_vm4, %v2796_v20  ;;  %v2166_v41 = vadd.f32 %v3756_v11, %v5062_v46  ;;  %v6696_v42 = vmax.f32 %v6695_v50, 0.0  ;;  %v6698_v40 = vmax.f32 %v6697_v29, 0.0  ;;  %v1521_v1 = vadd.f32 %v5062_v46, %v1520_v34  ;;  %v6704_v34 = vld [vmem:[#allocation51_spill] sm:$0xff] }
 0x188   :  { %v2670_v35 = vmax.f32 %v6692_v60, %v2478_v48  ;;  %v2734_v2 = vmax.f32 %v6694_v10, %v2606_v61  ;;  %2860 = vst.msk [vmem:[%s6434_s3 + $0x60] sm:$0xff] %vm2847_vm4, %v2795_v17  ;;  %v2161_v28 = vadd.f32 %v5062_v46, %v2160_v30  ;;  %v5838_v24 = vadd.f32 %v5346_v19, %v5062_v46  ;;  %v3567_v17 = vpop.f32.mrb[82].mxu0 }
 0x189   :  { %v2669_v43 = vmax.f32 %v6696_v42, %v2477_v13  ;;  %v2733_v37 = vmax.f32 %v6698_v40, %v2605_v39  ;;  %v2480_v63 = vmax.f32 %v1526_v3, 0.0  ;;  %v2608_v12 = vmax.f32 %v2166_v41, 0.0  ;;  %v3759_v13 = vpop.f32.mrb[82].mxu1  ;;  %v1530_v32 = vpop.f32.mrb[83].mxu0 }
 0x18a   :  { %v2798_v58 = vmax.f32 %v2670_v35, %v2734_v2  ;;  %v5842_v45 = vadd.f32 %v5348_v54, %v5062_v46  ;;  %v2479_v48 = vmax.f32 %v1521_v1, 0.0  ;;  %v2607_v61 = vmax.f32 %v2161_v28, 0.0  ;;  %v2170_v10 = vpop.f32.mrb[83].mxu1  ;;  %v6702_v2 = vld [vmem:[#allocation50_spill] sm:$0xff] }
 0x18b   :  { %v2797_v20 = vmax.f32 %v2669_v43, %v2733_v37  ;;  %v6699_v19 = vmax.f32 %v5258_v27, 0.0  ;;  %v6701_v11 = vmax.f32 %v6700_v59, 0.0  ;;  %v1536_v35 = vadd.f32 %v3567_v17, %v5062_v46 }
 0x18c   :  { %2863 = vst.msk [vmem:[%s6434_s3 + $0x78] sm:$0xff] %vm2847_vm4, %v2798_v58  ;;  %v2176_v54 = vadd.f32 %v3759_v13, %v5062_v46  ;;  %v6703_v3 = vmax.f32 %v6702_v2, 0.0  ;;  %v6705_v27 = vmax.f32 %v6704_v34, 0.0  ;;  %v1531_v50 = vadd.f32 %v5062_v46, %v1530_v32 }
 0x18d   :  { %v2672_v39 = vmax.f32 %v6699_v19, %v2480_v63  ;;  %v2736_v60 = vmax.f32 %v6701_v11, %v2608_v12  ;;  %2862 = vst.msk [vmem:[%s6434_s3 + $0x70] sm:$0xff] %vm2847_vm4, %v2797_v20  ;;  %v2171_v42 = vadd.f32 %v5062_v46, %v2170_v10  ;;  %v5866_v43 = vadd.f32 %v5062_v46, %v5360_v6  ;;  %v3570_v12 = vpop.f32.mrb[84].mxu0  ;;  %v3762_v20 = vpop.f32.mrb[84].mxu1  ;;  %v6709_v11 = vld [vmem:[#allocation53_spill] sm:$0xff] }
 0x18e   :  { %v2671_v41 = vmax.f32 %v6703_v3, %v2479_v48  ;;  %v2735_v30 = vmax.f32 %v6705_v27, %v2607_v61  ;;  %v2482_v40 = vmax.f32 %v1536_v35, 0.0  ;;  %v2610_v37 = vmax.f32 %v2176_v54, 0.0  ;;  %v6707_v61 = vld [vmem:[#allocation52_spill] sm:$0xff]  ;;  %v2180_v59 = vpop.f32.mrb[85].mxu1  ;;  %v6711_v54 = vld [vmem:[#allocation54_spill] sm:$0xff] }
 0x18f   :  { %v2800_v29 = vmax.f32 %v2672_v39, %v2736_v60  ;;  %v5870_v1 = vadd.f32 %v5062_v46, %v5362_v36  ;;  %v2481_v58 = vmax.f32 %v1531_v50, 0.0  ;;  %v2609_v63 = vmax.f32 %v2171_v42, 0.0  ;;  %v1540_v39 = vpop.f32.mrb[85].mxu0 }
 0x190   :  { %v2799_v28 = vmax.f32 %v2671_v41, %v2735_v30  ;;  %v6706_v6 = vmax.f32 %v5282_v16, 0.0  ;;  %v6708_v17 = vmax.f32 %v6707_v61, 0.0  ;;  %v1546_v19 = vadd.f32 %v3570_v12, %v5062_v46  ;;  %v6715_v12 = vld [vmem:[#allocation56_spill] sm:$0xff] }
 0x191   :  { %2865 = vst.msk [vmem:[%s6434_s3 + $0x88] sm:$0xff] %vm2847_vm4, %v2800_v29  ;;  %v2186_v36 = vadd.f32 %v3762_v20, %v5062_v46  ;;  %v6710_v60 = vmax.f32 %v6709_v11, 0.0  ;;  %v6712_v16 = vmax.f32 %v6711_v54, 0.0  ;;  %v1541_v10 = vadd.f32 %v5062_v46, %v1540_v39 }
 0x192   :  { %v2674_v48 = vmax.f32 %v6706_v6, %v2482_v40  ;;  %v2738_v13 = vmax.f32 %v6708_v17, %v2610_v37  ;;  %2864 = vst.msk [vmem:[%s6434_s3 + $0x80] sm:$0xff] %vm2847_vm4, %v2799_v28  ;;  %v2181_v2 = vadd.f32 %v5062_v46, %v2180_v59  ;;  %v2452_v3 = vmax.f32 %v5838_v24, 0.0  ;;  %v3573_v40 = vpop.f32.mrb[86].mxu0  ;;  %v3765_v37 = vpop.f32.mrb[86].mxu1  ;;  %v6713_v28 = vld [vmem:[#allocation55_spill] sm:$0xff]  ;;  %v6719_v59 = vld [vmem:[#allocation58_spill] sm:$0xff] }
 0x193   :  { %v2673_v35 = vmax.f32 %v6710_v60, %v2481_v58  ;;  %v2737_v32 = vmax.f32 %v6712_v16, %v2609_v63  ;;  %v2484_v34 = vmax.f32 %v1546_v19, 0.0  ;;  %v2612_v27 = vmax.f32 %v2186_v36, 0.0  ;;  %v1550_v17 = vpop.f32.mrb[87].mxu0  ;;  %v6717_v19 = vld [vmem:[#allocation57_spill] sm:$0xff] }
 0x194   :  { %v2802_v41 = vmax.f32 %v2674_v48, %v2738_v13  ;;  %v2580_v30 = vmax.f32 %v5842_v45, 0.0  ;;  %v2483_v42 = vmax.f32 %v1541_v10, 0.0  ;;  %v2611_v29 = vmax.f32 %v2181_v2, 0.0  ;;  %v2190_v13 = vpop.f32.mrb[87].mxu1 }
 0x195   :  { %v2801_v50 = vmax.f32 %v2673_v35, %v2737_v32  ;;  %v6714_v58 = vmax.f32 %v6713_v28, 0.0  ;;  %v6716_v20 = vmax.f32 %v6715_v12, 0.0  ;;  %v1556_v48 = vadd.f32 %v3573_v40, %v5062_v46  ;;  %v3576_v40 = vpop.f32.mrb[88].mxu0 }
 0x196   :  { %2867 = vst.msk [vmem:[%s6434_s3 + $0x98] sm:$0xff] %vm2847_vm4, %v2802_v41  ;;  %v2196_v61 = vadd.f32 %v3765_v37, %v5062_v46  ;;  %v6718_v36 = vmax.f32 %v6717_v19, 0.0  ;;  %v6720_v11 = vmax.f32 %v6719_v59, 0.0  ;;  %v1551_v35 = vadd.f32 %v5062_v46, %v1550_v17  ;;  %v3768_v37 = vpop.f32.mrb[88].mxu1  ;;  %v6725_v17 = vld [vmem:[#allocation61_spill] sm:$0xff] }
 0x197   :  { %v2676_v63 = vmax.f32 %v6714_v58, %v2484_v34  ;;  %v2740_v6 = vmax.f32 %v6716_v20, %v2612_v27  ;;  %2866 = vst.msk [vmem:[%s6434_s3 + $0x90] sm:$0xff] %vm2847_vm4, %v2801_v50  ;;  %v2191_v54 = vadd.f32 %v5062_v46, %v2190_v13  ;;  %v2451_v16 = vmax.f32 %v5866_v43, 0.0  ;;  %v6723_v58 = vld [vmem:[#allocation60_spill] sm:$0xff] }
 0x198   :  { %v2675_v39 = vmax.f32 %v6718_v36, %v2483_v42  ;;  %v2739_v60 = vmax.f32 %v6720_v11, %v2611_v29  ;;  %v2486_v10 = vmax.f32 %v1556_v48, 0.0  ;;  %v2614_v2 = vmax.f32 %v2196_v61, 0.0  ;;  %v6721_v42 = vld [vmem:[#allocation59_spill] sm:$0xff]  ;;  %v1560_v48 = vpop.f32.mrb[89].mxu0  ;;  %v2200_v61 = vpop.f32.mrb[89].mxu1  ;;  %v6727_v36 = vld [vmem:[#allocation62_spill] sm:$0xff] }
 0x199   :  { %v2804_v32 = vmax.f32 %v2676_v63, %v2740_v6  ;;  %v2485_v27 = vmax.f32 %v1551_v35, 0.0  ;;  %v2613_v50 = vmax.f32 %v2191_v54, 0.0  ;;  %v6722_v29 = vmax.f32 %v6721_v42, 0.0  ;;  %v6729_v35 = vld [vmem:[#allocation6_spill] sm:$0xff] }
 0x19a   :  { %v2803_v34 = vmax.f32 %v2675_v39, %v2739_v60  ;;  %v6724_v12 = vmax.f32 %v6723_v58, 0.0  ;;  %v1566_v20 = vadd.f32 %v3576_v40, %v5062_v46  ;;  %v2206_v6 = vadd.f32 %v3768_v37, %v5062_v46  ;;  %v3771_v58 = vpop.f32.mrb[90].mxu1 }
 0x19b   :  { %2869 = vst.msk [vmem:[%s6434_s3 + $0xa8] sm:$0xff] %vm2847_vm4, %v2804_v32  ;;  %v2678_v28 = vmax.f32 %v6722_v29, %v2486_v10  ;;  %v6726_v13 = vmax.f32 %v6725_v17, 0.0  ;;  %v6728_v39 = vmax.f32 %v6727_v36, 0.0  ;;  %v1561_v11 = vadd.f32 %v5062_v46, %v1560_v48  ;;  %v3579_v29 = vpop.f32.mrb[90].mxu0 }
 0x19c   :  { %v2742_v63 = vmax.f32 %v6724_v12, %v2614_v2  ;;  %2868 = vst.msk [vmem:[%s6434_s3 + $0xa0] sm:$0xff] %vm2847_vm4, %v2803_v34  ;;  %v2201_v60 = vadd.f32 %v5062_v46, %v2200_v61  ;;  %v5938_v54 = vadd.f32 %v6729_v35, %v5062_v46  ;;  %v2488_v10 = vmax.f32 %v1566_v20, 0.0  ;;  %v5943_v34 = vld [vmem:[%s6433_s2] ss:$0 sm:$0xff]  ;;  %v6731_v46 = vld [vmem:[#allocation63_spill] sm:$0xff]  ;;  %v1570_v17 = vpop.f32.mrb[91].mxu0 }
 0x19d   :  { %v2677_v19 = vmax.f32 %v6726_v13, %v2485_v27  ;;  %v2741_v59 = vmax.f32 %v6728_v39, %v2613_v50  ;;  %v2616_v2 = vmax.f32 %v2206_v6, 0.0  ;;  %v6730_v27 = vld [vmem:[#allocation67_spill] sm:$0xff]  ;;  %v2487_v37 = vmax.f32 %v1561_v11, 0.0  ;;  %v2210_v13 = vpop.f32.mrb[91].mxu1 }
 0x19e   :  { %v2806_v32 = vmax.f32 %v2678_v28, %v2742_v63  ;;  %v5947_v40 = vadd.f32 %v5943_v34, %v6730_v27  ;;  %v2615_v42 = vmax.f32 %v2201_v60, 0.0  ;;  %v6732_v28 = vmax.f32 %v6731_v46, 0.0  ;;  %v6733_v63 = vld [vmem:[#allocation64_spill] sm:$0xff]  ;;  %v6740_v46 = vld [vmem:[#allocation69_spill] sm:$0xff] }
 0x19f   :  { %v2805_v50 = vmax.f32 %v2677_v19, %v2741_v59  ;;  %v6734_v20 = vmax.f32 %v6733_v63, 0.0  ;;  %v1576_v48 = vadd.f32 %v5943_v34, %v3579_v29  ;;  %v2216_v61 = vadd.f32 %v5943_v34, %v3771_v58  ;;  %v6735_v19 = vld [vmem:[#allocation65_spill] sm:$0xff]  ;;  %v6737_v59 = vld [vmem:[#allocation66_spill] sm:$0xff] }
 0x1a0   :  { %2871 = vst.msk [vmem:[%s6434_s3 + $0xb8] sm:$0xff] %vm2847_vm4, %v2806_v32  ;;  %v2680_v12 = vmax.f32 %v6732_v28, %v2488_v10  ;;  %v6736_v36 = vmax.f32 %v6735_v19, 0.0  ;;  %v6738_v11 = vmax.f32 %v6737_v59, 0.0  ;;  %v1571_v35 = vadd.f32 %v5943_v34, %v1570_v17  ;;  %v6739_v10 = vld [vmem:[#allocation68_spill] sm:$0xff]  ;;  %v6744_v59 = vld [vmem:[#allocation3_spill] sm:$0xff] }
 0x1a1   :  { %v2744_v6 = vmax.f32 %v6734_v20, %v2616_v2  ;;  %2870 = vst.msk [vmem:[%s6434_s3 + $0xb0] sm:$0xff] %vm2847_vm4, %v2805_v50  ;;  %v2211_v32 = vadd.f32 %v5943_v34, %v2210_v13  ;;  %v5971_v2 = vadd.f32 %v5943_v34, %v6739_v10  ;;  %v2490_v29 = vmax.f32 %v1576_v48, 0.0  ;;  %v3582_v20 = vpop.f32.mrb[92].mxu0 }
 0x1a2   :  { %v2679_v39 = vmax.f32 %v6736_v36, %v2487_v37  ;;  %v2743_v60 = vmax.f32 %v6738_v11, %v2615_v42  ;;  %v2618_v58 = vmax.f32 %v2216_v61, 0.0  ;;  %v5975_v50 = vadd.f32 %v5943_v34, %v6740_v46  ;;  %v3774_v42 = vpop.f32.mrb[92].mxu1  ;;  %v1580_v36 = vpop.f32.mrb[93].mxu0 }
 0x1a3   :  { %v2808_v27 = vmax.f32 %v2680_v12, %v2744_v6  ;;  %v2489_v37 = vmax.f32 %v1571_v35, 0.0  ;;  %v2617_v63 = vmax.f32 %v2211_v32, 0.0  ;;  %v6741_v17 = vmax.f32 %v5378_v62, 0.0  ;;  %v6742_v12 = vld [vmem:[#allocation2_spill] sm:$0xff] }
 0x1a4   :  { %v2807_v28 = vmax.f32 %v2679_v39, %v2743_v60  ;;  %v6743_v6 = vmax.f32 %v6742_v12, 0.0  ;;  %v1586_v61 = vadd.f32 %v5943_v34, %v3582_v20  ;;  %v2226_v19 = vadd.f32 %v5943_v34, %v3774_v42  ;;  %v2220_v39 = vpop.f32.mrb[93].mxu1  ;;  %v3585_v12 = vpop.f32.mrb[94].mxu0 }
 0x1a5   :  { %2873 = vst.msk [vmem:[%s6434_s3 + $0xc8] sm:$0xff] %vm2847_vm4, %v2808_v27  ;;  %v2682_v13 = vmax.f32 %v6741_v17, %v2490_v29  ;;  %v6745_v11 = vmax.f32 %v6744_v59, 0.0  ;;  %v6746_v62 = vmax.f32 %v5390_v21, 0.0  ;;  %v1581_v32 = vadd.f32 %v5943_v34, %v1580_v36  ;;  %v6747_v21 = vld [vmem:[#allocation4_spill] sm:$0xff]  ;;  %v6749_v36 = vld [vmem:[#allocation5_spill] sm:$0xff] }
 0x1a6   :  { %v2746_v48 = vmax.f32 %v6743_v6, %v2618_v58  ;;  %2872 = vst.msk [vmem:[%s6434_s3 + $0xc0] sm:$0xff] %vm2847_vm4, %v2807_v28  ;;  %v2221_v10 = vadd.f32 %v5943_v34, %v2220_v39  ;;  %v2492_v58 = vmax.f32 %v1586_v61, 0.0  ;;  %v2620_v46 = vmax.f32 %v2226_v19, 0.0  ;;  %v3777_v6 = vpop.f32.mrb[94].mxu1  ;;  %v1590_v19 = vpop.f32.mrb[95].mxu0 }
 0x1a7   :  { %v2681_v60 = vmax.f32 %v6745_v11, %v2489_v37  ;;  %v2745_v35 = vmax.f32 %v6746_v62, %v2617_v63  ;;  %v2491_v17 = vmax.f32 %v1581_v32, 0.0  ;;  %v6748_v37 = vmax.f32 %v6747_v21, 0.0  ;;  %v2230_v59 = vpop.f32.mrb[95].mxu1  ;;  %v6751_v11 = vld [vmem:[#allocation7_spill] sm:$0xff]  ;;  %v3588_v20 = vpop.f32.mrb[96].mxu0 }
 0x1a8   :  { %v2810_v29 = vmax.f32 %v2682_v13, %v2746_v48  ;;  %v2619_v28 = vmax.f32 %v2221_v10, 0.0  ;;  %v6750_v39 = vmax.f32 %v6749_v36, 0.0  ;;  %v1596_v48 = vadd.f32 %v5943_v34, %v3585_v12 }
 0x1a9   :  { %v2809_v42 = vmax.f32 %v2681_v60, %v2745_v35  ;;  %v2684_v63 = vmax.f32 %v6748_v37, %v2492_v58  ;;  %v2236_v61 = vadd.f32 %v5943_v34, %v3777_v6  ;;  %v6752_v60 = vmax.f32 %v6751_v11, 0.0  ;;  %v6753_v35 = vld [vmem:[#allocation8_spill] sm:$0xff]  ;;  %v3780_v11 = vpop.f32.mrb[96].mxu1 }
 0x1aa   :  { %2875 = vst.msk [vmem:[%s6434_s3 + $0xd8] sm:$0xff] %vm2847_vm4, %v2810_v29  ;;  %v2748_v13 = vmax.f32 %v6750_v39, %v2620_v46  ;;  %v6754_v32 = vmax.f32 %v6753_v35, 0.0  ;;  %v1591_v29 = vadd.f32 %v5943_v34, %v1590_v19  ;;  %v2231_v58 = vadd.f32 %v5943_v34, %v2230_v59  ;;  %v6757_v59 = vld [vmem:[#allocation10_spill] sm:$0xff]  ;;  %v6759_v35 = vld [vmem:[#allocation11_spill] sm:$0xff]  ;;  %v6774_v46 = vld [vmem:[#allocation73_spill] sm:$0xff] }
 0x1ab   :  { %2874 = vst.msk [vmem:[%s6434_s3 + $0xd0] sm:$0xff] %vm2847_vm4, %v2809_v42  ;;  %v2683_v62 = vmax.f32 %v6752_v60, %v2491_v17  ;;  %v2494_v6 = vmax.f32 %v1596_v48, 0.0  ;;  %v2622_v21 = vmax.f32 %v2236_v61, 0.0  ;;  %v6755_v17 = vld [vmem:[#allocation9_spill] sm:$0xff]  ;;  %v6758_v60 = vmax.f32 %v6757_v59, 0.0  ;;  %v1600_v61 = vpop.f32.mrb[97].mxu0 }
 0x1ac   :  { %v2747_v10 = vmax.f32 %v6754_v32, %v2619_v28  ;;  %v2812_v12 = vmax.f32 %v2684_v63, %v2748_v13  ;;  %v2493_v39 = vmax.f32 %v1591_v29, 0.0  ;;  %v2621_v42 = vmax.f32 %v2231_v58, 0.0  ;;  %v6761_v29 = vld [vmem:[#allocation12_spill] sm:$0xff] }
 0x1ad   :  { %v6756_v28 = vmax.f32 %v6755_v17, 0.0  ;;  %v2750_v63 = vmax.f32 %v6758_v60, %v2622_v21  ;;  %v1606_v13 = vadd.f32 %v5943_v34, %v3588_v20  ;;  %v2246_v48 = vadd.f32 %v5943_v34, %v3780_v11  ;;  %v6763_v20 = vld [vmem:[#allocation70_spill] sm:$0xff]  ;;  %v6764_v60 = vld [vmem:[#allocation71_spill] sm:$0xff] }
 0x1ae   :  { %v2811_v36 = vmax.f32 %v2683_v62, %v2747_v10  ;;  %2877 = vst.msk [vmem:[%s6434_s3 + $0xe8] sm:$0xff] %vm2847_vm4, %v2812_v12  ;;  %v2240_v62 = vpop.f32.mrb[97].mxu1  ;;  %v6760_v32 = vmax.f32 %v6759_v35, 0.0  ;;  %v6762_v58 = vmax.f32 %v6761_v29, 0.0  ;;  %v6043_v11 = vadd.f32 %v5943_v34, %v6763_v20  ;;  %v3591_v29 = vpop.f32.mrb[98].mxu0 }
 0x1af   :  { %v2686_v19 = vmax.f32 %v6756_v28, %v2494_v6  ;;  %v1601_v6 = vadd.f32 %v5943_v34, %v1600_v61  ;;  %v2241_v21 = vadd.f32 %v5943_v34, %v2240_v62  ;;  %v2496_v28 = vmax.f32 %v1606_v13, 0.0  ;;  %v6765_v61 = vld [vmem:[#allocation13_spill] sm:$0xff] }
 0x1b0   :  { %2876 = vst.msk [vmem:[%s6434_s3 + $0xe0] sm:$0xff] %vm2847_vm4, %v2811_v36  ;;  %v2685_v10 = vmax.f32 %v6760_v32, %v2493_v39  ;;  %v2749_v12 = vmax.f32 %v6762_v58, %v2621_v42  ;;  %v2624_v59 = vmax.f32 %v2246_v48, 0.0  ;;  %v6047_v36 = vadd.f32 %v5943_v34, %v6764_v60  ;;  %v3783_v42 = vpop.f32.mrb[98].mxu1  ;;  %v6771_v60 = vld [vmem:[#allocation16_spill] sm:$0xff] }
 0x1b1   :  { %v2814_v17 = vmax.f32 %v2686_v19, %v2750_v63  ;;  %v2495_v39 = vmax.f32 %v1601_v6, 0.0  ;;  %v2623_v32 = vmax.f32 %v2241_v21, 0.0  ;;  %v6766_v62 = vmax.f32 %v6765_v61, 0.0  ;;  %v6767_v19 = vld [vmem:[#allocation14_spill] sm:$0xff]  ;;  %v6769_v6 = vld [vmem:[#allocation15_spill] sm:$0xff] }
 0x1b2   :  { %v2813_v35 = vmax.f32 %v2685_v10, %v2749_v12  ;;  %v6768_v63 = vmax.f32 %v6767_v19, 0.0  ;;  %v1616_v48 = vadd.f32 %v5943_v34, %v3591_v29  ;;  %v2256_v20 = vadd.f32 %v5943_v34, %v3783_v42  ;;  %v1610_v10 = vpop.f32.mrb[99].mxu0  ;;  %v2250_v12 = vpop.f32.mrb[99].mxu1  ;;  %v6773_v29 = vld [vmem:[#allocation72_spill] sm:$0xff] }
 0x1b3   :  { %2879 = vst.msk [vmem:[%s6434_s3 + $0xf8] sm:$0xff] %vm2847_vm4, %v2814_v17  ;;  %v2688_v58 = vmax.f32 %v6766_v62, %v2496_v28  ;;  %v6770_v21 = vmax.f32 %v6769_v6, 0.0  ;;  %v6772_v61 = vmax.f32 %v6771_v60, 0.0  ;;  %v1611_v62 = vadd.f32 %v5943_v34, %v1610_v10  ;;  %v3594_v60 = vpop.f32.mrb[100].mxu0 }
 0x1b4   :  { %v2752_v13 = vmax.f32 %v6768_v63, %v2624_v59  ;;  %2878 = vst.msk [vmem:[%s6434_s3 + $0xf0] sm:$0xff] %vm2847_vm4, %v2813_v35  ;;  %v2251_v59 = vadd.f32 %v5943_v34, %v2250_v12  ;;  %v6071_v42 = vadd.f32 %v5943_v34, %v6773_v29  ;;  %v2498_v63 = vmax.f32 %v1616_v48, 0.0 }
 0x1b5   :  { %v2687_v17 = vmax.f32 %v6770_v21, %v2495_v39  ;;  %v2751_v28 = vmax.f32 %v6772_v61, %v2623_v32  ;;  %v2626_v37 = vmax.f32 %v2256_v20, 0.0  ;;  %v6075_v35 = vadd.f32 %v5943_v34, %v6774_v46  ;;  %v3786_v32 = vpop.f32.mrb[100].mxu1 }
 0x1b6   :  { %v2816_v19 = vmax.f32 %v2688_v58, %v2752_v13  ;;  %v2497_v39 = vmax.f32 %v1611_v62, 0.0  ;;  %v2625_v21 = vmax.f32 %v2251_v59, 0.0  ;;  %v6775_v10 = vmax.f32 %v5474_v4, 0.0  ;;  %v6776_v58 = vld [vmem:[#allocation17_spill] sm:$0xff]  ;;  %v2260_v61 = vpop.f32.mrb[101].mxu1 }
 0x1b7   :  { %v2815_v6 = vmax.f32 %v2687_v17, %v2751_v28  ;;  %v6777_v13 = vmax.f32 %v6776_v58, 0.0  ;;  %v1626_v20 = vadd.f32 %v5943_v34, %v3594_v60  ;;  %v2266_v46 = vadd.f32 %v5943_v34, %v3786_v32  ;;  %v1620_v17 = vpop.f32.mrb[101].mxu0  ;;  %v6778_v28 = vld [vmem:[#allocation74_spill] sm:$0xff] }
 0x1b8   :  { %2881 = vst.msk [vmem:[%s6434_s3 + $0x108] sm:$0xff] %vm2847_vm4, %v2816_v19  ;;  %v2690_v12 = vmax.f32 %v6775_v10, %v2498_v63  ;;  %v6779_v62 = vmax.f32 %v6778_v28, 0.0  ;;  %v6780_v4 = vmax.f32 %v5486_v25, 0.0  ;;  %v1621_v19 = vadd.f32 %v5943_v34, %v1620_v17  ;;  %v3597_v41 = vpop.f32.mrb[102].mxu0  ;;  %v3789_v28 = vpop.f32.mrb[102].mxu1 }
 0x1b9   :  { %v2754_v48 = vmax.f32 %v6777_v13, %v2626_v37  ;;  %2880 = vst.msk [vmem:[%s6434_s3 + $0x100] sm:$0xff] %vm2847_vm4, %v2815_v6  ;;  %v2261_v37 = vadd.f32 %v5943_v34, %v2260_v61  ;;  %v2456_v63 = vmax.f32 %v6043_v11, 0.0  ;;  %v2500_v32 = vmax.f32 %v1626_v20, 0.0  ;;  %v2270_v17 = vpop.f32.mrb[103].mxu1  ;;  %v6783_v61 = vld [vmem:[#allocation20_spill] sm:$0xff] }
 0x1ba   :  { %v2689_v59 = vmax.f32 %v6779_v62, %v2497_v39  ;;  %v2753_v29 = vmax.f32 %v6780_v4, %v2625_v21  ;;  %v2628_v10 = vmax.f32 %v2266_v46, 0.0  ;;  %v2584_v58 = vmax.f32 %v6047_v36, 0.0  ;;  %v1630_v46 = vpop.f32.mrb[103].mxu0  ;;  %v6785_v4 = vld [vmem:[#allocation21_spill] sm:$0xff] }
 0x1bb   :  { %v2818_v60 = vmax.f32 %v2690_v12, %v2754_v48  ;;  %v2499_v27 = vmax.f32 %v1621_v19, 0.0  ;;  %v2627_v6 = vmax.f32 %v2261_v37, 0.0  ;;  %v6781_v25 = vmax.f32 %v5490_v14, 0.0 }
 0x1bc   :  { %v2817_v13 = vmax.f32 %v2689_v59, %v2753_v29  ;;  %v6782_v21 = vmax.f32 %v5494_v55, 0.0  ;;  %v1636_v48 = vadd.f32 %v5943_v34, %v3597_v41  ;;  %v2276_v20 = vadd.f32 %v5943_v34, %v3789_v28 }
 0x1bd   :  { %2883 = vst.msk [vmem:[%s6434_s3 + $0x118] sm:$0xff] %vm2847_vm4, %v2818_v60  ;;  %v2692_v39 = vmax.f32 %v6781_v25, %v2500_v32  ;;  %v6784_v62 = vmax.f32 %v6783_v61, 0.0  ;;  %v6786_v14 = vmax.f32 %v6785_v4, 0.0  ;;  %v1631_v55 = vadd.f32 %v5943_v34, %v1630_v46  ;;  %v3792_v61 = vpop.f32.mrb[104].mxu1  ;;  %v6790_v4 = vld [vmem:[#allocation23_spill] sm:$0xff] }
 0x1be   :  { %v2756_v12 = vmax.f32 %v6782_v21, %v2628_v10  ;;  %2882 = vst.msk [vmem:[%s6434_s3 + $0x110] sm:$0xff] %vm2847_vm4, %v2817_v13  ;;  %v2271_v19 = vadd.f32 %v5943_v34, %v2270_v17  ;;  %v2455_v41 = vmax.f32 %v6071_v42, 0.0  ;;  %v2502_v60 = vmax.f32 %v1636_v48, 0.0  ;;  %v3600_v21 = vpop.f32.mrb[104].mxu0  ;;  %v2280_v17 = vpop.f32.mrb[105].mxu1 }
 0x1bf   :  { %v2691_v59 = vmax.f32 %v6784_v62, %v2499_v27  ;;  %v2755_v29 = vmax.f32 %v6786_v14, %v2627_v6  ;;  %v2630_v32 = vmax.f32 %v2276_v20, 0.0  ;;  %v2501_v25 = vmax.f32 %v1631_v55, 0.0  ;;  %v1640_v20 = vpop.f32.mrb[105].mxu0  ;;  %v6792_v55 = vld [vmem:[#allocation18_spill] sm:$0xff] }
 0x1c0   :  { %v2820_v37 = vmax.f32 %v2692_v39, %v2756_v12  ;;  %v2629_v13 = vmax.f32 %v2271_v19, 0.0  ;;  %v6787_v27 = vmax.f32 %v5518_v15, 0.0  ;;  %v6788_v46 = vmax.f32 %v5522_v26, 0.0 }
 0x1c1   :  { %v2819_v28 = vmax.f32 %v2691_v59, %v2755_v29  ;;  %v1646_v12 = vadd.f32 %v5943_v34, %v3600_v21  ;;  %v2286_v48 = vadd.f32 %v5943_v34, %v3792_v61  ;;  %v6789_v62 = vmax.f32 %v5528_v22, 0.0  ;;  %v6793_v21 = vld [vmem:[#allocation19_spill] sm:$0xff] }
 0x1c2   :  { %2885 = vst.msk [vmem:[%s6434_s3 + $0x128] sm:$0xff] %vm2847_vm4, %v2820_v37  ;;  %v2694_v6 = vmax.f32 %v6787_v27, %v2502_v60  ;;  %v2758_v39 = vmax.f32 %v6788_v46, %v2630_v32  ;;  %v6791_v15 = vmax.f32 %v6790_v4, 0.0  ;;  %v1641_v26 = vadd.f32 %v5943_v34, %v1640_v20  ;;  %v3603_v27 = vpop.f32.mrb[106].mxu0 }
 0x1c3   :  { %2884 = vst.msk [vmem:[%s6434_s3 + $0x120] sm:$0xff] %vm2847_vm4, %v2819_v28  ;;  %v2693_v59 = vmax.f32 %v6789_v62, %v2501_v25  ;;  %v2281_v29 = vadd.f32 %v5943_v34, %v2280_v17  ;;  %v6143_v19 = vadd.f32 %v5943_v34, %v6792_v55  ;;  %v2504_v60 = vmax.f32 %v1646_v12, 0.0  ;;  %v1650_v17 = vpop.f32.mrb[107].mxu0  ;;  %v6800_v55 = vld [vmem:[#allocation22_spill] sm:$0xff] }
 0x1c4   :  { %v2757_v14 = vmax.f32 %v6791_v15, %v2629_v13  ;;  %v2822_v37 = vmax.f32 %v2694_v6, %v2758_v39  ;;  %v2632_v32 = vmax.f32 %v2286_v48, 0.0  ;;  %v6147_v28 = vadd.f32 %v5943_v34, %v6793_v21  ;;  %v3795_v13 = vpop.f32.mrb[106].mxu1 }
 0x1c5   :  { %v2503_v25 = vmax.f32 %v1641_v26, 0.0  ;;  %v2631_v61 = vmax.f32 %v2281_v29, 0.0  ;;  %v6794_v46 = vmax.f32 %v5546_v7, 0.0  ;;  %v6795_v6 = vmax.f32 %v5550_v5, 0.0  ;;  %v2290_v62 = vpop.f32.mrb[107].mxu1 }
 0x1c6   :  { %v2821_v22 = vmax.f32 %v2693_v59, %v2757_v14  ;;  %2887 = vst.msk [vmem:[%s6434_s3 + $0x138] sm:$0xff] %vm2847_vm4, %v2822_v37  ;;  %v1656_v12 = vadd.f32 %v5943_v34, %v3603_v27  ;;  %v2296_v48 = vadd.f32 %v5943_v34, %v3795_v13  ;;  %v6796_v59 = vld [vmem:[#allocation28_spill] sm:$0xff]  ;;  %v6798_v14 = vld [vmem:[#allocation30_spill] sm:$0xff]  ;;  %v1651_v5 = vadd.f32 %v5943_v34, %v1650_v17  ;;  %v6801_v27 = vld [vmem:[#allocation75_spill] sm:$0xff] }
 0x1c7   :  { %v2696_v20 = vmax.f32 %v6794_v46, %v2504_v60  ;;  %v2760_v39 = vmax.f32 %v6795_v6, %v2632_v32  ;;  %v6797_v4 = vmax.f32 %v6796_v59, 0.0  ;;  %v6799_v7 = vmax.f32 %v6798_v14, 0.0  ;;  %v3606_v6 = vpop.f32.mrb[108].mxu0  ;;  %v6802_v17 = vld [vmem:[#allocation31_spill] sm:$0xff] }
 0x1c8   :  { %2886 = vst.msk [vmem:[%s6434_s3 + $0x130] sm:$0xff] %vm2847_vm4, %v2821_v22  ;;  %v2291_v29 = vadd.f32 %v5943_v34, %v2290_v62  ;;  %v6171_v37 = vadd.f32 %v5943_v34, %v6800_v55  ;;  %v2506_v32 = vmax.f32 %v1656_v12, 0.0  ;;  %v2634_v21 = vmax.f32 %v2296_v48, 0.0 }
 0x1c9   :  { %v2695_v15 = vmax.f32 %v6797_v4, %v2503_v25  ;;  %v2759_v26 = vmax.f32 %v6799_v7, %v2631_v61  ;;  %v2824_v60 = vmax.f32 %v2696_v20, %v2760_v39  ;;  %v6175_v22 = vadd.f32 %v5943_v34, %v6801_v27  ;;  %v3798_v61 = vpop.f32.mrb[108].mxu1  ;;  %v6804_v20 = vld [vmem:[#allocation35_spill] sm:$0xff]  ;;  %v6806_v7 = vld [vmem:[#allocation36_spill] sm:$0xff] }
 0x1ca   :  { %v2505_v25 = vmax.f32 %v1651_v5, 0.0  ;;  %v2633_v46 = vmax.f32 %v2291_v29, 0.0  ;;  %v6803_v62 = vmax.f32 %v6802_v17, 0.0  ;;  %v6805_v39 = vmax.f32 %v6804_v20, 0.0  ;;  %v2300_v14 = vpop.f32.mrb[109].mxu1  ;;  %v6808_v29 = vld [vmem:[#allocation76_spill] sm:$0xff] }
 0x1cb   :  { %v2823_v13 = vmax.f32 %v2695_v15, %v2759_v26  ;;  %2889 = vst.msk [vmem:[%s6434_s3 + $0x148] sm:$0xff] %vm2847_vm4, %v2824_v60  ;;  %v1666_v48 = vadd.f32 %v5943_v34, %v3606_v6  ;;  %v2306_v4 = vadd.f32 %v5943_v34, %v3798_v61  ;;  %v1660_v15 = vpop.f32.mrb[109].mxu0  ;;  %v6807_v26 = vmax.f32 %v6806_v7, 0.0  ;;  %v3801_v7 = vpop.f32.mrb[110].mxu1 }
 0x1cc   :  { %v2698_v59 = vmax.f32 %v6803_v62, %v2506_v32  ;;  %v2762_v12 = vmax.f32 %v6805_v39, %v2634_v21  ;;  %v6809_v55 = vmax.f32 %v6808_v29, 0.0  ;;  %v1661_v32 = vadd.f32 %v5943_v34, %v1660_v15  ;;  %v3609_v10 = vpop.f32.mrb[110].mxu0  ;;  %v6814_v29 = vld [vmem:[#allocation81_spill] sm:$0xff] }
 0x1cd   :  { %2888 = vst.msk [vmem:[%s6434_s3 + $0x140] sm:$0xff] %vm2847_vm4, %v2823_v13  ;;  %v2697_v5 = vmax.f32 %v6807_v26, %v2505_v25  ;;  %v2301_v21 = vadd.f32 %v5943_v34, %v2300_v14  ;;  %v2508_v61 = vmax.f32 %v1666_v48, 0.0  ;;  %v2636_v17 = vmax.f32 %v2306_v4, 0.0  ;;  %v6810_v25 = vld [vmem:[#allocation77_spill] sm:$0xff]  ;;  %v6812_v14 = vld [vmem:[#allocation78_spill] sm:$0xff]  ;;  %v1670_v4 = vpop.f32.mrb[111].mxu0 }
 0x1ce   :  { %v2761_v60 = vmax.f32 %v6809_v55, %v2633_v46  ;;  %v2826_v6 = vmax.f32 %v2698_v59, %v2762_v12  ;;  %v2507_v39 = vmax.f32 %v1661_v32, 0.0  ;;  %v6811_v46 = vmax.f32 %v6810_v25, 0.0  ;;  %v6816_v32 = vld [vmem:[#allocation82_spill] sm:$0xff]  ;;  %v3612_v27 = vpop.f32.mrb[112].mxu0 }
 0x1cf   :  { %v2635_v13 = vmax.f32 %v2301_v21, 0.0  ;;  %v6813_v26 = vmax.f32 %v6812_v14, 0.0  ;;  %v1676_v12 = vadd.f32 %v5943_v34, %v3609_v10  ;;  %v2316_v48 = vadd.f32 %v5943_v34, %v3801_v7 }
 0x1d0   :  { %v2825_v20 = vmax.f32 %v2697_v5, %v2761_v60  ;;  %2891 = vst.msk [vmem:[%s6434_s3 + $0x158] sm:$0xff] %vm2847_vm4, %v2826_v6  ;;  %v2700_v15 = vmax.f32 %v6811_v46, %v2508_v61  ;;  %v2310_v5 = vpop.f32.mrb[111].mxu1  ;;  %v6815_v55 = vmax.f32 %v6814_v29, 0.0  ;;  %v6817_v21 = vmax.f32 %v6816_v32, 0.0  ;;  %v6822_v32 = vld [vmem:[#allocation87_spill] sm:$0xff] }
 0x1d1   :  { %v2764_v59 = vmax.f32 %v6813_v26, %v2636_v17  ;;  %v1671_v61 = vadd.f32 %v5943_v34, %v1670_v4  ;;  %v2311_v17 = vadd.f32 %v5943_v34, %v2310_v5  ;;  %v2457_v10 = vmax.f32 %v6171_v37, 0.0  ;;  %v3804_v29 = vpop.f32.mrb[112].mxu1  ;;  %v6820_v5 = vld [vmem:[#allocation86_spill] sm:$0xff] }
 0x1d2   :  { %2890 = vst.msk [vmem:[%s6434_s3 + $0x150] sm:$0xff] %vm2847_vm4, %v2825_v20  ;;  %v2699_v60 = vmax.f32 %v6815_v55, %v2507_v39  ;;  %v2763_v6 = vmax.f32 %v6817_v21, %v2635_v13  ;;  %v2510_v25 = vmax.f32 %v1676_v12, 0.0  ;;  %v2638_v46 = vmax.f32 %v2316_v48, 0.0  ;;  %v6818_v39 = vld [vmem:[#allocation85_spill] sm:$0xff]  ;;  %v1680_v48 = vpop.f32.mrb[113].mxu0 }
 0x1d3   :  { %v2828_v7 = vmax.f32 %v2700_v15, %v2764_v59  ;;  %v2585_v14 = vmax.f32 %v6175_v22, 0.0  ;;  %v2509_v62 = vmax.f32 %v1671_v61, 0.0  ;;  %v2637_v20 = vmax.f32 %v2311_v17, 0.0  ;;  %v6824_v61 = vld [vmem:[#allocation88_spill] sm:$0xff] }
 0x1d4   :  { %v2827_v26 = vmax.f32 %v2699_v60, %v2763_v6  ;;  %v6819_v13 = vmax.f32 %v6818_v39, 0.0  ;;  %v6821_v55 = vmax.f32 %v6820_v5, 0.0  ;;  %v1686_v59 = vadd.f32 %v5943_v34, %v3612_v27  ;;  %v2320_v60 = vpop.f32.mrb[113].mxu1  ;;  %v6826_v27 = vld [vmem:[#allocation24_spill] sm:$0xff] }
 0x1d5   :  { %2893 = vst.msk [vmem:[%s6434_s3 + $0x168] sm:$0xff] %vm2847_vm4, %v2828_v7  ;;  %v2326_v12 = vadd.f32 %v5943_v34, %v3804_v29  ;;  %v6823_v21 = vmax.f32 %v6822_v32, 0.0  ;;  %v6825_v17 = vmax.f32 %v6824_v61, 0.0  ;;  %v6243_v29 = vadd.f32 %v5943_v34, %v6826_v27  ;;  %v3615_v61 = vpop.f32.mrb[114].mxu0  ;;  %v6829_v27 = vld [vmem:[#allocation27_spill] sm:$0xff] }
 0x1d6   :  { %v2702_v4 = vmax.f32 %v6819_v13, %v2510_v25  ;;  %v2766_v15 = vmax.f32 %v6821_v55, %v2638_v46  ;;  %2892 = vst.msk [vmem:[%s6434_s3 + $0x160] sm:$0xff] %vm2847_vm4, %v2827_v26  ;;  %v1681_v25 = vadd.f32 %v5943_v34, %v1680_v48  ;;  %v2321_v46 = vadd.f32 %v5943_v34, %v2320_v60  ;;  %v6827_v55 = vld [vmem:[#allocation25_spill] sm:$0xff] }
 0x1d7   :  { %v2701_v6 = vmax.f32 %v6823_v21, %v2509_v62  ;;  %v2765_v7 = vmax.f32 %v6825_v17, %v2637_v20  ;;  %v2512_v13 = vmax.f32 %v1686_v59, 0.0  ;;  %v2640_v5 = vmax.f32 %v2326_v12, 0.0  ;;  %v3807_v20 = vpop.f32.mrb[114].mxu1  ;;  %v1690_v12 = vpop.f32.mrb[115].mxu0 }
 0x1d8   :  { %v2830_v39 = vmax.f32 %v2702_v4, %v2766_v15  ;;  %v6247_v26 = vadd.f32 %v5943_v34, %v6827_v55  ;;  %v2511_v62 = vmax.f32 %v1681_v25, 0.0  ;;  %v2639_v21 = vmax.f32 %v2321_v46, 0.0  ;;  %v2330_v60 = vpop.f32.mrb[115].mxu1  ;;  %v3618_v56 = vpop.f32.mrb[116].mxu0 }
 0x1d9   :  { %v2829_v32 = vmax.f32 %v2701_v6, %v2765_v7  ;;  %v2704_v48 = vmax.f32 %v2448_v9, %v2512_v13  ;;  %v2768_v4 = vmax.f32 %v2576_v49, %v2640_v5  ;;  %v1696_v15 = vadd.f32 %v5943_v34, %v3615_v61  ;;  %v6828_v49 = vld [vmem:[#allocation26_spill] sm:$0xff] }
 0x1da   :  { %2895 = vst.msk [vmem:[%s6434_s3 + $0x178] sm:$0xff] %vm2847_vm4, %v2830_v39  ;;  %v2336_v59 = vadd.f32 %v5943_v34, %v3807_v20  ;;  %v2703_v6 = vmax.f32 %v2447_v33, %v2511_v62  ;;  %v2767_v52 = vmax.f32 %v2575_v8, %v2639_v21  ;;  %v1691_v47 = vadd.f32 %v5943_v34, %v1690_v12  ;;  %v3810_v8 = vpop.f32.mrb[116].mxu1  ;;  %v1700_v21 = vpop.f32.mrb[117].mxu0 }
 0x1db   :  { %2894 = vst.msk [vmem:[%s6434_s3 + $0x170] sm:$0xff] %vm2847_vm4, %v2829_v32  ;;  %v2331_v9 = vadd.f32 %v5943_v34, %v2330_v60  ;;  %v6271_v17 = vadd.f32 %v5943_v34, %v6828_v49  ;;  %v2832_v7 = vmax.f32 %v2704_v48, %v2768_v4  ;;  %v2514_v25 = vmax.f32 %v1696_v15, 0.0  ;;  %v2340_v61 = vpop.f32.mrb[117].mxu1 }
 0x1dc   :  { %v2642_v46 = vmax.f32 %v2336_v59, 0.0  ;;  %v6275_v39 = vadd.f32 %v5943_v34, %v6829_v27  ;;  %v2831_v38 = vmax.f32 %v2703_v6, %v2767_v52  ;;  %v2513_v33 = vmax.f32 %v1691_v47, 0.0  ;;  %v3621_v52 = vpop.f32.mrb[118].mxu0  ;;  %v3813_v31 = vpop.f32.mrb[118].mxu1 }
 0x1dd   :  { %v2641_v13 = vmax.f32 %v2331_v9, 0.0  ;;  %2897 = vst.msk [vmem:[%s6434_s3 + $0x188] sm:$0xff] %vm2847_vm4, %v2832_v7  ;;  %v2706_v5 = vmax.f32 %v2450_v0, %v2514_v25  ;;  %v1706_v32 = vadd.f32 %v5943_v34, %v3618_v56  ;;  %v2346_v62 = vadd.f32 %v5943_v34, %v3810_v8  ;;  %v1710_v9 = vpop.f32.mrb[119].mxu0  ;;  %v2350_v49 = vpop.f32.mrb[119].mxu1 }
 0x1de   :  { %v2770_v55 = vmax.f32 %v2578_v18, %v2642_v46  ;;  %2896 = vst.msk [vmem:[%s6434_s3 + $0x180] sm:$0xff] %vm2847_vm4, %v2831_v38  ;;  %v2705_v20 = vmax.f32 %v2449_v53, %v2513_v33  ;;  %v1701_v44 = vadd.f32 %v5943_v34, %v1700_v21  ;;  %v2341_v0 = vadd.f32 %v5943_v34, %v2340_v61  ;;  %v3816_v43 = vpop.f32.mrb[120].mxu1 }
 0x1df   :  { %v2769_v51 = vmax.f32 %v2577_v57, %v2641_v13  ;;  %v2460_v18 = vmax.f32 %v6243_v29, 0.0  ;;  %v2516_v4 = vmax.f32 %v1706_v32, 0.0  ;;  %v2644_v15 = vmax.f32 %v2346_v62, 0.0 }
 0x1e0   :  { %v2834_v48 = vmax.f32 %v2706_v5, %v2770_v55  ;;  %v2588_v59 = vmax.f32 %v6247_v26, 0.0  ;;  %v2515_v60 = vmax.f32 %v1701_v44, 0.0  ;;  %v2643_v6 = vmax.f32 %v2341_v0, 0.0  ;;  %v3624_v5 = vpop.f32.mrb[120].mxu0 }
 0x1e1   :  { %v2833_v12 = vmax.f32 %v2705_v20, %v2769_v51  ;;  %v2708_v23 = vmax.f32 %v2452_v3, %v2516_v4  ;;  %v2772_v53 = vmax.f32 %v2580_v30, %v2644_v15  ;;  %v1716_v57 = vadd.f32 %v5943_v34, %v3621_v52  ;;  %v1720_v61 = vpop.f32.mrb[121].mxu0  ;;  %v2360_v20 = vpop.f32.mrb[121].mxu1  ;;  %v6835_v4 = vld [vmem:[#allocation79_spill] sm:$0xff]  ;;  %v6836_v52 = vld [vmem:[#allocation80_spill] sm:$0xff] }
 0x1e2   :  { %2899 = vst.msk [vmem:[%s6434_s3 + $0x198] sm:$0xff] %vm2847_vm4, %v2834_v48  ;;  %v2356_v47 = vadd.f32 %v5943_v34, %v3813_v31  ;;  %v2707_v7 = vmax.f32 %v2451_v16, %v2515_v60  ;;  %v6830_v24 = vmax.f32 %v5870_v1, 0.0  ;;  %v1711_v45 = vadd.f32 %v5943_v34, %v1710_v9 }
 0x1e3   :  { %2898 = vst.msk [vmem:[%s6434_s3 + $0x190] sm:$0xff] %vm2847_vm4, %v2833_v12  ;;  %v2351_v30 = vadd.f32 %v5943_v34, %v2350_v49  ;;  %v2459_v25 = vmax.f32 %v6271_v17, 0.0  ;;  %v2836_v46 = vmax.f32 %v2708_v23, %v2772_v53  ;;  %v2518_v27 = vmax.f32 %v1716_v57, 0.0  ;;  %v3819_v57 = vpop.f32.mrb[122].mxu1 }
 0x1e4   :  { %v2771_v3 = vmax.f32 %v6830_v24, %v2643_v6  ;;  %v2646_v38 = vmax.f32 %v2356_v47, 0.0  ;;  %v2587_v33 = vmax.f32 %v6275_v39, 0.0  ;;  %v2517_v56 = vmax.f32 %v1711_v45, 0.0 }
 0x1e5   :  { %v2645_v8 = vmax.f32 %v2351_v30, 0.0  ;;  %2901 = vst.msk [vmem:[%s6434_s3 + $0x1a8] sm:$0xff] %vm2847_vm4, %v2836_v46  ;;  %v6831_v1 = vmax.f32 %v5938_v54, 0.0  ;;  %v6832_v55 = vmax.f32 %v5947_v40, 0.0  ;;  %v1726_v62 = vadd.f32 %v5943_v34, %v3624_v5  ;;  %v6838_v30 = vld [vmem:[#allocation83_spill] sm:$0xff] }
 0x1e6   :  { %v2835_v13 = vmax.f32 %v2707_v7, %v2771_v3  ;;  %v2366_v21 = vadd.f32 %v5943_v34, %v3816_v43  ;;  %v6833_v51 = vmax.f32 %v5971_v2, 0.0  ;;  %v6834_v54 = vmax.f32 %v5975_v50, 0.0  ;;  %v3627_v50 = vpop.f32.mrb[122].mxu0  ;;  %v2370_v3 = vpop.f32.mrb[123].mxu1 }
 0x1e7   :  { %v2710_v16 = vmax.f32 %v6831_v1, %v2518_v27  ;;  %v2774_v32 = vmax.f32 %v6832_v55, %v2646_v38  ;;  %v1721_v40 = vadd.f32 %v5943_v34, %v1720_v61  ;;  %v2361_v48 = vadd.f32 %v5943_v34, %v2360_v20  ;;  %v1730_v24 = vpop.f32.mrb[123].mxu0  ;;  %v3822_v1 = vpop.f32.mrb[124].mxu1 }
 0x1e8   :  { %2900 = vst.msk [vmem:[%s6434_s3 + $0x1a0] sm:$0xff] %vm2847_vm4, %v2835_v13  ;;  %v2709_v44 = vmax.f32 %v6833_v51, %v2517_v56  ;;  %v2773_v0 = vmax.f32 %v6834_v54, %v2645_v8  ;;  %v6343_v15 = vadd.f32 %v5943_v34, %v6835_v4  ;;  %v2520_v60 = vmax.f32 %v1726_v62, 0.0  ;;  %v6839_v56 = vld [vmem:[#allocation84_spill] sm:$0xff]  ;;  %v2380_v20 = vpop.f32.mrb[125].mxu1 }
 0x1e9   :  { %v2838_v12 = vmax.f32 %v2710_v16, %v2774_v32  ;;  %v2648_v6 = vmax.f32 %v2366_v21, 0.0  ;;  %v6347_v31 = vadd.f32 %v5943_v34, %v6836_v52  ;;  %v2519_v23 = vmax.f32 %v1721_v40, 0.0  ;;  %v3825_v37 = vpop.f32.mrb[126].mxu1 }
 0x1ea   :  { %v2837_v2 = vmax.f32 %v2709_v44, %v2773_v0  ;;  %v2647_v53 = vmax.f32 %v2361_v48, 0.0  ;;  %v2712_v47 = vmax.f32 %v2456_v63, %v2520_v60  ;;  %v1736_v49 = vadd.f32 %v5943_v34, %v3627_v50 }
 0x1eb   :  { %2903 = vst.msk [vmem:[%s6434_s3 + $0x1b8] sm:$0xff] %vm2847_vm4, %v2838_v12  ;;  %v2776_v9 = vmax.f32 %v2584_v58, %v2648_v6  ;;  %v2376_v7 = vadd.f32 %v5943_v34, %v3819_v57  ;;  %v2711_v45 = vmax.f32 %v2455_v41, %v2519_v23  ;;  %v6837_v11 = vmax.f32 %v6075_v35, 0.0  ;;  %v3630_v41 = vpop.f32.mrb[124].mxu0 }
 0x1ec   :  { %2902 = vst.msk [vmem:[%s6434_s3 + $0x1b0] sm:$0xff] %vm2847_vm4, %v2837_v2  ;;  %v1731_v36 = vadd.f32 %v5943_v34, %v1730_v24  ;;  %v2371_v58 = vadd.f32 %v5943_v34, %v2370_v3  ;;  %v1431_v46 = vadd.f32 %v5943_v34, %v6838_v30  ;;  %v2522_v38 = vmax.f32 %v1736_v49, 0.0  ;;  %v1740_v61 = vpop.f32.mrb[125].mxu0  ;;  %v2390_v2 = vpop.f32.mrb[127].mxu1 }
 0x1ed   :  { %v2775_v63 = vmax.f32 %v6837_v11, %v2647_v53  ;;  %v2840_v27 = vmax.f32 %v2712_v47, %v2776_v9  ;;  %v2650_v13 = vmax.f32 %v2376_v7, 0.0  ;;  %v2071_v8 = vadd.f32 %v5943_v34, %v6839_v56  ;;  %v3633_v52 = vpop.f32.mrb[126].mxu0 }
 0x1ee   :  { %v2521_v43 = vmax.f32 %v1731_v36, 0.0  ;;  %v2649_v42 = vmax.f32 %v2371_v58, 0.0  ;;  %v6840_v35 = vmax.f32 %v6143_v19, 0.0  ;;  %v6841_v55 = vmax.f32 %v6147_v28, 0.0 }
 0x1ef   :  { %v2839_v5 = vmax.f32 %v2711_v45, %v2775_v63  ;;  %2905 = vst.msk [vmem:[%s6434_s3 + $0x1c8] sm:$0xff] %vm2847_vm4, %v2840_v27  ;;  %v1746_v62 = vadd.f32 %v5943_v34, %v3630_v41  ;;  %v2386_v21 = vadd.f32 %v5943_v34, %v3822_v1  ;;  %v1741_v28 = vadd.f32 %v5943_v34, %v1740_v61 }
 0x1f0   :  { %v2714_v16 = vmax.f32 %v6840_v35, %v2522_v38  ;;  %v2778_v32 = vmax.f32 %v6841_v55, %v2650_v13  ;;  %v2713_v51 = vmax.f32 %v2457_v10, %v2521_v43  ;;  %v2777_v19 = vmax.f32 %v2585_v14, %v2649_v42 }
 0x1f1   :  { %2904 = vst.msk [vmem:[%s6434_s3 + $0x1c0] sm:$0xff] %vm2847_vm4, %v2839_v5  ;;  %v2381_v44 = vadd.f32 %v5943_v34, %v2380_v20  ;;  %v2462_v54 = vmax.f32 %v6343_v15, 0.0  ;;  %v2524_v40 = vmax.f32 %v1746_v62, 0.0  ;;  %v2652_v48 = vmax.f32 %v2386_v21, 0.0 }
 0x1f2   :  { %v2842_v0 = vmax.f32 %v2714_v16, %v2778_v32  ;;  %v2590_v4 = vmax.f32 %v6347_v31, 0.0  ;;  %v2841_v12 = vmax.f32 %v2713_v51, %v2777_v19  ;;  %v2523_v60 = vmax.f32 %v1741_v28, 0.0  ;;  %v1750_v31 = vpop.f32.mrb[127].mxu0 }
 0x1f3   :  { %v2651_v6 = vmax.f32 %v2381_v44, 0.0  ;;  %v2716_v22 = vmax.f32 %v2460_v18, %v2524_v40  ;;  %v2780_v10 = vmax.f32 %v2588_v59, %v2652_v48  ;;  %v1756_v14 = vadd.f32 %v5943_v34, %v3633_v52 }
 0x1f4   :  { %2907 = vst.msk [vmem:[%s6434_s3 + $0x1d8] sm:$0xff] %vm2847_vm4, %v2842_v0  ;;  %v2396_v15 = vadd.f32 %v5943_v34, %v3825_v37  ;;  %2906 = vst.msk [vmem:[%s6434_s3 + $0x1d0] sm:$0xff] %vm2847_vm4, %v2841_v12  ;;  %v2715_v23 = vmax.f32 %v2459_v25, %v2523_v60  ;;  %v1751_v26 = vadd.f32 %v5943_v34, %v1750_v31  ;;  %v2461_v59 = vmax.f32 %v1431_v46, 0.0 }
 0x1f5   :  { %v2779_v29 = vmax.f32 %v2587_v33, %v2651_v6  ;;  %v2391_v18 = vadd.f32 %v5943_v34, %v2390_v2  ;;  %v2844_v53 = vmax.f32 %v2716_v22, %v2780_v10  ;;  %v2526_v50 = vmax.f32 %v1756_v14, 0.0 }
 0x1f6   :  { %v2654_v57 = vmax.f32 %v2396_v15, 0.0  ;;  %v2589_v47 = vmax.f32 %v2071_v8, 0.0  ;;  %v2525_v49 = vmax.f32 %v1751_v26, 0.0 }
 0x1f7   :  { %v2843_v9 = vmax.f32 %v2715_v23, %v2779_v29  ;;  %v2653_v7 = vmax.f32 %v2391_v18, 0.0  ;;  %2909 = vst.msk [vmem:[%s6434_s3 + $0x1e8] sm:$0xff] %vm2847_vm4, %v2844_v53  ;;  %v2718_v17 = vmax.f32 %v2462_v54, %v2526_v50 }
 0x1f8   :  { %v2782_v39 = vmax.f32 %v2590_v4, %v2654_v57  ;;  %v2717_v34 = vmax.f32 %v2461_v59, %v2525_v49 }
 0x1f9   :  { %2908 = vst.msk [vmem:[%s6434_s3 + $0x1e0] sm:$0xff] %vm2847_vm4, %v2843_v9  ;;  %v2781_v25 = vmax.f32 %v2589_v47, %v2653_v7 }
 0x1fa   :  { %v2846_v33 = vmax.f32 %v2718_v17, %v2782_v39 }
 0x1fb   :  { %v2845_v24 = vmax.f32 %v2717_v34, %v2781_v25 }
 0x1fc   :  { %2911 = vst.msk [vmem:[%s6434_s3 + $0x1f8] sm:$0xff] %vm2847_vm4, %v2846_v33 }
 0x1fd   :  { %2910 = vst.msk [vmem:[%s6434_s3 + $0x1f0] sm:$0xff] %vm2847_vm4, %v2845_v24 }

// kernel: card_cnn_forward.4
= control target key start
LH: loop header
LB: loop body
LE: loop exit
PB: predicated region body
PF: predicated region fallthrough
CT: control target
= control target key end

     0   :  { %v1671_v0 = vmov 0.0|0.0   ;;  %vm249_vm0 = vcmask 261120   ;;  %vm1324_vm1 = vcmask 523264   ;;  %s2824_s1 = inlined_call_operand.vmem [shape: f32[288,64], index: 1, kind: input, shape index: {}]   ;;  %s2825_s0 = inlined_call_operand.vmem [shape: f32[512,288], index: 0, kind: input, shape index: {}]   ;;  %s2826_s2 = inlined_call_operand.vmem [shape: f32[1,64], index: 2, kind: input, shape index: {}]   ;;  %s2827_s3 = inlined_call_operand.vmem [shape: f32[128,64], index: 3, kind: output, shape index: {}]  }
   0x1   :  { %1582 = vmatprep.subr.bf16.mxu0 %v1671_v0  ;;  %1638 = vmatprep.subr.bf16.mxu1 %v1671_v0  ;;  %v206_v1 = vld [vmem:[%s2824_s1] sm:$0xff]  ;;  %v207_v2 = vld [vmem:[%s2824_s1 + $0x8] sm:$0xff]  ;;  %v208_v3 = vld [vmem:[%s2824_s1 + $0x10] sm:$0xff] }
   0x2   :  { %v1583_v4 = vpack.c.bf16 %v207_v2, %v206_v1  ;;  %v209_v5 = vld [vmem:[%s2824_s1 + $0x18] sm:$0xff]  ;;  %v210_v7 = vld [vmem:[%s2824_s1 + $0x20] sm:$0xff]  ;;  %v211_v8 = vld [vmem:[%s2824_s1 + $0x28] sm:$0xff] }
   0x3   :  { %v1586_v6 = vpack.c.bf16 %v209_v5, %v208_v3  ;;  %v1589_v9 = vpack.c.bf16 %v211_v8, %v210_v7  ;;  %v212_v10 = vld [vmem:[%s2824_s1 + $0x30] sm:$0xff]  ;;  %v213_v11 = vld [vmem:[%s2824_s1 + $0x38] sm:$0xff]  ;;  %v15_v12 = vld [vmem:[%s2825_s0 + $0x8] sm:$0xff] }
   0x4   :  { %1584 = vmatpush1.bf16.msra.mxu0 %v1583_v4  ;;  %1654 = vmatpush1.bf16.msra.mxu1 %v1583_v4  ;;  %v1592_v13 = vpack.c.bf16 %v213_v11, %v212_v10  ;;  %v159_v14 = vld [vmem:[%s2825_s0 + $0x488] sm:$0xff]  ;;  %v214_v15 = vld [vmem:[%s2824_s1 + $0x40] sm:$0xff]  ;;  %v216_v18 = vld [vmem:[%s2824_s1 + $0x50] sm:$0xff] }
   0x5   :  { %1585 = vmatprep.subr.bf16.mxu0 %v1671_v0  ;;  %1639 = vmatprep.subr.bf16.mxu1 %v1671_v0  ;;  %v215_v16 = vld [vmem:[%s2824_s1 + $0x48] sm:$0xff]  ;;  %v217_v19 = vld [vmem:[%s2824_s1 + $0x58] sm:$0xff]  ;;  %v218_v21 = vld [vmem:[%s2824_s1 + $0x60] sm:$0xff] }
   0x6   :  { %506 = vmatprep.mubr.f32.mxu0 %v15_v12  ;;  %746 = vmatprep.mubr.f32.mxu1 %v159_v14  ;;  %v1595_v17 = vpack.c.bf16 %v215_v16, %v214_v15  ;;  %v1598_v20 = vpack.c.bf16 %v217_v19, %v216_v18  ;;  %v219_v22 = vld [vmem:[%s2824_s1 + $0x68] sm:$0xff]  ;;  %v220_v24 = vld [vmem:[%s2824_s1 + $0x70] sm:$0xff]  ;;  %v221_v25 = vld [vmem:[%s2824_s1 + $0x78] sm:$0xff] }
   0x7   :  { %v1601_v23 = vpack.c.bf16 %v219_v22, %v218_v21  ;;  %v1604_v26 = vpack.c.bf16 %v221_v25, %v220_v24  ;;  %v222_v27 = vld [vmem:[%s2824_s1 + $0x80] sm:$0xff]  ;;  %v223_v28 = vld [vmem:[%s2824_s1 + $0x88] sm:$0xff]  ;;  %v224_v30 = vld [vmem:[%s2824_s1 + $0x90] sm:$0xff] }
   0x8   :  { %1587 = vmatpush1.bf16.msra.mxu0 %v1586_v6  ;;  %1655 = vmatpush1.bf16.msra.mxu1 %v1586_v6  ;;  %v1607_v29 = vpack.c.bf16 %v223_v28, %v222_v27  ;;  %v225_v31 = vld [vmem:[%s2824_s1 + $0x98] sm:$0xff]  ;;  %v226_v33 = vld [vmem:[%s2824_s1 + $0xa0] sm:$0xff]  ;;  %v227_v34 = vld [vmem:[%s2824_s1 + $0xa8] sm:$0xff] }
   0x9   :  { %1588 = vmatprep.subr.bf16.mxu0 %v1671_v0  ;;  %1640 = vmatprep.subr.bf16.mxu1 %v1671_v0  ;;  %v1610_v32 = vpack.c.bf16 %v225_v31, %v224_v30  ;;  %v1613_v35 = vpack.c.bf16 %v227_v34, %v226_v33  ;;  %v228_v36 = vld [vmem:[%s2824_s1 + $0xb0] sm:$0xff]  ;;  %v229_v37 = vld [vmem:[%s2824_s1 + $0xb8] sm:$0xff]  ;;  %v230_v39 = vld [vmem:[%s2824_s1 + $0xc0] sm:$0xff] }
   0xa   :  { %v1616_v38 = vpack.c.bf16 %v229_v37, %v228_v36  ;;  %v231_v40 = vld [vmem:[%s2824_s1 + $0xc8] sm:$0xff]  ;;  %v232_v42 = vld [vmem:[%s2824_s1 + $0xd0] sm:$0xff]  ;;  %v233_v43 = vld [vmem:[%s2824_s1 + $0xd8] sm:$0xff] }
   0xb   :  { %v1619_v41 = vpack.c.bf16 %v231_v40, %v230_v39  ;;  %v1622_v44 = vpack.c.bf16 %v233_v43, %v232_v42  ;;  %v234_v45 = vld [vmem:[%s2824_s1 + $0xe0] sm:$0xff]  ;;  %v235_v46 = vld [vmem:[%s2824_s1 + $0xe8] sm:$0xff]  ;;  %v236_v48 = vld [vmem:[%s2824_s1 + $0xf0] sm:$0xff] }
   0xc   :  { %1590 = vmatpush1.bf16.msra.mxu0 %v1589_v9  ;;  %1656 = vmatpush1.bf16.msra.mxu1 %v1589_v9  ;;  %v1625_v47 = vpack.c.bf16 %v235_v46, %v234_v45  ;;  %v237_v49 = vld [vmem:[%s2824_s1 + $0xf8] sm:$0xff]  ;;  %v238_v50 = vld [vmem:[%s2824_s1 + $0x100] sm:$0xff]  ;;  %v239_v51 = vld [vmem:[%s2824_s1 + $0x108] sm:$0xff] }
   0xd   :  { %1591 = vmatprep.subr.bf16.mxu0 %v1671_v0  ;;  %1641 = vmatprep.subr.bf16.mxu1 %v1671_v0  ;;  %v1628_v52 = vpack.c.bf16 %v237_v49, %v236_v48  ;;  %v1630_v53 = vpack.c.bf16 %v239_v51, %v238_v50  ;;  %v240_v54 = vld [vmem:[%s2824_s1 + $0x110] sm:$0xff]  ;;  %v241_v55 = vld [vmem:[%s2824_s1 + $0x118] sm:$0xff]  ;;  %v14_v56 = vld [vmem:[%s2825_s0] sm:$0xff] }
   0xe   :  { %v158_v57 = vld [vmem:[%s2825_s0 + $0x480] sm:$0xff]  ;;  %v1634_v59 = vpack.c.bf16 %v241_v55, %v240_v54  ;;  %v17_v61 = vld [vmem:[%s2825_s0 + $0x18] sm:$0xff]  ;;  %v20_v1 = vld [vmem:[%s2825_s0 + $0x30] sm:$0xff] }
   0xf   :  { %v18_v58 = vld [vmem:[%s2825_s0 + $0x20] sm:$0xff]  ;;  %v161_v62 = vld [vmem:[%s2825_s0 + $0x498] sm:$0xff]  ;;  %v164_v2 = vld [vmem:[%s2825_s0 + $0x4b0] sm:$0xff] }
  0x10   :  { %1593 = vmatpush1.bf16.msra.mxu0 %v1592_v13  ;;  %1657 = vmatpush1.bf16.msra.mxu1 %v1592_v13  ;;  %v162_v60 = vld [vmem:[%s2825_s0 + $0x4a0] sm:$0xff]  ;;  %v21_v63 = vld [vmem:[%s2825_s0 + $0x38] sm:$0xff]  ;;  %v24_v3 = vld [vmem:[%s2825_s0 + $0x50] sm:$0xff] }
  0x11   :  { %1594 = vmatprep.subr.bf16.mxu0 %v1671_v0  ;;  %1642 = vmatprep.subr.bf16.mxu1 %v1671_v0  ;;  %v168_v4 = vld [vmem:[%s2825_s0 + $0x4d0] sm:$0xff]  ;;  %v23_v5 = vld [vmem:[%s2825_s0 + $0x48] sm:$0xff]  ;;  %v26_v9 = vld [vmem:[%s2825_s0 + $0x60] sm:$0xff] }
  0x12   :  { %v167_v6 = vld [vmem:[%s2825_s0 + $0x4c8] sm:$0xff]  ;;  %v170_v10 = vld [vmem:[%s2825_s0 + $0x4e0] sm:$0xff]  ;;  %v29_v13 = vld [vmem:[%s2825_s0 + $0x78] sm:$0xff] }
  0x13   :  { %v27_v7 = vld [vmem:[%s2825_s0 + $0x68] sm:$0xff]  ;;  %v30_v11 = vld [vmem:[%s2825_s0 + $0x80] sm:$0xff]  ;;  %v173_v14 = vld [vmem:[%s2825_s0 + $0x4f8] sm:$0xff] }
  0x14   :  { %1596 = vmatpush1.bf16.msra.mxu0 %v1595_v17  ;;  %1658 = vmatpush1.bf16.msra.mxu1 %v1595_v17  ;;  %v171_v8 = vld [vmem:[%s2825_s0 + $0x4e8] sm:$0xff]  ;;  %v174_v12 = vld [vmem:[%s2825_s0 + $0x500] sm:$0xff]  ;;  %v33_v15 = vld [vmem:[%s2825_s0 + $0x98] sm:$0xff] }
  0x15   :  { %1597 = vmatprep.subr.bf16.mxu0 %v1671_v0  ;;  %1643 = vmatprep.subr.bf16.mxu1 %v1671_v0  ;;  %v177_v16 = vld [vmem:[%s2825_s0 + $0x518] sm:$0xff]  ;;  %v32_v17 = vld [vmem:[%s2825_s0 + $0x90] sm:$0xff]  ;;  %v35_v21 = vld [vmem:[%s2825_s0 + $0xa8] sm:$0xff] }
  0x16   :  { %v176_v18 = vld [vmem:[%s2825_s0 + $0x510] sm:$0xff]  ;;  %v179_v22 = vld [vmem:[%s2825_s0 + $0x528] sm:$0xff]  ;;  %v38_v25 = vld [vmem:[%s2825_s0 + $0xc0] sm:$0xff] }
  0x17   :  { %v36_v19 = vld [vmem:[%s2825_s0 + $0xb0] sm:$0xff]  ;;  %v183_v24 = vld [vmem:[%s2825_s0 + $0x548] sm:$0xff]  ;;  %v42_v27 = vld [vmem:[%s2825_s0 + $0xe0] sm:$0xff] }
  0x18   :  { %1599 = vmatpush1.bf16.msra.mxu0 %v1598_v20  ;;  %1659 = vmatpush1.bf16.msra.mxu1 %v1598_v20  ;;  %v180_v20 = vld [vmem:[%s2825_s0 + $0x530] sm:$0xff]  ;;  %v186_v28 = vld [vmem:[%s2825_s0 + $0x560] sm:$0xff]  ;;  %v185_v30 = vld [vmem:[%s2825_s0 + $0x558] sm:$0xff] }
  0x19   :  { %1600 = vmatprep.subr.bf16.mxu0 %v1671_v0  ;;  %1644 = vmatprep.subr.bf16.mxu1 %v1671_v0  ;;  %v45_v31 = vld [vmem:[%s2825_s0 + $0xf8] sm:$0xff]  ;;  %v44_v33 = vld [vmem:[%s2825_s0 + $0xf0] sm:$0xff]  ;;  %v47_v37 = vld [vmem:[%s2825_s0 + $0x108] sm:$0xff] }
  0x1a   :  { %v188_v34 = vld [vmem:[%s2825_s0 + $0x570] sm:$0xff]  ;;  %v51_v39 = vld [vmem:[%s2825_s0 + $0x128] sm:$0xff]  ;;  %v194_v42 = vld [vmem:[%s2825_s0 + $0x5a0] sm:$0xff] }
  0x1b   :  { %v192_v36 = vld [vmem:[%s2825_s0 + $0x590] sm:$0xff]  ;;  %v195_v40 = vld [vmem:[%s2825_s0 + $0x5a8] sm:$0xff]  ;;  %v54_v43 = vld [vmem:[%s2825_s0 + $0x140] sm:$0xff] }
  0x1c   :  { %1602 = vmatpush1.bf16.msra.mxu0 %v1601_v23  ;;  %1660 = vmatpush1.bf16.msra.mxu1 %v1601_v23  ;;  %v39_v23 = vld [vmem:[%s2825_s0 + $0xc8] sm:$0xff]  ;;  %v53_v45 = vld [vmem:[%s2825_s0 + $0x138] sm:$0xff]  ;;  %v56_v49 = vld [vmem:[%s2825_s0 + $0x150] sm:$0xff] }
  0x1d   :  { %1603 = vmatprep.subr.bf16.mxu0 %v1671_v0  ;;  %1645 = vmatprep.subr.bf16.mxu1 %v1671_v0  ;;  %v197_v46 = vld [vmem:[%s2825_s0 + $0x5b8] sm:$0xff]  ;;  %v200_v50 = vld [vmem:[%s2825_s0 + $0x5d0] sm:$0xff]  ;;  %v203_v54 = vld [vmem:[%s2825_s0 + $0x5e8] sm:$0xff] }
  0x1e   :  { %v201_v48 = vld [vmem:[%s2825_s0 + $0x5d8] sm:$0xff]  ;;  %v60_v51 = vld [vmem:[%s2825_s0 + $0x170] sm:$0xff]  ;;  %v63_v55 = vld [vmem:[%s2825_s0 + $0x188] sm:$0xff] }
  0x20   :  { %1605 = vmatpush1.bf16.msra.mxu0 %v1604_v26  ;;  %1661 = vmatpush1.bf16.msra.mxu1 %v1604_v26  ;;  %v182_v26 = vld [vmem:[%s2825_s0 + $0x540] sm:$0xff] }
  0x21   :  { %1606 = vmatprep.subr.bf16.mxu0 %v1671_v0  ;;  %1646 = vmatprep.subr.bf16.mxu1 %v1671_v0 }
  0x24   :  { %1608 = vmatpush1.bf16.msra.mxu0 %v1607_v29  ;;  %1662 = vmatpush1.bf16.msra.mxu1 %v1607_v29  ;;  %v41_v29 = vld [vmem:[%s2825_s0 + $0xd8] sm:$0xff] }
  0x25   :  { %1609 = vmatprep.subr.bf16.mxu0 %v1671_v0  ;;  %1647 = vmatprep.subr.bf16.mxu1 %v1671_v0 }
  0x28   :  { %1611 = vmatpush1.bf16.msra.mxu0 %v1610_v32  ;;  %1663 = vmatpush1.bf16.msra.mxu1 %v1610_v32  ;;  %v189_v32 = vld [vmem:[%s2825_s0 + $0x578] sm:$0xff] }
  0x29   :  { %1612 = vmatprep.subr.bf16.mxu0 %v1671_v0  ;;  %1648 = vmatprep.subr.bf16.mxu1 %v1671_v0 }
  0x2c   :  { %1614 = vmatpush1.bf16.msra.mxu0 %v1613_v35  ;;  %1664 = vmatpush1.bf16.msra.mxu1 %v1613_v35  ;;  %v48_v35 = vld [vmem:[%s2825_s0 + $0x110] sm:$0xff] }
  0x2d   :  { %1615 = vmatprep.subr.bf16.mxu0 %v1671_v0  ;;  %1649 = vmatprep.subr.bf16.mxu1 %v1671_v0 }
  0x30   :  { %1617 = vmatpush1.bf16.msra.mxu0 %v1616_v38  ;;  %1665 = vmatpush1.bf16.msra.mxu1 %v1616_v38  ;;  %v191_v38 = vld [vmem:[%s2825_s0 + $0x588] sm:$0xff] }
  0x31   :  { %1618 = vmatprep.subr.bf16.mxu0 %v1671_v0  ;;  %1650 = vmatprep.subr.bf16.mxu1 %v1671_v0 }
  0x34   :  { %1620 = vmatpush1.bf16.msra.mxu0 %v1619_v41  ;;  %1666 = vmatpush1.bf16.msra.mxu1 %v1619_v41  ;;  %v50_v41 = vld [vmem:[%s2825_s0 + $0x120] sm:$0xff] }
  0x35   :  { %1621 = vmatprep.subr.bf16.mxu0 %v1671_v0  ;;  %1651 = vmatprep.subr.bf16.mxu1 %v1671_v0 }
  0x38   :  { %1623 = vmatpush1.bf16.msra.mxu0 %v1622_v44  ;;  %1667 = vmatpush1.bf16.msra.mxu1 %v1622_v44  ;;  %v198_v44 = vld [vmem:[%s2825_s0 + $0x5c0] sm:$0xff] }
  0x39   :  { %1624 = vmatprep.subr.bf16.mxu0 %v1671_v0  ;;  %1652 = vmatprep.subr.bf16.mxu1 %v1671_v0 }
  0x3c   :  { %1626 = vmatpush1.bf16.msra.mxu0 %v1625_v47  ;;  %1668 = vmatpush1.bf16.msra.mxu1 %v1625_v47  ;;  %v57_v47 = vld [vmem:[%s2825_s0 + $0x158] sm:$0xff] }
  0x3d   :  { %1627 = vmatprep.subr.bf16.mxu0 %v1671_v0  ;;  %1653 = vmatprep.subr.bf16.mxu1 %v1671_v0  ;;  %v165_v0 = vld [vmem:[%s2825_s0 + $0x4b8] sm:$0xff] }
  0x40   :  { %1629 = vmatpush1.bf16.msra.mxu0 %v1628_v52  ;;  %1669 = vmatpush1.bf16.msra.mxu1 %v1628_v52  ;;  %v204_v52 = vld [vmem:[%s2825_s0 + $0x5f0] sm:$0xff] }
  0x41   :  { %1631 = vmatprep.subr.bf16.mxu1 %v1630_v53 }
  0x43   :  { %507 = vmatmul.mubr.f32.vlgmr.msra.gmra.mrb[0].mxu0 %v14_v56  ;;  %747 = vmatmul.mubr.f32.vlgmr.msra.gmra.mrb[0].mxu1 %v158_v57  ;;  %v16_v56 = vld [vmem:[%s2825_s0 + $0x10] sm:$0xff]  ;;  %v62_v57 = vld [vmem:[%s2825_s0 + $0x180] sm:$0xff] }
  0x44   :  { %1633 = vmatpush3.bf16.msra.mxu1 %v1630_v53  ;;  %511 = vmatprep.mubr.f32.mxu0 %v18_v58  ;;  %v59_v53 = vld [vmem:[%s2825_s0 + $0x168] sm:$0xff] }
  0x45   :  { %751 = vmatprep.mubr.f32.mxu1 %v162_v60  ;;  %1635 = vmatprep.subr.bf16.mxu1 %v1634_v59  ;;  %v19_v58 = vld [vmem:[%s2825_s0 + $0x28] sm:$0xff]  ;;  %v22_v60 = vld [vmem:[%s2825_s0 + $0x40] sm:$0xff] }
  0x47   :  { %512 = vmatmul.mubr.f32.gmra.mrb[2].mxu0 %v17_v61  ;;  %752 = vmatmul.mubr.f32.gmra.mrb[2].mxu1 %v161_v62  ;;  %v65_v61 = vld [vmem:[%s2825_s0 + $0x198] sm:$0xff] }
  0x48   :  { %516 = vmatprep.mubr.f32.mxu0 %v21_v63  ;;  %756 = vmatprep.mubr.f32.mxu1 %v165_v0  ;;  %v25_v62 = vld [vmem:[%s2825_s0 + $0x58] sm:$0xff]  ;;  %v28_v0 = vld [vmem:[%s2825_s0 + $0x70] sm:$0xff] }
  0x49   :  { %1637 = vmatpush3.bf16.msra.mxu1 %v1634_v59  ;;  %v66_v59 = vld [vmem:[%s2825_s0 + $0x1a0] sm:$0xff]  ;;  %v69_v63 = vld [vmem:[%s2825_s0 + $0x1b8] sm:$0xff] }
  0x4b   :  { %517 = vmatmul.mubr.f32.gmra.mrb[4].mxu0 %v20_v1  ;;  %757 = vmatmul.mubr.f32.gmra.mrb[4].mxu1 %v164_v2  ;;  %v68_v1 = vld [vmem:[%s2825_s0 + $0x1b0] sm:$0xff]  ;;  %v31_v2 = vld [vmem:[%s2825_s0 + $0x88] sm:$0xff] }
  0x4c   :  { %521 = vmatprep.mubr.f32.mxu0 %v24_v3  ;;  %761 = vmatprep.mubr.f32.mxu1 %v168_v4  ;;  %v72_v3 = vld [vmem:[%s2825_s0 + $0x1d0] sm:$0xff]  ;;  %v34_v4 = vld [vmem:[%s2825_s0 + $0xa0] sm:$0xff] }
  0x4f   :  { %522 = vmatmul.mubr.f32.gmra.mrb[6].mxu0 %v23_v5  ;;  %762 = vmatmul.mubr.f32.gmra.mrb[6].mxu1 %v167_v6  ;;  %v71_v5 = vld [vmem:[%s2825_s0 + $0x1c8] sm:$0xff]  ;;  %v37_v6 = vld [vmem:[%s2825_s0 + $0xb8] sm:$0xff] }
  0x50   :  { %526 = vmatprep.mubr.f32.mxu0 %v27_v7  ;;  %766 = vmatprep.mubr.f32.mxu1 %v171_v8  ;;  %v75_v7 = vld [vmem:[%s2825_s0 + $0x1e8] sm:$0xff]  ;;  %v40_v8 = vld [vmem:[%s2825_s0 + $0xd0] sm:$0xff] }
  0x53   :  { %527 = vmatmul.mubr.f32.gmra.mrb[8].mxu0 %v26_v9  ;;  %767 = vmatmul.mubr.f32.gmra.mrb[8].mxu1 %v170_v10  ;;  %v74_v9 = vld [vmem:[%s2825_s0 + $0x1e0] sm:$0xff]  ;;  %v43_v10 = vld [vmem:[%s2825_s0 + $0xe8] sm:$0xff] }
  0x54   :  { %531 = vmatprep.mubr.f32.mxu0 %v30_v11  ;;  %771 = vmatprep.mubr.f32.mxu1 %v174_v12  ;;  %v78_v11 = vld [vmem:[%s2825_s0 + $0x200] sm:$0xff] }
  0x55   :  { %v46_v12 = vld [vmem:[%s2825_s0 + $0x100] sm:$0xff] }
  0x57   :  { %532 = vmatmul.mubr.f32.gmra.mrb[10].mxu0 %v29_v13  ;;  %772 = vmatmul.mubr.f32.gmra.mrb[10].mxu1 %v173_v14  ;;  %v77_v13 = vld [vmem:[%s2825_s0 + $0x1f8] sm:$0xff] }
  0x58   :  { %536 = vmatprep.mubr.f32.mxu0 %v33_v15  ;;  %776 = vmatprep.mubr.f32.mxu1 %v177_v16  ;;  %v49_v14 = vld [vmem:[%s2825_s0 + $0x118] sm:$0xff]  ;;  %v52_v16 = vld [vmem:[%s2825_s0 + $0x130] sm:$0xff] }
  0x59   :  { %v81_v15 = vld [vmem:[%s2825_s0 + $0x218] sm:$0xff] }
  0x5b   :  { %537 = vmatmul.mubr.f32.gmra.mrb[12].mxu0 %v32_v17  ;;  %777 = vmatmul.mubr.f32.gmra.mrb[12].mxu1 %v176_v18  ;;  %v80_v17 = vld [vmem:[%s2825_s0 + $0x210] sm:$0xff]  ;;  %v55_v18 = vld [vmem:[%s2825_s0 + $0x148] sm:$0xff] }
  0x5c   :  { %541 = vmatprep.mubr.f32.mxu0 %v36_v19  ;;  %781 = vmatprep.mubr.f32.mxu1 %v180_v20  ;;  %v84_v19 = vld [vmem:[%s2825_s0 + $0x230] sm:$0xff]  ;;  %v58_v20 = vld [vmem:[%s2825_s0 + $0x160] sm:$0xff] }
  0x5f   :  { %542 = vmatmul.mubr.f32.gmra.mrb[14].mxu0 %v35_v21  ;;  %782 = vmatmul.mubr.f32.gmra.mrb[14].mxu1 %v179_v22  ;;  %v83_v21 = vld [vmem:[%s2825_s0 + $0x228] sm:$0xff]  ;;  %v61_v22 = vld [vmem:[%s2825_s0 + $0x178] sm:$0xff] }
  0x60   :  { %546 = vmatprep.mubr.f32.mxu0 %v39_v23  ;;  %786 = vmatprep.mubr.f32.mxu1 %v183_v24  ;;  %v87_v23 = vld [vmem:[%s2825_s0 + $0x248] sm:$0xff]  ;;  %v64_v24 = vld [vmem:[%s2825_s0 + $0x190] sm:$0xff] }
  0x63   :  { %547 = vmatmul.mubr.f32.gmra.mrb[16].mxu0 %v38_v25  ;;  %787 = vmatmul.mubr.f32.gmra.mrb[16].mxu1 %v182_v26  ;;  %v86_v25 = vld [vmem:[%s2825_s0 + $0x240] sm:$0xff]  ;;  %v67_v26 = vld [vmem:[%s2825_s0 + $0x1a8] sm:$0xff] }
  0x64   :  { %551 = vmatprep.mubr.f32.mxu0 %v42_v27  ;;  %791 = vmatprep.mubr.f32.mxu1 %v186_v28  ;;  %v90_v27 = vld [vmem:[%s2825_s0 + $0x260] sm:$0xff] }
  0x65   :  { %v70_v28 = vld [vmem:[%s2825_s0 + $0x1c0] sm:$0xff] }
  0x67   :  { %552 = vmatmul.mubr.f32.gmra.mrb[18].mxu0 %v41_v29  ;;  %792 = vmatmul.mubr.f32.gmra.mrb[18].mxu1 %v185_v30  ;;  %v89_v29 = vld [vmem:[%s2825_s0 + $0x258] sm:$0xff] }
  0x68   :  { %556 = vmatprep.mubr.f32.mxu0 %v45_v31  ;;  %796 = vmatprep.mubr.f32.mxu1 %v189_v32  ;;  %v73_v30 = vld [vmem:[%s2825_s0 + $0x1d8] sm:$0xff]  ;;  %v76_v32 = vld [vmem:[%s2825_s0 + $0x1f0] sm:$0xff] }
  0x69   :  { %v93_v31 = vld [vmem:[%s2825_s0 + $0x278] sm:$0xff] }
  0x6b   :  { %557 = vmatmul.mubr.f32.gmra.mrb[20].mxu0 %v44_v33  ;;  %797 = vmatmul.mubr.f32.gmra.mrb[20].mxu1 %v188_v34  ;;  %v92_v33 = vld [vmem:[%s2825_s0 + $0x270] sm:$0xff]  ;;  %v79_v34 = vld [vmem:[%s2825_s0 + $0x208] sm:$0xff] }
  0x6c   :  { %561 = vmatprep.mubr.f32.mxu0 %v48_v35  ;;  %801 = vmatprep.mubr.f32.mxu1 %v192_v36  ;;  %v96_v35 = vld [vmem:[%s2825_s0 + $0x290] sm:$0xff]  ;;  %v82_v36 = vld [vmem:[%s2825_s0 + $0x220] sm:$0xff] }
  0x6f   :  { %562 = vmatmul.mubr.f32.gmra.mrb[22].mxu0 %v47_v37  ;;  %802 = vmatmul.mubr.f32.gmra.mrb[22].mxu1 %v191_v38  ;;  %v95_v37 = vld [vmem:[%s2825_s0 + $0x288] sm:$0xff]  ;;  %v85_v38 = vld [vmem:[%s2825_s0 + $0x238] sm:$0xff] }
  0x70   :  { %566 = vmatprep.mubr.f32.mxu0 %v51_v39  ;;  %806 = vmatprep.mubr.f32.mxu1 %v195_v40  ;;  %v99_v39 = vld [vmem:[%s2825_s0 + $0x2a8] sm:$0xff]  ;;  %v88_v40 = vld [vmem:[%s2825_s0 + $0x250] sm:$0xff] }
  0x73   :  { %567 = vmatmul.mubr.f32.gmra.mrb[24].mxu0 %v50_v41  ;;  %807 = vmatmul.mubr.f32.gmra.mrb[24].mxu1 %v194_v42  ;;  %v98_v41 = vld [vmem:[%s2825_s0 + $0x2a0] sm:$0xff]  ;;  %v91_v42 = vld [vmem:[%s2825_s0 + $0x268] sm:$0xff] }
  0x74   :  { %571 = vmatprep.mubr.f32.mxu0 %v54_v43  ;;  %811 = vmatprep.mubr.f32.mxu1 %v198_v44  ;;  %v102_v43 = vld [vmem:[%s2825_s0 + $0x2c0] sm:$0xff] }
  0x75   :  { %v94_v44 = vld [vmem:[%s2825_s0 + $0x280] sm:$0xff] }
  0x77   :  { %572 = vmatmul.mubr.f32.gmra.mrb[26].mxu0 %v53_v45  ;;  %812 = vmatmul.mubr.f32.gmra.mrb[26].mxu1 %v197_v46  ;;  %v101_v45 = vld [vmem:[%s2825_s0 + $0x2b8] sm:$0xff] }
  0x78   :  { %576 = vmatprep.mubr.f32.mxu0 %v57_v47  ;;  %816 = vmatprep.mubr.f32.mxu1 %v201_v48  ;;  %v97_v46 = vld [vmem:[%s2825_s0 + $0x298] sm:$0xff]  ;;  %v100_v48 = vld [vmem:[%s2825_s0 + $0x2b0] sm:$0xff] }
  0x79   :  { %v105_v47 = vld [vmem:[%s2825_s0 + $0x2d8] sm:$0xff] }
  0x7b   :  { %577 = vmatmul.mubr.f32.gmra.mrb[28].mxu0 %v56_v49  ;;  %817 = vmatmul.mubr.f32.gmra.mrb[28].mxu1 %v200_v50  ;;  %v104_v49 = vld [vmem:[%s2825_s0 + $0x2d0] sm:$0xff]  ;;  %v103_v50 = vld [vmem:[%s2825_s0 + $0x2c8] sm:$0xff] }
  0x7c   :  { %581 = vmatprep.mubr.f32.mxu0 %v60_v51  ;;  %821 = vmatprep.mubr.f32.mxu1 %v204_v52  ;;  %v108_v51 = vld [vmem:[%s2825_s0 + $0x2f0] sm:$0xff]  ;;  %v106_v52 = vld [vmem:[%s2825_s0 + $0x2e0] sm:$0xff] }
  0x7f   :  { %582 = vmatmul.mubr.f32.gmra.mrb[30].mxu0 %v59_v53  ;;  %822 = vmatmul.mubr.f32.gmra.mrb[30].mxu1 %v203_v54  ;;  %v107_v53 = vld [vmem:[%s2825_s0 + $0x2e8] sm:$0xff]  ;;  %v109_v54 = vld [vmem:[%s2825_s0 + $0x2f8] sm:$0xff] }
  0x80   :  { %586 = vmatprep.mubr.f32.mxu0 %v63_v55  ;;  %1486 = vmatprep.mubr.msk.f32.mxu1 %vm249_vm0, %v16_v56  ;;  %v111_v55 = vld [vmem:[%s2825_s0 + $0x308] sm:$0xff]  ;;  %v112_v56 = vld [vmem:[%s2825_s0 + $0x310] sm:$0xff] }
  0x83   :  { %587 = vmatmul.mubr.f32.gmra.mrb[32].mxu0 %v62_v57  ;;  %1487 = vmatmul.mubr.msk.f32.vlgmr.msra.gmra.mrb[32].mxu1 %vm249_vm0, %v19_v58  ;;  %v110_v57 = vld [vmem:[%s2825_s0 + $0x300] sm:$0xff]  ;;  %v115_v58 = vld [vmem:[%s2825_s0 + $0x328] sm:$0xff] }
  0x84   :  { %591 = vmatprep.mubr.f32.mxu0 %v66_v59  ;;  %1489 = vmatprep.mubr.msk.f32.mxu1 %vm249_vm0, %v22_v60  ;;  %v114_v59 = vld [vmem:[%s2825_s0 + $0x320] sm:$0xff] }
  0x85   :  { %v118_v60 = vld [vmem:[%s2825_s0 + $0x340] sm:$0xff] }
  0x87   :  { %592 = vmatmul.mubr.f32.gmra.mrb[34].mxu0 %v65_v61  ;;  %1490 = vmatmul.mubr.msk.f32.gmra.mrb[34].mxu1 %vm249_vm0, %v25_v62  ;;  %v113_v61 = vld [vmem:[%s2825_s0 + $0x318] sm:$0xff] }
  0x88   :  { %596 = vmatprep.mubr.f32.mxu0 %v69_v63  ;;  %1492 = vmatprep.mubr.msk.f32.mxu1 %vm249_vm0, %v28_v0  ;;  %v121_v62 = vld [vmem:[%s2825_s0 + $0x358] sm:$0xff]  ;;  %v124_v0 = vld [vmem:[%s2825_s0 + $0x370] sm:$0xff] }
  0x89   :  { %v117_v63 = vld [vmem:[%s2825_s0 + $0x338] sm:$0xff] }
  0x8b   :  { %597 = vmatmul.mubr.f32.gmra.mrb[36].mxu0 %v68_v1  ;;  %1493 = vmatmul.mubr.msk.f32.gmra.mrb[36].mxu1 %vm249_vm0, %v31_v2  ;;  %v116_v1 = vld [vmem:[%s2825_s0 + $0x330] sm:$0xff]  ;;  %v127_v2 = vld [vmem:[%s2825_s0 + $0x388] sm:$0xff] }
  0x8c   :  { %601 = vmatprep.mubr.f32.mxu0 %v72_v3  ;;  %1495 = vmatprep.mubr.msk.f32.mxu1 %vm249_vm0, %v34_v4  ;;  %v120_v3 = vld [vmem:[%s2825_s0 + $0x350] sm:$0xff]  ;;  %v130_v4 = vld [vmem:[%s2825_s0 + $0x3a0] sm:$0xff] }
  0x8f   :  { %602 = vmatmul.mubr.f32.gmra.mrb[38].mxu0 %v71_v5  ;;  %1496 = vmatmul.mubr.msk.f32.gmra.mrb[38].mxu1 %vm249_vm0, %v37_v6  ;;  %v119_v5 = vld [vmem:[%s2825_s0 + $0x348] sm:$0xff]  ;;  %v133_v6 = vld [vmem:[%s2825_s0 + $0x3b8] sm:$0xff] }
  0x90   :  { %606 = vmatprep.mubr.f32.mxu0 %v75_v7  ;;  %1498 = vmatprep.mubr.msk.f32.mxu1 %vm249_vm0, %v40_v8  ;;  %v123_v7 = vld [vmem:[%s2825_s0 + $0x368] sm:$0xff]  ;;  %v136_v8 = vld [vmem:[%s2825_s0 + $0x3d0] sm:$0xff] }
  0x93   :  { %607 = vmatmul.mubr.f32.gmra.mrb[40].mxu0 %v74_v9  ;;  %1499 = vmatmul.mubr.msk.f32.gmra.mrb[40].mxu1 %vm249_vm0, %v43_v10  ;;  %v122_v9 = vld [vmem:[%s2825_s0 + $0x360] sm:$0xff]  ;;  %v139_v10 = vld [vmem:[%s2825_s0 + $0x3e8] sm:$0xff] }
  0x94   :  { %611 = vmatprep.mubr.f32.mxu0 %v78_v11  ;;  %1501 = vmatprep.mubr.msk.f32.mxu1 %vm249_vm0, %v46_v12  ;;  %v126_v11 = vld [vmem:[%s2825_s0 + $0x380] sm:$0xff] }
  0x95   :  { %v142_v12 = vld [vmem:[%s2825_s0 + $0x400] sm:$0xff] }
  0x97   :  { %612 = vmatmul.mubr.f32.gmra.mrb[42].mxu0 %v77_v13  ;;  %1502 = vmatmul.mubr.msk.f32.gmra.mrb[42].mxu1 %vm249_vm0, %v49_v14  ;;  %v125_v13 = vld [vmem:[%s2825_s0 + $0x378] sm:$0xff] }
  0x98   :  { %616 = vmatprep.mubr.f32.mxu0 %v81_v15  ;;  %1504 = vmatprep.mubr.msk.f32.mxu1 %vm249_vm0, %v52_v16  ;;  %v145_v14 = vld [vmem:[%s2825_s0 + $0x418] sm:$0xff]  ;;  %v148_v16 = vld [vmem:[%s2825_s0 + $0x430] sm:$0xff] }
  0x99   :  { %v129_v15 = vld [vmem:[%s2825_s0 + $0x398] sm:$0xff] }
  0x9b   :  { %617 = vmatmul.mubr.f32.gmra.mrb[44].mxu0 %v80_v17  ;;  %1505 = vmatmul.mubr.msk.f32.gmra.mrb[44].mxu1 %vm249_vm0, %v55_v18  ;;  %v128_v17 = vld [vmem:[%s2825_s0 + $0x390] sm:$0xff]  ;;  %v151_v18 = vld [vmem:[%s2825_s0 + $0x448] sm:$0xff] }
  0x9c   :  { %621 = vmatprep.mubr.f32.mxu0 %v84_v19  ;;  %1507 = vmatprep.mubr.msk.f32.mxu1 %vm249_vm0, %v58_v20  ;;  %v132_v19 = vld [vmem:[%s2825_s0 + $0x3b0] sm:$0xff]  ;;  %v154_v20 = vld [vmem:[%s2825_s0 + $0x460] sm:$0xff] }
  0x9f   :  { %622 = vmatmul.mubr.f32.gmra.mrb[46].mxu0 %v83_v21  ;;  %1508 = vmatmul.mubr.msk.f32.gmra.mrb[46].mxu1 %vm249_vm0, %v61_v22  ;;  %v131_v21 = vld [vmem:[%s2825_s0 + $0x3a8] sm:$0xff]  ;;  %v157_v22 = vld [vmem:[%s2825_s0 + $0x478] sm:$0xff] }
  0xa0   :  { %626 = vmatprep.mubr.f32.mxu0 %v87_v23  ;;  %1510 = vmatprep.mubr.msk.f32.mxu1 %vm249_vm0, %v64_v24  ;;  %v135_v23 = vld [vmem:[%s2825_s0 + $0x3c8] sm:$0xff]  ;;  %v160_v24 = vld [vmem:[%s2825_s0 + $0x490] sm:$0xff] }
  0xa3   :  { %627 = vmatmul.mubr.f32.gmra.mrb[48].mxu0 %v86_v25  ;;  %1511 = vmatmul.mubr.msk.f32.gmra.mrb[48].mxu1 %vm249_vm0, %v67_v26  ;;  %v134_v25 = vld [vmem:[%s2825_s0 + $0x3c0] sm:$0xff]  ;;  %v163_v26 = vld [vmem:[%s2825_s0 + $0x4a8] sm:$0xff] }
  0xa4   :  { %631 = vmatprep.mubr.f32.mxu0 %v90_v27  ;;  %1513 = vmatprep.mubr.msk.f32.mxu1 %vm249_vm0, %v70_v28  ;;  %v138_v27 = vld [vmem:[%s2825_s0 + $0x3e0] sm:$0xff] }
  0xa5   :  { %v166_v28 = vld [vmem:[%s2825_s0 + $0x4c0] sm:$0xff] }
  0xa7   :  { %632 = vmatmul.mubr.f32.gmra.mrb[50].mxu0 %v89_v29  ;;  %1514 = vmatmul.mubr.msk.f32.gmra.mrb[50].mxu1 %vm249_vm0, %v73_v30  ;;  %v137_v29 = vld [vmem:[%s2825_s0 + $0x3d8] sm:$0xff] }
  0xa8   :  { %636 = vmatprep.mubr.f32.mxu0 %v93_v31  ;;  %1516 = vmatprep.mubr.msk.f32.mxu1 %vm249_vm0, %v76_v32  ;;  %v169_v30 = vld [vmem:[%s2825_s0 + $0x4d8] sm:$0xff]  ;;  %v172_v32 = vld [vmem:[%s2825_s0 + $0x4f0] sm:$0xff] }
  0xa9   :  { %v141_v31 = vld [vmem:[%s2825_s0 + $0x3f8] sm:$0xff] }
  0xab   :  { %637 = vmatmul.mubr.f32.gmra.mrb[52].mxu0 %v92_v33  ;;  %1517 = vmatmul.mubr.msk.f32.gmra.mrb[52].mxu1 %vm249_vm0, %v79_v34  ;;  %v140_v33 = vld [vmem:[%s2825_s0 + $0x3f0] sm:$0xff]  ;;  %v175_v34 = vld [vmem:[%s2825_s0 + $0x508] sm:$0xff] }
  0xac   :  { %641 = vmatprep.mubr.f32.mxu0 %v96_v35  ;;  %1519 = vmatprep.mubr.msk.f32.mxu1 %vm249_vm0, %v82_v36  ;;  %v144_v35 = vld [vmem:[%s2825_s0 + $0x410] sm:$0xff]  ;;  %v178_v36 = vld [vmem:[%s2825_s0 + $0x520] sm:$0xff] }
  0xaf   :  { %642 = vmatmul.mubr.f32.gmra.mrb[54].mxu0 %v95_v37  ;;  %1520 = vmatmul.mubr.msk.f32.gmra.mrb[54].mxu1 %vm249_vm0, %v85_v38  ;;  %v143_v37 = vld [vmem:[%s2825_s0 + $0x408] sm:$0xff]  ;;  %v181_v38 = vld [vmem:[%s2825_s0 + $0x538] sm:$0xff] }
  0xb0   :  { %646 = vmatprep.mubr.f32.mxu0 %v99_v39  ;;  %1522 = vmatprep.mubr.msk.f32.mxu1 %vm249_vm0, %v88_v40  ;;  %v147_v39 = vld [vmem:[%s2825_s0 + $0x428] sm:$0xff]  ;;  %v184_v40 = vld [vmem:[%s2825_s0 + $0x550] sm:$0xff] }
  0xb3   :  { %647 = vmatmul.mubr.f32.gmra.mrb[56].mxu0 %v98_v41  ;;  %1523 = vmatmul.mubr.msk.f32.gmra.mrb[56].mxu1 %vm249_vm0, %v91_v42  ;;  %v146_v41 = vld [vmem:[%s2825_s0 + $0x420] sm:$0xff]  ;;  %v187_v42 = vld [vmem:[%s2825_s0 + $0x568] sm:$0xff] }
  0xb4   :  { %651 = vmatprep.mubr.f32.mxu0 %v102_v43  ;;  %1525 = vmatprep.mubr.msk.f32.mxu1 %vm249_vm0, %v94_v44  ;;  %v150_v43 = vld [vmem:[%s2825_s0 + $0x440] sm:$0xff] }
  0xb5   :  { %v190_v44 = vld [vmem:[%s2825_s0 + $0x580] sm:$0xff] }
  0xb7   :  { %652 = vmatmul.mubr.f32.gmra.mrb[58].mxu0 %v101_v45  ;;  %1526 = vmatmul.mubr.msk.f32.gmra.mrb[58].mxu1 %vm249_vm0, %v97_v46  ;;  %v149_v45 = vld [vmem:[%s2825_s0 + $0x438] sm:$0xff] }
  0xb8   :  { %656 = vmatprep.mubr.f32.mxu0 %v105_v47  ;;  %1528 = vmatprep.mubr.msk.f32.mxu1 %vm249_vm0, %v100_v48  ;;  %v193_v46 = vld [vmem:[%s2825_s0 + $0x598] sm:$0xff]  ;;  %v196_v48 = vld [vmem:[%s2825_s0 + $0x5b0] sm:$0xff] }
  0xb9   :  { %v153_v47 = vld [vmem:[%s2825_s0 + $0x458] sm:$0xff] }
  0xbb   :  { %657 = vmatmul.mubr.f32.gmra.mrb[60].mxu0 %v104_v49  ;;  %1529 = vmatmul.mubr.msk.f32.gmra.mrb[60].mxu1 %vm249_vm0, %v103_v50  ;;  %v152_v49 = vld [vmem:[%s2825_s0 + $0x450] sm:$0xff]  ;;  %v199_v50 = vld [vmem:[%s2825_s0 + $0x5c8] sm:$0xff] }
  0xbc   :  { %661 = vmatprep.mubr.f32.mxu0 %v108_v51  ;;  %1531 = vmatprep.mubr.msk.f32.mxu1 %vm249_vm0, %v106_v52  ;;  %v156_v51 = vld [vmem:[%s2825_s0 + $0x470] sm:$0xff]  ;;  %v202_v52 = vld [vmem:[%s2825_s0 + $0x5e0] sm:$0xff] }
  0xbf   :  { %662 = vmatmul.mubr.f32.gmra.mrb[62].mxu0 %v107_v53  ;;  %1532 = vmatmul.mubr.msk.f32.gmra.mrb[62].mxu1 %vm249_vm0, %v109_v54  ;;  %v155_v53 = vld [vmem:[%s2825_s0 + $0x468] sm:$0xff]  ;;  %v205_v54 = vld [vmem:[%s2825_s0 + $0x5f8] sm:$0xff] }
  0xc0   :  { %666 = vmatprep.mubr.f32.mxu0 %v111_v55  ;;  %1534 = vmatprep.mubr.msk.f32.mxu1 %vm249_vm0, %v112_v56 }
  0xc3   :  { %667 = vmatmul.mubr.f32.gmra.mrb[64].mxu0 %v110_v57  ;;  %1535 = vmatmul.mubr.msk.f32.gmra.mrb[64].mxu1 %vm249_vm0, %v115_v58 }
  0xc4   :  { %671 = vmatprep.mubr.f32.mxu0 %v114_v59  ;;  %1537 = vmatprep.mubr.msk.f32.mxu1 %vm249_vm0, %v118_v60 }
  0xc7   :  { %672 = vmatmul.mubr.f32.gmra.mrb[66].mxu0 %v113_v61  ;;  %1538 = vmatmul.mubr.msk.f32.gmra.mrb[66].mxu1 %vm249_vm0, %v121_v62 }
  0xc8   :  { %676 = vmatprep.mubr.f32.mxu0 %v117_v63  ;;  %1540 = vmatprep.mubr.msk.f32.mxu1 %vm249_vm0, %v124_v0 }
  0xcb   :  { %677 = vmatmul.mubr.f32.gmra.mrb[68].mxu0 %v116_v1  ;;  %1541 = vmatmul.mubr.msk.f32.gmra.mrb[68].mxu1 %vm249_vm0, %v127_v2 }
  0xcc   :  { %681 = vmatprep.mubr.f32.mxu0 %v120_v3  ;;  %1543 = vmatprep.mubr.msk.f32.mxu1 %vm249_vm0, %v130_v4 }
  0xcf   :  { %682 = vmatmul.mubr.f32.gmra.mrb[70].mxu0 %v119_v5  ;;  %1544 = vmatmul.mubr.msk.f32.gmra.mrb[70].mxu1 %vm249_vm0, %v133_v6 }
  0xd0   :  { %686 = vmatprep.mubr.f32.mxu0 %v123_v7  ;;  %1546 = vmatprep.mubr.msk.f32.mxu1 %vm249_vm0, %v136_v8 }
  0xd3   :  { %687 = vmatmul.mubr.f32.gmra.mrb[72].mxu0 %v122_v9  ;;  %1547 = vmatmul.mubr.msk.f32.gmra.mrb[72].mxu1 %vm249_vm0, %v139_v10 }
  0xd4   :  { %691 = vmatprep.mubr.f32.mxu0 %v126_v11  ;;  %1549 = vmatprep.mubr.msk.f32.mxu1 %vm249_vm0, %v142_v12 }
  0xd7   :  { %692 = vmatmul.mubr.f32.gmra.mrb[74].mxu0 %v125_v13  ;;  %1550 = vmatmul.mubr.msk.f32.gmra.mrb[74].mxu1 %vm249_vm0, %v145_v14 }
  0xd8   :  { %696 = vmatprep.mubr.f32.mxu0 %v129_v15  ;;  %1552 = vmatprep.mubr.msk.f32.mxu1 %vm249_vm0, %v148_v16 }
  0xdb   :  { %697 = vmatmul.mubr.f32.gmra.mrb[76].mxu0 %v128_v17  ;;  %1553 = vmatmul.mubr.msk.f32.gmra.mrb[76].mxu1 %vm249_vm0, %v151_v18 }
  0xdc   :  { %701 = vmatprep.mubr.f32.mxu0 %v132_v19  ;;  %1555 = vmatprep.mubr.msk.f32.mxu1 %vm249_vm0, %v154_v20 }
  0xdf   :  { %702 = vmatmul.mubr.f32.gmra.mrb[78].mxu0 %v131_v21  ;;  %1556 = vmatmul.mubr.msk.f32.gmra.mrb[78].mxu1 %vm249_vm0, %v157_v22 }
  0xe0   :  { %706 = vmatprep.mubr.f32.mxu0 %v135_v23  ;;  %1558 = vmatprep.mubr.msk.f32.mxu1 %vm249_vm0, %v160_v24 }
  0xe3   :  { %707 = vmatmul.mubr.f32.gmra.mrb[80].mxu0 %v134_v25  ;;  %1559 = vmatmul.mubr.msk.f32.gmra.mrb[80].mxu1 %vm249_vm0, %v163_v26 }
  0xe4   :  { %711 = vmatprep.mubr.f32.mxu0 %v138_v27  ;;  %1561 = vmatprep.mubr.msk.f32.mxu1 %vm249_vm0, %v166_v28 }
  0xe7   :  { %712 = vmatmul.mubr.f32.gmra.mrb[82].mxu0 %v137_v29  ;;  %1562 = vmatmul.mubr.msk.f32.gmra.mrb[82].mxu1 %vm249_vm0, %v169_v30 }
  0xe8   :  { %716 = vmatprep.mubr.f32.mxu0 %v141_v31  ;;  %1564 = vmatprep.mubr.msk.f32.mxu1 %vm249_vm0, %v172_v32 }
  0xeb   :  { %717 = vmatmul.mubr.f32.gmra.mrb[84].mxu0 %v140_v33  ;;  %1565 = vmatmul.mubr.msk.f32.gmra.mrb[84].mxu1 %vm249_vm0, %v175_v34 }
  0xec   :  { %721 = vmatprep.mubr.f32.mxu0 %v144_v35  ;;  %1567 = vmatprep.mubr.msk.f32.mxu1 %vm249_vm0, %v178_v36 }
  0xef   :  { %722 = vmatmul.mubr.f32.gmra.mrb[86].mxu0 %v143_v37  ;;  %1568 = vmatmul.mubr.msk.f32.gmra.mrb[86].mxu1 %vm249_vm0, %v181_v38 }
  0xf0   :  { %726 = vmatprep.mubr.f32.mxu0 %v147_v39  ;;  %1570 = vmatprep.mubr.msk.f32.mxu1 %vm249_vm0, %v184_v40 }
  0xf3   :  { %727 = vmatmul.mubr.f32.gmra.mrb[88].mxu0 %v146_v41  ;;  %1571 = vmatmul.mubr.msk.f32.gmra.mrb[88].mxu1 %vm249_vm0, %v187_v42 }
  0xf4   :  { %731 = vmatprep.mubr.f32.mxu0 %v150_v43  ;;  %1573 = vmatprep.mubr.msk.f32.mxu1 %vm249_vm0, %v190_v44 }
  0xf7   :  { %732 = vmatmul.mubr.f32.gmra.mrb[90].mxu0 %v149_v45  ;;  %1574 = vmatmul.mubr.msk.f32.gmra.mrb[90].mxu1 %vm249_vm0, %v193_v46 }
  0xf8   :  { %736 = vmatprep.mubr.f32.mxu0 %v153_v47  ;;  %1576 = vmatprep.mubr.msk.f32.mxu1 %vm249_vm0, %v196_v48 }
  0xfb   :  { %737 = vmatmul.mubr.f32.gmra.mrb[92].mxu0 %v152_v49  ;;  %1577 = vmatmul.mubr.msk.f32.gmra.mrb[92].mxu1 %vm249_vm0, %v199_v50 }
  0xfc   :  { %741 = vmatprep.mubr.f32.mxu0 %v156_v51  ;;  %1579 = vmatprep.mubr.msk.f32.mxu1 %vm249_vm0, %v202_v52 }
  0xff   :  { %742 = vmatmul.mubr.f32.gmra.mrb[94].mxu0 %v155_v53  ;;  %1580 = vmatmul.mubr.msk.f32.gmra.mrb[94].mxu1 %vm249_vm0, %v205_v54  ;;  %v2523_v53 = vld [vmem:[%s2826_s2] ss:$0 sm:$0xff] }
 0x116   :  { %v2472_v55 = vpop.f32.mrb[0].mxu0  ;;  %v2474_v56 = vpop.f32.mrb[0].mxu1 }
 0x117   :  { %v510_v57 = vpop.f32.mrb[1].mxu0  ;;  %v750_v58 = vpop.f32.mrb[1].mxu1 }
 0x11a   :  { %v513_v59 = vpop.f32.mrb[2].mxu0  ;;  %v2476_v60 = vpop.f32.mrb[2].mxu1 }
 0x11b   :  { %v515_v61 = vpop.f32.mrb[3].mxu0  ;;  %v755_v62 = vpop.f32.mrb[3].mxu1  ;;  %v514_v58 = vadd.f32 %v2523_v53, %v513_v59 }
 0x11c   :  { %v509_v61 = vadd.f32 %v2523_v53, %v2472_v55 }
 0x11e   :  { %v2478_v63 = vpop.f32.mrb[4].mxu0  ;;  %v2480_v0 = vpop.f32.mrb[4].mxu1 }
 0x11f   :  { %v520_v1 = vpop.f32.mrb[5].mxu0  ;;  %v760_v2 = vpop.f32.mrb[5].mxu1 }
 0x122   :  { %v523_v3 = vpop.f32.mrb[6].mxu0  ;;  %v2482_v4 = vpop.f32.mrb[6].mxu1 }
 0x123   :  { %v525_v5 = vpop.f32.mrb[7].mxu0  ;;  %v765_v6 = vpop.f32.mrb[7].mxu1 }
 0x126   :  { %v2484_v7 = vpop.f32.mrb[8].mxu0  ;;  %v2486_v8 = vpop.f32.mrb[8].mxu1 }
 0x127   :  { %v530_v9 = vpop.f32.mrb[9].mxu0  ;;  %v770_v10 = vpop.f32.mrb[9].mxu1 }
 0x128   :  { %v524_v10 = vadd.f32 %v2523_v53, %v523_v3 }
 0x12a   :  { %v533_v11 = vpop.f32.mrb[10].mxu0  ;;  %v2488_v12 = vpop.f32.mrb[10].mxu1 }
 0x12b   :  { %v535_v13 = vpop.f32.mrb[11].mxu0  ;;  %v775_v14 = vpop.f32.mrb[11].mxu1 }
 0x12c   :  { %v519_v13 = vadd.f32 %v2523_v53, %v2478_v63 }
 0x12e   :  { %v2490_v15 = vpop.f32.mrb[12].mxu0  ;;  %v2492_v16 = vpop.f32.mrb[12].mxu1 }
 0x12f   :  { %v540_v17 = vpop.f32.mrb[13].mxu0  ;;  %v780_v18 = vpop.f32.mrb[13].mxu1 }
 0x132   :  { %v543_v19 = vpop.f32.mrb[14].mxu0  ;;  %v2494_v20 = vpop.f32.mrb[14].mxu1 }
 0x133   :  { %v545_v21 = vpop.f32.mrb[15].mxu0  ;;  %v785_v22 = vpop.f32.mrb[15].mxu1 }
 0x134   :  { %v534_v22 = vadd.f32 %v2523_v53, %v533_v11 }
 0x136   :  { %v2496_v23 = vpop.f32.mrb[16].mxu0  ;;  %v2498_v24 = vpop.f32.mrb[16].mxu1 }
 0x137   :  { %v550_v25 = vpop.f32.mrb[17].mxu0  ;;  %v790_v26 = vpop.f32.mrb[17].mxu1 }
 0x138   :  { %v529_v25 = vadd.f32 %v2523_v53, %v2484_v7 }
 0x13a   :  { %v553_v27 = vpop.f32.mrb[18].mxu0  ;;  %v2500_v28 = vpop.f32.mrb[18].mxu1 }
 0x13b   :  { %v555_v29 = vpop.f32.mrb[19].mxu0  ;;  %v795_v30 = vpop.f32.mrb[19].mxu1 }
 0x13e   :  { %v2502_v31 = vpop.f32.mrb[20].mxu0  ;;  %v2504_v32 = vpop.f32.mrb[20].mxu1 }
 0x13f   :  { %v560_v33 = vpop.f32.mrb[21].mxu0  ;;  %v800_v34 = vpop.f32.mrb[21].mxu1 }
 0x140   :  { %v544_v34 = vadd.f32 %v2523_v53, %v543_v19 }
 0x142   :  { %v563_v35 = vpop.f32.mrb[22].mxu0  ;;  %v2506_v36 = vpop.f32.mrb[22].mxu1 }
 0x143   :  { %v565_v37 = vpop.f32.mrb[23].mxu0  ;;  %v805_v38 = vpop.f32.mrb[23].mxu1 }
 0x144   :  { %v539_v37 = vadd.f32 %v2523_v53, %v2490_v15 }
 0x146   :  { %v2508_v39 = vpop.f32.mrb[24].mxu0  ;;  %v2510_v40 = vpop.f32.mrb[24].mxu1 }
 0x147   :  { %v570_v41 = vpop.f32.mrb[25].mxu0  ;;  %v810_v42 = vpop.f32.mrb[25].mxu1 }
 0x14a   :  { %v573_v43 = vpop.f32.mrb[26].mxu0  ;;  %v2512_v44 = vpop.f32.mrb[26].mxu1 }
 0x14b   :  { %v575_v45 = vpop.f32.mrb[27].mxu0  ;;  %v815_v46 = vpop.f32.mrb[27].mxu1 }
 0x14c   :  { %v554_v46 = vadd.f32 %v2523_v53, %v553_v27 }
 0x14e   :  { %v2514_v47 = vpop.f32.mrb[28].mxu0  ;;  %v2516_v48 = vpop.f32.mrb[28].mxu1 }
 0x14f   :  { %v580_v49 = vpop.f32.mrb[29].mxu0  ;;  %v820_v50 = vpop.f32.mrb[29].mxu1 }
 0x150   :  { %v549_v49 = vadd.f32 %v2523_v53, %v2496_v23 }
 0x152   :  { %v583_v51 = vpop.f32.mrb[30].mxu0  ;;  %v2518_v52 = vpop.f32.mrb[30].mxu1 }
 0x153   :  { %v585_v54 = vpop.f32.mrb[31].mxu0  ;;  %v825_v57 = vpop.f32.mrb[31].mxu1 }
 0x156   :  { %v2528_v62 = vpop.f32.mrb[32].mxu0  ;;  %v1488_v1 = vpop.f32.mrb[32].mxu1 }
 0x157   :  { %v2530_v2 = vadd.f32 %v1488_v1, %v514_v58  ;;  %v590_v5 = vpop.f32.mrb[33].mxu0  ;;  %v893_v6 = vpop.f32.mrb[33].mxu1  ;;  %v559_v1 = vadd.f32 %v2523_v53, %v2502_v31 }
 0x158   :  { %v2532_v9 = vadd.f32 %v893_v6, %v509_v61  ;;  %v564_v61 = vadd.f32 %v2523_v53, %v563_v35 }
 0x15a   :  { %v593_v14 = vpop.f32.mrb[34].mxu0  ;;  %v1491_v17 = vpop.f32.mrb[34].mxu1 }
 0x15b   :  { %v2537_v59 = vadd.f32 %v1491_v17, %v524_v10  ;;  %v595_v18 = vpop.f32.mrb[35].mxu0  ;;  %v903_v55 = vpop.f32.mrb[35].mxu1  ;;  %v574_v17 = vadd.f32 %v2523_v53, %v573_v43 }
 0x15c   :  { %v2539_v21 = vadd.f32 %v903_v55, %v519_v13  ;;  %v569_v18 = vadd.f32 %v2523_v53, %v2508_v39 }
 0x15e   :  { %v598_v26 = vpop.f32.mrb[36].mxu0  ;;  %v1494_v29 = vpop.f32.mrb[36].mxu1 }
 0x15f   :  { %v2544_v30 = vadd.f32 %v1494_v29, %v534_v22  ;;  %v600_v3 = vpop.f32.mrb[37].mxu0  ;;  %v913_v33 = vpop.f32.mrb[37].mxu1 }
 0x160   :  { %v2546_v63 = vadd.f32 %v913_v33, %v529_v25  ;;  %v584_v3 = vadd.f32 %v2523_v53, %v583_v51  ;;  %v579_v33 = vadd.f32 %v2523_v53, %v2514_v47  ;;  %v1213_v47 = vmax.f32 %v2530_v2, 0.0 }
 0x161   :  { %v1215_v2 = vmax.f32 %v2537_v59, 0.0  ;;  %v1217_v59 = vmax.f32 %v2544_v30, 0.0 }
 0x162   :  { %v603_v38 = vpop.f32.mrb[38].mxu0  ;;  %v1497_v41 = vpop.f32.mrb[38].mxu1 }
 0x163   :  { %v2551_v42 = vadd.f32 %v1497_v41, %v544_v34  ;;  %v605_v11 = vpop.f32.mrb[39].mxu0  ;;  %v923_v45 = vpop.f32.mrb[39].mxu1 }
 0x164   :  { %v2553_v7 = vadd.f32 %v923_v45, %v539_v37  ;;  %v594_v45 = vadd.f32 %v2523_v53, %v593_v14 }
 0x165   :  { %v1219_v30 = vmax.f32 %v2551_v42, 0.0 }
 0x166   :  { %v608_v50 = vpop.f32.mrb[40].mxu0  ;;  %v1500_v54 = vpop.f32.mrb[40].mxu1 }
 0x167   :  { %v2558_v57 = vadd.f32 %v1500_v54, %v554_v46  ;;  %v610_v19 = vpop.f32.mrb[41].mxu0  ;;  %v933_v58 = vpop.f32.mrb[41].mxu1  ;;  %v589_v46 = vadd.f32 %v2523_v53, %v2528_v62 }
 0x168   :  { %v2560_v15 = vadd.f32 %v933_v58, %v549_v49 }
 0x169   :  { %v1221_v42 = vmax.f32 %v2558_v57, 0.0 }
 0x16a   :  { %v613_v5 = vpop.f32.mrb[42].mxu0  ;;  %v1503_v6 = vpop.f32.mrb[42].mxu1 }
 0x16b   :  { %v2565_v10 = vadd.f32 %v1503_v6, %v564_v61  ;;  %v615_v27 = vpop.f32.mrb[43].mxu0  ;;  %v943_v13 = vpop.f32.mrb[43].mxu1 }
 0x16c   :  { %v2567_v23 = vadd.f32 %v943_v13, %v559_v1  ;;  %v604_v1 = vadd.f32 %v2523_v53, %v603_v38  ;;  %v1212_v27 = vmax.f32 %v2532_v9, 0.0  ;;  %v599_v13 = vadd.f32 %v2523_v53, %v598_v26 }
 0x16d   :  { %v614_v38 = vadd.f32 %v2523_v53, %v613_v5  ;;  %v1214_v9 = vmax.f32 %v2539_v21, 0.0  ;;  %v609_v26 = vadd.f32 %v2523_v53, %v608_v50  ;;  %v1216_v21 = vmax.f32 %v2546_v63, 0.0 }
 0x16e   :  { %v618_v55 = vpop.f32.mrb[44].mxu0  ;;  %v1506_v22 = vpop.f32.mrb[44].mxu1  ;;  %v1218_v63 = vmax.f32 %v2553_v7, 0.0  ;;  %v1220_v7 = vmax.f32 %v2560_v15, 0.0  ;;  %v1223_v57 = vmax.f32 %v2565_v10, 0.0  ;;  %v1222_v15 = vmax.f32 %v2567_v23, 0.0 }
 0x16f   :  { %v2572_v25 = vadd.f32 %v1506_v22, %v574_v17  ;;  %v620_v35 = vpop.f32.mrb[45].mxu0  ;;  %v953_v29 = vpop.f32.mrb[45].mxu1  ;;  %v619_v50 = vadd.f32 %v2523_v53, %v618_v55 }
 0x170   :  { %v2574_v31 = vadd.f32 %v953_v29, %v569_v18 }
 0x171   :  { %v1225_v10 = vmax.f32 %v2572_v25, 0.0 }
 0x172   :  { %v623_v34 = vpop.f32.mrb[46].mxu0  ;;  %v1509_v37 = vpop.f32.mrb[46].mxu1 }
 0x173   :  { %v2579_v41 = vadd.f32 %v1509_v37, %v584_v3  ;;  %v625_v43 = vpop.f32.mrb[47].mxu0  ;;  %v963_v11 = vpop.f32.mrb[47].mxu1  ;;  %v624_v5 = vadd.f32 %v2523_v53, %v623_v34 }
 0x174   :  { %v2581_v39 = vadd.f32 %v963_v11, %v579_v33 }
 0x176   :  { %v628_v49 = vpop.f32.mrb[48].mxu0  ;;  %v1512_v54 = vpop.f32.mrb[48].mxu1  ;;  %v1226_v25 = vmax.f32 %v2581_v39, 0.0 }
 0x177   :  { %v979_v19 = vadd.f32 %v1512_v54, %v594_v45  ;;  %v630_v51 = vpop.f32.mrb[49].mxu0  ;;  %v973_v58 = vpop.f32.mrb[49].mxu1  ;;  %v629_v55 = vadd.f32 %v2523_v53, %v628_v49 }
 0x178   :  { %v974_v61 = vadd.f32 %v973_v58, %v589_v46 }
 0x179   :  { %v1229_v6 = vmax.f32 %v979_v19, 0.0 }
 0x17a   :  { %v1228_v17 = vmax.f32 %v974_v61, 0.0  ;;  %v633_v14 = vpop.f32.mrb[50].mxu0  ;;  %v1515_v18 = vpop.f32.mrb[50].mxu1 }
 0x17b   :  { %v2590_v22 = vmax.f32 %v1213_v47, %v1229_v6  ;;  %v989_v62 = vadd.f32 %v1515_v18, %v604_v1  ;;  %v635_v35 = vpop.f32.mrb[51].mxu0  ;;  %v983_v29 = vpop.f32.mrb[51].mxu1  ;;  %v634_v34 = vadd.f32 %v2523_v53, %v633_v14 }
 0x17c   :  { %v2592_v3 = vmax.f32 %v1212_v27, %v1228_v17  ;;  %v984_v33 = vadd.f32 %v983_v29, %v599_v13 }
 0x17d   :  { %v1231_v37 = vmax.f32 %v989_v62, 0.0 }
 0x17e   :  { %v1230_v43 = vmax.f32 %v984_v33, 0.0  ;;  %v638_v11 = vpop.f32.mrb[52].mxu0  ;;  %v1518_v45 = vpop.f32.mrb[52].mxu1 }
 0x17f   :  { %v2598_v46 = vmax.f32 %v1215_v2, %v1231_v37  ;;  %v999_v54 = vadd.f32 %v1518_v45, %v614_v38  ;;  %v640_v19 = vpop.f32.mrb[53].mxu0  ;;  %v993_v51 = vpop.f32.mrb[53].mxu1  ;;  %v639_v49 = vadd.f32 %v2523_v53, %v638_v11 }
 0x180   :  { %v2600_v58 = vmax.f32 %v1214_v9, %v1230_v43  ;;  %v994_v61 = vadd.f32 %v993_v51, %v609_v26 }
 0x181   :  { %v1233_v47 = vmax.f32 %v999_v54, 0.0 }
 0x182   :  { %v1232_v1 = vmax.f32 %v994_v61, 0.0  ;;  %v643_v6 = vpop.f32.mrb[54].mxu0  ;;  %v1521_v27 = vpop.f32.mrb[54].mxu1 }
 0x183   :  { %v2606_v13 = vmax.f32 %v1217_v59, %v1233_v47  ;;  %v1009_v17 = vadd.f32 %v1521_v27, %v624_v5  ;;  %v645_v18 = vpop.f32.mrb[55].mxu0  ;;  %v1003_v62 = vpop.f32.mrb[55].mxu1  ;;  %v644_v14 = vadd.f32 %v2523_v53, %v643_v6 }
 0x184   :  { %v2608_v35 = vmax.f32 %v1216_v21, %v1232_v1  ;;  %v1004_v29 = vadd.f32 %v1003_v62, %v619_v50 }
 0x185   :  { %v1235_v33 = vmax.f32 %v1009_v17, 0.0 }
 0x186   :  { %v1234_v2 = vmax.f32 %v1004_v29, 0.0  ;;  %v648_v38 = vpop.f32.mrb[56].mxu0  ;;  %v1524_v37 = vpop.f32.mrb[56].mxu1 }
 0x187   :  { %v2614_v9 = vmax.f32 %v1219_v30, %v1235_v33  ;;  %v1019_v26 = vadd.f32 %v1524_v37, %v634_v34  ;;  %v650_v43 = vpop.f32.mrb[57].mxu0  ;;  %v1013_v45 = vpop.f32.mrb[57].mxu1  ;;  %v649_v11 = vadd.f32 %v2523_v53, %v648_v38 }
 0x188   :  { %v2616_v54 = vmax.f32 %v1218_v63, %v1234_v2  ;;  %v1014_v19 = vadd.f32 %v1013_v45, %v629_v55  ;;  %v1224_v43 = vmax.f32 %v2574_v31, 0.0 }
 0x189   :  { %v1237_v51 = vmax.f32 %v1019_v26, 0.0 }
 0x18a   :  { %v1236_v61 = vmax.f32 %v1014_v19, 0.0  ;;  %v653_v59 = vpop.f32.mrb[58].mxu0  ;;  %v1527_v5 = vpop.f32.mrb[58].mxu1 }
 0x18b   :  { %v2622_v47 = vmax.f32 %v1221_v42, %v1237_v51  ;;  %v1029_v21 = vadd.f32 %v1527_v5, %v644_v14  ;;  %v655_v50 = vpop.f32.mrb[59].mxu0  ;;  %v1023_v1 = vpop.f32.mrb[59].mxu1  ;;  %v654_v6 = vadd.f32 %v2523_v53, %v653_v59 }
 0x18c   :  { %v2624_v27 = vmax.f32 %v1220_v7, %v1236_v61  ;;  %v1024_v17 = vadd.f32 %v1023_v1, %v639_v49  ;;  %v1227_v50 = vmax.f32 %v2579_v41, 0.0 }
 0x18d   :  { %v1239_v18 = vmax.f32 %v1029_v21, 0.0 }
 0x18e   :  { %v1238_v62 = vmax.f32 %v1024_v17, 0.0  ;;  %v658_v29 = vpop.f32.mrb[60].mxu0  ;;  %v1530_v30 = vpop.f32.mrb[60].mxu1 }
 0x18f   :  { %v2630_v34 = vmax.f32 %v1223_v57, %v1239_v18  ;;  %v1039_v33 = vadd.f32 %v1530_v30, %v654_v6  ;;  %v660_v63 = vpop.f32.mrb[61].mxu0  ;;  %v1033_v55 = vpop.f32.mrb[61].mxu1  ;;  %v659_v23 = vadd.f32 %v2523_v53, %v658_v29 }
 0x190   :  { %v2632_v2 = vmax.f32 %v1222_v15, %v1238_v62  ;;  %v1034_v37 = vadd.f32 %v1033_v55, %v649_v11 }
 0x191   :  { %v1241_v26 = vmax.f32 %v1039_v33, 0.0 }
 0x192   :  { %v1240_v45 = vmax.f32 %v1034_v37, 0.0  ;;  %v663_v38 = vpop.f32.mrb[62].mxu0  ;;  %v1533_v19 = vpop.f32.mrb[62].mxu1 }
 0x193   :  { %v2637_v42 = vmax.f32 %v1225_v10, %v1241_v26  ;;  %v664_v14 = vadd.f32 %v2523_v53, %v663_v38  ;;  %v665_v51 = vpop.f32.mrb[63].mxu0  ;;  %v1043_v7 = vpop.f32.mrb[63].mxu1 }
 0x194   :  { %v2640_v49 = vmax.f32 %v1224_v43, %v1240_v45  ;;  %v1044_v61 = vadd.f32 %v1043_v7, %v659_v23 }
 0x195   :  { %v1049_v59 = vadd.f32 %v1533_v19, %v664_v14 }
 0x196   :  { %v1242_v5 = vmax.f32 %v1044_v61, 0.0  ;;  %v668_v21 = vpop.f32.mrb[64].mxu0  ;;  %v1536_v31 = vpop.f32.mrb[64].mxu1 }
 0x197   :  { %v1243_v1 = vmax.f32 %v1049_v59, 0.0  ;;  %v669_v17 = vadd.f32 %v2523_v53, %v668_v21  ;;  %v670_v57 = vpop.f32.mrb[65].mxu0  ;;  %v1053_v6 = vpop.f32.mrb[65].mxu1 }
 0x198   :  { %v2645_v18 = vmax.f32 %v1226_v25, %v1242_v5 }
 0x199   :  { %v2647_v15 = vmax.f32 %v1227_v50, %v1243_v1  ;;  %v2649_v11 = vadd.f32 %v1053_v6, %v669_v17 }
 0x19a   :  { %v673_v62 = vpop.f32.mrb[66].mxu0  ;;  %v1539_v29 = vpop.f32.mrb[66].mxu1 }
 0x19b   :  { %2828 = vst [vmem:[#allocation2_spill] sm:$0xff] %v2647_v15  ;;  %v674_v39 = vadd.f32 %v2523_v53, %v673_v62  ;;  %v675_v30 = vpop.f32.mrb[67].mxu0  ;;  %v1063_v33 = vpop.f32.mrb[67].mxu1 }
 0x19d   :  { %v1059_v63 = vadd.f32 %v1536_v31, %v674_v39 }
 0x19e   :  { %v678_v55 = vpop.f32.mrb[68].mxu0  ;;  %v1542_v41 = vpop.f32.mrb[68].mxu1 }
 0x19f   :  { %v679_v37 = vadd.f32 %v2523_v53, %v678_v55  ;;  %v680_v10 = vpop.f32.mrb[69].mxu0  ;;  %v1073_v26 = vpop.f32.mrb[69].mxu1 }
 0x1a1   :  { %v2653_v43 = vadd.f32 %v1063_v33, %v679_v37 }
 0x1a2   :  { %v683_v23 = vpop.f32.mrb[70].mxu0  ;;  %v1545_v45 = vpop.f32.mrb[70].mxu1 }
 0x1a3   :  { %v684_v38 = vadd.f32 %v2523_v53, %v683_v23  ;;  %v685_v19 = vpop.f32.mrb[71].mxu0  ;;  %v1083_v14 = vpop.f32.mrb[71].mxu1 }
 0x1a5   :  { %v2656_v51 = vadd.f32 %v1539_v29, %v684_v38 }
 0x1a6   :  { %v688_v7 = vpop.f32.mrb[72].mxu0  ;;  %v1548_v61 = vpop.f32.mrb[72].mxu1 }
 0x1a7   :  { %v689_v59 = vadd.f32 %v2523_v53, %v688_v7  ;;  %v690_v25 = vpop.f32.mrb[73].mxu0  ;;  %v1093_v5 = vpop.f32.mrb[73].mxu1  ;;  %v749_v7 = vadd.f32 %v2523_v53, %v2474_v56  ;;  %v1244_v56 = vmax.f32 %v2649_v11, 0.0 }
 0x1a9   :  { %v2659_v21 = vadd.f32 %v1073_v26, %v689_v59 }
 0x1aa   :  { %v693_v31 = vpop.f32.mrb[74].mxu0  ;;  %v2661_v50 = vpop.f32.mrb[74].mxu1 }
 0x1ab   :  { %v694_v1 = vadd.f32 %v2523_v53, %v693_v31  ;;  %v695_v17 = vpop.f32.mrb[75].mxu0  ;;  %v2664_v57 = vpop.f32.mrb[75].mxu1 }
 0x1ad   :  { %v2666_v6 = vadd.f32 %v1542_v41, %v694_v1  ;;  %v754_v41 = vadd.f32 %v2523_v53, %v2476_v60 }
 0x1ae   :  { %v698_v62 = vpop.f32.mrb[76].mxu0  ;;  %v2668_v29 = vpop.f32.mrb[76].mxu1 }
 0x1af   :  { %v699_v39 = vadd.f32 %v2523_v53, %v698_v62  ;;  %v700_v30 = vpop.f32.mrb[77].mxu0  ;;  %v2671_v33 = vpop.f32.mrb[77].mxu1 }
 0x1b0   :  { %v1245_v30 = vmax.f32 %v1059_v63, 0.0 }
 0x1b1   :  { %v2673_v55 = vadd.f32 %v1083_v14, %v699_v39  ;;  %v764_v39 = vadd.f32 %v2523_v53, %v2482_v4  ;;  %v774_v4 = vadd.f32 %v2523_v53, %v2488_v12 }
 0x1b2   :  { %v703_v37 = vpop.f32.mrb[78].mxu0  ;;  %v2675_v10 = vpop.f32.mrb[78].mxu1 }
 0x1b3   :  { %v704_v26 = vadd.f32 %v2523_v53, %v703_v37  ;;  %v705_v23 = vpop.f32.mrb[79].mxu0  ;;  %v2678_v38 = vpop.f32.mrb[79].mxu1 }
 0x1b5   :  { %v2682_v19 = vadd.f32 %v1545_v45, %v704_v26  ;;  %v759_v45 = vadd.f32 %v2523_v53, %v2480_v0 }
 0x1b6   :  { %v708_v59 = vpop.f32.mrb[80].mxu0  ;;  %v1560_v25 = vpop.f32.mrb[80].mxu1 }
 0x1b7   :  { %v709_v14 = vadd.f32 %v2523_v53, %v708_v59  ;;  %v1139_v31 = vadd.f32 %v1560_v25, %v754_v41  ;;  %v710_v1 = vpop.f32.mrb[81].mxu0  ;;  %v1133_v17 = vpop.f32.mrb[81].mxu1 }
 0x1b8   :  { %v1134_v62 = vadd.f32 %v1133_v17, %v749_v7  ;;  %v769_v17 = vadd.f32 %v2523_v53, %v2486_v8  ;;  %v784_v8 = vadd.f32 %v2523_v53, %v2494_v20  ;;  %v1248_v20 = vmax.f32 %v2659_v21, 0.0 }
 0x1b9   :  { %v2689_v37 = vadd.f32 %v1093_v5, %v709_v14  ;;  %v1261_v60 = vmax.f32 %v1139_v31, 0.0  ;;  %v1247_v14 = vmax.f32 %v2656_v51, 0.0 }
 0x1ba   :  { %v1260_v26 = vmax.f32 %v1134_v62, 0.0  ;;  %v713_v23 = vpop.f32.mrb[82].mxu0  ;;  %v1563_v15 = vpop.f32.mrb[82].mxu1 }
 0x1bb   :  { %v1293_v59 = vmax.f32 %v1245_v30, %v1261_v60  ;;  %v714_v41 = vadd.f32 %v2523_v53, %v713_v23  ;;  %v1149_v25 = vadd.f32 %v1563_v15, %v764_v39  ;;  %v715_v7 = vpop.f32.mrb[83].mxu0  ;;  %v1143_v1 = vpop.f32.mrb[83].mxu1  ;;  %v1246_v15 = vmax.f32 %v2653_v43, 0.0 }
 0x1bc   :  { %v1292_v63 = vmax.f32 %v1244_v56, %v1260_v26  ;;  %v1144_v5 = vadd.f32 %v1143_v1, %v759_v45  ;;  %v1249_v56 = vmax.f32 %v2666_v6, 0.0 }
 0x1bd   :  { %v1309_v0 = vmax.f32 %v2590_v22, %v1293_v59  ;;  %v2699_v11 = vadd.f32 %v1548_v61, %v714_v41  ;;  %v1263_v31 = vmax.f32 %v1149_v25, 0.0  ;;  %v779_v41 = vadd.f32 %v2523_v53, %v2492_v16 }
 0x1be   :  { %v1308_v62 = vmax.f32 %v2592_v3, %v1292_v63  ;;  %v1262_v39 = vmax.f32 %v1144_v5, 0.0  ;;  %v718_v30 = vpop.f32.mrb[84].mxu0  ;;  %v1566_v12 = vpop.f32.mrb[84].mxu1  ;;  %v794_v16 = vadd.f32 %v2523_v53, %v2500_v28 }
 0x1bf   :  { %1326 = vst.msk [vmem:[%s2827_s3 + $0x8] sm:$0xff] %vm1324_vm1, %v1309_v0  ;;  %v1295_v51 = vmax.f32 %v1247_v14, %v1263_v31  ;;  %v719_v22 = vadd.f32 %v2523_v53, %v718_v30  ;;  %v1159_v61 = vadd.f32 %v1566_v12, %v774_v4  ;;  %v720_v60 = vpop.f32.mrb[85].mxu0  ;;  %v1153_v45 = vpop.f32.mrb[85].mxu1  ;;  %v1251_v14 = vmax.f32 %v2682_v19, 0.0 }
 0x1c0   :  { %1325 = vst.msk [vmem:[%s2827_s3] sm:$0xff] %vm1324_vm1, %v1308_v62  ;;  %v1294_v3 = vmax.f32 %v1246_v15, %v1262_v39  ;;  %v1154_v43 = vadd.f32 %v1153_v45, %v769_v17  ;;  %v789_v15 = vadd.f32 %v2523_v53, %v2498_v24  ;;  %v1250_v62 = vmax.f32 %v2673_v55, 0.0 }
 0x1c1   :  { %v1311_v26 = vmax.f32 %v2598_v46, %v1295_v51  ;;  %v2719_v23 = vadd.f32 %v2664_v57, %v719_v22  ;;  %v1265_v59 = vmax.f32 %v1159_v61, 0.0  ;;  %v804_v24 = vadd.f32 %v2523_v53, %v2506_v36 }
 0x1c2   :  { %v1310_v25 = vmax.f32 %v2600_v58, %v1294_v3  ;;  %v1264_v7 = vmax.f32 %v1154_v43, 0.0  ;;  %v723_v1 = vpop.f32.mrb[86].mxu0  ;;  %v1569_v4 = vpop.f32.mrb[86].mxu1  ;;  %v1253_v61 = vmax.f32 %v2699_v11, 0.0  ;;  %v799_v3 = vadd.f32 %v2523_v53, %v2504_v32 }
 0x1c3   :  { %1328 = vst.msk [vmem:[%s2827_s3 + $0x18] sm:$0xff] %vm1324_vm1, %v1311_v26  ;;  %v1297_v46 = vmax.f32 %v1249_v56, %v1265_v59  ;;  %v724_v57 = vadd.f32 %v2523_v53, %v723_v1  ;;  %v1169_v6 = vadd.f32 %v1569_v4, %v784_v8  ;;  %v725_v63 = vpop.f32.mrb[87].mxu0  ;;  %v1163_v5 = vpop.f32.mrb[87].mxu1  ;;  %v1252_v43 = vmax.f32 %v2689_v37, 0.0 }
 0x1c4   :  { %1327 = vst.msk [vmem:[%s2827_s3 + $0x10] sm:$0xff] %vm1324_vm1, %v1310_v25  ;;  %v1296_v58 = vmax.f32 %v1248_v20, %v1264_v7  ;;  %v1164_v21 = vadd.f32 %v1163_v5, %v779_v41  ;;  %v814_v32 = vadd.f32 %v2523_v53, %v2512_v44 }
 0x1c5   :  { %v1313_v0 = vmax.f32 %v2606_v13, %v1297_v46  ;;  %v1109_v31 = vadd.f32 %v2661_v50, %v724_v57  ;;  %v1267_v17 = vmax.f32 %v1169_v6, 0.0  ;;  %v809_v46 = vadd.f32 %v2523_v53, %v2510_v40 }
 0x1c6   :  { %v1312_v28 = vmax.f32 %v2608_v35, %v1296_v58  ;;  %v1266_v39 = vmax.f32 %v1164_v21, 0.0  ;;  %v728_v30 = vpop.f32.mrb[88].mxu0  ;;  %v1572_v12 = vpop.f32.mrb[88].mxu1  ;;  %v1254_v57 = vmax.f32 %v2719_v23, 0.0  ;;  %v824_v40 = vadd.f32 %v2523_v53, %v2518_v52 }
 0x1c7   :  { %1330 = vst.msk [vmem:[%s2827_s3 + $0x28] sm:$0xff] %vm1324_vm1, %v1313_v0  ;;  %v1299_v19 = vmax.f32 %v1251_v14, %v1267_v17  ;;  %v729_v13 = vadd.f32 %v2523_v53, %v728_v30  ;;  %v1179_v50 = vadd.f32 %v1572_v12, %v794_v16  ;;  %v730_v51 = vpop.f32.mrb[89].mxu0  ;;  %v1173_v22 = vpop.f32.mrb[89].mxu1  ;;  %v1255_v25 = vmax.f32 %v1109_v31, 0.0 }
 0x1c8   :  { %1329 = vst.msk [vmem:[%s2827_s3 + $0x20] sm:$0xff] %vm1324_vm1, %v1312_v28  ;;  %v1298_v35 = vmax.f32 %v1250_v62, %v1266_v39  ;;  %v1174_v55 = vadd.f32 %v1173_v22, %v789_v15  ;;  %v819_v15 = vadd.f32 %v2523_v53, %v2516_v48 }
 0x1c9   :  { %v1315_v60 = vmax.f32 %v2614_v9, %v1299_v19  ;;  %v1114_v45 = vadd.f32 %v2671_v33, %v729_v13  ;;  %v1269_v8 = vmax.f32 %v1179_v50, 0.0 }
 0x1ca   :  { %v1314_v36 = vmax.f32 %v2616_v54, %v1298_v35  ;;  %v1268_v56 = vmax.f32 %v1174_v55, 0.0  ;;  %v733_v26 = vpop.f32.mrb[90].mxu0  ;;  %v1575_v59 = vpop.f32.mrb[90].mxu1 }
 0x1cb   :  { %1332 = vst.msk [vmem:[%s2827_s3 + $0x38] sm:$0xff] %vm1324_vm1, %v1315_v60  ;;  %v1301_v11 = vmax.f32 %v1253_v61, %v1269_v8  ;;  %v734_v9 = vadd.f32 %v2523_v53, %v733_v26  ;;  %v1189_v33 = vadd.f32 %v1575_v59, %v804_v24  ;;  %v735_v41 = vpop.f32.mrb[91].mxu0  ;;  %v1183_v20 = vpop.f32.mrb[91].mxu1  ;;  %v1256_v62 = vmax.f32 %v1114_v45, 0.0  ;;  %v2829_v60 = vld [vmem:[#allocation2_spill] sm:$0xff] }
 0x1cc   :  { %1331 = vst.msk [vmem:[%s2827_s3 + $0x30] sm:$0xff] %vm1324_vm1, %v1314_v36  ;;  %v1300_v54 = vmax.f32 %v1252_v43, %v1268_v56  ;;  %v1184_v37 = vadd.f32 %v1183_v20, %v799_v3 }
 0x1cd   :  { %v1317_v7 = vmax.f32 %v2622_v47, %v1301_v11  ;;  %v1119_v1 = vadd.f32 %v2668_v29, %v734_v9  ;;  %v1271_v4 = vmax.f32 %v1189_v33, 0.0 }
 0x1ce   :  { %v1316_v44 = vmax.f32 %v2624_v27, %v1300_v54  ;;  %v1270_v6 = vmax.f32 %v1184_v37, 0.0  ;;  %v738_v63 = vpop.f32.mrb[92].mxu0  ;;  %v1578_v5 = vpop.f32.mrb[92].mxu1 }
 0x1cf   :  { %1334 = vst.msk [vmem:[%s2827_s3 + $0x48] sm:$0xff] %vm1324_vm1, %v1317_v7  ;;  %v1303_v16 = vmax.f32 %v1255_v25, %v1271_v4  ;;  %v739_v47 = vadd.f32 %v2523_v53, %v738_v63  ;;  %v1199_v29 = vadd.f32 %v1578_v5, %v814_v32  ;;  %v740_v58 = vpop.f32.mrb[93].mxu0  ;;  %v1193_v21 = vpop.f32.mrb[93].mxu1  ;;  %v1257_v14 = vmax.f32 %v1119_v1, 0.0 }
 0x1d0   :  { %1333 = vst.msk [vmem:[%s2827_s3 + $0x40] sm:$0xff] %vm1324_vm1, %v1316_v44  ;;  %v1302_v27 = vmax.f32 %v1254_v57, %v1270_v6  ;;  %v1194_v23 = vadd.f32 %v1193_v21, %v809_v46 }
 0x1d1   :  { %v1319_v0 = vmax.f32 %v2630_v34, %v1303_v16  ;;  %v1124_v31 = vadd.f32 %v2678_v38, %v739_v47  ;;  %v1273_v17 = vmax.f32 %v1199_v29, 0.0 }
 0x1d2   :  { %v1318_v28 = vmax.f32 %v2632_v2, %v1302_v27  ;;  %v1272_v52 = vmax.f32 %v1194_v23, 0.0  ;;  %v743_v39 = vpop.f32.mrb[94].mxu0  ;;  %v1581_v30 = vpop.f32.mrb[94].mxu1 }
 0x1d3   :  { %1336 = vst.msk [vmem:[%s2827_s3 + $0x58] sm:$0xff] %vm1324_vm1, %v1319_v0  ;;  %v1305_v12 = vmax.f32 %v1257_v14, %v1273_v17  ;;  %v744_v34 = vadd.f32 %v2523_v53, %v743_v39  ;;  %v1209_v19 = vadd.f32 %v1581_v30, %v824_v40  ;;  %v745_v38 = vpop.f32.mrb[95].mxu0  ;;  %v1203_v13 = vpop.f32.mrb[95].mxu1  ;;  %v1258_v22 = vmax.f32 %v1124_v31, 0.0 }
 0x1d4   :  { %1335 = vst.msk [vmem:[%s2827_s3 + $0x50] sm:$0xff] %vm1324_vm1, %v1318_v28  ;;  %v1304_v48 = vmax.f32 %v1256_v62, %v1272_v52  ;;  %v1204_v2 = vadd.f32 %v1203_v13, %v819_v15 }
 0x1d5   :  { %v1321_v50 = vmax.f32 %v2637_v42, %v1305_v12  ;;  %v1129_v51 = vadd.f32 %v2675_v10, %v744_v34  ;;  %v1275_v55 = vmax.f32 %v1209_v19, 0.0 }
 0x1d6   :  { %v1320_v24 = vmax.f32 %v2640_v49, %v1304_v48  ;;  %v1274_v35 = vmax.f32 %v1204_v2, 0.0 }
 0x1d7   :  { %1338 = vst.msk [vmem:[%s2827_s3 + $0x68] sm:$0xff] %vm1324_vm1, %v1321_v50  ;;  %v1259_v53 = vmax.f32 %v1129_v51, 0.0 }
 0x1d8   :  { %1337 = vst.msk [vmem:[%s2827_s3 + $0x60] sm:$0xff] %vm1324_vm1, %v1320_v24  ;;  %v1306_v61 = vmax.f32 %v1258_v22, %v1274_v35 }
 0x1d9   :  { %v1307_v42 = vmax.f32 %v1259_v53, %v1275_v55 }
 0x1da   :  { %v1322_v10 = vmax.f32 %v2645_v18, %v1306_v61 }
 0x1db   :  { %v1323_v45 = vmax.f32 %v2829_v60, %v1307_v42 }
 0x1dc   :  { %1339 = vst.msk [vmem:[%s2827_s3 + $0x70] sm:$0xff] %vm1324_vm1, %v1322_v10 }
 0x1dd   :  { %1340 = vst.msk [vmem:[%s2827_s3 + $0x78] sm:$0xff] %vm1324_vm1, %v1323_v45 }

// kernel: card_cnn_forward.5
= control target key start
LH: loop header
LB: loop body
LE: loop exit
PB: predicated region body
PF: predicated region fallthrough
CT: control target
= control target key end

     0   :  { %v10910_v36 = vmov 1983009808   ;;  %v42_v38 = vlaneseq  ;;  %s14302_s0 = inlined_call_operand.vmem [shape: f32[2,4096], index: 0, kind: input, shape index: {}]   ;;  %s14303_s1 = inlined_call_operand.vmem [shape: bf16[4096,512], index: 1, kind: input, shape index: {}]   ;;  %s14304_s2 = inlined_call_operand.vmem [shape: f32[1,512], index: 2, kind: input, shape index: {}]   ;;  %s14305_s3 = inlined_call_operand.vmem [shape: bf16[512,10], index: 3, kind: input, shape index: {}]   ;;  %s14306_s4 = inlined_call_operand.vmem [shape: f32[1,10], index: 4, kind: input, shape index: {}]   ;;  %s14307_s5 = inlined_call_operand.hbm [shape: f32[2,10], index: 5, kind: output, shape index: {}]  }
   0x1   :  { %v9310_v0 = vld [vmem:[%s14303_s1 + $0x4] ss:$16 sps:$4 sm:$0xff]   ;;  %v9312_v1 = vld [vmem:[%s14303_s1 + $0xc] ss:$16 sps:$4 sm:$0xff]   ;;  %v9314_v2 = vld [vmem:[%s14303_s1] ss:$16 sps:$4 sm:$0xff]   ;;  %v40_v37 = vunpack.c.l.s4 %v10910_v36 }
   0x2   :  { %6404 = vmatprep.subr.bf16.mxu0 %v9310_v0  ;;  %v9315_v3 = vld [vmem:[%s14303_s1 + $0x8] ss:$16 sps:$4 sm:$0xff]   ;;  %7060 = vmatprep.subr.bf16.mxu1 %v9312_v1  ;;  %v9316_v4 = vld [vmem:[%s14303_s1 + $0x24] ss:$16 sps:$4 sm:$0xff]   ;;  %v9318_v5 = vld [vmem:[%s14303_s1 + $0x2c] ss:$16 sps:$4 sm:$0xff]  }
   0x3   :  { %6405 = vmatpush1.bf16.msra.mxu0 %v9314_v2  ;;  %7061 = vmatpush1.bf16.msra.mxu1 %v9315_v3  ;;  %v9320_v6 = vld [vmem:[%s14303_s1 + $0x20] ss:$16 sps:$4 sm:$0xff]   ;;  %v9321_v7 = vld [vmem:[%s14303_s1 + $0x28] ss:$16 sps:$4 sm:$0xff]   ;;  %v9322_v8 = vld [vmem:[%s14303_s1 + $0x44] ss:$16 sps:$4 sm:$0xff]   ;;  %v41_v42 = vunpack.c.0.s8 %v40_v37 }
   0x4   :  { %6406 = vmatprep.subr.bf16.mxu0 %v9316_v4  ;;  %7062 = vmatprep.subr.bf16.mxu1 %v9318_v5  ;;  %v9324_v9 = vld [vmem:[%s14303_s1 + $0x4c] ss:$16 sps:$4 sm:$0xff]   ;;  %v9326_v10 = vld [vmem:[%s14303_s1 + $0x40] ss:$16 sps:$4 sm:$0xff]   ;;  %v9327_v11 = vld [vmem:[%s14303_s1 + $0x48] ss:$16 sps:$4 sm:$0xff]  }
   0x5   :  { %v9328_v12 = vld [vmem:[%s14303_s1 + $0x64] ss:$16 sps:$4 sm:$0xff]   ;;  %v9330_v13 = vld [vmem:[%s14303_s1 + $0x6c] ss:$16 sps:$4 sm:$0xff]   ;;  %v9332_v14 = vld [vmem:[%s14303_s1 + $0x60] ss:$16 sps:$4 sm:$0xff]  }
   0x6   :  { %v9333_v15 = vld [vmem:[%s14303_s1 + $0x68] ss:$16 sps:$4 sm:$0xff]   ;;  %v9334_v16 = vld [vmem:[%s14303_s1 + $0x84] ss:$16 sps:$4 sm:$0xff]   ;;  %v9336_v17 = vld [vmem:[%s14303_s1 + $0x8c] ss:$16 sps:$4 sm:$0xff]  }
   0x7   :  { %6407 = vmatpush1.bf16.msra.mxu0 %v9320_v6  ;;  %7063 = vmatpush1.bf16.msra.mxu1 %v9321_v7  ;;  %v9338_v18 = vld [vmem:[%s14303_s1 + $0x80] ss:$16 sps:$4 sm:$0xff]   ;;  %v9339_v19 = vld [vmem:[%s14303_s1 + $0x88] ss:$16 sps:$4 sm:$0xff]   ;;  %v9340_v20 = vld [vmem:[%s14303_s1 + $0xa4] ss:$16 sps:$4 sm:$0xff]  }
   0x8   :  { %6408 = vmatprep.subr.bf16.mxu0 %v9322_v8  ;;  %7064 = vmatprep.subr.bf16.mxu1 %v9324_v9  ;;  %v9342_v21 = vld [vmem:[%s14303_s1 + $0xac] ss:$16 sps:$4 sm:$0xff]   ;;  %v9344_v22 = vld [vmem:[%s14303_s1 + $0xa0] ss:$16 sps:$4 sm:$0xff]   ;;  %v9345_v23 = vld [vmem:[%s14303_s1 + $0xa8] ss:$16 sps:$4 sm:$0xff]  }
   0x9   :  { %v9346_v24 = vld [vmem:[%s14303_s1 + $0xc4] ss:$16 sps:$4 sm:$0xff]   ;;  %v9348_v25 = vld [vmem:[%s14303_s1 + $0xcc] ss:$16 sps:$4 sm:$0xff]   ;;  %v9350_v26 = vld [vmem:[%s14303_s1 + $0xc0] ss:$16 sps:$4 sm:$0xff]  }
   0xa   :  { %v9351_v27 = vld [vmem:[%s14303_s1 + $0xc8] ss:$16 sps:$4 sm:$0xff]   ;;  %v9352_v28 = vld [vmem:[%s14303_s1 + $0xe4] ss:$16 sps:$4 sm:$0xff]   ;;  %v9354_v29 = vld [vmem:[%s14303_s1 + $0xec] ss:$16 sps:$4 sm:$0xff]  }
   0xb   :  { %6409 = vmatpush1.bf16.msra.mxu0 %v9326_v10  ;;  %7065 = vmatpush1.bf16.msra.mxu1 %v9327_v11  ;;  %v9356_v30 = vld [vmem:[%s14303_s1 + $0xe0] ss:$16 sps:$4 sm:$0xff]   ;;  %v9357_v31 = vld [vmem:[%s14303_s1 + $0xe8] ss:$16 sps:$4 sm:$0xff]   ;;  %v9358_v32 = vld [vmem:[%s14303_s1 + $0x104] ss:$16 sps:$4 sm:$0xff]  }
   0xc   :  { %6410 = vmatprep.subr.bf16.mxu0 %v9328_v12  ;;  %7066 = vmatprep.subr.bf16.mxu1 %v9330_v13  ;;  %v9360_v33 = vld [vmem:[%s14303_s1 + $0x10c] ss:$16 sps:$4 sm:$0xff]   ;;  %v9362_v34 = vld [vmem:[%s14303_s1 + $0x100] ss:$16 sps:$4 sm:$0xff]   ;;  %v9363_v35 = vld [vmem:[%s14303_s1 + $0x108] ss:$16 sps:$4 sm:$0xff]  }
   0xd   :  { %v9364_v39 = vld [vmem:[%s14303_s1 + $0x124] ss:$16 sps:$4 sm:$0xff]   ;;  %v9366_v40 = vld [vmem:[%s14303_s1 + $0x12c] ss:$16 sps:$4 sm:$0xff]   ;;  %v9368_v41 = vld [vmem:[%s14303_s1 + $0x120] ss:$16 sps:$4 sm:$0xff]  }
   0xe   :  { %v11059_v43 = vshrl.u32 %v42_v38, 7  ;;  %v9369_v44 = vld [vmem:[%s14303_s1 + $0x128] ss:$16 sps:$4 sm:$0xff]   ;;  %v9370_v45 = vld [vmem:[%s14303_s1 + $0x144] ss:$16 sps:$4 sm:$0xff]  }
   0xf   :  { %6411 = vmatpush1.bf16.msra.mxu0 %v9332_v14  ;;  %7067 = vmatpush1.bf16.msra.mxu1 %v9333_v15  ;;  %v9372_v46 = vld [vmem:[%s14303_s1 + $0x14c] ss:$16 sps:$4 sm:$0xff]   ;;  %v9374_v47 = vld [vmem:[%s14303_s1 + $0x140] ss:$16 sps:$4 sm:$0xff]   ;;  %v9375_v48 = vld [vmem:[%s14303_s1 + $0x148] ss:$16 sps:$4 sm:$0xff]  }
  0x10   :  { %6412 = vmatprep.subr.bf16.mxu0 %v9334_v16  ;;  %7068 = vmatprep.subr.bf16.mxu1 %v9336_v17  ;;  %v11077_v49 = vsub.s32 %v41_v42, %v11059_v43  ;;  %v9376_v50 = vld [vmem:[%s14303_s1 + $0x164] ss:$16 sps:$4 sm:$0xff]   ;;  %v9378_v51 = vld [vmem:[%s14303_s1 + $0x16c] ss:$16 sps:$4 sm:$0xff]   ;;  %v9380_v53 = vld [vmem:[%s14303_s1 + $0x160] ss:$16 sps:$4 sm:$0xff]  }
  0x11   :  { %v22_v52 = vld [vmem:[%s14302_s0] sm:$0xff]  ;;  %v9381_v55 = vld [vmem:[%s14303_s1 + $0x168] ss:$16 sps:$4 sm:$0xff]   ;;  %v9384_v57 = vld [vmem:[%s14303_s1 + $0x18c] ss:$16 sps:$4 sm:$0xff]  }
  0x12   :  { %v45_v54 = vrot.slane %v22_v52, %v11077_v49  ;;  %v9382_v56 = vld [vmem:[%s14303_s1 + $0x184] ss:$16 sps:$4 sm:$0xff]   ;;  %v9386_v59 = vld [vmem:[%s14303_s1 + $0x180] ss:$16 sps:$4 sm:$0xff]   ;;  %v9387_v61 = vld [vmem:[%s14303_s1 + $0x188] ss:$16 sps:$4 sm:$0xff]   ;;  %v38_v4 = vcombine.high %v22_v52, %v22_v52 }
  0x13   :  { %6413 = vmatpush1.bf16.msra.mxu0 %v9338_v18  ;;  %7069 = vmatpush1.bf16.msra.mxu1 %v9339_v19  ;;  %v9388_v62 = vld [vmem:[%s14303_s1 + $0x1a4] ss:$16 sps:$4 sm:$0xff]   ;;  %v9390_v63 = vld [vmem:[%s14303_s1 + $0x1ac] ss:$16 sps:$4 sm:$0xff]   ;;  %v9392_v0 = vld [vmem:[%s14303_s1 + $0x1a0] ss:$16 sps:$4 sm:$0xff]  }
  0x14   :  { %6414 = vmatprep.subr.bf16.mxu0 %v9340_v20  ;;  %7070 = vmatprep.subr.bf16.mxu1 %v9342_v21  ;;  %v53_v58 = vcombine.high %v45_v54, %v45_v54  ;;  %v9393_v1 = vld [vmem:[%s14303_s1 + $0x1a8] ss:$16 sps:$4 sm:$0xff]   ;;  %v9394_v2 = vld [vmem:[%s14303_s1 + $0x1c4] ss:$16 sps:$4 sm:$0xff]   ;;  %v9396_v3 = vld [vmem:[%s14303_s1 + $0x1cc] ss:$16 sps:$4 sm:$0xff]   ;;  %v11138_v9 = vrot.slane %v38_v4, %v11077_v49  ;;  %v206_v16 = vpack.c.bf16 %v45_v54, %v45_v54 }
  0x15   :  { %v9398_v5 = vld [vmem:[%s14303_s1 + $0x1c0] ss:$16 sps:$4 sm:$0xff]   ;;  %v9399_v6 = vld [vmem:[%s14303_s1 + $0x1c8] ss:$16 sps:$4 sm:$0xff]   ;;  %v9400_v7 = vld [vmem:[%s14303_s1 + $0x1e4] ss:$16 sps:$4 sm:$0xff]  }
  0x16   :  { %v207_v60 = vpack.c.bf16 %v53_v58, %v53_v58  ;;  %v9402_v8 = vld [vmem:[%s14303_s1 + $0x1ec] ss:$16 sps:$4 sm:$0xff]   ;;  %v9404_v10 = vld [vmem:[%s14303_s1 + $0x1e0] ss:$16 sps:$4 sm:$0xff]   ;;  %v9405_v11 = vld [vmem:[%s14303_s1 + $0x1e8] ss:$16 sps:$4 sm:$0xff]   ;;  %v54_v14 = vcombine.high %v11138_v9, %v11138_v9 }
  0x17   :  { %6415 = vmatpush1.bf16.msra.mxu0 %v9344_v22  ;;  %7071 = vmatpush1.bf16.msra.mxu1 %v9345_v23  ;;  %v9409_v12 = vld [vmem:[%s14303_s1 + $0x204] ss:$16 sps:$4 sm:$0xff]   ;;  %v9412_v13 = vld [vmem:[%s14303_s1 + $0x20c] ss:$16 sps:$4 sm:$0xff]   ;;  %v9407_v15 = vld [vmem:[%s14303_s1 + $0x200] ss:$16 sps:$4 sm:$0xff]  }
  0x18   :  { %6416 = vmatprep.subr.bf16.mxu0 %v9346_v24  ;;  %7072 = vmatprep.subr.bf16.mxu1 %v9348_v25  ;;  %v9410_v17 = vld [vmem:[%s14303_s1 + $0x208] ss:$16 sps:$4 sm:$0xff]   ;;  %v9415_v18 = vld [vmem:[%s14303_s1 + $0x224] ss:$16 sps:$4 sm:$0xff]   ;;  %v9418_v19 = vld [vmem:[%s14303_s1 + $0x22c] ss:$16 sps:$4 sm:$0xff]   ;;  %v209_v20 = vpack.c.bf16 %v54_v14, %v54_v14 }
  0x19   :  { %6436 = vmatprep.mubr.bf16.mxu0 %v207_v60  ;;  %7092 = vmatprep.mubr.bf16.mxu1 %v207_v60  ;;  %v9413_v21 = vld [vmem:[%s14303_s1 + $0x220] ss:$16 sps:$4 sm:$0xff]   ;;  %v9416_v22 = vld [vmem:[%s14303_s1 + $0x228] ss:$16 sps:$4 sm:$0xff]   ;;  %v9421_v23 = vld [vmem:[%s14303_s1 + $0x244] ss:$16 sps:$4 sm:$0xff]  }
  0x1a   :  { %v9424_v24 = vld [vmem:[%s14303_s1 + $0x24c] ss:$16 sps:$4 sm:$0xff]   ;;  %v9419_v25 = vld [vmem:[%s14303_s1 + $0x240] ss:$16 sps:$4 sm:$0xff]   ;;  %v9440_v38 = vld [vmem:[%s14303_s1 + $0x2a8] ss:$16 sps:$4 sm:$0xff]  }
  0x1b   :  { %6417 = vmatpush1.bf16.msra.mxu0 %v9350_v26  ;;  %7073 = vmatpush1.bf16.msra.mxu1 %v9351_v27  ;;  %v9422_v26 = vld [vmem:[%s14303_s1 + $0x248] ss:$16 sps:$4 sm:$0xff]   ;;  %v9427_v27 = vld [vmem:[%s14303_s1 + $0x264] ss:$16 sps:$4 sm:$0xff]   ;;  %v9442_v36 = vld [vmem:[%s14303_s1 + $0x2ac] ss:$16 sps:$4 sm:$0xff]  }
  0x1c   :  { %6418 = vmatprep.subr.bf16.mxu0 %v9352_v28  ;;  %7074 = vmatprep.subr.bf16.mxu1 %v9354_v29  ;;  %v9430_v28 = vld [vmem:[%s14303_s1 + $0x26c] ss:$16 sps:$4 sm:$0xff]   ;;  %v9425_v29 = vld [vmem:[%s14303_s1 + $0x260] ss:$16 sps:$4 sm:$0xff]   ;;  %v9446_v42 = vld [vmem:[%s14303_s1 + $0x2c8] ss:$16 sps:$4 sm:$0xff]  }
  0x1d   :  { %v9437_v37 = vld [vmem:[%s14303_s1 + $0x2a0] ss:$16 sps:$4 sm:$0xff]   ;;  %v9458_v52 = vld [vmem:[%s14303_s1 + $0x308] ss:$16 sps:$4 sm:$0xff]   ;;  %v9466_v54 = vld [vmem:[%s14303_s1 + $0x32c] ss:$16 sps:$4 sm:$0xff]  }
  0x1e   :  { %v9472_v58 = vld [vmem:[%s14303_s1 + $0x34c] ss:$16 sps:$4 sm:$0xff]   ;;  %v9470_v60 = vld [vmem:[%s14303_s1 + $0x348] ss:$16 sps:$4 sm:$0xff]   ;;  %v9499_v14 = vld [vmem:[%s14303_s1 + $0x3e4] ss:$16 sps:$4 sm:$0xff]  }
  0x1f   :  { %6419 = vmatpush1.bf16.msra.mxu0 %v9356_v30  ;;  %7075 = vmatpush1.bf16.msra.mxu1 %v9357_v31  ;;  %v9428_v30 = vld [vmem:[%s14303_s1 + $0x268] ss:$16 sps:$4 sm:$0xff]   ;;  %v9433_v31 = vld [vmem:[%s14303_s1 + $0x284] ss:$16 sps:$4 sm:$0xff]  }
  0x20   :  { %6420 = vmatprep.subr.bf16.mxu0 %v9358_v32  ;;  %7076 = vmatprep.subr.bf16.mxu1 %v9360_v33  ;;  %v9436_v32 = vld [vmem:[%s14303_s1 + $0x28c] ss:$16 sps:$4 sm:$0xff]   ;;  %v9431_v33 = vld [vmem:[%s14303_s1 + $0x280] ss:$16 sps:$4 sm:$0xff]   ;;  %v9482_v4 = vld [vmem:[%s14303_s1 + $0x388] ss:$16 sps:$4 sm:$0xff]  }
  0x23   :  { %6421 = vmatpush1.bf16.msra.mxu0 %v9362_v34  ;;  %7077 = vmatpush1.bf16.msra.mxu1 %v9363_v35  ;;  %v9434_v34 = vld [vmem:[%s14303_s1 + $0x288] ss:$16 sps:$4 sm:$0xff]   ;;  %v9439_v35 = vld [vmem:[%s14303_s1 + $0x2a4] ss:$16 sps:$4 sm:$0xff]  }
  0x24   :  { %6422 = vmatprep.subr.bf16.mxu0 %v9364_v39  ;;  %7078 = vmatprep.subr.bf16.mxu1 %v9366_v40  ;;  %v9445_v39 = vld [vmem:[%s14303_s1 + $0x2c4] ss:$16 sps:$4 sm:$0xff]   ;;  %v9448_v40 = vld [vmem:[%s14303_s1 + $0x2cc] ss:$16 sps:$4 sm:$0xff]  }
  0x27   :  { %6423 = vmatpush1.bf16.msra.mxu0 %v9368_v41  ;;  %7079 = vmatpush1.bf16.msra.mxu1 %v9369_v44  ;;  %v9443_v41 = vld [vmem:[%s14303_s1 + $0x2c0] ss:$16 sps:$4 sm:$0xff]   ;;  %v9451_v44 = vld [vmem:[%s14303_s1 + $0x2e4] ss:$16 sps:$4 sm:$0xff]  }
  0x28   :  { %6424 = vmatprep.subr.bf16.mxu0 %v9370_v45  ;;  %7080 = vmatprep.subr.bf16.mxu1 %v9372_v46  ;;  %v9454_v45 = vld [vmem:[%s14303_s1 + $0x2ec] ss:$16 sps:$4 sm:$0xff]   ;;  %v9449_v46 = vld [vmem:[%s14303_s1 + $0x2e0] ss:$16 sps:$4 sm:$0xff]  }
  0x2b   :  { %6425 = vmatpush1.bf16.msra.mxu0 %v9374_v47  ;;  %7081 = vmatpush1.bf16.msra.mxu1 %v9375_v48  ;;  %v9452_v47 = vld [vmem:[%s14303_s1 + $0x2e8] ss:$16 sps:$4 sm:$0xff]   ;;  %v9457_v48 = vld [vmem:[%s14303_s1 + $0x304] ss:$16 sps:$4 sm:$0xff]  }
  0x2c   :  { %6426 = vmatprep.subr.bf16.mxu0 %v9376_v50  ;;  %7082 = vmatprep.subr.bf16.mxu1 %v9378_v51  ;;  %v9460_v50 = vld [vmem:[%s14303_s1 + $0x30c] ss:$16 sps:$4 sm:$0xff]   ;;  %v9455_v51 = vld [vmem:[%s14303_s1 + $0x300] ss:$16 sps:$4 sm:$0xff]  }
  0x2f   :  { %6427 = vmatpush1.bf16.msra.mxu0 %v9380_v53  ;;  %7083 = vmatpush1.bf16.msra.mxu1 %v9381_v55  ;;  %v9463_v53 = vld [vmem:[%s14303_s1 + $0x324] ss:$16 sps:$4 sm:$0xff]   ;;  %v9461_v55 = vld [vmem:[%s14303_s1 + $0x320] ss:$16 sps:$4 sm:$0xff]  }
  0x30   :  { %6428 = vmatprep.subr.bf16.mxu0 %v9382_v56  ;;  %7084 = vmatprep.subr.bf16.mxu1 %v9384_v57  ;;  %v9464_v56 = vld [vmem:[%s14303_s1 + $0x328] ss:$16 sps:$4 sm:$0xff]   ;;  %v9469_v57 = vld [vmem:[%s14303_s1 + $0x344] ss:$16 sps:$4 sm:$0xff]  }
  0x33   :  { %6429 = vmatpush1.bf16.msra.mxu0 %v9386_v59  ;;  %7085 = vmatpush1.bf16.msra.mxu1 %v9387_v61  ;;  %v9467_v59 = vld [vmem:[%s14303_s1 + $0x340] ss:$16 sps:$4 sm:$0xff]   ;;  %v9475_v61 = vld [vmem:[%s14303_s1 + $0x364] ss:$16 sps:$4 sm:$0xff]  }
  0x34   :  { %6430 = vmatprep.subr.bf16.mxu0 %v9388_v62  ;;  %7086 = vmatprep.subr.bf16.mxu1 %v9390_v63  ;;  %v9478_v62 = vld [vmem:[%s14303_s1 + $0x36c] ss:$16 sps:$4 sm:$0xff]   ;;  %v9473_v63 = vld [vmem:[%s14303_s1 + $0x360] ss:$16 sps:$4 sm:$0xff]  }
  0x37   :  { %6431 = vmatpush1.bf16.msra.mxu0 %v9392_v0  ;;  %7087 = vmatpush1.bf16.msra.mxu1 %v9393_v1  ;;  %v9476_v0 = vld [vmem:[%s14303_s1 + $0x368] ss:$16 sps:$4 sm:$0xff]   ;;  %v9481_v1 = vld [vmem:[%s14303_s1 + $0x384] ss:$16 sps:$4 sm:$0xff]  }
  0x38   :  { %6432 = vmatprep.subr.bf16.mxu0 %v9394_v2  ;;  %7088 = vmatprep.subr.bf16.mxu1 %v9396_v3  ;;  %v9484_v2 = vld [vmem:[%s14303_s1 + $0x38c] ss:$16 sps:$4 sm:$0xff]   ;;  %v9479_v3 = vld [vmem:[%s14303_s1 + $0x380] ss:$16 sps:$4 sm:$0xff]  }
  0x3b   :  { %6433 = vmatpush1.bf16.msra.mxu0 %v9398_v5  ;;  %7089 = vmatpush1.bf16.msra.mxu1 %v9399_v6  ;;  %v9487_v5 = vld [vmem:[%s14303_s1 + $0x3a4] ss:$16 sps:$4 sm:$0xff]   ;;  %v9490_v6 = vld [vmem:[%s14303_s1 + $0x3ac] ss:$16 sps:$4 sm:$0xff]  }
  0x3c   :  { %6434 = vmatprep.subr.bf16.mxu0 %v9400_v7  ;;  %7090 = vmatprep.subr.bf16.mxu1 %v9402_v8  ;;  %v9485_v7 = vld [vmem:[%s14303_s1 + $0x3a0] ss:$16 sps:$4 sm:$0xff]   ;;  %v9488_v8 = vld [vmem:[%s14303_s1 + $0x3a8] ss:$16 sps:$4 sm:$0xff]  }
  0x3f   :  { %6435 = vmatpush1.bf16.msra.mxu0 %v9404_v10  ;;  %7091 = vmatpush1.bf16.msra.mxu1 %v9405_v11  ;;  %v9493_v10 = vld [vmem:[%s14303_s1 + $0x3c4] ss:$16 sps:$4 sm:$0xff]   ;;  %v9496_v11 = vld [vmem:[%s14303_s1 + $0x3cc] ss:$16 sps:$4 sm:$0xff]  }
  0x40   :  { %6445 = vmatprep.subr.bf16.mxu0 %v9409_v12  ;;  %7101 = vmatprep.subr.bf16.mxu1 %v9412_v13  ;;  %v9491_v12 = vld [vmem:[%s14303_s1 + $0x3c0] ss:$16 sps:$4 sm:$0xff]   ;;  %v9494_v13 = vld [vmem:[%s14303_s1 + $0x3c8] ss:$16 sps:$4 sm:$0xff]  }
  0x42   :  { %6437 = vmatmul.mubr.bf16.vlgmr.msra.gmra.mrb[0].mxu0 %v206_v16  ;;  %7093 = vmatmul.mubr.bf16.vlgmr.msra.gmra.mrb[0].mxu1 %v206_v16  ;;  %v9497_v16 = vld [vmem:[%s14303_s1 + $0x3e0] ss:$16 sps:$4 sm:$0xff]  }
  0x43   :  { %6446 = vmatpush1.bf16.msra.mxu0 %v9407_v15  ;;  %7102 = vmatpush1.bf16.msra.mxu1 %v9410_v17  ;;  %v9502_v15 = vld [vmem:[%s14303_s1 + $0x3ec] ss:$16 sps:$4 sm:$0xff]   ;;  %v9500_v17 = vld [vmem:[%s14303_s1 + $0x3e8] ss:$16 sps:$4 sm:$0xff]  }
  0x44   :  { %6447 = vmatprep.subr.bf16.mxu0 %v9415_v18  ;;  %7103 = vmatprep.subr.bf16.mxu1 %v9418_v19  ;;  %v9505_v18 = vld [vmem:[%s14303_s1 + $0x404] ss:$16 sps:$4 sm:$0xff]   ;;  %v9508_v19 = vld [vmem:[%s14303_s1 + $0x40c] ss:$16 sps:$4 sm:$0xff]  }
  0x45   :  { %6477 = vmatprep.mubr.bf16.mxu0 %v209_v20  ;;  %7133 = vmatprep.mubr.bf16.mxu1 %v209_v20  ;;  %v9503_v20 = vld [vmem:[%s14303_s1 + $0x400] ss:$16 sps:$4 sm:$0xff]  }
  0x47   :  { %6448 = vmatpush1.bf16.msra.mxu0 %v9413_v21  ;;  %7104 = vmatpush1.bf16.msra.mxu1 %v9416_v22  ;;  %v208_v21 = vpack.c.bf16 %v11138_v9, %v11138_v9  ;;  %v9506_v22 = vld [vmem:[%s14303_s1 + $0x408] ss:$16 sps:$4 sm:$0xff]   ;;  %v9514_v9 = vld [vmem:[%s14303_s1 + $0x42c] ss:$16 sps:$4 sm:$0xff]  }
  0x48   :  { %6449 = vmatprep.subr.bf16.mxu0 %v9421_v23  ;;  %7105 = vmatprep.subr.bf16.mxu1 %v9424_v24  ;;  %v11357_v23 = vld [vmem:[%s14302_s0 + $0x8] sm:$0xff]  ;;  %v9511_v24 = vld [vmem:[%s14303_s1 + $0x424] ss:$16 sps:$4 sm:$0xff]  }
  0x4b   :  { %6450 = vmatpush1.bf16.msra.mxu0 %v9419_v25  ;;  %7106 = vmatpush1.bf16.msra.mxu1 %v9422_v26  ;;  %v11367_v25 = vrot.slane %v11357_v23, %v11077_v49 }
  0x4c   :  { %6451 = vmatprep.subr.bf16.mxu0 %v9427_v27  ;;  %7107 = vmatprep.subr.bf16.mxu1 %v9430_v28  ;;  %v9509_v27 = vld [vmem:[%s14303_s1 + $0x420] ss:$16 sps:$4 sm:$0xff]   ;;  %v9512_v28 = vld [vmem:[%s14303_s1 + $0x428] ss:$16 sps:$4 sm:$0xff]  }
  0x4d   :  { %v70_v26 = vcombine.high %v11367_v25, %v11367_v25 }
  0x4f   :  { %6452 = vmatpush1.bf16.msra.mxu0 %v9425_v29  ;;  %7108 = vmatpush1.bf16.msra.mxu1 %v9428_v30  ;;  %v9517_v29 = vld [vmem:[%s14303_s1 + $0x444] ss:$16 sps:$4 sm:$0xff]   ;;  %v9520_v30 = vld [vmem:[%s14303_s1 + $0x44c] ss:$16 sps:$4 sm:$0xff]  }
  0x50   :  { %6453 = vmatprep.subr.bf16.mxu0 %v9433_v31  ;;  %7109 = vmatprep.subr.bf16.mxu1 %v9436_v32  ;;  %v211_v31 = vpack.c.bf16 %v70_v26, %v70_v26  ;;  %v9515_v32 = vld [vmem:[%s14303_s1 + $0x440] ss:$16 sps:$4 sm:$0xff]   ;;  %v9596_v26 = vld [vmem:[%s14303_s1 + $0x5e8] ss:$16 sps:$4 sm:$0xff]  }
  0x53   :  { %6454 = vmatpush1.bf16.msra.mxu0 %v9431_v33  ;;  %7110 = vmatpush1.bf16.msra.mxu1 %v9434_v34  ;;  %v9518_v33 = vld [vmem:[%s14303_s1 + $0x448] ss:$16 sps:$4 sm:$0xff]   ;;  %v9523_v34 = vld [vmem:[%s14303_s1 + $0x464] ss:$16 sps:$4 sm:$0xff]  }
  0x54   :  { %6455 = vmatprep.subr.bf16.mxu0 %v9439_v35  ;;  %7111 = vmatprep.subr.bf16.mxu1 %v9442_v36  ;;  %v9526_v35 = vld [vmem:[%s14303_s1 + $0x46c] ss:$16 sps:$4 sm:$0xff]   ;;  %v9521_v36 = vld [vmem:[%s14303_s1 + $0x460] ss:$16 sps:$4 sm:$0xff]  }
  0x57   :  { %6456 = vmatpush1.bf16.msra.mxu0 %v9437_v37  ;;  %7112 = vmatpush1.bf16.msra.mxu1 %v9440_v38  ;;  %v9524_v37 = vld [vmem:[%s14303_s1 + $0x468] ss:$16 sps:$4 sm:$0xff]   ;;  %v9529_v38 = vld [vmem:[%s14303_s1 + $0x484] ss:$16 sps:$4 sm:$0xff]  }
  0x58   :  { %6457 = vmatprep.subr.bf16.mxu0 %v9445_v39  ;;  %7113 = vmatprep.subr.bf16.mxu1 %v9448_v40  ;;  %v9532_v39 = vld [vmem:[%s14303_s1 + $0x48c] ss:$16 sps:$4 sm:$0xff]   ;;  %v9527_v40 = vld [vmem:[%s14303_s1 + $0x480] ss:$16 sps:$4 sm:$0xff]  }
  0x5b   :  { %6458 = vmatpush1.bf16.msra.mxu0 %v9443_v41  ;;  %7114 = vmatpush1.bf16.msra.mxu1 %v9446_v42  ;;  %v9530_v41 = vld [vmem:[%s14303_s1 + $0x488] ss:$16 sps:$4 sm:$0xff]   ;;  %v9535_v42 = vld [vmem:[%s14303_s1 + $0x4a4] ss:$16 sps:$4 sm:$0xff]  }
  0x5c   :  { %6459 = vmatprep.subr.bf16.mxu0 %v9451_v44  ;;  %7115 = vmatprep.subr.bf16.mxu1 %v9454_v45  ;;  %v9538_v44 = vld [vmem:[%s14303_s1 + $0x4ac] ss:$16 sps:$4 sm:$0xff]   ;;  %v9533_v45 = vld [vmem:[%s14303_s1 + $0x4a0] ss:$16 sps:$4 sm:$0xff]  }
  0x5f   :  { %6460 = vmatpush1.bf16.msra.mxu0 %v9449_v46  ;;  %7116 = vmatpush1.bf16.msra.mxu1 %v9452_v47  ;;  %v9536_v46 = vld [vmem:[%s14303_s1 + $0x4a8] ss:$16 sps:$4 sm:$0xff]   ;;  %v9541_v47 = vld [vmem:[%s14303_s1 + $0x4c4] ss:$16 sps:$4 sm:$0xff]  }
  0x60   :  { %6461 = vmatprep.subr.bf16.mxu0 %v9457_v48  ;;  %7117 = vmatprep.subr.bf16.mxu1 %v9460_v50  ;;  %v9544_v48 = vld [vmem:[%s14303_s1 + $0x4cc] ss:$16 sps:$4 sm:$0xff]   ;;  %v9539_v50 = vld [vmem:[%s14303_s1 + $0x4c0] ss:$16 sps:$4 sm:$0xff]  }
  0x63   :  { %6462 = vmatpush1.bf16.msra.mxu0 %v9455_v51  ;;  %7118 = vmatpush1.bf16.msra.mxu1 %v9458_v52  ;;  %v9542_v51 = vld [vmem:[%s14303_s1 + $0x4c8] ss:$16 sps:$4 sm:$0xff]   ;;  %v9547_v52 = vld [vmem:[%s14303_s1 + $0x4e4] ss:$16 sps:$4 sm:$0xff]  }
  0x64   :  { %6463 = vmatprep.subr.bf16.mxu0 %v9463_v53  ;;  %7119 = vmatprep.subr.bf16.mxu1 %v9466_v54  ;;  %v9550_v53 = vld [vmem:[%s14303_s1 + $0x4ec] ss:$16 sps:$4 sm:$0xff]   ;;  %v9545_v54 = vld [vmem:[%s14303_s1 + $0x4e0] ss:$16 sps:$4 sm:$0xff]  }
  0x67   :  { %6464 = vmatpush1.bf16.msra.mxu0 %v9461_v55  ;;  %7120 = vmatpush1.bf16.msra.mxu1 %v9464_v56  ;;  %v9548_v55 = vld [vmem:[%s14303_s1 + $0x4e8] ss:$16 sps:$4 sm:$0xff]   ;;  %v9553_v56 = vld [vmem:[%s14303_s1 + $0x504] ss:$16 sps:$4 sm:$0xff]  }
  0x68   :  { %6465 = vmatprep.subr.bf16.mxu0 %v9469_v57  ;;  %7121 = vmatprep.subr.bf16.mxu1 %v9472_v58  ;;  %v9556_v57 = vld [vmem:[%s14303_s1 + $0x50c] ss:$16 sps:$4 sm:$0xff]   ;;  %v9551_v58 = vld [vmem:[%s14303_s1 + $0x500] ss:$16 sps:$4 sm:$0xff]  }
  0x6b   :  { %6466 = vmatpush1.bf16.msra.mxu0 %v9467_v59  ;;  %7122 = vmatpush1.bf16.msra.mxu1 %v9470_v60  ;;  %v9554_v59 = vld [vmem:[%s14303_s1 + $0x508] ss:$16 sps:$4 sm:$0xff]   ;;  %v9559_v60 = vld [vmem:[%s14303_s1 + $0x524] ss:$16 sps:$4 sm:$0xff]  }
  0x6c   :  { %6467 = vmatprep.subr.bf16.mxu0 %v9475_v61  ;;  %7123 = vmatprep.subr.bf16.mxu1 %v9478_v62  ;;  %v9562_v61 = vld [vmem:[%s14303_s1 + $0x52c] ss:$16 sps:$4 sm:$0xff]   ;;  %v9557_v62 = vld [vmem:[%s14303_s1 + $0x520] ss:$16 sps:$4 sm:$0xff]  }
  0x6f   :  { %6468 = vmatpush1.bf16.msra.mxu0 %v9473_v63  ;;  %7124 = vmatpush1.bf16.msra.mxu1 %v9476_v0  ;;  %v9560_v63 = vld [vmem:[%s14303_s1 + $0x528] ss:$16 sps:$4 sm:$0xff]   ;;  %v9565_v0 = vld [vmem:[%s14303_s1 + $0x544] ss:$16 sps:$4 sm:$0xff]  }
  0x70   :  { %6469 = vmatprep.subr.bf16.mxu0 %v9481_v1  ;;  %7125 = vmatprep.subr.bf16.mxu1 %v9484_v2  ;;  %v9568_v1 = vld [vmem:[%s14303_s1 + $0x54c] ss:$16 sps:$4 sm:$0xff]   ;;  %v9563_v2 = vld [vmem:[%s14303_s1 + $0x540] ss:$16 sps:$4 sm:$0xff]  }
  0x73   :  { %6470 = vmatpush1.bf16.msra.mxu0 %v9479_v3  ;;  %7126 = vmatpush1.bf16.msra.mxu1 %v9482_v4  ;;  %v9566_v3 = vld [vmem:[%s14303_s1 + $0x548] ss:$16 sps:$4 sm:$0xff]   ;;  %v9571_v4 = vld [vmem:[%s14303_s1 + $0x564] ss:$16 sps:$4 sm:$0xff]  }
  0x74   :  { %6471 = vmatprep.subr.bf16.mxu0 %v9487_v5  ;;  %7127 = vmatprep.subr.bf16.mxu1 %v9490_v6  ;;  %v9574_v5 = vld [vmem:[%s14303_s1 + $0x56c] ss:$16 sps:$4 sm:$0xff]   ;;  %v9569_v6 = vld [vmem:[%s14303_s1 + $0x560] ss:$16 sps:$4 sm:$0xff]  }
  0x77   :  { %6472 = vmatpush1.bf16.msra.mxu0 %v9485_v7  ;;  %7128 = vmatpush1.bf16.msra.mxu1 %v9488_v8  ;;  %v9572_v7 = vld [vmem:[%s14303_s1 + $0x568] ss:$16 sps:$4 sm:$0xff]   ;;  %v9577_v8 = vld [vmem:[%s14303_s1 + $0x584] ss:$16 sps:$4 sm:$0xff]  }
  0x78   :  { %6473 = vmatprep.subr.bf16.mxu0 %v9493_v10  ;;  %7129 = vmatprep.subr.bf16.mxu1 %v9496_v11  ;;  %v9580_v10 = vld [vmem:[%s14303_s1 + $0x58c] ss:$16 sps:$4 sm:$0xff]   ;;  %v9575_v11 = vld [vmem:[%s14303_s1 + $0x580] ss:$16 sps:$4 sm:$0xff]  }
  0x7b   :  { %6474 = vmatpush1.bf16.msra.mxu0 %v9491_v12  ;;  %7130 = vmatpush1.bf16.msra.mxu1 %v9494_v13  ;;  %v9578_v12 = vld [vmem:[%s14303_s1 + $0x588] ss:$16 sps:$4 sm:$0xff]   ;;  %v9583_v13 = vld [vmem:[%s14303_s1 + $0x5a4] ss:$16 sps:$4 sm:$0xff]  }
  0x7c   :  { %6475 = vmatprep.subr.bf16.mxu0 %v9499_v14  ;;  %7131 = vmatprep.subr.bf16.mxu1 %v9502_v15  ;;  %v9586_v14 = vld [vmem:[%s14303_s1 + $0x5ac] ss:$16 sps:$4 sm:$0xff]   ;;  %v9581_v15 = vld [vmem:[%s14303_s1 + $0x5a0] ss:$16 sps:$4 sm:$0xff]  }
  0x7f   :  { %6476 = vmatpush1.bf16.msra.mxu0 %v9497_v16  ;;  %7132 = vmatpush1.bf16.msra.mxu1 %v9500_v17  ;;  %v9584_v16 = vld [vmem:[%s14303_s1 + $0x5a8] ss:$16 sps:$4 sm:$0xff]   ;;  %v9589_v17 = vld [vmem:[%s14303_s1 + $0x5c4] ss:$16 sps:$4 sm:$0xff]  }
  0x80   :  { %6486 = vmatprep.subr.bf16.mxu0 %v9505_v18  ;;  %7142 = vmatprep.subr.bf16.mxu1 %v9508_v19  ;;  %v9592_v18 = vld [vmem:[%s14303_s1 + $0x5cc] ss:$16 sps:$4 sm:$0xff]   ;;  %v55_v19 = vcombine.high %v11357_v23, %v11357_v23 }
  0x81   :  { %v9598_v23 = vld [vmem:[%s14303_s1 + $0x5ec] ss:$16 sps:$4 sm:$0xff]  }
  0x82   :  { %6478 = vmatmul.mubr.bf16.vlgmr.msra.gmra.mrb[0].mxu0 %v208_v21  ;;  %7134 = vmatmul.mubr.bf16.vlgmr.msra.gmra.mrb[0].mxu1 %v208_v21  ;;  %v9590_v21 = vld [vmem:[%s14303_s1 + $0x5c8] ss:$16 sps:$4 sm:$0xff]  }
  0x83   :  { %6487 = vmatpush1.bf16.msra.mxu0 %v9503_v20  ;;  %7143 = vmatpush1.bf16.msra.mxu1 %v9506_v22  ;;  %v9587_v20 = vld [vmem:[%s14303_s1 + $0x5c0] ss:$16 sps:$4 sm:$0xff]   ;;  %v9595_v22 = vld [vmem:[%s14303_s1 + $0x5e4] ss:$16 sps:$4 sm:$0xff]  }
  0x84   :  { %6488 = vmatprep.subr.bf16.mxu0 %v9511_v24  ;;  %7144 = vmatprep.subr.bf16.mxu1 %v9514_v9  ;;  %v11542_v24 = vrot.slane %v55_v19, %v11077_v49  ;;  %v9593_v9 = vld [vmem:[%s14303_s1 + $0x5e0] ss:$16 sps:$4 sm:$0xff]   ;;  %v9674_v19 = vld [vmem:[%s14303_s1 + $0x788] ss:$16 sps:$4 sm:$0xff]  }
  0x85   :  { %6518 = vmatprep.mubr.bf16.mxu0 %v211_v31  ;;  %7174 = vmatprep.mubr.bf16.mxu1 %v211_v31  ;;  %v9599_v31 = vld [vmem:[%s14303_s1 + $0x600] ss:$16 sps:$4 sm:$0xff]  }
  0x87   :  { %6489 = vmatpush1.bf16.msra.mxu0 %v9509_v27  ;;  %7145 = vmatpush1.bf16.msra.mxu1 %v9512_v28  ;;  %v9601_v27 = vld [vmem:[%s14303_s1 + $0x604] ss:$16 sps:$4 sm:$0xff]   ;;  %v9604_v28 = vld [vmem:[%s14303_s1 + $0x60c] ss:$16 sps:$4 sm:$0xff]  }
  0x88   :  { %6490 = vmatprep.subr.bf16.mxu0 %v9517_v29  ;;  %7146 = vmatprep.subr.bf16.mxu1 %v9520_v30  ;;  %v71_v29 = vcombine.high %v11542_v24, %v11542_v24  ;;  %v210_v30 = vpack.c.bf16 %v11367_v25, %v11367_v25  ;;  %v9610_v25 = vld [vmem:[%s14303_s1 + $0x62c] ss:$16 sps:$4 sm:$0xff]  }
  0x8b   :  { %6491 = vmatpush1.bf16.msra.mxu0 %v9515_v32  ;;  %7147 = vmatpush1.bf16.msra.mxu1 %v9518_v33  ;;  %v9602_v32 = vld [vmem:[%s14303_s1 + $0x608] ss:$16 sps:$4 sm:$0xff]   ;;  %v9607_v33 = vld [vmem:[%s14303_s1 + $0x624] ss:$16 sps:$4 sm:$0xff]  }
  0x8c   :  { %6492 = vmatprep.subr.bf16.mxu0 %v9523_v34  ;;  %7148 = vmatprep.subr.bf16.mxu1 %v9526_v35  ;;  %v213_v34 = vpack.c.bf16 %v71_v29, %v71_v29  ;;  %v9605_v35 = vld [vmem:[%s14303_s1 + $0x620] ss:$16 sps:$4 sm:$0xff]   ;;  %v9686_v29 = vld [vmem:[%s14303_s1 + $0x7c8] ss:$16 sps:$4 sm:$0xff]  }
  0x8f   :  { %6493 = vmatpush1.bf16.msra.mxu0 %v9521_v36  ;;  %7149 = vmatpush1.bf16.msra.mxu1 %v9524_v37  ;;  %v9608_v36 = vld [vmem:[%s14303_s1 + $0x628] ss:$16 sps:$4 sm:$0xff]   ;;  %v9613_v37 = vld [vmem:[%s14303_s1 + $0x644] ss:$16 sps:$4 sm:$0xff]  }
  0x90   :  { %6494 = vmatprep.subr.bf16.mxu0 %v9529_v38  ;;  %7150 = vmatprep.subr.bf16.mxu1 %v9532_v39  ;;  %v9616_v38 = vld [vmem:[%s14303_s1 + $0x64c] ss:$16 sps:$4 sm:$0xff]   ;;  %v9611_v39 = vld [vmem:[%s14303_s1 + $0x640] ss:$16 sps:$4 sm:$0xff]  }
  0x93   :  { %6495 = vmatpush1.bf16.msra.mxu0 %v9527_v40  ;;  %7151 = vmatpush1.bf16.msra.mxu1 %v9530_v41  ;;  %v9614_v40 = vld [vmem:[%s14303_s1 + $0x648] ss:$16 sps:$4 sm:$0xff]   ;;  %v9619_v41 = vld [vmem:[%s14303_s1 + $0x664] ss:$16 sps:$4 sm:$0xff]  }
  0x94   :  { %6496 = vmatprep.subr.bf16.mxu0 %v9535_v42  ;;  %7152 = vmatprep.subr.bf16.mxu1 %v9538_v44  ;;  %v9622_v42 = vld [vmem:[%s14303_s1 + $0x66c] ss:$16 sps:$4 sm:$0xff]   ;;  %v9617_v44 = vld [vmem:[%s14303_s1 + $0x660] ss:$16 sps:$4 sm:$0xff]  }
  0x97   :  { %6497 = vmatpush1.bf16.msra.mxu0 %v9533_v45  ;;  %7153 = vmatpush1.bf16.msra.mxu1 %v9536_v46  ;;  %v9620_v45 = vld [vmem:[%s14303_s1 + $0x668] ss:$16 sps:$4 sm:$0xff]   ;;  %v9625_v46 = vld [vmem:[%s14303_s1 + $0x684] ss:$16 sps:$4 sm:$0xff]  }
  0x98   :  { %6498 = vmatprep.subr.bf16.mxu0 %v9541_v47  ;;  %7154 = vmatprep.subr.bf16.mxu1 %v9544_v48  ;;  %v9628_v47 = vld [vmem:[%s14303_s1 + $0x68c] ss:$16 sps:$4 sm:$0xff]   ;;  %v9623_v48 = vld [vmem:[%s14303_s1 + $0x680] ss:$16 sps:$4 sm:$0xff]  }
  0x9b   :  { %6499 = vmatpush1.bf16.msra.mxu0 %v9539_v50  ;;  %7155 = vmatpush1.bf16.msra.mxu1 %v9542_v51  ;;  %v9626_v50 = vld [vmem:[%s14303_s1 + $0x688] ss:$16 sps:$4 sm:$0xff]   ;;  %v9631_v51 = vld [vmem:[%s14303_s1 + $0x6a4] ss:$16 sps:$4 sm:$0xff]  }
  0x9c   :  { %6500 = vmatprep.subr.bf16.mxu0 %v9547_v52  ;;  %7156 = vmatprep.subr.bf16.mxu1 %v9550_v53  ;;  %v9634_v52 = vld [vmem:[%s14303_s1 + $0x6ac] ss:$16 sps:$4 sm:$0xff]   ;;  %v9629_v53 = vld [vmem:[%s14303_s1 + $0x6a0] ss:$16 sps:$4 sm:$0xff]  }
  0x9f   :  { %6501 = vmatpush1.bf16.msra.mxu0 %v9545_v54  ;;  %7157 = vmatpush1.bf16.msra.mxu1 %v9548_v55  ;;  %v9632_v54 = vld [vmem:[%s14303_s1 + $0x6a8] ss:$16 sps:$4 sm:$0xff]   ;;  %v9637_v55 = vld [vmem:[%s14303_s1 + $0x6c4] ss:$16 sps:$4 sm:$0xff]  }
  0xa0   :  { %6502 = vmatprep.subr.bf16.mxu0 %v9553_v56  ;;  %7158 = vmatprep.subr.bf16.mxu1 %v9556_v57  ;;  %v9640_v56 = vld [vmem:[%s14303_s1 + $0x6cc] ss:$16 sps:$4 sm:$0xff]   ;;  %v9635_v57 = vld [vmem:[%s14303_s1 + $0x6c0] ss:$16 sps:$4 sm:$0xff]  }
  0xa3   :  { %6503 = vmatpush1.bf16.msra.mxu0 %v9551_v58  ;;  %7159 = vmatpush1.bf16.msra.mxu1 %v9554_v59  ;;  %v9638_v58 = vld [vmem:[%s14303_s1 + $0x6c8] ss:$16 sps:$4 sm:$0xff]   ;;  %v9643_v59 = vld [vmem:[%s14303_s1 + $0x6e4] ss:$16 sps:$4 sm:$0xff]  }
  0xa4   :  { %6504 = vmatprep.subr.bf16.mxu0 %v9559_v60  ;;  %7160 = vmatprep.subr.bf16.mxu1 %v9562_v61  ;;  %v9646_v60 = vld [vmem:[%s14303_s1 + $0x6ec] ss:$16 sps:$4 sm:$0xff]   ;;  %v9641_v61 = vld [vmem:[%s14303_s1 + $0x6e0] ss:$16 sps:$4 sm:$0xff]  }
  0xa7   :  { %6505 = vmatpush1.bf16.msra.mxu0 %v9557_v62  ;;  %7161 = vmatpush1.bf16.msra.mxu1 %v9560_v63  ;;  %v9644_v62 = vld [vmem:[%s14303_s1 + $0x6e8] ss:$16 sps:$4 sm:$0xff]   ;;  %v9649_v63 = vld [vmem:[%s14303_s1 + $0x704] ss:$16 sps:$4 sm:$0xff]  }
  0xa8   :  { %6506 = vmatprep.subr.bf16.mxu0 %v9565_v0  ;;  %7162 = vmatprep.subr.bf16.mxu1 %v9568_v1  ;;  %v9652_v0 = vld [vmem:[%s14303_s1 + $0x70c] ss:$16 sps:$4 sm:$0xff]   ;;  %v9647_v1 = vld [vmem:[%s14303_s1 + $0x700] ss:$16 sps:$4 sm:$0xff]  }
  0xab   :  { %6507 = vmatpush1.bf16.msra.mxu0 %v9563_v2  ;;  %7163 = vmatpush1.bf16.msra.mxu1 %v9566_v3  ;;  %v9650_v2 = vld [vmem:[%s14303_s1 + $0x708] ss:$16 sps:$4 sm:$0xff]   ;;  %v9655_v3 = vld [vmem:[%s14303_s1 + $0x724] ss:$16 sps:$4 sm:$0xff]  }
  0xac   :  { %6508 = vmatprep.subr.bf16.mxu0 %v9571_v4  ;;  %7164 = vmatprep.subr.bf16.mxu1 %v9574_v5  ;;  %v9658_v4 = vld [vmem:[%s14303_s1 + $0x72c] ss:$16 sps:$4 sm:$0xff]   ;;  %v9653_v5 = vld [vmem:[%s14303_s1 + $0x720] ss:$16 sps:$4 sm:$0xff]  }
  0xaf   :  { %6509 = vmatpush1.bf16.msra.mxu0 %v9569_v6  ;;  %7165 = vmatpush1.bf16.msra.mxu1 %v9572_v7  ;;  %v9656_v6 = vld [vmem:[%s14303_s1 + $0x728] ss:$16 sps:$4 sm:$0xff]   ;;  %v9661_v7 = vld [vmem:[%s14303_s1 + $0x744] ss:$16 sps:$4 sm:$0xff]  }
  0xb0   :  { %6510 = vmatprep.subr.bf16.mxu0 %v9577_v8  ;;  %7166 = vmatprep.subr.bf16.mxu1 %v9580_v10  ;;  %v9664_v8 = vld [vmem:[%s14303_s1 + $0x74c] ss:$16 sps:$4 sm:$0xff]   ;;  %v9659_v10 = vld [vmem:[%s14303_s1 + $0x740] ss:$16 sps:$4 sm:$0xff]  }
  0xb3   :  { %6511 = vmatpush1.bf16.msra.mxu0 %v9575_v11  ;;  %7167 = vmatpush1.bf16.msra.mxu1 %v9578_v12  ;;  %v9662_v11 = vld [vmem:[%s14303_s1 + $0x748] ss:$16 sps:$4 sm:$0xff]   ;;  %v9667_v12 = vld [vmem:[%s14303_s1 + $0x764] ss:$16 sps:$4 sm:$0xff]  }
  0xb4   :  { %6512 = vmatprep.subr.bf16.mxu0 %v9583_v13  ;;  %7168 = vmatprep.subr.bf16.mxu1 %v9586_v14  ;;  %v9670_v13 = vld [vmem:[%s14303_s1 + $0x76c] ss:$16 sps:$4 sm:$0xff]   ;;  %v9665_v14 = vld [vmem:[%s14303_s1 + $0x760] ss:$16 sps:$4 sm:$0xff]  }
  0xb7   :  { %6513 = vmatpush1.bf16.msra.mxu0 %v9581_v15  ;;  %7169 = vmatpush1.bf16.msra.mxu1 %v9584_v16  ;;  %v9668_v15 = vld [vmem:[%s14303_s1 + $0x768] ss:$16 sps:$4 sm:$0xff]   ;;  %v9673_v16 = vld [vmem:[%s14303_s1 + $0x784] ss:$16 sps:$4 sm:$0xff]  }
  0xb8   :  { %6514 = vmatprep.subr.bf16.mxu0 %v9589_v17  ;;  %7170 = vmatprep.subr.bf16.mxu1 %v9592_v18  ;;  %v9676_v17 = vld [vmem:[%s14303_s1 + $0x78c] ss:$16 sps:$4 sm:$0xff]   ;;  %v9671_v18 = vld [vmem:[%s14303_s1 + $0x780] ss:$16 sps:$4 sm:$0xff]  }
  0xbb   :  { %6515 = vmatpush1.bf16.msra.mxu0 %v9587_v20  ;;  %7171 = vmatpush1.bf16.msra.mxu1 %v9590_v21  ;;  %v9679_v20 = vld [vmem:[%s14303_s1 + $0x7a4] ss:$16 sps:$4 sm:$0xff]   ;;  %v9682_v21 = vld [vmem:[%s14303_s1 + $0x7ac] ss:$16 sps:$4 sm:$0xff]  }
  0xbc   :  { %6516 = vmatprep.subr.bf16.mxu0 %v9595_v22  ;;  %7172 = vmatprep.subr.bf16.mxu1 %v9598_v23  ;;  %v9677_v22 = vld [vmem:[%s14303_s1 + $0x7a0] ss:$16 sps:$4 sm:$0xff]   ;;  %v9680_v23 = vld [vmem:[%s14303_s1 + $0x7a8] ss:$16 sps:$4 sm:$0xff]  }
  0xbf   :  { %6517 = vmatpush1.bf16.msra.mxu0 %v9593_v9  ;;  %7173 = vmatpush1.bf16.msra.mxu1 %v9596_v26  ;;  %v9685_v9 = vld [vmem:[%s14303_s1 + $0x7c4] ss:$16 sps:$4 sm:$0xff]   ;;  %v9688_v26 = vld [vmem:[%s14303_s1 + $0x7cc] ss:$16 sps:$4 sm:$0xff]  }
  0xc0   :  { %6527 = vmatprep.subr.bf16.mxu0 %v9601_v27  ;;  %7183 = vmatprep.subr.bf16.mxu1 %v9604_v28  ;;  %v9683_v27 = vld [vmem:[%s14303_s1 + $0x7c0] ss:$16 sps:$4 sm:$0xff]  }
  0xc1   :  { %v11734_v28 = vld [vmem:[%s14302_s0 + $0x10] sm:$0xff] }
  0xc2   :  { %6519 = vmatmul.mubr.bf16.vlgmr.msra.gmra.mrb[0].mxu0 %v210_v30  ;;  %7175 = vmatmul.mubr.bf16.vlgmr.msra.gmra.mrb[0].mxu1 %v210_v30  ;;  %v9691_v30 = vld [vmem:[%s14303_s1 + $0x7e4] ss:$16 sps:$4 sm:$0xff]  }
  0xc3   :  { %6528 = vmatpush1.bf16.msra.mxu0 %v9599_v31  ;;  %7184 = vmatpush1.bf16.msra.mxu1 %v9602_v32  ;;  %v9694_v31 = vld [vmem:[%s14303_s1 + $0x7ec] ss:$16 sps:$4 sm:$0xff]   ;;  %v11747_v32 = vrot.slane %v11734_v28, %v11077_v49 }
  0xc4   :  { %6529 = vmatprep.subr.bf16.mxu0 %v9607_v33  ;;  %7185 = vmatprep.subr.bf16.mxu1 %v9610_v25  ;;  %v9689_v33 = vld [vmem:[%s14303_s1 + $0x7e0] ss:$16 sps:$4 sm:$0xff]   ;;  %v9692_v25 = vld [vmem:[%s14303_s1 + $0x7e8] ss:$16 sps:$4 sm:$0xff]  }
  0xc5   :  { %6559 = vmatprep.mubr.bf16.mxu0 %v213_v34  ;;  %7215 = vmatprep.mubr.bf16.mxu1 %v213_v34  ;;  %v9698_v34 = vld [vmem:[%s14303_s1 + $0x804] ss:$16 sps:$4 sm:$0xff]  }
  0xc7   :  { %6530 = vmatpush1.bf16.msra.mxu0 %v9605_v35  ;;  %7186 = vmatpush1.bf16.msra.mxu1 %v9608_v36  ;;  %v9701_v35 = vld [vmem:[%s14303_s1 + $0x80c] ss:$16 sps:$4 sm:$0xff]   ;;  %v87_v36 = vcombine.high %v11747_v32, %v11747_v32 }
  0xc8   :  { %6531 = vmatprep.subr.bf16.mxu0 %v9613_v37  ;;  %7187 = vmatprep.subr.bf16.mxu1 %v9616_v38  ;;  %v9696_v37 = vld [vmem:[%s14303_s1 + $0x800] ss:$16 sps:$4 sm:$0xff]   ;;  %v212_v38 = vpack.c.bf16 %v11542_v24, %v11542_v24 }
  0xc9   :  { %v9702_v24 = vld [vmem:[%s14303_s1 + $0x820] ss:$16 sps:$4 sm:$0xff]  }
  0xcb   :  { %6532 = vmatpush1.bf16.msra.mxu0 %v9611_v39  ;;  %7188 = vmatpush1.bf16.msra.mxu1 %v9614_v40  ;;  %v9699_v39 = vld [vmem:[%s14303_s1 + $0x808] ss:$16 sps:$4 sm:$0xff]   ;;  %v9704_v40 = vld [vmem:[%s14303_s1 + $0x824] ss:$16 sps:$4 sm:$0xff]  }
  0xcc   :  { %6533 = vmatprep.subr.bf16.mxu0 %v9619_v41  ;;  %7189 = vmatprep.subr.bf16.mxu1 %v9622_v42  ;;  %v9707_v41 = vld [vmem:[%s14303_s1 + $0x82c] ss:$16 sps:$4 sm:$0xff]   ;;  %v215_v42 = vpack.c.bf16 %v87_v36, %v87_v36  ;;  %v9780_v36 = vld [vmem:[%s14303_s1 + $0x9c0] ss:$16 sps:$4 sm:$0xff]  }
  0xcf   :  { %6534 = vmatpush1.bf16.msra.mxu0 %v9617_v44  ;;  %7190 = vmatpush1.bf16.msra.mxu1 %v9620_v45  ;;  %v9705_v44 = vld [vmem:[%s14303_s1 + $0x828] ss:$16 sps:$4 sm:$0xff]   ;;  %v9710_v45 = vld [vmem:[%s14303_s1 + $0x844] ss:$16 sps:$4 sm:$0xff]  }
  0xd0   :  { %6535 = vmatprep.subr.bf16.mxu0 %v9625_v46  ;;  %7191 = vmatprep.subr.bf16.mxu1 %v9628_v47  ;;  %v9713_v46 = vld [vmem:[%s14303_s1 + $0x84c] ss:$16 sps:$4 sm:$0xff]   ;;  %v9708_v47 = vld [vmem:[%s14303_s1 + $0x840] ss:$16 sps:$4 sm:$0xff]  }
  0xd3   :  { %6536 = vmatpush1.bf16.msra.mxu0 %v9623_v48  ;;  %7192 = vmatpush1.bf16.msra.mxu1 %v9626_v50  ;;  %v9711_v48 = vld [vmem:[%s14303_s1 + $0x848] ss:$16 sps:$4 sm:$0xff]   ;;  %v9716_v50 = vld [vmem:[%s14303_s1 + $0x864] ss:$16 sps:$4 sm:$0xff]  }
  0xd4   :  { %6537 = vmatprep.subr.bf16.mxu0 %v9631_v51  ;;  %7193 = vmatprep.subr.bf16.mxu1 %v9634_v52  ;;  %v9719_v51 = vld [vmem:[%s14303_s1 + $0x86c] ss:$16 sps:$4 sm:$0xff]   ;;  %v9714_v52 = vld [vmem:[%s14303_s1 + $0x860] ss:$16 sps:$4 sm:$0xff]  }
  0xd7   :  { %6538 = vmatpush1.bf16.msra.mxu0 %v9629_v53  ;;  %7194 = vmatpush1.bf16.msra.mxu1 %v9632_v54  ;;  %v9717_v53 = vld [vmem:[%s14303_s1 + $0x868] ss:$16 sps:$4 sm:$0xff]   ;;  %v9722_v54 = vld [vmem:[%s14303_s1 + $0x884] ss:$16 sps:$4 sm:$0xff]  }
  0xd8   :  { %6539 = vmatprep.subr.bf16.mxu0 %v9637_v55  ;;  %7195 = vmatprep.subr.bf16.mxu1 %v9640_v56  ;;  %v9725_v55 = vld [vmem:[%s14303_s1 + $0x88c] ss:$16 sps:$4 sm:$0xff]   ;;  %v9720_v56 = vld [vmem:[%s14303_s1 + $0x880] ss:$16 sps:$4 sm:$0xff]  }
  0xdb   :  { %6540 = vmatpush1.bf16.msra.mxu0 %v9635_v57  ;;  %7196 = vmatpush1.bf16.msra.mxu1 %v9638_v58  ;;  %v9723_v57 = vld [vmem:[%s14303_s1 + $0x888] ss:$16 sps:$4 sm:$0xff]   ;;  %v9728_v58 = vld [vmem:[%s14303_s1 + $0x8a4] ss:$16 sps:$4 sm:$0xff]  }
  0xdc   :  { %6541 = vmatprep.subr.bf16.mxu0 %v9643_v59  ;;  %7197 = vmatprep.subr.bf16.mxu1 %v9646_v60  ;;  %v9731_v59 = vld [vmem:[%s14303_s1 + $0x8ac] ss:$16 sps:$4 sm:$0xff]   ;;  %v9726_v60 = vld [vmem:[%s14303_s1 + $0x8a0] ss:$16 sps:$4 sm:$0xff]  }
  0xdf   :  { %6542 = vmatpush1.bf16.msra.mxu0 %v9641_v61  ;;  %7198 = vmatpush1.bf16.msra.mxu1 %v9644_v62  ;;  %v9729_v61 = vld [vmem:[%s14303_s1 + $0x8a8] ss:$16 sps:$4 sm:$0xff]   ;;  %v9734_v62 = vld [vmem:[%s14303_s1 + $0x8c4] ss:$16 sps:$4 sm:$0xff]  }
  0xe0   :  { %6543 = vmatprep.subr.bf16.mxu0 %v9649_v63  ;;  %7199 = vmatprep.subr.bf16.mxu1 %v9652_v0  ;;  %v9737_v63 = vld [vmem:[%s14303_s1 + $0x8cc] ss:$16 sps:$4 sm:$0xff]   ;;  %v9732_v0 = vld [vmem:[%s14303_s1 + $0x8c0] ss:$16 sps:$4 sm:$0xff]  }
  0xe3   :  { %6544 = vmatpush1.bf16.msra.mxu0 %v9647_v1  ;;  %7200 = vmatpush1.bf16.msra.mxu1 %v9650_v2  ;;  %v9735_v1 = vld [vmem:[%s14303_s1 + $0x8c8] ss:$16 sps:$4 sm:$0xff]   ;;  %v9740_v2 = vld [vmem:[%s14303_s1 + $0x8e4] ss:$16 sps:$4 sm:$0xff]  }
  0xe4   :  { %6545 = vmatprep.subr.bf16.mxu0 %v9655_v3  ;;  %7201 = vmatprep.subr.bf16.mxu1 %v9658_v4  ;;  %v9743_v3 = vld [vmem:[%s14303_s1 + $0x8ec] ss:$16 sps:$4 sm:$0xff]   ;;  %v9738_v4 = vld [vmem:[%s14303_s1 + $0x8e0] ss:$16 sps:$4 sm:$0xff]  }
  0xe7   :  { %6546 = vmatpush1.bf16.msra.mxu0 %v9653_v5  ;;  %7202 = vmatpush1.bf16.msra.mxu1 %v9656_v6  ;;  %v9741_v5 = vld [vmem:[%s14303_s1 + $0x8e8] ss:$16 sps:$4 sm:$0xff]   ;;  %v9746_v6 = vld [vmem:[%s14303_s1 + $0x904] ss:$16 sps:$4 sm:$0xff]  }
  0xe8   :  { %6547 = vmatprep.subr.bf16.mxu0 %v9661_v7  ;;  %7203 = vmatprep.subr.bf16.mxu1 %v9664_v8  ;;  %v9749_v7 = vld [vmem:[%s14303_s1 + $0x90c] ss:$16 sps:$4 sm:$0xff]   ;;  %v9744_v8 = vld [vmem:[%s14303_s1 + $0x900] ss:$16 sps:$4 sm:$0xff]  }
  0xeb   :  { %6548 = vmatpush1.bf16.msra.mxu0 %v9659_v10  ;;  %7204 = vmatpush1.bf16.msra.mxu1 %v9662_v11  ;;  %v9747_v10 = vld [vmem:[%s14303_s1 + $0x908] ss:$16 sps:$4 sm:$0xff]   ;;  %v9752_v11 = vld [vmem:[%s14303_s1 + $0x924] ss:$16 sps:$4 sm:$0xff]  }
  0xec   :  { %6549 = vmatprep.subr.bf16.mxu0 %v9667_v12  ;;  %7205 = vmatprep.subr.bf16.mxu1 %v9670_v13  ;;  %v9755_v12 = vld [vmem:[%s14303_s1 + $0x92c] ss:$16 sps:$4 sm:$0xff]   ;;  %v9750_v13 = vld [vmem:[%s14303_s1 + $0x920] ss:$16 sps:$4 sm:$0xff]  }
  0xef   :  { %6550 = vmatpush1.bf16.msra.mxu0 %v9665_v14  ;;  %7206 = vmatpush1.bf16.msra.mxu1 %v9668_v15  ;;  %v9753_v14 = vld [vmem:[%s14303_s1 + $0x928] ss:$16 sps:$4 sm:$0xff]   ;;  %v9758_v15 = vld [vmem:[%s14303_s1 + $0x944] ss:$16 sps:$4 sm:$0xff]  }
  0xf0   :  { %6551 = vmatprep.subr.bf16.mxu0 %v9673_v16  ;;  %7207 = vmatprep.subr.bf16.mxu1 %v9676_v17  ;;  %v9761_v16 = vld [vmem:[%s14303_s1 + $0x94c] ss:$16 sps:$4 sm:$0xff]   ;;  %v9756_v17 = vld [vmem:[%s14303_s1 + $0x940] ss:$16 sps:$4 sm:$0xff]  }
  0xf3   :  { %6552 = vmatpush1.bf16.msra.mxu0 %v9671_v18  ;;  %7208 = vmatpush1.bf16.msra.mxu1 %v9674_v19  ;;  %v9759_v18 = vld [vmem:[%s14303_s1 + $0x948] ss:$16 sps:$4 sm:$0xff]   ;;  %v9764_v19 = vld [vmem:[%s14303_s1 + $0x964] ss:$16 sps:$4 sm:$0xff]  }
  0xf4   :  { %6553 = vmatprep.subr.bf16.mxu0 %v9679_v20  ;;  %7209 = vmatprep.subr.bf16.mxu1 %v9682_v21  ;;  %v9767_v20 = vld [vmem:[%s14303_s1 + $0x96c] ss:$16 sps:$4 sm:$0xff]   ;;  %v9762_v21 = vld [vmem:[%s14303_s1 + $0x960] ss:$16 sps:$4 sm:$0xff]  }
  0xf7   :  { %6554 = vmatpush1.bf16.msra.mxu0 %v9677_v22  ;;  %7210 = vmatpush1.bf16.msra.mxu1 %v9680_v23  ;;  %v9765_v22 = vld [vmem:[%s14303_s1 + $0x968] ss:$16 sps:$4 sm:$0xff]   ;;  %v9770_v23 = vld [vmem:[%s14303_s1 + $0x984] ss:$16 sps:$4 sm:$0xff]  }
  0xf8   :  { %6555 = vmatprep.subr.bf16.mxu0 %v9685_v9  ;;  %7211 = vmatprep.subr.bf16.mxu1 %v9688_v26  ;;  %v9773_v9 = vld [vmem:[%s14303_s1 + $0x98c] ss:$16 sps:$4 sm:$0xff]   ;;  %v9768_v26 = vld [vmem:[%s14303_s1 + $0x980] ss:$16 sps:$4 sm:$0xff]  }
  0xfb   :  { %6556 = vmatpush1.bf16.msra.mxu0 %v9683_v27  ;;  %7212 = vmatpush1.bf16.msra.mxu1 %v9686_v29  ;;  %v9771_v27 = vld [vmem:[%s14303_s1 + $0x988] ss:$16 sps:$4 sm:$0xff]   ;;  %v9776_v29 = vld [vmem:[%s14303_s1 + $0x9a4] ss:$16 sps:$4 sm:$0xff]  }
  0xfc   :  { %6557 = vmatprep.subr.bf16.mxu0 %v9691_v30  ;;  %7213 = vmatprep.subr.bf16.mxu1 %v9694_v31  ;;  %v9779_v30 = vld [vmem:[%s14303_s1 + $0x9ac] ss:$16 sps:$4 sm:$0xff]   ;;  %v9774_v31 = vld [vmem:[%s14303_s1 + $0x9a0] ss:$16 sps:$4 sm:$0xff]  }
  0xff   :  { %6558 = vmatpush1.bf16.msra.mxu0 %v9689_v33  ;;  %7214 = vmatpush1.bf16.msra.mxu1 %v9692_v25  ;;  %v9777_v33 = vld [vmem:[%s14303_s1 + $0x9a8] ss:$16 sps:$4 sm:$0xff]   ;;  %v9782_v25 = vld [vmem:[%s14303_s1 + $0x9c4] ss:$16 sps:$4 sm:$0xff]  }
 0x100   :  { %6568 = vmatprep.subr.bf16.mxu0 %v9698_v34  ;;  %7224 = vmatprep.subr.bf16.mxu1 %v9701_v35  ;;  %v9785_v34 = vld [vmem:[%s14303_s1 + $0x9cc] ss:$16 sps:$4 sm:$0xff]   ;;  %v72_v35 = vcombine.high %v11734_v28, %v11734_v28 }
 0x101   :  { %v9791_v28 = vld [vmem:[%s14303_s1 + $0x9ec] ss:$16 sps:$4 sm:$0xff]  }
 0x102   :  { %6560 = vmatmul.mubr.bf16.vlgmr.msra.gmra.mrb[0].mxu0 %v212_v38  ;;  %7216 = vmatmul.mubr.bf16.vlgmr.msra.gmra.mrb[0].mxu1 %v212_v38  ;;  %v9788_v38 = vld [vmem:[%s14303_s1 + $0x9e4] ss:$16 sps:$4 sm:$0xff]  }
 0x103   :  { %6569 = vmatpush1.bf16.msra.mxu0 %v9696_v37  ;;  %7225 = vmatpush1.bf16.msra.mxu1 %v9699_v39  ;;  %v9783_v37 = vld [vmem:[%s14303_s1 + $0x9c8] ss:$16 sps:$4 sm:$0xff]   ;;  %v11948_v39 = vrot.slane %v72_v35, %v11077_v49 }
 0x104   :  { %6570 = vmatprep.subr.bf16.mxu0 %v9704_v40  ;;  %7226 = vmatprep.subr.bf16.mxu1 %v9707_v41  ;;  %v9786_v40 = vld [vmem:[%s14303_s1 + $0x9e0] ss:$16 sps:$4 sm:$0xff]   ;;  %v9789_v41 = vld [vmem:[%s14303_s1 + $0x9e8] ss:$16 sps:$4 sm:$0xff]  }
 0x105   :  { %6600 = vmatprep.mubr.bf16.mxu0 %v215_v42  ;;  %7256 = vmatprep.mubr.bf16.mxu1 %v215_v42  ;;  %v9794_v42 = vld [vmem:[%s14303_s1 + $0xa04] ss:$16 sps:$4 sm:$0xff]   ;;  %v9867_v35 = vld [vmem:[%s14303_s1 + $0xb88] ss:$16 sps:$4 sm:$0xff]  }
 0x107   :  { %6571 = vmatpush1.bf16.msra.mxu0 %v9702_v24  ;;  %7227 = vmatpush1.bf16.msra.mxu1 %v9705_v44  ;;  %v9797_v24 = vld [vmem:[%s14303_s1 + $0xa0c] ss:$16 sps:$4 sm:$0xff]   ;;  %v88_v44 = vcombine.high %v11948_v39, %v11948_v39 }
 0x108   :  { %6572 = vmatprep.subr.bf16.mxu0 %v9710_v45  ;;  %7228 = vmatprep.subr.bf16.mxu1 %v9713_v46  ;;  %v214_v45 = vpack.c.bf16 %v11747_v32, %v11747_v32  ;;  %v9792_v46 = vld [vmem:[%s14303_s1 + $0xa00] ss:$16 sps:$4 sm:$0xff]   ;;  %v9803_v32 = vld [vmem:[%s14303_s1 + $0xa2c] ss:$16 sps:$4 sm:$0xff]  }
 0x10b   :  { %6573 = vmatpush1.bf16.msra.mxu0 %v9708_v47  ;;  %7229 = vmatpush1.bf16.msra.mxu1 %v9711_v48  ;;  %v9795_v47 = vld [vmem:[%s14303_s1 + $0xa08] ss:$16 sps:$4 sm:$0xff]   ;;  %v9800_v48 = vld [vmem:[%s14303_s1 + $0xa24] ss:$16 sps:$4 sm:$0xff]  }
 0x10c   :  { %6574 = vmatprep.subr.bf16.mxu0 %v9716_v50  ;;  %7230 = vmatprep.subr.bf16.mxu1 %v9719_v51  ;;  %v217_v50 = vpack.c.bf16 %v88_v44, %v88_v44  ;;  %v9798_v51 = vld [vmem:[%s14303_s1 + $0xa20] ss:$16 sps:$4 sm:$0xff]   ;;  %v9879_v44 = vld [vmem:[%s14303_s1 + $0xbc8] ss:$16 sps:$4 sm:$0xff]  }
 0x10f   :  { %6575 = vmatpush1.bf16.msra.mxu0 %v9714_v52  ;;  %7231 = vmatpush1.bf16.msra.mxu1 %v9717_v53  ;;  %v9801_v52 = vld [vmem:[%s14303_s1 + $0xa28] ss:$16 sps:$4 sm:$0xff]   ;;  %v9806_v53 = vld [vmem:[%s14303_s1 + $0xa44] ss:$16 sps:$4 sm:$0xff]  }
 0x110   :  { %6576 = vmatprep.subr.bf16.mxu0 %v9722_v54  ;;  %7232 = vmatprep.subr.bf16.mxu1 %v9725_v55  ;;  %v9809_v54 = vld [vmem:[%s14303_s1 + $0xa4c] ss:$16 sps:$4 sm:$0xff]   ;;  %v9804_v55 = vld [vmem:[%s14303_s1 + $0xa40] ss:$16 sps:$4 sm:$0xff]  }
 0x113   :  { %6577 = vmatpush1.bf16.msra.mxu0 %v9720_v56  ;;  %7233 = vmatpush1.bf16.msra.mxu1 %v9723_v57  ;;  %v9807_v56 = vld [vmem:[%s14303_s1 + $0xa48] ss:$16 sps:$4 sm:$0xff]   ;;  %v9812_v57 = vld [vmem:[%s14303_s1 + $0xa64] ss:$16 sps:$4 sm:$0xff]  }
 0x114   :  { %6578 = vmatprep.subr.bf16.mxu0 %v9728_v58  ;;  %7234 = vmatprep.subr.bf16.mxu1 %v9731_v59  ;;  %v9815_v58 = vld [vmem:[%s14303_s1 + $0xa6c] ss:$16 sps:$4 sm:$0xff]   ;;  %v9810_v59 = vld [vmem:[%s14303_s1 + $0xa60] ss:$16 sps:$4 sm:$0xff]  }
 0x117   :  { %6579 = vmatpush1.bf16.msra.mxu0 %v9726_v60  ;;  %7235 = vmatpush1.bf16.msra.mxu1 %v9729_v61  ;;  %v9813_v60 = vld [vmem:[%s14303_s1 + $0xa68] ss:$16 sps:$4 sm:$0xff]   ;;  %v9818_v61 = vld [vmem:[%s14303_s1 + $0xa84] ss:$16 sps:$4 sm:$0xff]  }
 0x118   :  { %6580 = vmatprep.subr.bf16.mxu0 %v9734_v62  ;;  %7236 = vmatprep.subr.bf16.mxu1 %v9737_v63  ;;  %v9821_v62 = vld [vmem:[%s14303_s1 + $0xa8c] ss:$16 sps:$4 sm:$0xff]   ;;  %v9816_v63 = vld [vmem:[%s14303_s1 + $0xa80] ss:$16 sps:$4 sm:$0xff]  }
 0x11b   :  { %6581 = vmatpush1.bf16.msra.mxu0 %v9732_v0  ;;  %7237 = vmatpush1.bf16.msra.mxu1 %v9735_v1  ;;  %v9819_v0 = vld [vmem:[%s14303_s1 + $0xa88] ss:$16 sps:$4 sm:$0xff]   ;;  %v9824_v1 = vld [vmem:[%s14303_s1 + $0xaa4] ss:$16 sps:$4 sm:$0xff]  }
 0x11c   :  { %6582 = vmatprep.subr.bf16.mxu0 %v9740_v2  ;;  %7238 = vmatprep.subr.bf16.mxu1 %v9743_v3  ;;  %v9827_v2 = vld [vmem:[%s14303_s1 + $0xaac] ss:$16 sps:$4 sm:$0xff]   ;;  %v9822_v3 = vld [vmem:[%s14303_s1 + $0xaa0] ss:$16 sps:$4 sm:$0xff]  }
 0x11f   :  { %6583 = vmatpush1.bf16.msra.mxu0 %v9738_v4  ;;  %7239 = vmatpush1.bf16.msra.mxu1 %v9741_v5  ;;  %v9825_v4 = vld [vmem:[%s14303_s1 + $0xaa8] ss:$16 sps:$4 sm:$0xff]   ;;  %v9830_v5 = vld [vmem:[%s14303_s1 + $0xac4] ss:$16 sps:$4 sm:$0xff]  }
 0x120   :  { %6584 = vmatprep.subr.bf16.mxu0 %v9746_v6  ;;  %7240 = vmatprep.subr.bf16.mxu1 %v9749_v7  ;;  %v9833_v6 = vld [vmem:[%s14303_s1 + $0xacc] ss:$16 sps:$4 sm:$0xff]   ;;  %v9828_v7 = vld [vmem:[%s14303_s1 + $0xac0] ss:$16 sps:$4 sm:$0xff]  }
 0x123   :  { %6585 = vmatpush1.bf16.msra.mxu0 %v9744_v8  ;;  %7241 = vmatpush1.bf16.msra.mxu1 %v9747_v10  ;;  %v9831_v8 = vld [vmem:[%s14303_s1 + $0xac8] ss:$16 sps:$4 sm:$0xff]   ;;  %v9836_v10 = vld [vmem:[%s14303_s1 + $0xae4] ss:$16 sps:$4 sm:$0xff]  }
 0x124   :  { %6586 = vmatprep.subr.bf16.mxu0 %v9752_v11  ;;  %7242 = vmatprep.subr.bf16.mxu1 %v9755_v12  ;;  %v9839_v11 = vld [vmem:[%s14303_s1 + $0xaec] ss:$16 sps:$4 sm:$0xff]   ;;  %v9834_v12 = vld [vmem:[%s14303_s1 + $0xae0] ss:$16 sps:$4 sm:$0xff]  }
 0x127   :  { %6587 = vmatpush1.bf16.msra.mxu0 %v9750_v13  ;;  %7243 = vmatpush1.bf16.msra.mxu1 %v9753_v14  ;;  %v9837_v13 = vld [vmem:[%s14303_s1 + $0xae8] ss:$16 sps:$4 sm:$0xff]   ;;  %v9842_v14 = vld [vmem:[%s14303_s1 + $0xb04] ss:$16 sps:$4 sm:$0xff]  }
 0x128   :  { %6588 = vmatprep.subr.bf16.mxu0 %v9758_v15  ;;  %7244 = vmatprep.subr.bf16.mxu1 %v9761_v16  ;;  %v9845_v15 = vld [vmem:[%s14303_s1 + $0xb0c] ss:$16 sps:$4 sm:$0xff]   ;;  %v9840_v16 = vld [vmem:[%s14303_s1 + $0xb00] ss:$16 sps:$4 sm:$0xff]  }
 0x12b   :  { %6589 = vmatpush1.bf16.msra.mxu0 %v9756_v17  ;;  %7245 = vmatpush1.bf16.msra.mxu1 %v9759_v18  ;;  %v9843_v17 = vld [vmem:[%s14303_s1 + $0xb08] ss:$16 sps:$4 sm:$0xff]   ;;  %v9848_v18 = vld [vmem:[%s14303_s1 + $0xb24] ss:$16 sps:$4 sm:$0xff]  }
 0x12c   :  { %6590 = vmatprep.subr.bf16.mxu0 %v9764_v19  ;;  %7246 = vmatprep.subr.bf16.mxu1 %v9767_v20  ;;  %v9851_v19 = vld [vmem:[%s14303_s1 + $0xb2c] ss:$16 sps:$4 sm:$0xff]   ;;  %v9846_v20 = vld [vmem:[%s14303_s1 + $0xb20] ss:$16 sps:$4 sm:$0xff]  }
 0x12f   :  { %6591 = vmatpush1.bf16.msra.mxu0 %v9762_v21  ;;  %7247 = vmatpush1.bf16.msra.mxu1 %v9765_v22  ;;  %v9849_v21 = vld [vmem:[%s14303_s1 + $0xb28] ss:$16 sps:$4 sm:$0xff]   ;;  %v9854_v22 = vld [vmem:[%s14303_s1 + $0xb44] ss:$16 sps:$4 sm:$0xff]  }
 0x130   :  { %6592 = vmatprep.subr.bf16.mxu0 %v9770_v23  ;;  %7248 = vmatprep.subr.bf16.mxu1 %v9773_v9  ;;  %v9857_v23 = vld [vmem:[%s14303_s1 + $0xb4c] ss:$16 sps:$4 sm:$0xff]   ;;  %v9852_v9 = vld [vmem:[%s14303_s1 + $0xb40] ss:$16 sps:$4 sm:$0xff]  }
 0x133   :  { %6593 = vmatpush1.bf16.msra.mxu0 %v9768_v26  ;;  %7249 = vmatpush1.bf16.msra.mxu1 %v9771_v27  ;;  %v9855_v26 = vld [vmem:[%s14303_s1 + $0xb48] ss:$16 sps:$4 sm:$0xff]   ;;  %v9860_v27 = vld [vmem:[%s14303_s1 + $0xb64] ss:$16 sps:$4 sm:$0xff]  }
 0x134   :  { %6594 = vmatprep.subr.bf16.mxu0 %v9776_v29  ;;  %7250 = vmatprep.subr.bf16.mxu1 %v9779_v30  ;;  %v9863_v29 = vld [vmem:[%s14303_s1 + $0xb6c] ss:$16 sps:$4 sm:$0xff]   ;;  %v9858_v30 = vld [vmem:[%s14303_s1 + $0xb60] ss:$16 sps:$4 sm:$0xff]  }
 0x137   :  { %6595 = vmatpush1.bf16.msra.mxu0 %v9774_v31  ;;  %7251 = vmatpush1.bf16.msra.mxu1 %v9777_v33  ;;  %v9861_v31 = vld [vmem:[%s14303_s1 + $0xb68] ss:$16 sps:$4 sm:$0xff]   ;;  %v9866_v33 = vld [vmem:[%s14303_s1 + $0xb84] ss:$16 sps:$4 sm:$0xff]  }
 0x138   :  { %6596 = vmatprep.subr.bf16.mxu0 %v9782_v25  ;;  %7252 = vmatprep.subr.bf16.mxu1 %v9785_v34  ;;  %v9869_v25 = vld [vmem:[%s14303_s1 + $0xb8c] ss:$16 sps:$4 sm:$0xff]   ;;  %v9864_v34 = vld [vmem:[%s14303_s1 + $0xb80] ss:$16 sps:$4 sm:$0xff]  }
 0x13b   :  { %6597 = vmatpush1.bf16.msra.mxu0 %v9780_v36  ;;  %7253 = vmatpush1.bf16.msra.mxu1 %v9783_v37  ;;  %v9872_v36 = vld [vmem:[%s14303_s1 + $0xba4] ss:$16 sps:$4 sm:$0xff]   ;;  %v9875_v37 = vld [vmem:[%s14303_s1 + $0xbac] ss:$16 sps:$4 sm:$0xff]  }
 0x13c   :  { %6598 = vmatprep.subr.bf16.mxu0 %v9788_v38  ;;  %7254 = vmatprep.subr.bf16.mxu1 %v9791_v28  ;;  %v9870_v38 = vld [vmem:[%s14303_s1 + $0xba0] ss:$16 sps:$4 sm:$0xff]   ;;  %v9873_v28 = vld [vmem:[%s14303_s1 + $0xba8] ss:$16 sps:$4 sm:$0xff]  }
 0x13f   :  { %6599 = vmatpush1.bf16.msra.mxu0 %v9786_v40  ;;  %7255 = vmatpush1.bf16.msra.mxu1 %v9789_v41  ;;  %v9878_v40 = vld [vmem:[%s14303_s1 + $0xbc4] ss:$16 sps:$4 sm:$0xff]   ;;  %v9881_v41 = vld [vmem:[%s14303_s1 + $0xbcc] ss:$16 sps:$4 sm:$0xff]  }
 0x140   :  { %6609 = vmatprep.subr.bf16.mxu0 %v9794_v42  ;;  %7265 = vmatprep.subr.bf16.mxu1 %v9797_v24  ;;  %v12137_v42 = vld [vmem:[%s14302_s0 + $0x18] sm:$0xff]  ;;  %v9876_v24 = vld [vmem:[%s14303_s1 + $0xbc0] ss:$16 sps:$4 sm:$0xff]  }
 0x142   :  { %6601 = vmatmul.mubr.bf16.vlgmr.msra.gmra.mrb[0].mxu0 %v214_v45  ;;  %7257 = vmatmul.mubr.bf16.vlgmr.msra.gmra.mrb[0].mxu1 %v214_v45  ;;  %v9884_v45 = vld [vmem:[%s14303_s1 + $0xbe4] ss:$16 sps:$4 sm:$0xff]  }
 0x143   :  { %6610 = vmatpush1.bf16.msra.mxu0 %v9792_v46  ;;  %7266 = vmatpush1.bf16.msra.mxu1 %v9795_v47  ;;  %v9887_v46 = vld [vmem:[%s14303_s1 + $0xbec] ss:$16 sps:$4 sm:$0xff]   ;;  %v12153_v47 = vrot.slane %v12137_v42, %v11077_v49 }
 0x144   :  { %6611 = vmatprep.subr.bf16.mxu0 %v9800_v48  ;;  %7267 = vmatprep.subr.bf16.mxu1 %v9803_v32  ;;  %v9882_v48 = vld [vmem:[%s14303_s1 + $0xbe0] ss:$16 sps:$4 sm:$0xff]   ;;  %v9885_v32 = vld [vmem:[%s14303_s1 + $0xbe8] ss:$16 sps:$4 sm:$0xff]  }
 0x145   :  { %6641 = vmatprep.mubr.bf16.mxu0 %v217_v50  ;;  %7297 = vmatprep.mubr.bf16.mxu1 %v217_v50  ;;  %v9891_v50 = vld [vmem:[%s14303_s1 + $0xc04] ss:$16 sps:$4 sm:$0xff]  }
 0x147   :  { %6612 = vmatpush1.bf16.msra.mxu0 %v9798_v51  ;;  %7268 = vmatpush1.bf16.msra.mxu1 %v9801_v52  ;;  %v9894_v51 = vld [vmem:[%s14303_s1 + $0xc0c] ss:$16 sps:$4 sm:$0xff]   ;;  %v104_v52 = vcombine.high %v12153_v47, %v12153_v47 }
 0x148   :  { %6613 = vmatprep.subr.bf16.mxu0 %v9806_v53  ;;  %7269 = vmatprep.subr.bf16.mxu1 %v9809_v54  ;;  %v216_v53 = vpack.c.bf16 %v11948_v39, %v11948_v39  ;;  %v9889_v54 = vld [vmem:[%s14303_s1 + $0xc00] ss:$16 sps:$4 sm:$0xff]   ;;  %v9900_v39 = vld [vmem:[%s14303_s1 + $0xc2c] ss:$16 sps:$4 sm:$0xff]  }
 0x14b   :  { %6614 = vmatpush1.bf16.msra.mxu0 %v9804_v55  ;;  %7270 = vmatpush1.bf16.msra.mxu1 %v9807_v56  ;;  %v9892_v55 = vld [vmem:[%s14303_s1 + $0xc08] ss:$16 sps:$4 sm:$0xff]   ;;  %v9897_v56 = vld [vmem:[%s14303_s1 + $0xc24] ss:$16 sps:$4 sm:$0xff]  }
 0x14c   :  { %6615 = vmatprep.subr.bf16.mxu0 %v9812_v57  ;;  %7271 = vmatprep.subr.bf16.mxu1 %v9815_v58  ;;  %v219_v57 = vpack.c.bf16 %v104_v52, %v104_v52  ;;  %v9895_v58 = vld [vmem:[%s14303_s1 + $0xc20] ss:$16 sps:$4 sm:$0xff]  }
 0x14d   :  { %v9973_v52 = vld [vmem:[%s14303_s1 + $0xdc0] ss:$16 sps:$4 sm:$0xff]  }
 0x14f   :  { %6616 = vmatpush1.bf16.msra.mxu0 %v9810_v59  ;;  %7272 = vmatpush1.bf16.msra.mxu1 %v9813_v60  ;;  %v9898_v59 = vld [vmem:[%s14303_s1 + $0xc28] ss:$16 sps:$4 sm:$0xff]   ;;  %v9903_v60 = vld [vmem:[%s14303_s1 + $0xc44] ss:$16 sps:$4 sm:$0xff]  }
 0x150   :  { %6617 = vmatprep.subr.bf16.mxu0 %v9818_v61  ;;  %7273 = vmatprep.subr.bf16.mxu1 %v9821_v62  ;;  %v9906_v61 = vld [vmem:[%s14303_s1 + $0xc4c] ss:$16 sps:$4 sm:$0xff]   ;;  %v9901_v62 = vld [vmem:[%s14303_s1 + $0xc40] ss:$16 sps:$4 sm:$0xff]  }
 0x153   :  { %6618 = vmatpush1.bf16.msra.mxu0 %v9816_v63  ;;  %7274 = vmatpush1.bf16.msra.mxu1 %v9819_v0  ;;  %v9904_v63 = vld [vmem:[%s14303_s1 + $0xc48] ss:$16 sps:$4 sm:$0xff]   ;;  %v9909_v0 = vld [vmem:[%s14303_s1 + $0xc64] ss:$16 sps:$4 sm:$0xff]  }
 0x154   :  { %6619 = vmatprep.subr.bf16.mxu0 %v9824_v1  ;;  %7275 = vmatprep.subr.bf16.mxu1 %v9827_v2  ;;  %v9912_v1 = vld [vmem:[%s14303_s1 + $0xc6c] ss:$16 sps:$4 sm:$0xff]   ;;  %v9907_v2 = vld [vmem:[%s14303_s1 + $0xc60] ss:$16 sps:$4 sm:$0xff]  }
 0x157   :  { %6620 = vmatpush1.bf16.msra.mxu0 %v9822_v3  ;;  %7276 = vmatpush1.bf16.msra.mxu1 %v9825_v4  ;;  %v9910_v3 = vld [vmem:[%s14303_s1 + $0xc68] ss:$16 sps:$4 sm:$0xff]   ;;  %v9915_v4 = vld [vmem:[%s14303_s1 + $0xc84] ss:$16 sps:$4 sm:$0xff]  }
 0x158   :  { %6621 = vmatprep.subr.bf16.mxu0 %v9830_v5  ;;  %7277 = vmatprep.subr.bf16.mxu1 %v9833_v6  ;;  %v9918_v5 = vld [vmem:[%s14303_s1 + $0xc8c] ss:$16 sps:$4 sm:$0xff]   ;;  %v9913_v6 = vld [vmem:[%s14303_s1 + $0xc80] ss:$16 sps:$4 sm:$0xff]  }
 0x15b   :  { %6622 = vmatpush1.bf16.msra.mxu0 %v9828_v7  ;;  %7278 = vmatpush1.bf16.msra.mxu1 %v9831_v8  ;;  %v9916_v7 = vld [vmem:[%s14303_s1 + $0xc88] ss:$16 sps:$4 sm:$0xff]   ;;  %v9921_v8 = vld [vmem:[%s14303_s1 + $0xca4] ss:$16 sps:$4 sm:$0xff]  }
 0x15c   :  { %6623 = vmatprep.subr.bf16.mxu0 %v9836_v10  ;;  %7279 = vmatprep.subr.bf16.mxu1 %v9839_v11  ;;  %v9924_v10 = vld [vmem:[%s14303_s1 + $0xcac] ss:$16 sps:$4 sm:$0xff]   ;;  %v9919_v11 = vld [vmem:[%s14303_s1 + $0xca0] ss:$16 sps:$4 sm:$0xff]  }
 0x15f   :  { %6624 = vmatpush1.bf16.msra.mxu0 %v9834_v12  ;;  %7280 = vmatpush1.bf16.msra.mxu1 %v9837_v13  ;;  %v9922_v12 = vld [vmem:[%s14303_s1 + $0xca8] ss:$16 sps:$4 sm:$0xff]   ;;  %v9927_v13 = vld [vmem:[%s14303_s1 + $0xcc4] ss:$16 sps:$4 sm:$0xff]  }
 0x160   :  { %6625 = vmatprep.subr.bf16.mxu0 %v9842_v14  ;;  %7281 = vmatprep.subr.bf16.mxu1 %v9845_v15  ;;  %v9930_v14 = vld [vmem:[%s14303_s1 + $0xccc] ss:$16 sps:$4 sm:$0xff]   ;;  %v9925_v15 = vld [vmem:[%s14303_s1 + $0xcc0] ss:$16 sps:$4 sm:$0xff]  }
 0x163   :  { %6626 = vmatpush1.bf16.msra.mxu0 %v9840_v16  ;;  %7282 = vmatpush1.bf16.msra.mxu1 %v9843_v17  ;;  %v9928_v16 = vld [vmem:[%s14303_s1 + $0xcc8] ss:$16 sps:$4 sm:$0xff]   ;;  %v9933_v17 = vld [vmem:[%s14303_s1 + $0xce4] ss:$16 sps:$4 sm:$0xff]  }
 0x164   :  { %6627 = vmatprep.subr.bf16.mxu0 %v9848_v18  ;;  %7283 = vmatprep.subr.bf16.mxu1 %v9851_v19  ;;  %v9936_v18 = vld [vmem:[%s14303_s1 + $0xcec] ss:$16 sps:$4 sm:$0xff]   ;;  %v9931_v19 = vld [vmem:[%s14303_s1 + $0xce0] ss:$16 sps:$4 sm:$0xff]  }
 0x167   :  { %6628 = vmatpush1.bf16.msra.mxu0 %v9846_v20  ;;  %7284 = vmatpush1.bf16.msra.mxu1 %v9849_v21  ;;  %v9934_v20 = vld [vmem:[%s14303_s1 + $0xce8] ss:$16 sps:$4 sm:$0xff]   ;;  %v9939_v21 = vld [vmem:[%s14303_s1 + $0xd04] ss:$16 sps:$4 sm:$0xff]  }
 0x168   :  { %6629 = vmatprep.subr.bf16.mxu0 %v9854_v22  ;;  %7285 = vmatprep.subr.bf16.mxu1 %v9857_v23  ;;  %v9942_v22 = vld [vmem:[%s14303_s1 + $0xd0c] ss:$16 sps:$4 sm:$0xff]   ;;  %v9937_v23 = vld [vmem:[%s14303_s1 + $0xd00] ss:$16 sps:$4 sm:$0xff]  }
 0x16b   :  { %6630 = vmatpush1.bf16.msra.mxu0 %v9852_v9  ;;  %7286 = vmatpush1.bf16.msra.mxu1 %v9855_v26  ;;  %v9940_v9 = vld [vmem:[%s14303_s1 + $0xd08] ss:$16 sps:$4 sm:$0xff]   ;;  %v9945_v26 = vld [vmem:[%s14303_s1 + $0xd24] ss:$16 sps:$4 sm:$0xff]  }
 0x16c   :  { %6631 = vmatprep.subr.bf16.mxu0 %v9860_v27  ;;  %7287 = vmatprep.subr.bf16.mxu1 %v9863_v29  ;;  %v9948_v27 = vld [vmem:[%s14303_s1 + $0xd2c] ss:$16 sps:$4 sm:$0xff]   ;;  %v9943_v29 = vld [vmem:[%s14303_s1 + $0xd20] ss:$16 sps:$4 sm:$0xff]  }
 0x16f   :  { %6632 = vmatpush1.bf16.msra.mxu0 %v9858_v30  ;;  %7288 = vmatpush1.bf16.msra.mxu1 %v9861_v31  ;;  %v9946_v30 = vld [vmem:[%s14303_s1 + $0xd28] ss:$16 sps:$4 sm:$0xff]   ;;  %v9951_v31 = vld [vmem:[%s14303_s1 + $0xd44] ss:$16 sps:$4 sm:$0xff]  }
 0x170   :  { %6633 = vmatprep.subr.bf16.mxu0 %v9866_v33  ;;  %7289 = vmatprep.subr.bf16.mxu1 %v9869_v25  ;;  %v9954_v33 = vld [vmem:[%s14303_s1 + $0xd4c] ss:$16 sps:$4 sm:$0xff]   ;;  %v9949_v25 = vld [vmem:[%s14303_s1 + $0xd40] ss:$16 sps:$4 sm:$0xff]  }
 0x173   :  { %6634 = vmatpush1.bf16.msra.mxu0 %v9864_v34  ;;  %7290 = vmatpush1.bf16.msra.mxu1 %v9867_v35  ;;  %v9952_v34 = vld [vmem:[%s14303_s1 + $0xd48] ss:$16 sps:$4 sm:$0xff]   ;;  %v9957_v35 = vld [vmem:[%s14303_s1 + $0xd64] ss:$16 sps:$4 sm:$0xff]  }
 0x174   :  { %6635 = vmatprep.subr.bf16.mxu0 %v9872_v36  ;;  %7291 = vmatprep.subr.bf16.mxu1 %v9875_v37  ;;  %v9960_v36 = vld [vmem:[%s14303_s1 + $0xd6c] ss:$16 sps:$4 sm:$0xff]   ;;  %v9955_v37 = vld [vmem:[%s14303_s1 + $0xd60] ss:$16 sps:$4 sm:$0xff]  }
 0x177   :  { %6636 = vmatpush1.bf16.msra.mxu0 %v9870_v38  ;;  %7292 = vmatpush1.bf16.msra.mxu1 %v9873_v28  ;;  %v9958_v38 = vld [vmem:[%s14303_s1 + $0xd68] ss:$16 sps:$4 sm:$0xff]   ;;  %v9963_v28 = vld [vmem:[%s14303_s1 + $0xd84] ss:$16 sps:$4 sm:$0xff]  }
 0x178   :  { %6637 = vmatprep.subr.bf16.mxu0 %v9878_v40  ;;  %7293 = vmatprep.subr.bf16.mxu1 %v9881_v41  ;;  %v9966_v40 = vld [vmem:[%s14303_s1 + $0xd8c] ss:$16 sps:$4 sm:$0xff]   ;;  %v9961_v41 = vld [vmem:[%s14303_s1 + $0xd80] ss:$16 sps:$4 sm:$0xff]  }
 0x17b   :  { %6638 = vmatpush1.bf16.msra.mxu0 %v9876_v24  ;;  %7294 = vmatpush1.bf16.msra.mxu1 %v9879_v44  ;;  %v9964_v24 = vld [vmem:[%s14303_s1 + $0xd88] ss:$16 sps:$4 sm:$0xff]   ;;  %v9969_v44 = vld [vmem:[%s14303_s1 + $0xda4] ss:$16 sps:$4 sm:$0xff]  }
 0x17c   :  { %6639 = vmatprep.subr.bf16.mxu0 %v9884_v45  ;;  %7295 = vmatprep.subr.bf16.mxu1 %v9887_v46  ;;  %v9972_v45 = vld [vmem:[%s14303_s1 + $0xdac] ss:$16 sps:$4 sm:$0xff]   ;;  %v9967_v46 = vld [vmem:[%s14303_s1 + $0xda0] ss:$16 sps:$4 sm:$0xff]  }
 0x17f   :  { %6640 = vmatpush1.bf16.msra.mxu0 %v9882_v48  ;;  %7296 = vmatpush1.bf16.msra.mxu1 %v9885_v32  ;;  %v9970_v48 = vld [vmem:[%s14303_s1 + $0xda8] ss:$16 sps:$4 sm:$0xff]   ;;  %v9975_v32 = vld [vmem:[%s14303_s1 + $0xdc4] ss:$16 sps:$4 sm:$0xff]  }
 0x180   :  { %6650 = vmatprep.subr.bf16.mxu0 %v9891_v50  ;;  %7306 = vmatprep.subr.bf16.mxu1 %v9894_v51  ;;  %v9978_v50 = vld [vmem:[%s14303_s1 + $0xdcc] ss:$16 sps:$4 sm:$0xff]   ;;  %v89_v51 = vcombine.high %v12137_v42, %v12137_v42 }
 0x181   :  { %v9984_v42 = vld [vmem:[%s14303_s1 + $0xdec] ss:$16 sps:$4 sm:$0xff]  }
 0x182   :  { %6642 = vmatmul.mubr.bf16.vlgmr.msra.gmra.mrb[0].mxu0 %v216_v53  ;;  %7298 = vmatmul.mubr.bf16.vlgmr.msra.gmra.mrb[0].mxu1 %v216_v53  ;;  %v9976_v53 = vld [vmem:[%s14303_s1 + $0xdc8] ss:$16 sps:$4 sm:$0xff]  }
 0x183   :  { %6651 = vmatpush1.bf16.msra.mxu0 %v9889_v54  ;;  %7307 = vmatpush1.bf16.msra.mxu1 %v9892_v55  ;;  %v9981_v54 = vld [vmem:[%s14303_s1 + $0xde4] ss:$16 sps:$4 sm:$0xff]   ;;  %v12354_v55 = vrot.slane %v89_v51, %v11077_v49  ;;  %v10060_v51 = vld [vmem:[%s14303_s1 + $0xf88] ss:$16 sps:$4 sm:$0xff]  }
 0x184   :  { %6652 = vmatprep.subr.bf16.mxu0 %v9897_v56  ;;  %7308 = vmatprep.subr.bf16.mxu1 %v9900_v39  ;;  %v9979_v56 = vld [vmem:[%s14303_s1 + $0xde0] ss:$16 sps:$4 sm:$0xff]   ;;  %v9982_v39 = vld [vmem:[%s14303_s1 + $0xde8] ss:$16 sps:$4 sm:$0xff]  }
 0x185   :  { %6682 = vmatprep.mubr.bf16.mxu0 %v219_v57  ;;  %7338 = vmatprep.mubr.bf16.mxu1 %v219_v57  ;;  %v9987_v57 = vld [vmem:[%s14303_s1 + $0xe04] ss:$16 sps:$4 sm:$0xff]  }
 0x187   :  { %6653 = vmatpush1.bf16.msra.mxu0 %v9895_v58  ;;  %7309 = vmatpush1.bf16.msra.mxu1 %v9898_v59  ;;  %v9990_v58 = vld [vmem:[%s14303_s1 + $0xe0c] ss:$16 sps:$4 sm:$0xff]   ;;  %v105_v59 = vcombine.high %v12354_v55, %v12354_v55 }
 0x188   :  { %6654 = vmatprep.subr.bf16.mxu0 %v9903_v60  ;;  %7310 = vmatprep.subr.bf16.mxu1 %v9906_v61  ;;  %v218_v60 = vpack.c.bf16 %v12153_v47, %v12153_v47  ;;  %v9985_v61 = vld [vmem:[%s14303_s1 + $0xe00] ss:$16 sps:$4 sm:$0xff]   ;;  %v9996_v47 = vld [vmem:[%s14303_s1 + $0xe2c] ss:$16 sps:$4 sm:$0xff]  }
 0x18b   :  { %6655 = vmatpush1.bf16.msra.mxu0 %v9901_v62  ;;  %7311 = vmatpush1.bf16.msra.mxu1 %v9904_v63  ;;  %v9988_v62 = vld [vmem:[%s14303_s1 + $0xe08] ss:$16 sps:$4 sm:$0xff]   ;;  %v9993_v63 = vld [vmem:[%s14303_s1 + $0xe24] ss:$16 sps:$4 sm:$0xff]  }
 0x18c   :  { %6656 = vmatprep.subr.bf16.mxu0 %v9909_v0  ;;  %7312 = vmatprep.subr.bf16.mxu1 %v9912_v1  ;;  %v221_v0 = vpack.c.bf16 %v105_v59, %v105_v59  ;;  %v9991_v1 = vld [vmem:[%s14303_s1 + $0xe20] ss:$16 sps:$4 sm:$0xff]   ;;  %v10072_v59 = vld [vmem:[%s14303_s1 + $0xfc8] ss:$16 sps:$4 sm:$0xff]  }
 0x18f   :  { %6657 = vmatpush1.bf16.msra.mxu0 %v9907_v2  ;;  %7313 = vmatpush1.bf16.msra.mxu1 %v9910_v3  ;;  %v9994_v2 = vld [vmem:[%s14303_s1 + $0xe28] ss:$16 sps:$4 sm:$0xff]   ;;  %v9999_v3 = vld [vmem:[%s14303_s1 + $0xe44] ss:$16 sps:$4 sm:$0xff]  }
 0x190   :  { %6658 = vmatprep.subr.bf16.mxu0 %v9915_v4  ;;  %7314 = vmatprep.subr.bf16.mxu1 %v9918_v5  ;;  %v10002_v4 = vld [vmem:[%s14303_s1 + $0xe4c] ss:$16 sps:$4 sm:$0xff]   ;;  %v9997_v5 = vld [vmem:[%s14303_s1 + $0xe40] ss:$16 sps:$4 sm:$0xff]  }
 0x193   :  { %6659 = vmatpush1.bf16.msra.mxu0 %v9913_v6  ;;  %7315 = vmatpush1.bf16.msra.mxu1 %v9916_v7  ;;  %v10000_v6 = vld [vmem:[%s14303_s1 + $0xe48] ss:$16 sps:$4 sm:$0xff]   ;;  %v10005_v7 = vld [vmem:[%s14303_s1 + $0xe64] ss:$16 sps:$4 sm:$0xff]  }
 0x194   :  { %6660 = vmatprep.subr.bf16.mxu0 %v9921_v8  ;;  %7316 = vmatprep.subr.bf16.mxu1 %v9924_v10  ;;  %v10008_v8 = vld [vmem:[%s14303_s1 + $0xe6c] ss:$16 sps:$4 sm:$0xff]   ;;  %v10003_v10 = vld [vmem:[%s14303_s1 + $0xe60] ss:$16 sps:$4 sm:$0xff]  }
 0x197   :  { %6661 = vmatpush1.bf16.msra.mxu0 %v9919_v11  ;;  %7317 = vmatpush1.bf16.msra.mxu1 %v9922_v12  ;;  %v10006_v11 = vld [vmem:[%s14303_s1 + $0xe68] ss:$16 sps:$4 sm:$0xff]   ;;  %v10011_v12 = vld [vmem:[%s14303_s1 + $0xe84] ss:$16 sps:$4 sm:$0xff]  }
 0x198   :  { %6662 = vmatprep.subr.bf16.mxu0 %v9927_v13  ;;  %7318 = vmatprep.subr.bf16.mxu1 %v9930_v14  ;;  %v10014_v13 = vld [vmem:[%s14303_s1 + $0xe8c] ss:$16 sps:$4 sm:$0xff]   ;;  %v10009_v14 = vld [vmem:[%s14303_s1 + $0xe80] ss:$16 sps:$4 sm:$0xff]  }
 0x19b   :  { %6663 = vmatpush1.bf16.msra.mxu0 %v9925_v15  ;;  %7319 = vmatpush1.bf16.msra.mxu1 %v9928_v16  ;;  %v10012_v15 = vld [vmem:[%s14303_s1 + $0xe88] ss:$16 sps:$4 sm:$0xff]   ;;  %v10017_v16 = vld [vmem:[%s14303_s1 + $0xea4] ss:$16 sps:$4 sm:$0xff]  }
 0x19c   :  { %6664 = vmatprep.subr.bf16.mxu0 %v9933_v17  ;;  %7320 = vmatprep.subr.bf16.mxu1 %v9936_v18  ;;  %v10020_v17 = vld [vmem:[%s14303_s1 + $0xeac] ss:$16 sps:$4 sm:$0xff]   ;;  %v10015_v18 = vld [vmem:[%s14303_s1 + $0xea0] ss:$16 sps:$4 sm:$0xff]  }
 0x19f   :  { %6665 = vmatpush1.bf16.msra.mxu0 %v9931_v19  ;;  %7321 = vmatpush1.bf16.msra.mxu1 %v9934_v20  ;;  %v10018_v19 = vld [vmem:[%s14303_s1 + $0xea8] ss:$16 sps:$4 sm:$0xff]   ;;  %v10023_v20 = vld [vmem:[%s14303_s1 + $0xec4] ss:$16 sps:$4 sm:$0xff]  }
 0x1a0   :  { %6666 = vmatprep.subr.bf16.mxu0 %v9939_v21  ;;  %7322 = vmatprep.subr.bf16.mxu1 %v9942_v22  ;;  %v10026_v21 = vld [vmem:[%s14303_s1 + $0xecc] ss:$16 sps:$4 sm:$0xff]   ;;  %v10021_v22 = vld [vmem:[%s14303_s1 + $0xec0] ss:$16 sps:$4 sm:$0xff]  }
 0x1a3   :  { %6667 = vmatpush1.bf16.msra.mxu0 %v9937_v23  ;;  %7323 = vmatpush1.bf16.msra.mxu1 %v9940_v9  ;;  %v10024_v23 = vld [vmem:[%s14303_s1 + $0xec8] ss:$16 sps:$4 sm:$0xff]   ;;  %v10029_v9 = vld [vmem:[%s14303_s1 + $0xee4] ss:$16 sps:$4 sm:$0xff]  }
 0x1a4   :  { %6668 = vmatprep.subr.bf16.mxu0 %v9945_v26  ;;  %7324 = vmatprep.subr.bf16.mxu1 %v9948_v27  ;;  %v10032_v26 = vld [vmem:[%s14303_s1 + $0xeec] ss:$16 sps:$4 sm:$0xff]   ;;  %v10027_v27 = vld [vmem:[%s14303_s1 + $0xee0] ss:$16 sps:$4 sm:$0xff]  }
 0x1a7   :  { %6669 = vmatpush1.bf16.msra.mxu0 %v9943_v29  ;;  %7325 = vmatpush1.bf16.msra.mxu1 %v9946_v30  ;;  %v10030_v29 = vld [vmem:[%s14303_s1 + $0xee8] ss:$16 sps:$4 sm:$0xff]   ;;  %v10035_v30 = vld [vmem:[%s14303_s1 + $0xf04] ss:$16 sps:$4 sm:$0xff]  }
 0x1a8   :  { %6670 = vmatprep.subr.bf16.mxu0 %v9951_v31  ;;  %7326 = vmatprep.subr.bf16.mxu1 %v9954_v33  ;;  %v10038_v31 = vld [vmem:[%s14303_s1 + $0xf0c] ss:$16 sps:$4 sm:$0xff]   ;;  %v10033_v33 = vld [vmem:[%s14303_s1 + $0xf00] ss:$16 sps:$4 sm:$0xff]  }
 0x1ab   :  { %6671 = vmatpush1.bf16.msra.mxu0 %v9949_v25  ;;  %7327 = vmatpush1.bf16.msra.mxu1 %v9952_v34  ;;  %v10036_v25 = vld [vmem:[%s14303_s1 + $0xf08] ss:$16 sps:$4 sm:$0xff]   ;;  %v10041_v34 = vld [vmem:[%s14303_s1 + $0xf24] ss:$16 sps:$4 sm:$0xff]  }
 0x1ac   :  { %6672 = vmatprep.subr.bf16.mxu0 %v9957_v35  ;;  %7328 = vmatprep.subr.bf16.mxu1 %v9960_v36  ;;  %v10044_v35 = vld [vmem:[%s14303_s1 + $0xf2c] ss:$16 sps:$4 sm:$0xff]   ;;  %v10039_v36 = vld [vmem:[%s14303_s1 + $0xf20] ss:$16 sps:$4 sm:$0xff]  }
 0x1af   :  { %6673 = vmatpush1.bf16.msra.mxu0 %v9955_v37  ;;  %7329 = vmatpush1.bf16.msra.mxu1 %v9958_v38  ;;  %v10042_v37 = vld [vmem:[%s14303_s1 + $0xf28] ss:$16 sps:$4 sm:$0xff]   ;;  %v10047_v38 = vld [vmem:[%s14303_s1 + $0xf44] ss:$16 sps:$4 sm:$0xff]  }
 0x1b0   :  { %6674 = vmatprep.subr.bf16.mxu0 %v9963_v28  ;;  %7330 = vmatprep.subr.bf16.mxu1 %v9966_v40  ;;  %v10050_v28 = vld [vmem:[%s14303_s1 + $0xf4c] ss:$16 sps:$4 sm:$0xff]   ;;  %v10045_v40 = vld [vmem:[%s14303_s1 + $0xf40] ss:$16 sps:$4 sm:$0xff]  }
 0x1b3   :  { %6675 = vmatpush1.bf16.msra.mxu0 %v9961_v41  ;;  %7331 = vmatpush1.bf16.msra.mxu1 %v9964_v24  ;;  %v10048_v41 = vld [vmem:[%s14303_s1 + $0xf48] ss:$16 sps:$4 sm:$0xff]   ;;  %v10053_v24 = vld [vmem:[%s14303_s1 + $0xf64] ss:$16 sps:$4 sm:$0xff]  }
 0x1b4   :  { %6676 = vmatprep.subr.bf16.mxu0 %v9969_v44  ;;  %7332 = vmatprep.subr.bf16.mxu1 %v9972_v45  ;;  %v10056_v44 = vld [vmem:[%s14303_s1 + $0xf6c] ss:$16 sps:$4 sm:$0xff]   ;;  %v10051_v45 = vld [vmem:[%s14303_s1 + $0xf60] ss:$16 sps:$4 sm:$0xff]  }
 0x1b7   :  { %6677 = vmatpush1.bf16.msra.mxu0 %v9967_v46  ;;  %7333 = vmatpush1.bf16.msra.mxu1 %v9970_v48  ;;  %v10054_v46 = vld [vmem:[%s14303_s1 + $0xf68] ss:$16 sps:$4 sm:$0xff]   ;;  %v10059_v48 = vld [vmem:[%s14303_s1 + $0xf84] ss:$16 sps:$4 sm:$0xff]  }
 0x1b8   :  { %6678 = vmatprep.subr.bf16.mxu0 %v9975_v32  ;;  %7334 = vmatprep.subr.bf16.mxu1 %v9978_v50  ;;  %v10062_v32 = vld [vmem:[%s14303_s1 + $0xf8c] ss:$16 sps:$4 sm:$0xff]   ;;  %v10057_v50 = vld [vmem:[%s14303_s1 + $0xf80] ss:$16 sps:$4 sm:$0xff]  }
 0x1bb   :  { %6679 = vmatpush1.bf16.msra.mxu0 %v9973_v52  ;;  %7335 = vmatpush1.bf16.msra.mxu1 %v9976_v53  ;;  %v10065_v52 = vld [vmem:[%s14303_s1 + $0xfa4] ss:$16 sps:$4 sm:$0xff]   ;;  %v10068_v53 = vld [vmem:[%s14303_s1 + $0xfac] ss:$16 sps:$4 sm:$0xff]  }
 0x1bc   :  { %6680 = vmatprep.subr.bf16.mxu0 %v9981_v54  ;;  %7336 = vmatprep.subr.bf16.mxu1 %v9984_v42  ;;  %v10063_v54 = vld [vmem:[%s14303_s1 + $0xfa0] ss:$16 sps:$4 sm:$0xff]   ;;  %v10066_v42 = vld [vmem:[%s14303_s1 + $0xfa8] ss:$16 sps:$4 sm:$0xff]  }
 0x1bf   :  { %6681 = vmatpush1.bf16.msra.mxu0 %v9979_v56  ;;  %7337 = vmatpush1.bf16.msra.mxu1 %v9982_v39  ;;  %v10071_v56 = vld [vmem:[%s14303_s1 + $0xfc4] ss:$16 sps:$4 sm:$0xff]   ;;  %v10074_v39 = vld [vmem:[%s14303_s1 + $0xfcc] ss:$16 sps:$4 sm:$0xff]  }
 0x1c0   :  { %6691 = vmatprep.subr.bf16.mxu0 %v9987_v57  ;;  %7347 = vmatprep.subr.bf16.mxu1 %v9990_v58  ;;  %v12543_v57 = vld [vmem:[%s14302_s0 + $0x20] sm:$0xff] }
 0x1c1   :  { %v10069_v58 = vld [vmem:[%s14303_s1 + $0xfc0] ss:$16 sps:$4 sm:$0xff]  }
 0x1c2   :  { %6683 = vmatmul.mubr.bf16.vlgmr.msra.gmra.mrb[0].mxu0 %v218_v60  ;;  %7339 = vmatmul.mubr.bf16.vlgmr.msra.gmra.mrb[0].mxu1 %v218_v60  ;;  %v10077_v60 = vld [vmem:[%s14303_s1 + $0xfe4] ss:$16 sps:$4 sm:$0xff]  }
 0x1c3   :  { %6692 = vmatpush1.bf16.msra.mxu0 %v9985_v61  ;;  %7348 = vmatpush1.bf16.msra.mxu1 %v9988_v62  ;;  %v10080_v61 = vld [vmem:[%s14303_s1 + $0xfec] ss:$16 sps:$4 sm:$0xff]   ;;  %v12559_v62 = vrot.slane %v12543_v57, %v11077_v49 }
 0x1c4   :  { %6693 = vmatprep.subr.bf16.mxu0 %v9993_v63  ;;  %7349 = vmatprep.subr.bf16.mxu1 %v9996_v47  ;;  %v10075_v63 = vld [vmem:[%s14303_s1 + $0xfe0] ss:$16 sps:$4 sm:$0xff]   ;;  %v10078_v47 = vld [vmem:[%s14303_s1 + $0xfe8] ss:$16 sps:$4 sm:$0xff]  }
 0x1c5   :  { %6723 = vmatprep.mubr.bf16.mxu0 %v221_v0  ;;  %7379 = vmatprep.mubr.bf16.mxu1 %v221_v0  ;;  %v10084_v0 = vld [vmem:[%s14303_s1 + $0x1004] ss:$16 sps:$4 sm:$0xff]  }
 0x1c7   :  { %6694 = vmatpush1.bf16.msra.mxu0 %v9991_v1  ;;  %7350 = vmatpush1.bf16.msra.mxu1 %v9994_v2  ;;  %v10087_v1 = vld [vmem:[%s14303_s1 + $0x100c] ss:$16 sps:$4 sm:$0xff]   ;;  %v121_v2 = vcombine.high %v12559_v62, %v12559_v62 }
 0x1c8   :  { %6695 = vmatprep.subr.bf16.mxu0 %v9999_v3  ;;  %7351 = vmatprep.subr.bf16.mxu1 %v10002_v4  ;;  %v220_v3 = vpack.c.bf16 %v12354_v55, %v12354_v55  ;;  %v10082_v4 = vld [vmem:[%s14303_s1 + $0x1000] ss:$16 sps:$4 sm:$0xff]   ;;  %v10093_v55 = vld [vmem:[%s14303_s1 + $0x102c] ss:$16 sps:$4 sm:$0xff]  }
 0x1cb   :  { %6696 = vmatpush1.bf16.msra.mxu0 %v9997_v5  ;;  %7352 = vmatpush1.bf16.msra.mxu1 %v10000_v6  ;;  %v10085_v5 = vld [vmem:[%s14303_s1 + $0x1008] ss:$16 sps:$4 sm:$0xff]   ;;  %v10090_v6 = vld [vmem:[%s14303_s1 + $0x1024] ss:$16 sps:$4 sm:$0xff]  }
 0x1cc   :  { %6697 = vmatprep.subr.bf16.mxu0 %v10005_v7  ;;  %7353 = vmatprep.subr.bf16.mxu1 %v10008_v8  ;;  %v223_v7 = vpack.c.bf16 %v121_v2, %v121_v2  ;;  %v10088_v8 = vld [vmem:[%s14303_s1 + $0x1020] ss:$16 sps:$4 sm:$0xff]  }
 0x1cd   :  { %v10166_v2 = vld [vmem:[%s14303_s1 + $0x11c0] ss:$16 sps:$4 sm:$0xff]  }
 0x1cf   :  { %6698 = vmatpush1.bf16.msra.mxu0 %v10003_v10  ;;  %7354 = vmatpush1.bf16.msra.mxu1 %v10006_v11  ;;  %v10091_v10 = vld [vmem:[%s14303_s1 + $0x1028] ss:$16 sps:$4 sm:$0xff]   ;;  %v10096_v11 = vld [vmem:[%s14303_s1 + $0x1044] ss:$16 sps:$4 sm:$0xff]  }
 0x1d0   :  { %6699 = vmatprep.subr.bf16.mxu0 %v10011_v12  ;;  %7355 = vmatprep.subr.bf16.mxu1 %v10014_v13  ;;  %v10099_v12 = vld [vmem:[%s14303_s1 + $0x104c] ss:$16 sps:$4 sm:$0xff]   ;;  %v10094_v13 = vld [vmem:[%s14303_s1 + $0x1040] ss:$16 sps:$4 sm:$0xff]  }
 0x1d3   :  { %6700 = vmatpush1.bf16.msra.mxu0 %v10009_v14  ;;  %7356 = vmatpush1.bf16.msra.mxu1 %v10012_v15  ;;  %v10097_v14 = vld [vmem:[%s14303_s1 + $0x1048] ss:$16 sps:$4 sm:$0xff]   ;;  %v10102_v15 = vld [vmem:[%s14303_s1 + $0x1064] ss:$16 sps:$4 sm:$0xff]  }
 0x1d4   :  { %6701 = vmatprep.subr.bf16.mxu0 %v10017_v16  ;;  %7357 = vmatprep.subr.bf16.mxu1 %v10020_v17  ;;  %v10105_v16 = vld [vmem:[%s14303_s1 + $0x106c] ss:$16 sps:$4 sm:$0xff]   ;;  %v10100_v17 = vld [vmem:[%s14303_s1 + $0x1060] ss:$16 sps:$4 sm:$0xff]  }
 0x1d7   :  { %6702 = vmatpush1.bf16.msra.mxu0 %v10015_v18  ;;  %7358 = vmatpush1.bf16.msra.mxu1 %v10018_v19  ;;  %v10103_v18 = vld [vmem:[%s14303_s1 + $0x1068] ss:$16 sps:$4 sm:$0xff]   ;;  %v10108_v19 = vld [vmem:[%s14303_s1 + $0x1084] ss:$16 sps:$4 sm:$0xff]  }
 0x1d8   :  { %6703 = vmatprep.subr.bf16.mxu0 %v10023_v20  ;;  %7359 = vmatprep.subr.bf16.mxu1 %v10026_v21  ;;  %v10111_v20 = vld [vmem:[%s14303_s1 + $0x108c] ss:$16 sps:$4 sm:$0xff]   ;;  %v10106_v21 = vld [vmem:[%s14303_s1 + $0x1080] ss:$16 sps:$4 sm:$0xff]  }
 0x1db   :  { %6704 = vmatpush1.bf16.msra.mxu0 %v10021_v22  ;;  %7360 = vmatpush1.bf16.msra.mxu1 %v10024_v23  ;;  %v10109_v22 = vld [vmem:[%s14303_s1 + $0x1088] ss:$16 sps:$4 sm:$0xff]   ;;  %v10114_v23 = vld [vmem:[%s14303_s1 + $0x10a4] ss:$16 sps:$4 sm:$0xff]  }
 0x1dc   :  { %6705 = vmatprep.subr.bf16.mxu0 %v10029_v9  ;;  %7361 = vmatprep.subr.bf16.mxu1 %v10032_v26  ;;  %v10117_v9 = vld [vmem:[%s14303_s1 + $0x10ac] ss:$16 sps:$4 sm:$0xff]   ;;  %v10112_v26 = vld [vmem:[%s14303_s1 + $0x10a0] ss:$16 sps:$4 sm:$0xff]  }
 0x1df   :  { %6706 = vmatpush1.bf16.msra.mxu0 %v10027_v27  ;;  %7362 = vmatpush1.bf16.msra.mxu1 %v10030_v29  ;;  %v10115_v27 = vld [vmem:[%s14303_s1 + $0x10a8] ss:$16 sps:$4 sm:$0xff]   ;;  %v10120_v29 = vld [vmem:[%s14303_s1 + $0x10c4] ss:$16 sps:$4 sm:$0xff]  }
 0x1e0   :  { %6707 = vmatprep.subr.bf16.mxu0 %v10035_v30  ;;  %7363 = vmatprep.subr.bf16.mxu1 %v10038_v31  ;;  %v10123_v30 = vld [vmem:[%s14303_s1 + $0x10cc] ss:$16 sps:$4 sm:$0xff]   ;;  %v10118_v31 = vld [vmem:[%s14303_s1 + $0x10c0] ss:$16 sps:$4 sm:$0xff]  }
 0x1e3   :  { %6708 = vmatpush1.bf16.msra.mxu0 %v10033_v33  ;;  %7364 = vmatpush1.bf16.msra.mxu1 %v10036_v25  ;;  %v10121_v33 = vld [vmem:[%s14303_s1 + $0x10c8] ss:$16 sps:$4 sm:$0xff]   ;;  %v10126_v25 = vld [vmem:[%s14303_s1 + $0x10e4] ss:$16 sps:$4 sm:$0xff]  }
 0x1e4   :  { %6709 = vmatprep.subr.bf16.mxu0 %v10041_v34  ;;  %7365 = vmatprep.subr.bf16.mxu1 %v10044_v35  ;;  %v10129_v34 = vld [vmem:[%s14303_s1 + $0x10ec] ss:$16 sps:$4 sm:$0xff]   ;;  %v10124_v35 = vld [vmem:[%s14303_s1 + $0x10e0] ss:$16 sps:$4 sm:$0xff]  }
 0x1e7   :  { %6710 = vmatpush1.bf16.msra.mxu0 %v10039_v36  ;;  %7366 = vmatpush1.bf16.msra.mxu1 %v10042_v37  ;;  %v10127_v36 = vld [vmem:[%s14303_s1 + $0x10e8] ss:$16 sps:$4 sm:$0xff]   ;;  %v10132_v37 = vld [vmem:[%s14303_s1 + $0x1104] ss:$16 sps:$4 sm:$0xff]  }
 0x1e8   :  { %6711 = vmatprep.subr.bf16.mxu0 %v10047_v38  ;;  %7367 = vmatprep.subr.bf16.mxu1 %v10050_v28  ;;  %v10135_v38 = vld [vmem:[%s14303_s1 + $0x110c] ss:$16 sps:$4 sm:$0xff]   ;;  %v10130_v28 = vld [vmem:[%s14303_s1 + $0x1100] ss:$16 sps:$4 sm:$0xff]  }
 0x1eb   :  { %6712 = vmatpush1.bf16.msra.mxu0 %v10045_v40  ;;  %7368 = vmatpush1.bf16.msra.mxu1 %v10048_v41  ;;  %v10133_v40 = vld [vmem:[%s14303_s1 + $0x1108] ss:$16 sps:$4 sm:$0xff]   ;;  %v10138_v41 = vld [vmem:[%s14303_s1 + $0x1124] ss:$16 sps:$4 sm:$0xff]  }
 0x1ec   :  { %6713 = vmatprep.subr.bf16.mxu0 %v10053_v24  ;;  %7369 = vmatprep.subr.bf16.mxu1 %v10056_v44  ;;  %v10141_v24 = vld [vmem:[%s14303_s1 + $0x112c] ss:$16 sps:$4 sm:$0xff]   ;;  %v10136_v44 = vld [vmem:[%s14303_s1 + $0x1120] ss:$16 sps:$4 sm:$0xff]  }
 0x1ef   :  { %6714 = vmatpush1.bf16.msra.mxu0 %v10051_v45  ;;  %7370 = vmatpush1.bf16.msra.mxu1 %v10054_v46  ;;  %v10139_v45 = vld [vmem:[%s14303_s1 + $0x1128] ss:$16 sps:$4 sm:$0xff]   ;;  %v10144_v46 = vld [vmem:[%s14303_s1 + $0x1144] ss:$16 sps:$4 sm:$0xff]  }
 0x1f0   :  { %6715 = vmatprep.subr.bf16.mxu0 %v10059_v48  ;;  %7371 = vmatprep.subr.bf16.mxu1 %v10062_v32  ;;  %v10147_v48 = vld [vmem:[%s14303_s1 + $0x114c] ss:$16 sps:$4 sm:$0xff]   ;;  %v10142_v32 = vld [vmem:[%s14303_s1 + $0x1140] ss:$16 sps:$4 sm:$0xff]  }
 0x1f3   :  { %6716 = vmatpush1.bf16.msra.mxu0 %v10057_v50  ;;  %7372 = vmatpush1.bf16.msra.mxu1 %v10060_v51  ;;  %v10145_v50 = vld [vmem:[%s14303_s1 + $0x1148] ss:$16 sps:$4 sm:$0xff]   ;;  %v10150_v51 = vld [vmem:[%s14303_s1 + $0x1164] ss:$16 sps:$4 sm:$0xff]  }
 0x1f4   :  { %6717 = vmatprep.subr.bf16.mxu0 %v10065_v52  ;;  %7373 = vmatprep.subr.bf16.mxu1 %v10068_v53  ;;  %v10153_v52 = vld [vmem:[%s14303_s1 + $0x116c] ss:$16 sps:$4 sm:$0xff]   ;;  %v10148_v53 = vld [vmem:[%s14303_s1 + $0x1160] ss:$16 sps:$4 sm:$0xff]  }
 0x1f7   :  { %6718 = vmatpush1.bf16.msra.mxu0 %v10063_v54  ;;  %7374 = vmatpush1.bf16.msra.mxu1 %v10066_v42  ;;  %v10151_v54 = vld [vmem:[%s14303_s1 + $0x1168] ss:$16 sps:$4 sm:$0xff]   ;;  %v10156_v42 = vld [vmem:[%s14303_s1 + $0x1184] ss:$16 sps:$4 sm:$0xff]  }
 0x1f8   :  { %6719 = vmatprep.subr.bf16.mxu0 %v10071_v56  ;;  %7375 = vmatprep.subr.bf16.mxu1 %v10074_v39  ;;  %v10159_v56 = vld [vmem:[%s14303_s1 + $0x118c] ss:$16 sps:$4 sm:$0xff]   ;;  %v10154_v39 = vld [vmem:[%s14303_s1 + $0x1180] ss:$16 sps:$4 sm:$0xff]  }
 0x1fb   :  { %6720 = vmatpush1.bf16.msra.mxu0 %v10069_v58  ;;  %7376 = vmatpush1.bf16.msra.mxu1 %v10072_v59  ;;  %v10157_v58 = vld [vmem:[%s14303_s1 + $0x1188] ss:$16 sps:$4 sm:$0xff]   ;;  %v10162_v59 = vld [vmem:[%s14303_s1 + $0x11a4] ss:$16 sps:$4 sm:$0xff]  }
 0x1fc   :  { %6721 = vmatprep.subr.bf16.mxu0 %v10077_v60  ;;  %7377 = vmatprep.subr.bf16.mxu1 %v10080_v61  ;;  %v10165_v60 = vld [vmem:[%s14303_s1 + $0x11ac] ss:$16 sps:$4 sm:$0xff]   ;;  %v10160_v61 = vld [vmem:[%s14303_s1 + $0x11a0] ss:$16 sps:$4 sm:$0xff]  }
 0x1ff   :  { %6722 = vmatpush1.bf16.msra.mxu0 %v10075_v63  ;;  %7378 = vmatpush1.bf16.msra.mxu1 %v10078_v47  ;;  %v10163_v63 = vld [vmem:[%s14303_s1 + $0x11a8] ss:$16 sps:$4 sm:$0xff]   ;;  %v10168_v47 = vld [vmem:[%s14303_s1 + $0x11c4] ss:$16 sps:$4 sm:$0xff]  }
 0x200   :  { %6732 = vmatprep.subr.bf16.mxu0 %v10084_v0  ;;  %7388 = vmatprep.subr.bf16.mxu1 %v10087_v1  ;;  %v10171_v0 = vld [vmem:[%s14303_s1 + $0x11cc] ss:$16 sps:$4 sm:$0xff]   ;;  %v106_v1 = vcombine.high %v12543_v57, %v12543_v57 }
 0x201   :  { %v10177_v57 = vld [vmem:[%s14303_s1 + $0x11ec] ss:$16 sps:$4 sm:$0xff]  }
 0x202   :  { %6724 = vmatmul.mubr.bf16.vlgmr.msra.gmra.mrb[0].mxu0 %v220_v3  ;;  %7380 = vmatmul.mubr.bf16.vlgmr.msra.gmra.mrb[0].mxu1 %v220_v3  ;;  %v10169_v3 = vld [vmem:[%s14303_s1 + $0x11c8] ss:$16 sps:$4 sm:$0xff]  }
 0x203   :  { %6733 = vmatpush1.bf16.msra.mxu0 %v10082_v4  ;;  %7389 = vmatpush1.bf16.msra.mxu1 %v10085_v5  ;;  %v10174_v4 = vld [vmem:[%s14303_s1 + $0x11e4] ss:$16 sps:$4 sm:$0xff]   ;;  %v12760_v5 = vrot.slane %v106_v1, %v11077_v49 }
 0x204   :  { %6734 = vmatprep.subr.bf16.mxu0 %v10090_v6  ;;  %7390 = vmatprep.subr.bf16.mxu1 %v10093_v55  ;;  %v10172_v6 = vld [vmem:[%s14303_s1 + $0x11e0] ss:$16 sps:$4 sm:$0xff]   ;;  %v10175_v55 = vld [vmem:[%s14303_s1 + $0x11e8] ss:$16 sps:$4 sm:$0xff]  }
 0x205   :  { %6764 = vmatprep.mubr.bf16.mxu0 %v223_v7  ;;  %7420 = vmatprep.mubr.bf16.mxu1 %v223_v7  ;;  %v10180_v7 = vld [vmem:[%s14303_s1 + $0x1204] ss:$16 sps:$4 sm:$0xff]  }
 0x207   :  { %6735 = vmatpush1.bf16.msra.mxu0 %v10088_v8  ;;  %7391 = vmatpush1.bf16.msra.mxu1 %v10091_v10  ;;  %v10183_v8 = vld [vmem:[%s14303_s1 + $0x120c] ss:$16 sps:$4 sm:$0xff]   ;;  %v122_v10 = vcombine.high %v12760_v5, %v12760_v5 }
 0x208   :  { %6736 = vmatprep.subr.bf16.mxu0 %v10096_v11  ;;  %7392 = vmatprep.subr.bf16.mxu1 %v10099_v12  ;;  %v222_v11 = vpack.c.bf16 %v12559_v62, %v12559_v62  ;;  %v10178_v12 = vld [vmem:[%s14303_s1 + $0x1200] ss:$16 sps:$4 sm:$0xff]   ;;  %v10189_v62 = vld [vmem:[%s14303_s1 + $0x122c] ss:$16 sps:$4 sm:$0xff]  }
 0x20b   :  { %6737 = vmatpush1.bf16.msra.mxu0 %v10094_v13  ;;  %7393 = vmatpush1.bf16.msra.mxu1 %v10097_v14  ;;  %v10181_v13 = vld [vmem:[%s14303_s1 + $0x1208] ss:$16 sps:$4 sm:$0xff]   ;;  %v10186_v14 = vld [vmem:[%s14303_s1 + $0x1224] ss:$16 sps:$4 sm:$0xff]  }
 0x20c   :  { %6738 = vmatprep.subr.bf16.mxu0 %v10102_v15  ;;  %7394 = vmatprep.subr.bf16.mxu1 %v10105_v16  ;;  %v225_v15 = vpack.c.bf16 %v122_v10, %v122_v10  ;;  %v10184_v16 = vld [vmem:[%s14303_s1 + $0x1220] ss:$16 sps:$4 sm:$0xff]  }
 0x20f   :  { %6739 = vmatpush1.bf16.msra.mxu0 %v10100_v17  ;;  %7395 = vmatpush1.bf16.msra.mxu1 %v10103_v18  ;;  %v10187_v17 = vld [vmem:[%s14303_s1 + $0x1228] ss:$16 sps:$4 sm:$0xff]   ;;  %v10192_v18 = vld [vmem:[%s14303_s1 + $0x1244] ss:$16 sps:$4 sm:$0xff]  }
 0x210   :  { %6740 = vmatprep.subr.bf16.mxu0 %v10108_v19  ;;  %7396 = vmatprep.subr.bf16.mxu1 %v10111_v20  ;;  %v10195_v19 = vld [vmem:[%s14303_s1 + $0x124c] ss:$16 sps:$4 sm:$0xff]   ;;  %v10190_v20 = vld [vmem:[%s14303_s1 + $0x1240] ss:$16 sps:$4 sm:$0xff]  }
 0x213   :  { %6741 = vmatpush1.bf16.msra.mxu0 %v10106_v21  ;;  %7397 = vmatpush1.bf16.msra.mxu1 %v10109_v22  ;;  %v10193_v21 = vld [vmem:[%s14303_s1 + $0x1248] ss:$16 sps:$4 sm:$0xff]   ;;  %v10198_v22 = vld [vmem:[%s14303_s1 + $0x1264] ss:$16 sps:$4 sm:$0xff]  }
 0x214   :  { %6742 = vmatprep.subr.bf16.mxu0 %v10114_v23  ;;  %7398 = vmatprep.subr.bf16.mxu1 %v10117_v9  ;;  %v10201_v23 = vld [vmem:[%s14303_s1 + $0x126c] ss:$16 sps:$4 sm:$0xff]   ;;  %v10196_v9 = vld [vmem:[%s14303_s1 + $0x1260] ss:$16 sps:$4 sm:$0xff]  }
 0x217   :  { %6743 = vmatpush1.bf16.msra.mxu0 %v10112_v26  ;;  %7399 = vmatpush1.bf16.msra.mxu1 %v10115_v27  ;;  %v10199_v26 = vld [vmem:[%s14303_s1 + $0x1268] ss:$16 sps:$4 sm:$0xff]   ;;  %v10204_v27 = vld [vmem:[%s14303_s1 + $0x1284] ss:$16 sps:$4 sm:$0xff]  }
 0x218   :  { %6744 = vmatprep.subr.bf16.mxu0 %v10120_v29  ;;  %7400 = vmatprep.subr.bf16.mxu1 %v10123_v30  ;;  %v10207_v29 = vld [vmem:[%s14303_s1 + $0x128c] ss:$16 sps:$4 sm:$0xff]   ;;  %v10202_v30 = vld [vmem:[%s14303_s1 + $0x1280] ss:$16 sps:$4 sm:$0xff]  }
 0x21b   :  { %6745 = vmatpush1.bf16.msra.mxu0 %v10118_v31  ;;  %7401 = vmatpush1.bf16.msra.mxu1 %v10121_v33  ;;  %v10205_v31 = vld [vmem:[%s14303_s1 + $0x1288] ss:$16 sps:$4 sm:$0xff]   ;;  %v10210_v33 = vld [vmem:[%s14303_s1 + $0x12a4] ss:$16 sps:$4 sm:$0xff]  }
 0x21c   :  { %6746 = vmatprep.subr.bf16.mxu0 %v10126_v25  ;;  %7402 = vmatprep.subr.bf16.mxu1 %v10129_v34  ;;  %v10213_v25 = vld [vmem:[%s14303_s1 + $0x12ac] ss:$16 sps:$4 sm:$0xff]   ;;  %v10208_v34 = vld [vmem:[%s14303_s1 + $0x12a0] ss:$16 sps:$4 sm:$0xff]  }
 0x21f   :  { %6747 = vmatpush1.bf16.msra.mxu0 %v10124_v35  ;;  %7403 = vmatpush1.bf16.msra.mxu1 %v10127_v36  ;;  %v10211_v35 = vld [vmem:[%s14303_s1 + $0x12a8] ss:$16 sps:$4 sm:$0xff]   ;;  %v10216_v36 = vld [vmem:[%s14303_s1 + $0x12c4] ss:$16 sps:$4 sm:$0xff]  }
 0x220   :  { %6748 = vmatprep.subr.bf16.mxu0 %v10132_v37  ;;  %7404 = vmatprep.subr.bf16.mxu1 %v10135_v38  ;;  %v10219_v37 = vld [vmem:[%s14303_s1 + $0x12cc] ss:$16 sps:$4 sm:$0xff]   ;;  %v10214_v38 = vld [vmem:[%s14303_s1 + $0x12c0] ss:$16 sps:$4 sm:$0xff]  }
 0x223   :  { %6749 = vmatpush1.bf16.msra.mxu0 %v10130_v28  ;;  %7405 = vmatpush1.bf16.msra.mxu1 %v10133_v40  ;;  %v10217_v28 = vld [vmem:[%s14303_s1 + $0x12c8] ss:$16 sps:$4 sm:$0xff]   ;;  %v10222_v40 = vld [vmem:[%s14303_s1 + $0x12e4] ss:$16 sps:$4 sm:$0xff]  }
 0x224   :  { %6750 = vmatprep.subr.bf16.mxu0 %v10138_v41  ;;  %7406 = vmatprep.subr.bf16.mxu1 %v10141_v24  ;;  %v10225_v41 = vld [vmem:[%s14303_s1 + $0x12ec] ss:$16 sps:$4 sm:$0xff]   ;;  %v10220_v24 = vld [vmem:[%s14303_s1 + $0x12e0] ss:$16 sps:$4 sm:$0xff]  }
 0x227   :  { %6751 = vmatpush1.bf16.msra.mxu0 %v10136_v44  ;;  %7407 = vmatpush1.bf16.msra.mxu1 %v10139_v45  ;;  %v10223_v44 = vld [vmem:[%s14303_s1 + $0x12e8] ss:$16 sps:$4 sm:$0xff]   ;;  %v10228_v45 = vld [vmem:[%s14303_s1 + $0x1304] ss:$16 sps:$4 sm:$0xff]  }
 0x228   :  { %6752 = vmatprep.subr.bf16.mxu0 %v10144_v46  ;;  %7408 = vmatprep.subr.bf16.mxu1 %v10147_v48  ;;  %v10231_v46 = vld [vmem:[%s14303_s1 + $0x130c] ss:$16 sps:$4 sm:$0xff]   ;;  %v10226_v48 = vld [vmem:[%s14303_s1 + $0x1300] ss:$16 sps:$4 sm:$0xff]  }
 0x22b   :  { %6753 = vmatpush1.bf16.msra.mxu0 %v10142_v32  ;;  %7409 = vmatpush1.bf16.msra.mxu1 %v10145_v50  ;;  %v10229_v32 = vld [vmem:[%s14303_s1 + $0x1308] ss:$16 sps:$4 sm:$0xff]   ;;  %v10234_v50 = vld [vmem:[%s14303_s1 + $0x1324] ss:$16 sps:$4 sm:$0xff]  }
 0x22c   :  { %6754 = vmatprep.subr.bf16.mxu0 %v10150_v51  ;;  %7410 = vmatprep.subr.bf16.mxu1 %v10153_v52  ;;  %v10237_v51 = vld [vmem:[%s14303_s1 + $0x132c] ss:$16 sps:$4 sm:$0xff]  }
 0x22f   :  { %6755 = vmatpush1.bf16.msra.mxu0 %v10148_v53  ;;  %7411 = vmatpush1.bf16.msra.mxu1 %v10151_v54 }
 0x230   :  { %6756 = vmatprep.subr.bf16.mxu0 %v10156_v42  ;;  %7412 = vmatprep.subr.bf16.mxu1 %v10159_v56 }
 0x233   :  { %6757 = vmatpush1.bf16.msra.mxu0 %v10154_v39  ;;  %7413 = vmatpush1.bf16.msra.mxu1 %v10157_v58 }
 0x234   :  { %6758 = vmatprep.subr.bf16.mxu0 %v10162_v59  ;;  %7414 = vmatprep.subr.bf16.mxu1 %v10165_v60 }
 0x237   :  { %6759 = vmatpush1.bf16.msra.mxu0 %v10160_v61  ;;  %7415 = vmatpush1.bf16.msra.mxu1 %v10163_v63 }
 0x238   :  { %6760 = vmatprep.subr.bf16.mxu0 %v10168_v47  ;;  %7416 = vmatprep.subr.bf16.mxu1 %v10171_v0 }
 0x23b   :  { %6761 = vmatpush1.bf16.msra.mxu0 %v10166_v2  ;;  %7417 = vmatpush1.bf16.msra.mxu1 %v10169_v3 }
 0x23c   :  { %6762 = vmatprep.subr.bf16.mxu0 %v10174_v4  ;;  %7418 = vmatprep.subr.bf16.mxu1 %v10177_v57 }
 0x23f   :  { %6763 = vmatpush1.bf16.msra.mxu0 %v10172_v6  ;;  %7419 = vmatpush1.bf16.msra.mxu1 %v10175_v55 }
 0x240   :  { %6773 = vmatprep.subr.bf16.mxu0 %v10180_v7  ;;  %7429 = vmatprep.subr.bf16.mxu1 %v10183_v8 }
 0x242   :  { %6765 = vmatmul.mubr.bf16.vlgmr.msra.gmra.mrb[0].mxu0 %v222_v11  ;;  %7421 = vmatmul.mubr.bf16.vlgmr.msra.gmra.mrb[0].mxu1 %v222_v11 }
 0x243   :  { %6774 = vmatpush1.bf16.msra.mxu0 %v10178_v12  ;;  %7430 = vmatpush1.bf16.msra.mxu1 %v10181_v13 }
 0x244   :  { %6775 = vmatprep.subr.bf16.mxu0 %v10186_v14  ;;  %7431 = vmatprep.subr.bf16.mxu1 %v10189_v62 }
 0x245   :  { %6805 = vmatprep.mubr.bf16.mxu0 %v225_v15  ;;  %7461 = vmatprep.mubr.bf16.mxu1 %v225_v15 }
 0x247   :  { %6776 = vmatpush1.bf16.msra.mxu0 %v10184_v16  ;;  %7432 = vmatpush1.bf16.msra.mxu1 %v10187_v17 }
 0x248   :  { %6777 = vmatprep.subr.bf16.mxu0 %v10192_v18  ;;  %7433 = vmatprep.subr.bf16.mxu1 %v10195_v19 }
 0x24b   :  { %6778 = vmatpush1.bf16.msra.mxu0 %v10190_v20  ;;  %7434 = vmatpush1.bf16.msra.mxu1 %v10193_v21 }
 0x24c   :  { %6779 = vmatprep.subr.bf16.mxu0 %v10198_v22  ;;  %7435 = vmatprep.subr.bf16.mxu1 %v10201_v23 }
 0x24f   :  { %6780 = vmatpush1.bf16.msra.mxu0 %v10196_v9  ;;  %7436 = vmatpush1.bf16.msra.mxu1 %v10199_v26 }
 0x250   :  { %6781 = vmatprep.subr.bf16.mxu0 %v10204_v27  ;;  %7437 = vmatprep.subr.bf16.mxu1 %v10207_v29 }
 0x253   :  { %6782 = vmatpush1.bf16.msra.mxu0 %v10202_v30  ;;  %7438 = vmatpush1.bf16.msra.mxu1 %v10205_v31 }
 0x254   :  { %6783 = vmatprep.subr.bf16.mxu0 %v10210_v33  ;;  %7439 = vmatprep.subr.bf16.mxu1 %v10213_v25 }
 0x257   :  { %6784 = vmatpush1.bf16.msra.mxu0 %v10208_v34  ;;  %7440 = vmatpush1.bf16.msra.mxu1 %v10211_v35 }
 0x258   :  { %6785 = vmatprep.subr.bf16.mxu0 %v10216_v36  ;;  %7441 = vmatprep.subr.bf16.mxu1 %v10219_v37 }
 0x25b   :  { %6786 = vmatpush1.bf16.msra.mxu0 %v10214_v38  ;;  %7442 = vmatpush1.bf16.msra.mxu1 %v10217_v28 }
 0x25c   :  { %6787 = vmatprep.subr.bf16.mxu0 %v10222_v40  ;;  %7443 = vmatprep.subr.bf16.mxu1 %v10225_v41 }
 0x25f   :  { %6788 = vmatpush1.bf16.msra.mxu0 %v10220_v24  ;;  %7444 = vmatpush1.bf16.msra.mxu1 %v10223_v44 }
 0x260   :  { %6789 = vmatprep.subr.bf16.mxu0 %v10228_v45  ;;  %7445 = vmatprep.subr.bf16.mxu1 %v10231_v46 }
 0x261   :  { %10 = vsyncpa [#allocation3], 0  ;;  %v10232_v52 = vld [vmem:[%s14303_s1 + $0x1320] ss:$16 sps:$4 sm:$0xff]   ;;  %v10235_v53 = vld [vmem:[%s14303_s1 + $0x1328] ss:$16 sps:$4 sm:$0xff]   ;;  %v224_v18 = vpack.c.bf16 %v12760_v5, %v12760_v5 }
 0x262   :  { %v10240_v54 = vld [vmem:[%s14303_s1 + $0x1344] ss:$16 sps:$4 sm:$0xff]   ;;  %v10243_v42 = vld [vmem:[%s14303_s1 + $0x134c] ss:$16 sps:$4 sm:$0xff]   ;;  %v10238_v56 = vld [vmem:[%s14303_s1 + $0x1340] ss:$16 sps:$4 sm:$0xff]  }
 0x263   :  { %6790 = vmatpush1.bf16.msra.mxu0 %v10226_v48  ;;  %7446 = vmatpush1.bf16.msra.mxu1 %v10229_v32  ;;  %v10241_v39 = vld [vmem:[%s14303_s1 + $0x1348] ss:$16 sps:$4 sm:$0xff]   ;;  %v10246_v58 = vld [vmem:[%s14303_s1 + $0x1364] ss:$16 sps:$4 sm:$0xff]   ;;  %v10249_v59 = vld [vmem:[%s14303_s1 + $0x136c] ss:$16 sps:$4 sm:$0xff]  }
 0x264   :  { %6791 = vmatprep.subr.bf16.mxu0 %v10234_v50  ;;  %7447 = vmatprep.subr.bf16.mxu1 %v10237_v51  ;;  %v10244_v60 = vld [vmem:[%s14303_s1 + $0x1360] ss:$16 sps:$4 sm:$0xff]   ;;  %v10247_v61 = vld [vmem:[%s14303_s1 + $0x1368] ss:$16 sps:$4 sm:$0xff]   ;;  %v10252_v63 = vld [vmem:[%s14303_s1 + $0x1384] ss:$16 sps:$4 sm:$0xff]  }
 0x265   :  { %v10255_v47 = vld [vmem:[%s14303_s1 + $0x138c] ss:$16 sps:$4 sm:$0xff]   ;;  %v10250_v0 = vld [vmem:[%s14303_s1 + $0x1380] ss:$16 sps:$4 sm:$0xff]   ;;  %v10253_v1 = vld [vmem:[%s14303_s1 + $0x1388] ss:$16 sps:$4 sm:$0xff]  }
 0x266   :  { %v10258_v2 = vld [vmem:[%s14303_s1 + $0x13a4] ss:$16 sps:$4 sm:$0xff]   ;;  %v10261_v3 = vld [vmem:[%s14303_s1 + $0x13ac] ss:$16 sps:$4 sm:$0xff]   ;;  %v10256_v4 = vld [vmem:[%s14303_s1 + $0x13a0] ss:$16 sps:$4 sm:$0xff]  }
 0x267   :  { %6792 = vmatpush1.bf16.msra.mxu0 %v10232_v52  ;;  %7448 = vmatpush1.bf16.msra.mxu1 %v10235_v53  ;;  %v10259_v57 = vld [vmem:[%s14303_s1 + $0x13a8] ss:$16 sps:$4 sm:$0xff]   ;;  %v10264_v6 = vld [vmem:[%s14303_s1 + $0x13c4] ss:$16 sps:$4 sm:$0xff]   ;;  %v10267_v55 = vld [vmem:[%s14303_s1 + $0x13cc] ss:$16 sps:$4 sm:$0xff]  }
 0x268   :  { %6793 = vmatprep.subr.bf16.mxu0 %v10240_v54  ;;  %7449 = vmatprep.subr.bf16.mxu1 %v10243_v42  ;;  %v12949_v7 = vld [vmem:[%s14302_s0 + $0x28] sm:$0xff]  ;;  %v10262_v8 = vld [vmem:[%s14303_s1 + $0x13c0] ss:$16 sps:$4 sm:$0xff]   ;;  %v10270_v11 = vld [vmem:[%s14303_s1 + $0x13e4] ss:$16 sps:$4 sm:$0xff]   ;;  %s10911_s7 = smov [#allocation2]  }
 0x269   :  { %v10265_v10 = vld [vmem:[%s14303_s1 + $0x13c8] ss:$16 sps:$4 sm:$0xff]   ;;  %v10273_v12 = vld [vmem:[%s14303_s1 + $0x13ec] ss:$16 sps:$4 sm:$0xff]   ;;  %v12965_v13 = vrot.slane %v12949_v7, %v11077_v49  ;;  %v10268_v14 = vld [vmem:[%s14303_s1 + $0x13e0] ss:$16 sps:$4 sm:$0xff]  }
 0x26a   :  { %v10271_v62 = vld [vmem:[%s14303_s1 + $0x13e8] ss:$16 sps:$4 sm:$0xff]   ;;  %v10277_v15 = vld [vmem:[%s14303_s1 + $0x1404] ss:$16 sps:$4 sm:$0xff]   ;;  %v10280_v16 = vld [vmem:[%s14303_s1 + $0x140c] ss:$16 sps:$4 sm:$0xff]  }
 0x26b   :  { %6794 = vmatpush1.bf16.msra.mxu0 %v10238_v56  ;;  %7450 = vmatpush1.bf16.msra.mxu1 %v10241_v39  ;;  %v138_v17 = vcombine.high %v12965_v13, %v12965_v13  ;;  %v10275_v19 = vld [vmem:[%s14303_s1 + $0x1400] ss:$16 sps:$4 sm:$0xff]   ;;  %v10278_v20 = vld [vmem:[%s14303_s1 + $0x1408] ss:$16 sps:$4 sm:$0xff]   ;;  %v10283_v21 = vld [vmem:[%s14303_s1 + $0x1424] ss:$16 sps:$4 sm:$0xff]  }
 0x26c   :  { %6795 = vmatprep.subr.bf16.mxu0 %v10246_v58  ;;  %7451 = vmatprep.subr.bf16.mxu1 %v10249_v59  ;;  %v10286_v5 = vld [vmem:[%s14303_s1 + $0x142c] ss:$16 sps:$4 sm:$0xff]   ;;  %v10281_v23 = vld [vmem:[%s14303_s1 + $0x1420] ss:$16 sps:$4 sm:$0xff]   ;;  %v10284_v9 = vld [vmem:[%s14303_s1 + $0x1428] ss:$16 sps:$4 sm:$0xff]  }
 0x26d   :  { %v227_v22 = vpack.c.bf16 %v138_v17, %v138_v17  ;;  %v10289_v26 = vld [vmem:[%s14303_s1 + $0x1444] ss:$16 sps:$4 sm:$0xff]   ;;  %v10292_v27 = vld [vmem:[%s14303_s1 + $0x144c] ss:$16 sps:$4 sm:$0xff]   ;;  %v10287_v29 = vld [vmem:[%s14303_s1 + $0x1440] ss:$16 sps:$4 sm:$0xff]  }
 0x26e   :  { %v10290_v30 = vld [vmem:[%s14303_s1 + $0x1448] ss:$16 sps:$4 sm:$0xff]   ;;  %v10295_v31 = vld [vmem:[%s14303_s1 + $0x1464] ss:$16 sps:$4 sm:$0xff]   ;;  %v10298_v33 = vld [vmem:[%s14303_s1 + $0x146c] ss:$16 sps:$4 sm:$0xff]  }
 0x26f   :  { %6796 = vmatpush1.bf16.msra.mxu0 %v10244_v60  ;;  %7452 = vmatpush1.bf16.msra.mxu1 %v10247_v61  ;;  %v10293_v25 = vld [vmem:[%s14303_s1 + $0x1460] ss:$16 sps:$4 sm:$0xff]   ;;  %v10296_v34 = vld [vmem:[%s14303_s1 + $0x1468] ss:$16 sps:$4 sm:$0xff]   ;;  %v10301_v35 = vld [vmem:[%s14303_s1 + $0x1484] ss:$16 sps:$4 sm:$0xff]  }
 0x270   :  { %6797 = vmatprep.subr.bf16.mxu0 %v10252_v63  ;;  %7453 = vmatprep.subr.bf16.mxu1 %v10255_v47  ;;  %v10304_v36 = vld [vmem:[%s14303_s1 + $0x148c] ss:$16 sps:$4 sm:$0xff]   ;;  %v10299_v37 = vld [vmem:[%s14303_s1 + $0x1480] ss:$16 sps:$4 sm:$0xff]   ;;  %v10302_v38 = vld [vmem:[%s14303_s1 + $0x1488] ss:$16 sps:$4 sm:$0xff]  }
 0x271   :  { %v10307_v28 = vld [vmem:[%s14303_s1 + $0x14a4] ss:$16 sps:$4 sm:$0xff]   ;;  %v10310_v40 = vld [vmem:[%s14303_s1 + $0x14ac] ss:$16 sps:$4 sm:$0xff]   ;;  %v10305_v41 = vld [vmem:[%s14303_s1 + $0x14a0] ss:$16 sps:$4 sm:$0xff]  }
 0x272   :  { %v10308_v24 = vld [vmem:[%s14303_s1 + $0x14a8] ss:$16 sps:$4 sm:$0xff]   ;;  %v10313_v44 = vld [vmem:[%s14303_s1 + $0x14c4] ss:$16 sps:$4 sm:$0xff]   ;;  %v10316_v45 = vld [vmem:[%s14303_s1 + $0x14cc] ss:$16 sps:$4 sm:$0xff]  }
 0x273   :  { %6798 = vmatpush1.bf16.msra.mxu0 %v10250_v0  ;;  %7454 = vmatpush1.bf16.msra.mxu1 %v10253_v1  ;;  %v10311_v46 = vld [vmem:[%s14303_s1 + $0x14c0] ss:$16 sps:$4 sm:$0xff]   ;;  %v10314_v48 = vld [vmem:[%s14303_s1 + $0x14c8] ss:$16 sps:$4 sm:$0xff]   ;;  %v10319_v32 = vld [vmem:[%s14303_s1 + $0x14e4] ss:$16 sps:$4 sm:$0xff]  }
 0x274   :  { %6799 = vmatprep.subr.bf16.mxu0 %v10258_v2  ;;  %7455 = vmatprep.subr.bf16.mxu1 %v10261_v3  ;;  %v10322_v50 = vld [vmem:[%s14303_s1 + $0x14ec] ss:$16 sps:$4 sm:$0xff]   ;;  %v10317_v51 = vld [vmem:[%s14303_s1 + $0x14e0] ss:$16 sps:$4 sm:$0xff]   ;;  %v10320_v52 = vld [vmem:[%s14303_s1 + $0x14e8] ss:$16 sps:$4 sm:$0xff]  }
 0x275   :  { %v10325_v53 = vld [vmem:[%s14303_s1 + $0x1504] ss:$16 sps:$4 sm:$0xff]   ;;  %v10328_v54 = vld [vmem:[%s14303_s1 + $0x150c] ss:$16 sps:$4 sm:$0xff]   ;;  %v10323_v42 = vld [vmem:[%s14303_s1 + $0x1500] ss:$16 sps:$4 sm:$0xff]  }
 0x276   :  { %v10326_v56 = vld [vmem:[%s14303_s1 + $0x1508] ss:$16 sps:$4 sm:$0xff]   ;;  %v10331_v39 = vld [vmem:[%s14303_s1 + $0x1524] ss:$16 sps:$4 sm:$0xff]   ;;  %v10334_v58 = vld [vmem:[%s14303_s1 + $0x152c] ss:$16 sps:$4 sm:$0xff]  }
 0x277   :  { %6800 = vmatpush1.bf16.msra.mxu0 %v10256_v4  ;;  %7456 = vmatpush1.bf16.msra.mxu1 %v10259_v57  ;;  %v10329_v59 = vld [vmem:[%s14303_s1 + $0x1520] ss:$16 sps:$4 sm:$0xff]   ;;  %v10332_v60 = vld [vmem:[%s14303_s1 + $0x1528] ss:$16 sps:$4 sm:$0xff]   ;;  %v10337_v61 = vld [vmem:[%s14303_s1 + $0x1544] ss:$16 sps:$4 sm:$0xff]  }
 0x278   :  { %6801 = vmatprep.subr.bf16.mxu0 %v10264_v6  ;;  %7457 = vmatprep.subr.bf16.mxu1 %v10267_v55  ;;  %v10340_v63 = vld [vmem:[%s14303_s1 + $0x154c] ss:$16 sps:$4 sm:$0xff]   ;;  %v10335_v47 = vld [vmem:[%s14303_s1 + $0x1540] ss:$16 sps:$4 sm:$0xff]   ;;  %v10338_v0 = vld [vmem:[%s14303_s1 + $0x1548] ss:$16 sps:$4 sm:$0xff]  }
 0x279   :  { %v10343_v1 = vld [vmem:[%s14303_s1 + $0x1564] ss:$16 sps:$4 sm:$0xff]   ;;  %v10346_v2 = vld [vmem:[%s14303_s1 + $0x156c] ss:$16 sps:$4 sm:$0xff]   ;;  %v10341_v3 = vld [vmem:[%s14303_s1 + $0x1560] ss:$16 sps:$4 sm:$0xff]  }
 0x27a   :  { %v10344_v4 = vld [vmem:[%s14303_s1 + $0x1568] ss:$16 sps:$4 sm:$0xff]   ;;  %v10349_v57 = vld [vmem:[%s14303_s1 + $0x1584] ss:$16 sps:$4 sm:$0xff]   ;;  %v10352_v6 = vld [vmem:[%s14303_s1 + $0x158c] ss:$16 sps:$4 sm:$0xff]  }
 0x27b   :  { %6802 = vmatpush1.bf16.msra.mxu0 %v10262_v8  ;;  %7458 = vmatpush1.bf16.msra.mxu1 %v10265_v10  ;;  %v10347_v55 = vld [vmem:[%s14303_s1 + $0x1580] ss:$16 sps:$4 sm:$0xff]   ;;  %v10350_v8 = vld [vmem:[%s14303_s1 + $0x1588] ss:$16 sps:$4 sm:$0xff]   ;;  %v10355_v10 = vld [vmem:[%s14303_s1 + $0x15a4] ss:$16 sps:$4 sm:$0xff]  }
 0x27c   :  { %6803 = vmatprep.subr.bf16.mxu0 %v10270_v11  ;;  %7459 = vmatprep.subr.bf16.mxu1 %v10273_v12  ;;  %v10358_v11 = vld [vmem:[%s14303_s1 + $0x15ac] ss:$16 sps:$4 sm:$0xff]   ;;  %v10353_v12 = vld [vmem:[%s14303_s1 + $0x15a0] ss:$16 sps:$4 sm:$0xff]   ;;  %s8075_s8 = sshll.u32 %s10911_s7, 4  ;;  %vm8067_vm0 = vcmask 74752   ;;  %s8076_s8 = int_to_ptr.vmem [resolvable:$true] %s8075_s8 }
 0x27d   :  { %v10359_v17 = vld [vmem:[%s14303_s1 + $0x15c0] ss:$16 sps:$4 sm:$0xff]   ;;  %s10886_s9 = scalar_lea.vmem %s8076_s8, 32  ;;  %p10891_p1 = scmp.lt.s32.totalorder %s8076_s8, %s8076_s8 }
 0x27e   :  { %p10887_p0 = scmp.ne.s32.totalorder %s8076_s8, %s10886_s9  ;;  %p10892_p2 = scmp.lt.s32.totalorder %s10886_s9, %s10886_s9 }
 0x27f   :  { %6804 = vmatpush1.bf16.msra.mxu0 %v10268_v14  ;;  %7460 = vmatpush1.bf16.msra.mxu1 %v10271_v62  ;;  %v10356_v14 = vld [vmem:[%s14303_s1 + $0x15a8] ss:$16 sps:$4 sm:$0xff]   ;;  %v10361_v62 = vld [vmem:[%s14303_s1 + $0x15c4] ss:$16 sps:$4 sm:$0xff]  }
 0x280   :  { %6814 = vmatprep.subr.bf16.mxu0 %v10277_v15  ;;  %7470 = vmatprep.subr.bf16.mxu1 %v10280_v16  ;;  %v10364_v15 = vld [vmem:[%s14303_s1 + $0x15cc] ss:$16 sps:$4 sm:$0xff]   ;;  %v123_v16 = vcombine.high %v12949_v7, %v12949_v7  ;;  %p10893_p3 = por %p10892_p2, %p10891_p1 }
 0x281   :  { %v10370_v7 = vld [vmem:[%s14303_s1 + $0x15ec] ss:$16 sps:$4 sm:$0xff]  }
 0x282   :  { %6806 = vmatmul.mubr.bf16.vlgmr.msra.gmra.mrb[0].mxu0 %v224_v18  ;;  %7462 = vmatmul.mubr.bf16.vlgmr.msra.gmra.mrb[0].mxu1 %v224_v18  ;;  %v10362_v18 = vld [vmem:[%s14303_s1 + $0x15c8] ss:$16 sps:$4 sm:$0xff]   ;;  %p10894_p4 = pnand %p10893_p3, %p10887_p0 }
 0x283   :  { %6815 = vmatpush1.bf16.msra.mxu0 %v10275_v19  ;;  %7471 = vmatpush1.bf16.msra.mxu1 %v10278_v20  ;;  %v10367_v19 = vld [vmem:[%s14303_s1 + $0x15e4] ss:$16 sps:$4 sm:$0xff]   ;;  %v13166_v20 = vrot.slane %v123_v16, %v11077_v49  ;;  %v10446_v16 = vld [vmem:[%s14303_s1 + $0x1788] ss:$16 sps:$4 sm:$0xff]  }
 0x284   :  { %6816 = vmatprep.subr.bf16.mxu0 %v10283_v21  ;;  %7472 = vmatprep.subr.bf16.mxu1 %v10286_v5  ;;  %v10365_v21 = vld [vmem:[%s14303_s1 + $0x15e0] ss:$16 sps:$4 sm:$0xff]   ;;  %v10368_v5 = vld [vmem:[%s14303_s1 + $0x15e8] ss:$16 sps:$4 sm:$0xff]  }
 0x285   :  { %6846 = vmatprep.mubr.bf16.mxu0 %v227_v22  ;;  %7502 = vmatprep.mubr.bf16.mxu1 %v227_v22  ;;  %v10373_v22 = vld [vmem:[%s14303_s1 + $0x1604] ss:$16 sps:$4 sm:$0xff]  }
 0x287   :  { %6817 = vmatpush1.bf16.msra.mxu0 %v10281_v23  ;;  %7473 = vmatpush1.bf16.msra.mxu1 %v10284_v9  ;;  %v10376_v23 = vld [vmem:[%s14303_s1 + $0x160c] ss:$16 sps:$4 sm:$0xff]   ;;  %v139_v9 = vcombine.high %v13166_v20, %v13166_v20 }
 0x288   :  { %6818 = vmatprep.subr.bf16.mxu0 %v10289_v26  ;;  %7474 = vmatprep.subr.bf16.mxu1 %v10292_v27  ;;  %v226_v26 = vpack.c.bf16 %v12965_v13, %v12965_v13  ;;  %v10371_v27 = vld [vmem:[%s14303_s1 + $0x1600] ss:$16 sps:$4 sm:$0xff]   ;;  %v10382_v13 = vld [vmem:[%s14303_s1 + $0x162c] ss:$16 sps:$4 sm:$0xff]  }
 0x28b   :  { %6819 = vmatpush1.bf16.msra.mxu0 %v10287_v29  ;;  %7475 = vmatpush1.bf16.msra.mxu1 %v10290_v30  ;;  %v10374_v29 = vld [vmem:[%s14303_s1 + $0x1608] ss:$16 sps:$4 sm:$0xff]   ;;  %v10379_v30 = vld [vmem:[%s14303_s1 + $0x1624] ss:$16 sps:$4 sm:$0xff]  }
 0x28c   :  { %6820 = vmatprep.subr.bf16.mxu0 %v10295_v31  ;;  %7476 = vmatprep.subr.bf16.mxu1 %v10298_v33  ;;  %v229_v31 = vpack.c.bf16 %v139_v9, %v139_v9  ;;  %v10377_v33 = vld [vmem:[%s14303_s1 + $0x1620] ss:$16 sps:$4 sm:$0xff]   ;;  %v10458_v9 = vld [vmem:[%s14303_s1 + $0x17c8] ss:$16 sps:$4 sm:$0xff]  }
 0x28f   :  { %6821 = vmatpush1.bf16.msra.mxu0 %v10293_v25  ;;  %7477 = vmatpush1.bf16.msra.mxu1 %v10296_v34  ;;  %v10380_v25 = vld [vmem:[%s14303_s1 + $0x1628] ss:$16 sps:$4 sm:$0xff]   ;;  %v10385_v34 = vld [vmem:[%s14303_s1 + $0x1644] ss:$16 sps:$4 sm:$0xff]  }
 0x290   :  { %6822 = vmatprep.subr.bf16.mxu0 %v10301_v35  ;;  %7478 = vmatprep.subr.bf16.mxu1 %v10304_v36  ;;  %v10388_v35 = vld [vmem:[%s14303_s1 + $0x164c] ss:$16 sps:$4 sm:$0xff]   ;;  %v10383_v36 = vld [vmem:[%s14303_s1 + $0x1640] ss:$16 sps:$4 sm:$0xff]  }
 0x293   :  { %6823 = vmatpush1.bf16.msra.mxu0 %v10299_v37  ;;  %7479 = vmatpush1.bf16.msra.mxu1 %v10302_v38  ;;  %v10386_v37 = vld [vmem:[%s14303_s1 + $0x1648] ss:$16 sps:$4 sm:$0xff]   ;;  %v10391_v38 = vld [vmem:[%s14303_s1 + $0x1664] ss:$16 sps:$4 sm:$0xff]  }
 0x294   :  { %6824 = vmatprep.subr.bf16.mxu0 %v10307_v28  ;;  %7480 = vmatprep.subr.bf16.mxu1 %v10310_v40  ;;  %v10394_v28 = vld [vmem:[%s14303_s1 + $0x166c] ss:$16 sps:$4 sm:$0xff]   ;;  %v10389_v40 = vld [vmem:[%s14303_s1 + $0x1660] ss:$16 sps:$4 sm:$0xff]  }
 0x297   :  { %6825 = vmatpush1.bf16.msra.mxu0 %v10305_v41  ;;  %7481 = vmatpush1.bf16.msra.mxu1 %v10308_v24  ;;  %v10392_v41 = vld [vmem:[%s14303_s1 + $0x1668] ss:$16 sps:$4 sm:$0xff]   ;;  %v10397_v24 = vld [vmem:[%s14303_s1 + $0x1684] ss:$16 sps:$4 sm:$0xff]  }
 0x298   :  { %6826 = vmatprep.subr.bf16.mxu0 %v10313_v44  ;;  %7482 = vmatprep.subr.bf16.mxu1 %v10316_v45  ;;  %v10400_v44 = vld [vmem:[%s14303_s1 + $0x168c] ss:$16 sps:$4 sm:$0xff]   ;;  %v10395_v45 = vld [vmem:[%s14303_s1 + $0x1680] ss:$16 sps:$4 sm:$0xff]  }
 0x29b   :  { %6827 = vmatpush1.bf16.msra.mxu0 %v10311_v46  ;;  %7483 = vmatpush1.bf16.msra.mxu1 %v10314_v48  ;;  %v10398_v46 = vld [vmem:[%s14303_s1 + $0x1688] ss:$16 sps:$4 sm:$0xff]   ;;  %v10403_v48 = vld [vmem:[%s14303_s1 + $0x16a4] ss:$16 sps:$4 sm:$0xff]  }
 0x29c   :  { %6828 = vmatprep.subr.bf16.mxu0 %v10319_v32  ;;  %7484 = vmatprep.subr.bf16.mxu1 %v10322_v50  ;;  %v10406_v32 = vld [vmem:[%s14303_s1 + $0x16ac] ss:$16 sps:$4 sm:$0xff]   ;;  %v10401_v50 = vld [vmem:[%s14303_s1 + $0x16a0] ss:$16 sps:$4 sm:$0xff]  }
 0x29f   :  { %6829 = vmatpush1.bf16.msra.mxu0 %v10317_v51  ;;  %7485 = vmatpush1.bf16.msra.mxu1 %v10320_v52  ;;  %v10404_v51 = vld [vmem:[%s14303_s1 + $0x16a8] ss:$16 sps:$4 sm:$0xff]   ;;  %v10409_v52 = vld [vmem:[%s14303_s1 + $0x16c4] ss:$16 sps:$4 sm:$0xff]  }
 0x2a0   :  { %6830 = vmatprep.subr.bf16.mxu0 %v10325_v53  ;;  %7486 = vmatprep.subr.bf16.mxu1 %v10328_v54  ;;  %v10412_v53 = vld [vmem:[%s14303_s1 + $0x16cc] ss:$16 sps:$4 sm:$0xff]   ;;  %v10407_v54 = vld [vmem:[%s14303_s1 + $0x16c0] ss:$16 sps:$4 sm:$0xff]  }
 0x2a3   :  { %6831 = vmatpush1.bf16.msra.mxu0 %v10323_v42  ;;  %7487 = vmatpush1.bf16.msra.mxu1 %v10326_v56  ;;  %v10410_v42 = vld [vmem:[%s14303_s1 + $0x16c8] ss:$16 sps:$4 sm:$0xff]   ;;  %v10415_v56 = vld [vmem:[%s14303_s1 + $0x16e4] ss:$16 sps:$4 sm:$0xff]  }
 0x2a4   :  { %6832 = vmatprep.subr.bf16.mxu0 %v10331_v39  ;;  %7488 = vmatprep.subr.bf16.mxu1 %v10334_v58  ;;  %v10418_v39 = vld [vmem:[%s14303_s1 + $0x16ec] ss:$16 sps:$4 sm:$0xff]   ;;  %v10413_v58 = vld [vmem:[%s14303_s1 + $0x16e0] ss:$16 sps:$4 sm:$0xff]  }
 0x2a7   :  { %6833 = vmatpush1.bf16.msra.mxu0 %v10329_v59  ;;  %7489 = vmatpush1.bf16.msra.mxu1 %v10332_v60  ;;  %v10416_v59 = vld [vmem:[%s14303_s1 + $0x16e8] ss:$16 sps:$4 sm:$0xff]   ;;  %v10421_v60 = vld [vmem:[%s14303_s1 + $0x1704] ss:$16 sps:$4 sm:$0xff]  }
 0x2a8   :  { %6834 = vmatprep.subr.bf16.mxu0 %v10337_v61  ;;  %7490 = vmatprep.subr.bf16.mxu1 %v10340_v63  ;;  %v10424_v61 = vld [vmem:[%s14303_s1 + $0x170c] ss:$16 sps:$4 sm:$0xff]   ;;  %v10419_v63 = vld [vmem:[%s14303_s1 + $0x1700] ss:$16 sps:$4 sm:$0xff]  }
 0x2ab   :  { %6835 = vmatpush1.bf16.msra.mxu0 %v10335_v47  ;;  %7491 = vmatpush1.bf16.msra.mxu1 %v10338_v0  ;;  %v10422_v47 = vld [vmem:[%s14303_s1 + $0x1708] ss:$16 sps:$4 sm:$0xff]   ;;  %v10427_v0 = vld [vmem:[%s14303_s1 + $0x1724] ss:$16 sps:$4 sm:$0xff]  }
 0x2ac   :  { %6836 = vmatprep.subr.bf16.mxu0 %v10343_v1  ;;  %7492 = vmatprep.subr.bf16.mxu1 %v10346_v2  ;;  %v10430_v1 = vld [vmem:[%s14303_s1 + $0x172c] ss:$16 sps:$4 sm:$0xff]   ;;  %v10425_v2 = vld [vmem:[%s14303_s1 + $0x1720] ss:$16 sps:$4 sm:$0xff]  }
 0x2af   :  { %6837 = vmatpush1.bf16.msra.mxu0 %v10341_v3  ;;  %7493 = vmatpush1.bf16.msra.mxu1 %v10344_v4  ;;  %v10428_v3 = vld [vmem:[%s14303_s1 + $0x1728] ss:$16 sps:$4 sm:$0xff]   ;;  %v10433_v4 = vld [vmem:[%s14303_s1 + $0x1744] ss:$16 sps:$4 sm:$0xff]  }
 0x2b0   :  { %6838 = vmatprep.subr.bf16.mxu0 %v10349_v57  ;;  %7494 = vmatprep.subr.bf16.mxu1 %v10352_v6  ;;  %v10436_v57 = vld [vmem:[%s14303_s1 + $0x174c] ss:$16 sps:$4 sm:$0xff]   ;;  %v10431_v6 = vld [vmem:[%s14303_s1 + $0x1740] ss:$16 sps:$4 sm:$0xff]  }
 0x2b3   :  { %6839 = vmatpush1.bf16.msra.mxu0 %v10347_v55  ;;  %7495 = vmatpush1.bf16.msra.mxu1 %v10350_v8  ;;  %v10434_v55 = vld [vmem:[%s14303_s1 + $0x1748] ss:$16 sps:$4 sm:$0xff]   ;;  %v10439_v8 = vld [vmem:[%s14303_s1 + $0x1764] ss:$16 sps:$4 sm:$0xff]  }
 0x2b4   :  { %6840 = vmatprep.subr.bf16.mxu0 %v10355_v10  ;;  %7496 = vmatprep.subr.bf16.mxu1 %v10358_v11  ;;  %v10442_v10 = vld [vmem:[%s14303_s1 + $0x176c] ss:$16 sps:$4 sm:$0xff]   ;;  %v10437_v11 = vld [vmem:[%s14303_s1 + $0x1760] ss:$16 sps:$4 sm:$0xff]  }
 0x2b7   :  { %6841 = vmatpush1.bf16.msra.mxu0 %v10353_v12  ;;  %7497 = vmatpush1.bf16.msra.mxu1 %v10356_v14  ;;  %v10440_v12 = vld [vmem:[%s14303_s1 + $0x1768] ss:$16 sps:$4 sm:$0xff]   ;;  %v10445_v14 = vld [vmem:[%s14303_s1 + $0x1784] ss:$16 sps:$4 sm:$0xff]  }
 0x2b8   :  { %6842 = vmatprep.subr.bf16.mxu0 %v10361_v62  ;;  %7498 = vmatprep.subr.bf16.mxu1 %v10364_v15  ;;  %v10448_v62 = vld [vmem:[%s14303_s1 + $0x178c] ss:$16 sps:$4 sm:$0xff]   ;;  %v10443_v15 = vld [vmem:[%s14303_s1 + $0x1780] ss:$16 sps:$4 sm:$0xff]  }
 0x2bb   :  { %6843 = vmatpush1.bf16.msra.mxu0 %v10359_v17  ;;  %7499 = vmatpush1.bf16.msra.mxu1 %v10362_v18  ;;  %v10451_v17 = vld [vmem:[%s14303_s1 + $0x17a4] ss:$16 sps:$4 sm:$0xff]   ;;  %v10454_v18 = vld [vmem:[%s14303_s1 + $0x17ac] ss:$16 sps:$4 sm:$0xff]  }
 0x2bc   :  { %6844 = vmatprep.subr.bf16.mxu0 %v10367_v19  ;;  %7500 = vmatprep.subr.bf16.mxu1 %v10370_v7  ;;  %v10449_v19 = vld [vmem:[%s14303_s1 + $0x17a0] ss:$16 sps:$4 sm:$0xff]   ;;  %v10452_v7 = vld [vmem:[%s14303_s1 + $0x17a8] ss:$16 sps:$4 sm:$0xff]  }
 0x2bf   :  { %6845 = vmatpush1.bf16.msra.mxu0 %v10365_v21  ;;  %7501 = vmatpush1.bf16.msra.mxu1 %v10368_v5  ;;  %v10457_v21 = vld [vmem:[%s14303_s1 + $0x17c4] ss:$16 sps:$4 sm:$0xff]   ;;  %v10460_v5 = vld [vmem:[%s14303_s1 + $0x17cc] ss:$16 sps:$4 sm:$0xff]  }
 0x2c0   :  { %6855 = vmatprep.subr.bf16.mxu0 %v10373_v22  ;;  %7511 = vmatprep.subr.bf16.mxu1 %v10376_v23  ;;  %v13355_v22 = vld [vmem:[%s14302_s0 + $0x30] sm:$0xff] }
 0x2c1   :  { %v10455_v23 = vld [vmem:[%s14303_s1 + $0x17c0] ss:$16 sps:$4 sm:$0xff]  }
 0x2c2   :  { %6847 = vmatmul.mubr.bf16.vlgmr.msra.gmra.mrb[0].mxu0 %v226_v26  ;;  %7503 = vmatmul.mubr.bf16.vlgmr.msra.gmra.mrb[0].mxu1 %v226_v26  ;;  %v10463_v26 = vld [vmem:[%s14303_s1 + $0x17e4] ss:$16 sps:$4 sm:$0xff]  }
 0x2c3   :  { %6856 = vmatpush1.bf16.msra.mxu0 %v10371_v27  ;;  %7512 = vmatpush1.bf16.msra.mxu1 %v10374_v29  ;;  %v10466_v27 = vld [vmem:[%s14303_s1 + $0x17ec] ss:$16 sps:$4 sm:$0xff]   ;;  %v13371_v29 = vrot.slane %v13355_v22, %v11077_v49 }
 0x2c4   :  { %6857 = vmatprep.subr.bf16.mxu0 %v10379_v30  ;;  %7513 = vmatprep.subr.bf16.mxu1 %v10382_v13  ;;  %v10461_v30 = vld [vmem:[%s14303_s1 + $0x17e0] ss:$16 sps:$4 sm:$0xff]   ;;  %v10464_v13 = vld [vmem:[%s14303_s1 + $0x17e8] ss:$16 sps:$4 sm:$0xff]  }
 0x2c5   :  { %6887 = vmatprep.mubr.bf16.mxu0 %v229_v31  ;;  %7543 = vmatprep.mubr.bf16.mxu1 %v229_v31  ;;  %v10470_v31 = vld [vmem:[%s14303_s1 + $0x1804] ss:$16 sps:$4 sm:$0xff]  }
 0x2c7   :  { %6858 = vmatpush1.bf16.msra.mxu0 %v10377_v33  ;;  %7514 = vmatpush1.bf16.msra.mxu1 %v10380_v25  ;;  %v10473_v33 = vld [vmem:[%s14303_s1 + $0x180c] ss:$16 sps:$4 sm:$0xff]   ;;  %v155_v25 = vcombine.high %v13371_v29, %v13371_v29 }
 0x2c8   :  { %6859 = vmatprep.subr.bf16.mxu0 %v10385_v34  ;;  %7515 = vmatprep.subr.bf16.mxu1 %v10388_v35  ;;  %v228_v34 = vpack.c.bf16 %v13166_v20, %v13166_v20  ;;  %v10468_v35 = vld [vmem:[%s14303_s1 + $0x1800] ss:$16 sps:$4 sm:$0xff]   ;;  %v10479_v20 = vld [vmem:[%s14303_s1 + $0x182c] ss:$16 sps:$4 sm:$0xff]  }
 0x2cb   :  { %6860 = vmatpush1.bf16.msra.mxu0 %v10383_v36  ;;  %7516 = vmatpush1.bf16.msra.mxu1 %v10386_v37  ;;  %v10471_v36 = vld [vmem:[%s14303_s1 + $0x1808] ss:$16 sps:$4 sm:$0xff]   ;;  %v10476_v37 = vld [vmem:[%s14303_s1 + $0x1824] ss:$16 sps:$4 sm:$0xff]  }
 0x2cc   :  { %6861 = vmatprep.subr.bf16.mxu0 %v10391_v38  ;;  %7517 = vmatprep.subr.bf16.mxu1 %v10394_v28  ;;  %v231_v38 = vpack.c.bf16 %v155_v25, %v155_v25  ;;  %v10474_v28 = vld [vmem:[%s14303_s1 + $0x1820] ss:$16 sps:$4 sm:$0xff]  }
 0x2cd   :  { %v10552_v25 = vld [vmem:[%s14303_s1 + $0x19c0] ss:$16 sps:$4 sm:$0xff]  }
 0x2cf   :  { %6862 = vmatpush1.bf16.msra.mxu0 %v10389_v40  ;;  %7518 = vmatpush1.bf16.msra.mxu1 %v10392_v41  ;;  %v10477_v40 = vld [vmem:[%s14303_s1 + $0x1828] ss:$16 sps:$4 sm:$0xff]   ;;  %v10482_v41 = vld [vmem:[%s14303_s1 + $0x1844] ss:$16 sps:$4 sm:$0xff]  }
 0x2d0   :  { %6863 = vmatprep.subr.bf16.mxu0 %v10397_v24  ;;  %7519 = vmatprep.subr.bf16.mxu1 %v10400_v44  ;;  %v10485_v24 = vld [vmem:[%s14303_s1 + $0x184c] ss:$16 sps:$4 sm:$0xff]   ;;  %v10480_v44 = vld [vmem:[%s14303_s1 + $0x1840] ss:$16 sps:$4 sm:$0xff]  }
 0x2d3   :  { %6864 = vmatpush1.bf16.msra.mxu0 %v10395_v45  ;;  %7520 = vmatpush1.bf16.msra.mxu1 %v10398_v46  ;;  %v10483_v45 = vld [vmem:[%s14303_s1 + $0x1848] ss:$16 sps:$4 sm:$0xff]   ;;  %v10488_v46 = vld [vmem:[%s14303_s1 + $0x1864] ss:$16 sps:$4 sm:$0xff]  }
 0x2d4   :  { %6865 = vmatprep.subr.bf16.mxu0 %v10403_v48  ;;  %7521 = vmatprep.subr.bf16.mxu1 %v10406_v32  ;;  %v10491_v48 = vld [vmem:[%s14303_s1 + $0x186c] ss:$16 sps:$4 sm:$0xff]   ;;  %v10486_v32 = vld [vmem:[%s14303_s1 + $0x1860] ss:$16 sps:$4 sm:$0xff]  }
 0x2d7   :  { %6866 = vmatpush1.bf16.msra.mxu0 %v10401_v50  ;;  %7522 = vmatpush1.bf16.msra.mxu1 %v10404_v51  ;;  %v10489_v50 = vld [vmem:[%s14303_s1 + $0x1868] ss:$16 sps:$4 sm:$0xff]   ;;  %v10494_v51 = vld [vmem:[%s14303_s1 + $0x1884] ss:$16 sps:$4 sm:$0xff]  }
 0x2d8   :  { %6867 = vmatprep.subr.bf16.mxu0 %v10409_v52  ;;  %7523 = vmatprep.subr.bf16.mxu1 %v10412_v53  ;;  %v10497_v52 = vld [vmem:[%s14303_s1 + $0x188c] ss:$16 sps:$4 sm:$0xff]   ;;  %v10492_v53 = vld [vmem:[%s14303_s1 + $0x1880] ss:$16 sps:$4 sm:$0xff]  }
 0x2db   :  { %6868 = vmatpush1.bf16.msra.mxu0 %v10407_v54  ;;  %7524 = vmatpush1.bf16.msra.mxu1 %v10410_v42  ;;  %v10495_v54 = vld [vmem:[%s14303_s1 + $0x1888] ss:$16 sps:$4 sm:$0xff]   ;;  %v10500_v42 = vld [vmem:[%s14303_s1 + $0x18a4] ss:$16 sps:$4 sm:$0xff]  }
 0x2dc   :  { %6869 = vmatprep.subr.bf16.mxu0 %v10415_v56  ;;  %7525 = vmatprep.subr.bf16.mxu1 %v10418_v39  ;;  %v10503_v56 = vld [vmem:[%s14303_s1 + $0x18ac] ss:$16 sps:$4 sm:$0xff]   ;;  %v10498_v39 = vld [vmem:[%s14303_s1 + $0x18a0] ss:$16 sps:$4 sm:$0xff]  }
 0x2df   :  { %6870 = vmatpush1.bf16.msra.mxu0 %v10413_v58  ;;  %7526 = vmatpush1.bf16.msra.mxu1 %v10416_v59  ;;  %v10501_v58 = vld [vmem:[%s14303_s1 + $0x18a8] ss:$16 sps:$4 sm:$0xff]   ;;  %v10506_v59 = vld [vmem:[%s14303_s1 + $0x18c4] ss:$16 sps:$4 sm:$0xff]  }
 0x2e0   :  { %6871 = vmatprep.subr.bf16.mxu0 %v10421_v60  ;;  %7527 = vmatprep.subr.bf16.mxu1 %v10424_v61  ;;  %v10509_v60 = vld [vmem:[%s14303_s1 + $0x18cc] ss:$16 sps:$4 sm:$0xff]   ;;  %v10504_v61 = vld [vmem:[%s14303_s1 + $0x18c0] ss:$16 sps:$4 sm:$0xff]  }
 0x2e3   :  { %6872 = vmatpush1.bf16.msra.mxu0 %v10419_v63  ;;  %7528 = vmatpush1.bf16.msra.mxu1 %v10422_v47  ;;  %v10507_v63 = vld [vmem:[%s14303_s1 + $0x18c8] ss:$16 sps:$4 sm:$0xff]   ;;  %v10512_v47 = vld [vmem:[%s14303_s1 + $0x18e4] ss:$16 sps:$4 sm:$0xff]  }
 0x2e4   :  { %6873 = vmatprep.subr.bf16.mxu0 %v10427_v0  ;;  %7529 = vmatprep.subr.bf16.mxu1 %v10430_v1  ;;  %v10515_v0 = vld [vmem:[%s14303_s1 + $0x18ec] ss:$16 sps:$4 sm:$0xff]   ;;  %v10510_v1 = vld [vmem:[%s14303_s1 + $0x18e0] ss:$16 sps:$4 sm:$0xff]  }
 0x2e7   :  { %6874 = vmatpush1.bf16.msra.mxu0 %v10425_v2  ;;  %7530 = vmatpush1.bf16.msra.mxu1 %v10428_v3  ;;  %v10513_v2 = vld [vmem:[%s14303_s1 + $0x18e8] ss:$16 sps:$4 sm:$0xff]   ;;  %v10518_v3 = vld [vmem:[%s14303_s1 + $0x1904] ss:$16 sps:$4 sm:$0xff]  }
 0x2e8   :  { %6875 = vmatprep.subr.bf16.mxu0 %v10433_v4  ;;  %7531 = vmatprep.subr.bf16.mxu1 %v10436_v57  ;;  %v10521_v4 = vld [vmem:[%s14303_s1 + $0x190c] ss:$16 sps:$4 sm:$0xff]   ;;  %v10516_v57 = vld [vmem:[%s14303_s1 + $0x1900] ss:$16 sps:$4 sm:$0xff]  }
 0x2eb   :  { %6876 = vmatpush1.bf16.msra.mxu0 %v10431_v6  ;;  %7532 = vmatpush1.bf16.msra.mxu1 %v10434_v55  ;;  %v10519_v6 = vld [vmem:[%s14303_s1 + $0x1908] ss:$16 sps:$4 sm:$0xff]   ;;  %v10524_v55 = vld [vmem:[%s14303_s1 + $0x1924] ss:$16 sps:$4 sm:$0xff]  }
 0x2ec   :  { %6877 = vmatprep.subr.bf16.mxu0 %v10439_v8  ;;  %7533 = vmatprep.subr.bf16.mxu1 %v10442_v10  ;;  %v10527_v8 = vld [vmem:[%s14303_s1 + $0x192c] ss:$16 sps:$4 sm:$0xff]   ;;  %v10522_v10 = vld [vmem:[%s14303_s1 + $0x1920] ss:$16 sps:$4 sm:$0xff]  }
 0x2ef   :  { %6878 = vmatpush1.bf16.msra.mxu0 %v10437_v11  ;;  %7534 = vmatpush1.bf16.msra.mxu1 %v10440_v12  ;;  %v10525_v11 = vld [vmem:[%s14303_s1 + $0x1928] ss:$16 sps:$4 sm:$0xff]   ;;  %v10530_v12 = vld [vmem:[%s14303_s1 + $0x1944] ss:$16 sps:$4 sm:$0xff]  }
 0x2f0   :  { %6879 = vmatprep.subr.bf16.mxu0 %v10445_v14  ;;  %7535 = vmatprep.subr.bf16.mxu1 %v10448_v62  ;;  %v10533_v14 = vld [vmem:[%s14303_s1 + $0x194c] ss:$16 sps:$4 sm:$0xff]   ;;  %v10528_v62 = vld [vmem:[%s14303_s1 + $0x1940] ss:$16 sps:$4 sm:$0xff]  }
 0x2f3   :  { %6880 = vmatpush1.bf16.msra.mxu0 %v10443_v15  ;;  %7536 = vmatpush1.bf16.msra.mxu1 %v10446_v16  ;;  %v10531_v15 = vld [vmem:[%s14303_s1 + $0x1948] ss:$16 sps:$4 sm:$0xff]   ;;  %v10536_v16 = vld [vmem:[%s14303_s1 + $0x1964] ss:$16 sps:$4 sm:$0xff]  }
 0x2f4   :  { %6881 = vmatprep.subr.bf16.mxu0 %v10451_v17  ;;  %7537 = vmatprep.subr.bf16.mxu1 %v10454_v18  ;;  %v10539_v17 = vld [vmem:[%s14303_s1 + $0x196c] ss:$16 sps:$4 sm:$0xff]   ;;  %v10534_v18 = vld [vmem:[%s14303_s1 + $0x1960] ss:$16 sps:$4 sm:$0xff]  }
 0x2f7   :  { %6882 = vmatpush1.bf16.msra.mxu0 %v10449_v19  ;;  %7538 = vmatpush1.bf16.msra.mxu1 %v10452_v7  ;;  %v10537_v19 = vld [vmem:[%s14303_s1 + $0x1968] ss:$16 sps:$4 sm:$0xff]   ;;  %v10542_v7 = vld [vmem:[%s14303_s1 + $0x1984] ss:$16 sps:$4 sm:$0xff]  }
 0x2f8   :  { %6883 = vmatprep.subr.bf16.mxu0 %v10457_v21  ;;  %7539 = vmatprep.subr.bf16.mxu1 %v10460_v5  ;;  %v10545_v21 = vld [vmem:[%s14303_s1 + $0x198c] ss:$16 sps:$4 sm:$0xff]   ;;  %v10540_v5 = vld [vmem:[%s14303_s1 + $0x1980] ss:$16 sps:$4 sm:$0xff]  }
 0x2fb   :  { %6884 = vmatpush1.bf16.msra.mxu0 %v10455_v23  ;;  %7540 = vmatpush1.bf16.msra.mxu1 %v10458_v9  ;;  %v10543_v23 = vld [vmem:[%s14303_s1 + $0x1988] ss:$16 sps:$4 sm:$0xff]   ;;  %v10548_v9 = vld [vmem:[%s14303_s1 + $0x19a4] ss:$16 sps:$4 sm:$0xff]  }
 0x2fc   :  { %6885 = vmatprep.subr.bf16.mxu0 %v10463_v26  ;;  %7541 = vmatprep.subr.bf16.mxu1 %v10466_v27  ;;  %v10551_v26 = vld [vmem:[%s14303_s1 + $0x19ac] ss:$16 sps:$4 sm:$0xff]   ;;  %v10546_v27 = vld [vmem:[%s14303_s1 + $0x19a0] ss:$16 sps:$4 sm:$0xff]  }
 0x2ff   :  { %6886 = vmatpush1.bf16.msra.mxu0 %v10461_v30  ;;  %7542 = vmatpush1.bf16.msra.mxu1 %v10464_v13  ;;  %v10549_v30 = vld [vmem:[%s14303_s1 + $0x19a8] ss:$16 sps:$4 sm:$0xff]   ;;  %v10554_v13 = vld [vmem:[%s14303_s1 + $0x19c4] ss:$16 sps:$4 sm:$0xff]  }
 0x300   :  { %6896 = vmatprep.subr.bf16.mxu0 %v10470_v31  ;;  %7552 = vmatprep.subr.bf16.mxu1 %v10473_v33  ;;  %v10557_v31 = vld [vmem:[%s14303_s1 + $0x19cc] ss:$16 sps:$4 sm:$0xff]   ;;  %v140_v33 = vcombine.high %v13355_v22, %v13355_v22 }
 0x301   :  { %v10563_v22 = vld [vmem:[%s14303_s1 + $0x19ec] ss:$16 sps:$4 sm:$0xff]  }
 0x302   :  { %6888 = vmatmul.mubr.bf16.vlgmr.msra.gmra.mrb[0].mxu0 %v228_v34  ;;  %7544 = vmatmul.mubr.bf16.vlgmr.msra.gmra.mrb[0].mxu1 %v228_v34  ;;  %v10555_v34 = vld [vmem:[%s14303_s1 + $0x19c8] ss:$16 sps:$4 sm:$0xff]  }
 0x303   :  { %6897 = vmatpush1.bf16.msra.mxu0 %v10468_v35  ;;  %7553 = vmatpush1.bf16.msra.mxu1 %v10471_v36  ;;  %v10560_v35 = vld [vmem:[%s14303_s1 + $0x19e4] ss:$16 sps:$4 sm:$0xff]   ;;  %v13572_v36 = vrot.slane %v140_v33, %v11077_v49  ;;  %v10639_v33 = vld [vmem:[%s14303_s1 + $0x1b88] ss:$16 sps:$4 sm:$0xff]  }
 0x304   :  { %6898 = vmatprep.subr.bf16.mxu0 %v10476_v37  ;;  %7554 = vmatprep.subr.bf16.mxu1 %v10479_v20  ;;  %v10558_v37 = vld [vmem:[%s14303_s1 + $0x19e0] ss:$16 sps:$4 sm:$0xff]   ;;  %v10561_v20 = vld [vmem:[%s14303_s1 + $0x19e8] ss:$16 sps:$4 sm:$0xff]  }
 0x305   :  { %6928 = vmatprep.mubr.bf16.mxu0 %v231_v38  ;;  %7584 = vmatprep.mubr.bf16.mxu1 %v231_v38  ;;  %v10566_v38 = vld [vmem:[%s14303_s1 + $0x1a04] ss:$16 sps:$4 sm:$0xff]  }
 0x307   :  { %6899 = vmatpush1.bf16.msra.mxu0 %v10474_v28  ;;  %7555 = vmatpush1.bf16.msra.mxu1 %v10477_v40  ;;  %v10569_v28 = vld [vmem:[%s14303_s1 + $0x1a0c] ss:$16 sps:$4 sm:$0xff]   ;;  %v156_v40 = vcombine.high %v13572_v36, %v13572_v36 }
 0x308   :  { %6900 = vmatprep.subr.bf16.mxu0 %v10482_v41  ;;  %7556 = vmatprep.subr.bf16.mxu1 %v10485_v24  ;;  %v230_v41 = vpack.c.bf16 %v13371_v29, %v13371_v29  ;;  %v10564_v24 = vld [vmem:[%s14303_s1 + $0x1a00] ss:$16 sps:$4 sm:$0xff]   ;;  %v10575_v29 = vld [vmem:[%s14303_s1 + $0x1a2c] ss:$16 sps:$4 sm:$0xff]  }
 0x30b   :  { %6901 = vmatpush1.bf16.msra.mxu0 %v10480_v44  ;;  %7557 = vmatpush1.bf16.msra.mxu1 %v10483_v45  ;;  %v10567_v44 = vld [vmem:[%s14303_s1 + $0x1a08] ss:$16 sps:$4 sm:$0xff]   ;;  %v10572_v45 = vld [vmem:[%s14303_s1 + $0x1a24] ss:$16 sps:$4 sm:$0xff]  }
 0x30c   :  { %6902 = vmatprep.subr.bf16.mxu0 %v10488_v46  ;;  %7558 = vmatprep.subr.bf16.mxu1 %v10491_v48  ;;  %v233_v46 = vpack.c.bf16 %v156_v40, %v156_v40  ;;  %v10570_v48 = vld [vmem:[%s14303_s1 + $0x1a20] ss:$16 sps:$4 sm:$0xff]   ;;  %v10651_v40 = vld [vmem:[%s14303_s1 + $0x1bc8] ss:$16 sps:$4 sm:$0xff]  }
 0x30f   :  { %6903 = vmatpush1.bf16.msra.mxu0 %v10486_v32  ;;  %7559 = vmatpush1.bf16.msra.mxu1 %v10489_v50  ;;  %v10573_v32 = vld [vmem:[%s14303_s1 + $0x1a28] ss:$16 sps:$4 sm:$0xff]   ;;  %v10578_v50 = vld [vmem:[%s14303_s1 + $0x1a44] ss:$16 sps:$4 sm:$0xff]  }
 0x310   :  { %6904 = vmatprep.subr.bf16.mxu0 %v10494_v51  ;;  %7560 = vmatprep.subr.bf16.mxu1 %v10497_v52  ;;  %v10581_v51 = vld [vmem:[%s14303_s1 + $0x1a4c] ss:$16 sps:$4 sm:$0xff]   ;;  %v10576_v52 = vld [vmem:[%s14303_s1 + $0x1a40] ss:$16 sps:$4 sm:$0xff]  }
 0x313   :  { %6905 = vmatpush1.bf16.msra.mxu0 %v10492_v53  ;;  %7561 = vmatpush1.bf16.msra.mxu1 %v10495_v54  ;;  %v10579_v53 = vld [vmem:[%s14303_s1 + $0x1a48] ss:$16 sps:$4 sm:$0xff]   ;;  %v10584_v54 = vld [vmem:[%s14303_s1 + $0x1a64] ss:$16 sps:$4 sm:$0xff]  }
 0x314   :  { %6906 = vmatprep.subr.bf16.mxu0 %v10500_v42  ;;  %7562 = vmatprep.subr.bf16.mxu1 %v10503_v56  ;;  %v10587_v42 = vld [vmem:[%s14303_s1 + $0x1a6c] ss:$16 sps:$4 sm:$0xff]   ;;  %v10582_v56 = vld [vmem:[%s14303_s1 + $0x1a60] ss:$16 sps:$4 sm:$0xff]  }
 0x317   :  { %6907 = vmatpush1.bf16.msra.mxu0 %v10498_v39  ;;  %7563 = vmatpush1.bf16.msra.mxu1 %v10501_v58  ;;  %v10585_v39 = vld [vmem:[%s14303_s1 + $0x1a68] ss:$16 sps:$4 sm:$0xff]   ;;  %v10590_v58 = vld [vmem:[%s14303_s1 + $0x1a84] ss:$16 sps:$4 sm:$0xff]  }
 0x318   :  { %6908 = vmatprep.subr.bf16.mxu0 %v10506_v59  ;;  %7564 = vmatprep.subr.bf16.mxu1 %v10509_v60  ;;  %v10593_v59 = vld [vmem:[%s14303_s1 + $0x1a8c] ss:$16 sps:$4 sm:$0xff]   ;;  %v10588_v60 = vld [vmem:[%s14303_s1 + $0x1a80] ss:$16 sps:$4 sm:$0xff]  }
 0x31b   :  { %6909 = vmatpush1.bf16.msra.mxu0 %v10504_v61  ;;  %7565 = vmatpush1.bf16.msra.mxu1 %v10507_v63  ;;  %v10591_v61 = vld [vmem:[%s14303_s1 + $0x1a88] ss:$16 sps:$4 sm:$0xff]   ;;  %v10596_v63 = vld [vmem:[%s14303_s1 + $0x1aa4] ss:$16 sps:$4 sm:$0xff]  }
 0x31c   :  { %6910 = vmatprep.subr.bf16.mxu0 %v10512_v47  ;;  %7566 = vmatprep.subr.bf16.mxu1 %v10515_v0  ;;  %v10599_v47 = vld [vmem:[%s14303_s1 + $0x1aac] ss:$16 sps:$4 sm:$0xff]   ;;  %v10594_v0 = vld [vmem:[%s14303_s1 + $0x1aa0] ss:$16 sps:$4 sm:$0xff]  }
 0x31f   :  { %6911 = vmatpush1.bf16.msra.mxu0 %v10510_v1  ;;  %7567 = vmatpush1.bf16.msra.mxu1 %v10513_v2  ;;  %v10597_v1 = vld [vmem:[%s14303_s1 + $0x1aa8] ss:$16 sps:$4 sm:$0xff]   ;;  %v10602_v2 = vld [vmem:[%s14303_s1 + $0x1ac4] ss:$16 sps:$4 sm:$0xff]  }
 0x320   :  { %6912 = vmatprep.subr.bf16.mxu0 %v10518_v3  ;;  %7568 = vmatprep.subr.bf16.mxu1 %v10521_v4  ;;  %v10605_v3 = vld [vmem:[%s14303_s1 + $0x1acc] ss:$16 sps:$4 sm:$0xff]   ;;  %v10600_v4 = vld [vmem:[%s14303_s1 + $0x1ac0] ss:$16 sps:$4 sm:$0xff]  }
 0x323   :  { %6913 = vmatpush1.bf16.msra.mxu0 %v10516_v57  ;;  %7569 = vmatpush1.bf16.msra.mxu1 %v10519_v6  ;;  %v10603_v57 = vld [vmem:[%s14303_s1 + $0x1ac8] ss:$16 sps:$4 sm:$0xff]   ;;  %v10608_v6 = vld [vmem:[%s14303_s1 + $0x1ae4] ss:$16 sps:$4 sm:$0xff]  }
 0x324   :  { %6914 = vmatprep.subr.bf16.mxu0 %v10524_v55  ;;  %7570 = vmatprep.subr.bf16.mxu1 %v10527_v8  ;;  %v10611_v55 = vld [vmem:[%s14303_s1 + $0x1aec] ss:$16 sps:$4 sm:$0xff]   ;;  %v10606_v8 = vld [vmem:[%s14303_s1 + $0x1ae0] ss:$16 sps:$4 sm:$0xff]  }
 0x327   :  { %6915 = vmatpush1.bf16.msra.mxu0 %v10522_v10  ;;  %7571 = vmatpush1.bf16.msra.mxu1 %v10525_v11  ;;  %v10609_v10 = vld [vmem:[%s14303_s1 + $0x1ae8] ss:$16 sps:$4 sm:$0xff]   ;;  %v10614_v11 = vld [vmem:[%s14303_s1 + $0x1b04] ss:$16 sps:$4 sm:$0xff]  }
 0x328   :  { %6916 = vmatprep.subr.bf16.mxu0 %v10530_v12  ;;  %7572 = vmatprep.subr.bf16.mxu1 %v10533_v14  ;;  %v10617_v12 = vld [vmem:[%s14303_s1 + $0x1b0c] ss:$16 sps:$4 sm:$0xff]   ;;  %v10612_v14 = vld [vmem:[%s14303_s1 + $0x1b00] ss:$16 sps:$4 sm:$0xff]  }
 0x32b   :  { %6917 = vmatpush1.bf16.msra.mxu0 %v10528_v62  ;;  %7573 = vmatpush1.bf16.msra.mxu1 %v10531_v15  ;;  %v10615_v62 = vld [vmem:[%s14303_s1 + $0x1b08] ss:$16 sps:$4 sm:$0xff]   ;;  %v10620_v15 = vld [vmem:[%s14303_s1 + $0x1b24] ss:$16 sps:$4 sm:$0xff]  }
 0x32c   :  { %6918 = vmatprep.subr.bf16.mxu0 %v10536_v16  ;;  %7574 = vmatprep.subr.bf16.mxu1 %v10539_v17  ;;  %v10623_v16 = vld [vmem:[%s14303_s1 + $0x1b2c] ss:$16 sps:$4 sm:$0xff]   ;;  %v10618_v17 = vld [vmem:[%s14303_s1 + $0x1b20] ss:$16 sps:$4 sm:$0xff]  }
 0x32f   :  { %6919 = vmatpush1.bf16.msra.mxu0 %v10534_v18  ;;  %7575 = vmatpush1.bf16.msra.mxu1 %v10537_v19  ;;  %v10621_v18 = vld [vmem:[%s14303_s1 + $0x1b28] ss:$16 sps:$4 sm:$0xff]   ;;  %v10626_v19 = vld [vmem:[%s14303_s1 + $0x1b44] ss:$16 sps:$4 sm:$0xff]  }
 0x330   :  { %6920 = vmatprep.subr.bf16.mxu0 %v10542_v7  ;;  %7576 = vmatprep.subr.bf16.mxu1 %v10545_v21  ;;  %v10629_v7 = vld [vmem:[%s14303_s1 + $0x1b4c] ss:$16 sps:$4 sm:$0xff]   ;;  %v10624_v21 = vld [vmem:[%s14303_s1 + $0x1b40] ss:$16 sps:$4 sm:$0xff]  }
 0x333   :  { %6921 = vmatpush1.bf16.msra.mxu0 %v10540_v5  ;;  %7577 = vmatpush1.bf16.msra.mxu1 %v10543_v23  ;;  %v10627_v5 = vld [vmem:[%s14303_s1 + $0x1b48] ss:$16 sps:$4 sm:$0xff]   ;;  %v10632_v23 = vld [vmem:[%s14303_s1 + $0x1b64] ss:$16 sps:$4 sm:$0xff]  }
 0x334   :  { %6922 = vmatprep.subr.bf16.mxu0 %v10548_v9  ;;  %7578 = vmatprep.subr.bf16.mxu1 %v10551_v26  ;;  %v10635_v9 = vld [vmem:[%s14303_s1 + $0x1b6c] ss:$16 sps:$4 sm:$0xff]   ;;  %v10630_v26 = vld [vmem:[%s14303_s1 + $0x1b60] ss:$16 sps:$4 sm:$0xff]  }
 0x337   :  { %6923 = vmatpush1.bf16.msra.mxu0 %v10546_v27  ;;  %7579 = vmatpush1.bf16.msra.mxu1 %v10549_v30  ;;  %v10633_v27 = vld [vmem:[%s14303_s1 + $0x1b68] ss:$16 sps:$4 sm:$0xff]   ;;  %v10638_v30 = vld [vmem:[%s14303_s1 + $0x1b84] ss:$16 sps:$4 sm:$0xff]  }
 0x338   :  { %6924 = vmatprep.subr.bf16.mxu0 %v10554_v13  ;;  %7580 = vmatprep.subr.bf16.mxu1 %v10557_v31  ;;  %v10641_v13 = vld [vmem:[%s14303_s1 + $0x1b8c] ss:$16 sps:$4 sm:$0xff]   ;;  %v10636_v31 = vld [vmem:[%s14303_s1 + $0x1b80] ss:$16 sps:$4 sm:$0xff]  }
 0x33b   :  { %6925 = vmatpush1.bf16.msra.mxu0 %v10552_v25  ;;  %7581 = vmatpush1.bf16.msra.mxu1 %v10555_v34  ;;  %v10644_v25 = vld [vmem:[%s14303_s1 + $0x1ba4] ss:$16 sps:$4 sm:$0xff]   ;;  %v10647_v34 = vld [vmem:[%s14303_s1 + $0x1bac] ss:$16 sps:$4 sm:$0xff]  }
 0x33c   :  { %6926 = vmatprep.subr.bf16.mxu0 %v10560_v35  ;;  %7582 = vmatprep.subr.bf16.mxu1 %v10563_v22  ;;  %v10642_v35 = vld [vmem:[%s14303_s1 + $0x1ba0] ss:$16 sps:$4 sm:$0xff]   ;;  %v10645_v22 = vld [vmem:[%s14303_s1 + $0x1ba8] ss:$16 sps:$4 sm:$0xff]  }
 0x33f   :  { %6927 = vmatpush1.bf16.msra.mxu0 %v10558_v37  ;;  %7583 = vmatpush1.bf16.msra.mxu1 %v10561_v20  ;;  %v10650_v37 = vld [vmem:[%s14303_s1 + $0x1bc4] ss:$16 sps:$4 sm:$0xff]   ;;  %v10653_v20 = vld [vmem:[%s14303_s1 + $0x1bcc] ss:$16 sps:$4 sm:$0xff]  }
 0x340   :  { %6937 = vmatprep.subr.bf16.mxu0 %v10566_v38  ;;  %7593 = vmatprep.subr.bf16.mxu1 %v10569_v28  ;;  %v13761_v38 = vld [vmem:[%s14302_s0 + $0x38] sm:$0xff]  ;;  %v10648_v28 = vld [vmem:[%s14303_s1 + $0x1bc0] ss:$16 sps:$4 sm:$0xff]  }
 0x342   :  { %6929 = vmatmul.mubr.bf16.vlgmr.msra.gmra.mrb[0].mxu0 %v230_v41  ;;  %7585 = vmatmul.mubr.bf16.vlgmr.msra.gmra.mrb[0].mxu1 %v230_v41  ;;  %v10656_v41 = vld [vmem:[%s14303_s1 + $0x1be4] ss:$16 sps:$4 sm:$0xff]  }
 0x343   :  { %6938 = vmatpush1.bf16.msra.mxu0 %v10564_v24  ;;  %7594 = vmatpush1.bf16.msra.mxu1 %v10567_v44  ;;  %v10659_v24 = vld [vmem:[%s14303_s1 + $0x1bec] ss:$16 sps:$4 sm:$0xff]   ;;  %v13777_v44 = vrot.slane %v13761_v38, %v11077_v49 }
 0x344   :  { %6939 = vmatprep.subr.bf16.mxu0 %v10572_v45  ;;  %7595 = vmatprep.subr.bf16.mxu1 %v10575_v29  ;;  %v10654_v45 = vld [vmem:[%s14303_s1 + $0x1be0] ss:$16 sps:$4 sm:$0xff]   ;;  %v10657_v29 = vld [vmem:[%s14303_s1 + $0x1be8] ss:$16 sps:$4 sm:$0xff]  }
 0x345   :  { %6969 = vmatprep.mubr.bf16.mxu0 %v233_v46  ;;  %7625 = vmatprep.mubr.bf16.mxu1 %v233_v46  ;;  %v10663_v46 = vld [vmem:[%s14303_s1 + $0x1c04] ss:$16 sps:$4 sm:$0xff]  }
 0x347   :  { %6940 = vmatpush1.bf16.msra.mxu0 %v10570_v48  ;;  %7596 = vmatpush1.bf16.msra.mxu1 %v10573_v32  ;;  %v10666_v48 = vld [vmem:[%s14303_s1 + $0x1c0c] ss:$16 sps:$4 sm:$0xff]   ;;  %v172_v32 = vcombine.high %v13777_v44, %v13777_v44 }
 0x348   :  { %6941 = vmatprep.subr.bf16.mxu0 %v10578_v50  ;;  %7597 = vmatprep.subr.bf16.mxu1 %v10581_v51  ;;  %v232_v50 = vpack.c.bf16 %v13572_v36, %v13572_v36  ;;  %v10661_v51 = vld [vmem:[%s14303_s1 + $0x1c00] ss:$16 sps:$4 sm:$0xff]   ;;  %v10672_v36 = vld [vmem:[%s14303_s1 + $0x1c2c] ss:$16 sps:$4 sm:$0xff]  }
 0x34b   :  { %6942 = vmatpush1.bf16.msra.mxu0 %v10576_v52  ;;  %7598 = vmatpush1.bf16.msra.mxu1 %v10579_v53  ;;  %v10664_v52 = vld [vmem:[%s14303_s1 + $0x1c08] ss:$16 sps:$4 sm:$0xff]   ;;  %v10669_v53 = vld [vmem:[%s14303_s1 + $0x1c24] ss:$16 sps:$4 sm:$0xff]  }
 0x34c   :  { %6943 = vmatprep.subr.bf16.mxu0 %v10584_v54  ;;  %7599 = vmatprep.subr.bf16.mxu1 %v10587_v42  ;;  %v235_v54 = vpack.c.bf16 %v172_v32, %v172_v32  ;;  %v10667_v42 = vld [vmem:[%s14303_s1 + $0x1c20] ss:$16 sps:$4 sm:$0xff]  }
 0x34d   :  { %v10745_v32 = vld [vmem:[%s14303_s1 + $0x1dc0] ss:$16 sps:$4 sm:$0xff]  }
 0x34f   :  { %6944 = vmatpush1.bf16.msra.mxu0 %v10582_v56  ;;  %7600 = vmatpush1.bf16.msra.mxu1 %v10585_v39  ;;  %v10670_v56 = vld [vmem:[%s14303_s1 + $0x1c28] ss:$16 sps:$4 sm:$0xff]   ;;  %v10675_v39 = vld [vmem:[%s14303_s1 + $0x1c44] ss:$16 sps:$4 sm:$0xff]  }
 0x350   :  { %6945 = vmatprep.subr.bf16.mxu0 %v10590_v58  ;;  %7601 = vmatprep.subr.bf16.mxu1 %v10593_v59  ;;  %v10678_v58 = vld [vmem:[%s14303_s1 + $0x1c4c] ss:$16 sps:$4 sm:$0xff]   ;;  %v10673_v59 = vld [vmem:[%s14303_s1 + $0x1c40] ss:$16 sps:$4 sm:$0xff]  }
 0x353   :  { %6946 = vmatpush1.bf16.msra.mxu0 %v10588_v60  ;;  %7602 = vmatpush1.bf16.msra.mxu1 %v10591_v61  ;;  %v10676_v60 = vld [vmem:[%s14303_s1 + $0x1c48] ss:$16 sps:$4 sm:$0xff]   ;;  %v10681_v61 = vld [vmem:[%s14303_s1 + $0x1c64] ss:$16 sps:$4 sm:$0xff]  }
 0x354   :  { %6947 = vmatprep.subr.bf16.mxu0 %v10596_v63  ;;  %7603 = vmatprep.subr.bf16.mxu1 %v10599_v47  ;;  %v10684_v63 = vld [vmem:[%s14303_s1 + $0x1c6c] ss:$16 sps:$4 sm:$0xff]   ;;  %v10679_v47 = vld [vmem:[%s14303_s1 + $0x1c60] ss:$16 sps:$4 sm:$0xff]  }
 0x357   :  { %6948 = vmatpush1.bf16.msra.mxu0 %v10594_v0  ;;  %7604 = vmatpush1.bf16.msra.mxu1 %v10597_v1  ;;  %v10682_v0 = vld [vmem:[%s14303_s1 + $0x1c68] ss:$16 sps:$4 sm:$0xff]   ;;  %v10687_v1 = vld [vmem:[%s14303_s1 + $0x1c84] ss:$16 sps:$4 sm:$0xff]  }
 0x358   :  { %6949 = vmatprep.subr.bf16.mxu0 %v10602_v2  ;;  %7605 = vmatprep.subr.bf16.mxu1 %v10605_v3  ;;  %v10690_v2 = vld [vmem:[%s14303_s1 + $0x1c8c] ss:$16 sps:$4 sm:$0xff]   ;;  %v10685_v3 = vld [vmem:[%s14303_s1 + $0x1c80] ss:$16 sps:$4 sm:$0xff]  }
 0x35b   :  { %6950 = vmatpush1.bf16.msra.mxu0 %v10600_v4  ;;  %7606 = vmatpush1.bf16.msra.mxu1 %v10603_v57  ;;  %v10688_v4 = vld [vmem:[%s14303_s1 + $0x1c88] ss:$16 sps:$4 sm:$0xff]   ;;  %v10693_v57 = vld [vmem:[%s14303_s1 + $0x1ca4] ss:$16 sps:$4 sm:$0xff]  }
 0x35c   :  { %6951 = vmatprep.subr.bf16.mxu0 %v10608_v6  ;;  %7607 = vmatprep.subr.bf16.mxu1 %v10611_v55  ;;  %v10696_v6 = vld [vmem:[%s14303_s1 + $0x1cac] ss:$16 sps:$4 sm:$0xff]   ;;  %v10691_v55 = vld [vmem:[%s14303_s1 + $0x1ca0] ss:$16 sps:$4 sm:$0xff]  }
 0x35f   :  { %6952 = vmatpush1.bf16.msra.mxu0 %v10606_v8  ;;  %7608 = vmatpush1.bf16.msra.mxu1 %v10609_v10  ;;  %v10694_v8 = vld [vmem:[%s14303_s1 + $0x1ca8] ss:$16 sps:$4 sm:$0xff]   ;;  %v10699_v10 = vld [vmem:[%s14303_s1 + $0x1cc4] ss:$16 sps:$4 sm:$0xff]  }
 0x360   :  { %6953 = vmatprep.subr.bf16.mxu0 %v10614_v11  ;;  %7609 = vmatprep.subr.bf16.mxu1 %v10617_v12  ;;  %v10702_v11 = vld [vmem:[%s14303_s1 + $0x1ccc] ss:$16 sps:$4 sm:$0xff]   ;;  %v10697_v12 = vld [vmem:[%s14303_s1 + $0x1cc0] ss:$16 sps:$4 sm:$0xff]  }
 0x363   :  { %6954 = vmatpush1.bf16.msra.mxu0 %v10612_v14  ;;  %7610 = vmatpush1.bf16.msra.mxu1 %v10615_v62  ;;  %v10700_v14 = vld [vmem:[%s14303_s1 + $0x1cc8] ss:$16 sps:$4 sm:$0xff]   ;;  %v10705_v62 = vld [vmem:[%s14303_s1 + $0x1ce4] ss:$16 sps:$4 sm:$0xff]  }
 0x364   :  { %6955 = vmatprep.subr.bf16.mxu0 %v10620_v15  ;;  %7611 = vmatprep.subr.bf16.mxu1 %v10623_v16  ;;  %v10708_v15 = vld [vmem:[%s14303_s1 + $0x1cec] ss:$16 sps:$4 sm:$0xff]   ;;  %v10703_v16 = vld [vmem:[%s14303_s1 + $0x1ce0] ss:$16 sps:$4 sm:$0xff]  }
 0x367   :  { %6956 = vmatpush1.bf16.msra.mxu0 %v10618_v17  ;;  %7612 = vmatpush1.bf16.msra.mxu1 %v10621_v18  ;;  %v10706_v17 = vld [vmem:[%s14303_s1 + $0x1ce8] ss:$16 sps:$4 sm:$0xff]   ;;  %v10711_v18 = vld [vmem:[%s14303_s1 + $0x1d04] ss:$16 sps:$4 sm:$0xff]  }
 0x368   :  { %6957 = vmatprep.subr.bf16.mxu0 %v10626_v19  ;;  %7613 = vmatprep.subr.bf16.mxu1 %v10629_v7  ;;  %v10714_v19 = vld [vmem:[%s14303_s1 + $0x1d0c] ss:$16 sps:$4 sm:$0xff]   ;;  %v10709_v7 = vld [vmem:[%s14303_s1 + $0x1d00] ss:$16 sps:$4 sm:$0xff]  }
 0x36b   :  { %6958 = vmatpush1.bf16.msra.mxu0 %v10624_v21  ;;  %7614 = vmatpush1.bf16.msra.mxu1 %v10627_v5  ;;  %v10712_v21 = vld [vmem:[%s14303_s1 + $0x1d08] ss:$16 sps:$4 sm:$0xff]   ;;  %v10717_v5 = vld [vmem:[%s14303_s1 + $0x1d24] ss:$16 sps:$4 sm:$0xff]  }
 0x36c   :  { %6959 = vmatprep.subr.bf16.mxu0 %v10632_v23  ;;  %7615 = vmatprep.subr.bf16.mxu1 %v10635_v9  ;;  %v10720_v23 = vld [vmem:[%s14303_s1 + $0x1d2c] ss:$16 sps:$4 sm:$0xff]   ;;  %v10715_v9 = vld [vmem:[%s14303_s1 + $0x1d20] ss:$16 sps:$4 sm:$0xff]  }
 0x36f   :  { %6960 = vmatpush1.bf16.msra.mxu0 %v10630_v26  ;;  %7616 = vmatpush1.bf16.msra.mxu1 %v10633_v27  ;;  %v10718_v26 = vld [vmem:[%s14303_s1 + $0x1d28] ss:$16 sps:$4 sm:$0xff]   ;;  %v10723_v27 = vld [vmem:[%s14303_s1 + $0x1d44] ss:$16 sps:$4 sm:$0xff]  }
 0x370   :  { %6961 = vmatprep.subr.bf16.mxu0 %v10638_v30  ;;  %7617 = vmatprep.subr.bf16.mxu1 %v10641_v13  ;;  %v10726_v30 = vld [vmem:[%s14303_s1 + $0x1d4c] ss:$16 sps:$4 sm:$0xff]   ;;  %v10721_v13 = vld [vmem:[%s14303_s1 + $0x1d40] ss:$16 sps:$4 sm:$0xff]  }
 0x373   :  { %6962 = vmatpush1.bf16.msra.mxu0 %v10636_v31  ;;  %7618 = vmatpush1.bf16.msra.mxu1 %v10639_v33  ;;  %v10724_v31 = vld [vmem:[%s14303_s1 + $0x1d48] ss:$16 sps:$4 sm:$0xff]   ;;  %v10729_v33 = vld [vmem:[%s14303_s1 + $0x1d64] ss:$16 sps:$4 sm:$0xff]  }
 0x374   :  { %6963 = vmatprep.subr.bf16.mxu0 %v10644_v25  ;;  %7619 = vmatprep.subr.bf16.mxu1 %v10647_v34  ;;  %v10732_v25 = vld [vmem:[%s14303_s1 + $0x1d6c] ss:$16 sps:$4 sm:$0xff]   ;;  %v10727_v34 = vld [vmem:[%s14303_s1 + $0x1d60] ss:$16 sps:$4 sm:$0xff]  }
 0x377   :  { %6964 = vmatpush1.bf16.msra.mxu0 %v10642_v35  ;;  %7620 = vmatpush1.bf16.msra.mxu1 %v10645_v22  ;;  %v10730_v35 = vld [vmem:[%s14303_s1 + $0x1d68] ss:$16 sps:$4 sm:$0xff]   ;;  %v10735_v22 = vld [vmem:[%s14303_s1 + $0x1d84] ss:$16 sps:$4 sm:$0xff]  }
 0x378   :  { %6965 = vmatprep.subr.bf16.mxu0 %v10650_v37  ;;  %7621 = vmatprep.subr.bf16.mxu1 %v10653_v20  ;;  %v10738_v37 = vld [vmem:[%s14303_s1 + $0x1d8c] ss:$16 sps:$4 sm:$0xff]   ;;  %v10733_v20 = vld [vmem:[%s14303_s1 + $0x1d80] ss:$16 sps:$4 sm:$0xff]  }
 0x37b   :  { %6966 = vmatpush1.bf16.msra.mxu0 %v10648_v28  ;;  %7622 = vmatpush1.bf16.msra.mxu1 %v10651_v40  ;;  %v10736_v28 = vld [vmem:[%s14303_s1 + $0x1d88] ss:$16 sps:$4 sm:$0xff]   ;;  %v10741_v40 = vld [vmem:[%s14303_s1 + $0x1da4] ss:$16 sps:$4 sm:$0xff]  }
 0x37c   :  { %6967 = vmatprep.subr.bf16.mxu0 %v10656_v41  ;;  %7623 = vmatprep.subr.bf16.mxu1 %v10659_v24  ;;  %v10744_v41 = vld [vmem:[%s14303_s1 + $0x1dac] ss:$16 sps:$4 sm:$0xff]   ;;  %v10739_v24 = vld [vmem:[%s14303_s1 + $0x1da0] ss:$16 sps:$4 sm:$0xff]  }
 0x37f   :  { %6968 = vmatpush1.bf16.msra.mxu0 %v10654_v45  ;;  %7624 = vmatpush1.bf16.msra.mxu1 %v10657_v29  ;;  %v10742_v45 = vld [vmem:[%s14303_s1 + $0x1da8] ss:$16 sps:$4 sm:$0xff]   ;;  %v10747_v29 = vld [vmem:[%s14303_s1 + $0x1dc4] ss:$16 sps:$4 sm:$0xff]  }
 0x380   :  { %6978 = vmatprep.subr.bf16.mxu0 %v10663_v46  ;;  %7634 = vmatprep.subr.bf16.mxu1 %v10666_v48  ;;  %v10750_v46 = vld [vmem:[%s14303_s1 + $0x1dcc] ss:$16 sps:$4 sm:$0xff]   ;;  %v157_v48 = vcombine.high %v13761_v38, %v13761_v38 }
 0x381   :  { %v10756_v38 = vld [vmem:[%s14303_s1 + $0x1dec] ss:$16 sps:$4 sm:$0xff]  }
 0x382   :  { %6970 = vmatmul.mubr.bf16.vlgmr.msra.gmra.mrb[0].mxu0 %v232_v50  ;;  %7626 = vmatmul.mubr.bf16.vlgmr.msra.gmra.mrb[0].mxu1 %v232_v50  ;;  %v10748_v50 = vld [vmem:[%s14303_s1 + $0x1dc8] ss:$16 sps:$4 sm:$0xff]  }
 0x383   :  { %6979 = vmatpush1.bf16.msra.mxu0 %v10661_v51  ;;  %7635 = vmatpush1.bf16.msra.mxu1 %v10664_v52  ;;  %v10753_v51 = vld [vmem:[%s14303_s1 + $0x1de4] ss:$16 sps:$4 sm:$0xff]   ;;  %v13978_v52 = vrot.slane %v157_v48, %v11077_v49  ;;  %v10762_v49 = vld [vmem:[%s14303_s1 + $0x1e0c] ss:$16 sps:$4 sm:$0xff]  }
 0x384   :  { %6980 = vmatprep.subr.bf16.mxu0 %v10669_v53  ;;  %7636 = vmatprep.subr.bf16.mxu1 %v10672_v36  ;;  %v10751_v53 = vld [vmem:[%s14303_s1 + $0x1de0] ss:$16 sps:$4 sm:$0xff]   ;;  %v10754_v36 = vld [vmem:[%s14303_s1 + $0x1de8] ss:$16 sps:$4 sm:$0xff]   ;;  %v10837_v48 = vld [vmem:[%s14303_s1 + $0x1fa4] ss:$16 sps:$4 sm:$0xff]  }
 0x385   :  { %7010 = vmatprep.mubr.bf16.mxu0 %v235_v54  ;;  %7666 = vmatprep.mubr.bf16.mxu1 %v235_v54  ;;  %v10759_v54 = vld [vmem:[%s14303_s1 + $0x1e04] ss:$16 sps:$4 sm:$0xff]  }
 0x387   :  { %6981 = vmatpush1.bf16.msra.mxu0 %v10667_v42  ;;  %7637 = vmatpush1.bf16.msra.mxu1 %v10670_v56  ;;  %v173_v42 = vcombine.high %v13978_v52, %v13978_v52  ;;  %v234_v56 = vpack.c.bf16 %v13777_v44, %v13777_v44  ;;  %v10768_v44 = vld [vmem:[%s14303_s1 + $0x1e2c] ss:$16 sps:$4 sm:$0xff]  }
 0x388   :  { %6982 = vmatprep.subr.bf16.mxu0 %v10675_v39  ;;  %7638 = vmatprep.subr.bf16.mxu1 %v10678_v58  ;;  %v10757_v39 = vld [vmem:[%s14303_s1 + $0x1e00] ss:$16 sps:$4 sm:$0xff]   ;;  %v10760_v58 = vld [vmem:[%s14303_s1 + $0x1e08] ss:$16 sps:$4 sm:$0xff]  }
 0x38b   :  { %6983 = vmatpush1.bf16.msra.mxu0 %v10673_v59  ;;  %7639 = vmatpush1.bf16.msra.mxu1 %v10676_v60  ;;  %v10765_v59 = vld [vmem:[%s14303_s1 + $0x1e24] ss:$16 sps:$4 sm:$0xff]   ;;  %v237_v60 = vpack.c.bf16 %v173_v42, %v173_v42  ;;  %v10852_v42 = vld [vmem:[%s14303_s1 + $0x1fec] ss:$16 sps:$4 sm:$0xff]  }
 0x38c   :  { %6984 = vmatprep.subr.bf16.mxu0 %v10681_v61  ;;  %7640 = vmatprep.subr.bf16.mxu1 %v10684_v63  ;;  %v10763_v61 = vld [vmem:[%s14303_s1 + $0x1e20] ss:$16 sps:$4 sm:$0xff]   ;;  %v10766_v63 = vld [vmem:[%s14303_s1 + $0x1e28] ss:$16 sps:$4 sm:$0xff]  }
 0x38f   :  { %6985 = vmatpush1.bf16.msra.mxu0 %v10679_v47  ;;  %7641 = vmatpush1.bf16.msra.mxu1 %v10682_v0  ;;  %v10771_v47 = vld [vmem:[%s14303_s1 + $0x1e44] ss:$16 sps:$4 sm:$0xff]   ;;  %v10774_v0 = vld [vmem:[%s14303_s1 + $0x1e4c] ss:$16 sps:$4 sm:$0xff]  }
 0x390   :  { %6986 = vmatprep.subr.bf16.mxu0 %v10687_v1  ;;  %7642 = vmatprep.subr.bf16.mxu1 %v10690_v2  ;;  %v10769_v1 = vld [vmem:[%s14303_s1 + $0x1e40] ss:$16 sps:$4 sm:$0xff]   ;;  %v10772_v2 = vld [vmem:[%s14303_s1 + $0x1e48] ss:$16 sps:$4 sm:$0xff]  }
 0x393   :  { %6987 = vmatpush1.bf16.msra.mxu0 %v10685_v3  ;;  %7643 = vmatpush1.bf16.msra.mxu1 %v10688_v4  ;;  %v10777_v3 = vld [vmem:[%s14303_s1 + $0x1e64] ss:$16 sps:$4 sm:$0xff]   ;;  %v10780_v4 = vld [vmem:[%s14303_s1 + $0x1e6c] ss:$16 sps:$4 sm:$0xff]  }
 0x394   :  { %6988 = vmatprep.subr.bf16.mxu0 %v10693_v57  ;;  %7644 = vmatprep.subr.bf16.mxu1 %v10696_v6  ;;  %v10775_v57 = vld [vmem:[%s14303_s1 + $0x1e60] ss:$16 sps:$4 sm:$0xff]   ;;  %v10778_v6 = vld [vmem:[%s14303_s1 + $0x1e68] ss:$16 sps:$4 sm:$0xff]  }
 0x397   :  { %6989 = vmatpush1.bf16.msra.mxu0 %v10691_v55  ;;  %7645 = vmatpush1.bf16.msra.mxu1 %v10694_v8  ;;  %v10783_v55 = vld [vmem:[%s14303_s1 + $0x1e84] ss:$16 sps:$4 sm:$0xff]   ;;  %v10786_v8 = vld [vmem:[%s14303_s1 + $0x1e8c] ss:$16 sps:$4 sm:$0xff]  }
 0x398   :  { %6990 = vmatprep.subr.bf16.mxu0 %v10699_v10  ;;  %7646 = vmatprep.subr.bf16.mxu1 %v10702_v11  ;;  %v10781_v10 = vld [vmem:[%s14303_s1 + $0x1e80] ss:$16 sps:$4 sm:$0xff]   ;;  %v10784_v11 = vld [vmem:[%s14303_s1 + $0x1e88] ss:$16 sps:$4 sm:$0xff]  }
 0x39b   :  { %6991 = vmatpush1.bf16.msra.mxu0 %v10697_v12  ;;  %7647 = vmatpush1.bf16.msra.mxu1 %v10700_v14  ;;  %v10789_v12 = vld [vmem:[%s14303_s1 + $0x1ea4] ss:$16 sps:$4 sm:$0xff]   ;;  %v10792_v14 = vld [vmem:[%s14303_s1 + $0x1eac] ss:$16 sps:$4 sm:$0xff]  }
 0x39c   :  { %6992 = vmatprep.subr.bf16.mxu0 %v10705_v62  ;;  %7648 = vmatprep.subr.bf16.mxu1 %v10708_v15  ;;  %v10787_v62 = vld [vmem:[%s14303_s1 + $0x1ea0] ss:$16 sps:$4 sm:$0xff]   ;;  %v10790_v15 = vld [vmem:[%s14303_s1 + $0x1ea8] ss:$16 sps:$4 sm:$0xff]  }
 0x39f   :  { %6993 = vmatpush1.bf16.msra.mxu0 %v10703_v16  ;;  %7649 = vmatpush1.bf16.msra.mxu1 %v10706_v17  ;;  %v10795_v16 = vld [vmem:[%s14303_s1 + $0x1ec4] ss:$16 sps:$4 sm:$0xff]   ;;  %v10798_v17 = vld [vmem:[%s14303_s1 + $0x1ecc] ss:$16 sps:$4 sm:$0xff]  }
 0x3a0   :  { %6994 = vmatprep.subr.bf16.mxu0 %v10711_v18  ;;  %7650 = vmatprep.subr.bf16.mxu1 %v10714_v19  ;;  %v10793_v18 = vld [vmem:[%s14303_s1 + $0x1ec0] ss:$16 sps:$4 sm:$0xff]   ;;  %v10796_v19 = vld [vmem:[%s14303_s1 + $0x1ec8] ss:$16 sps:$4 sm:$0xff]  }
 0x3a3   :  { %6995 = vmatpush1.bf16.msra.mxu0 %v10709_v7  ;;  %7651 = vmatpush1.bf16.msra.mxu1 %v10712_v21  ;;  %v10801_v7 = vld [vmem:[%s14303_s1 + $0x1ee4] ss:$16 sps:$4 sm:$0xff]   ;;  %v10804_v21 = vld [vmem:[%s14303_s1 + $0x1eec] ss:$16 sps:$4 sm:$0xff]  }
 0x3a4   :  { %6996 = vmatprep.subr.bf16.mxu0 %v10717_v5  ;;  %7652 = vmatprep.subr.bf16.mxu1 %v10720_v23  ;;  %v10799_v5 = vld [vmem:[%s14303_s1 + $0x1ee0] ss:$16 sps:$4 sm:$0xff]   ;;  %v10802_v23 = vld [vmem:[%s14303_s1 + $0x1ee8] ss:$16 sps:$4 sm:$0xff]  }
 0x3a7   :  { %6997 = vmatpush1.bf16.msra.mxu0 %v10715_v9  ;;  %7653 = vmatpush1.bf16.msra.mxu1 %v10718_v26  ;;  %v10807_v9 = vld [vmem:[%s14303_s1 + $0x1f04] ss:$16 sps:$4 sm:$0xff]   ;;  %v10810_v26 = vld [vmem:[%s14303_s1 + $0x1f0c] ss:$16 sps:$4 sm:$0xff]  }
 0x3a8   :  { %6998 = vmatprep.subr.bf16.mxu0 %v10723_v27  ;;  %7654 = vmatprep.subr.bf16.mxu1 %v10726_v30  ;;  %v10805_v27 = vld [vmem:[%s14303_s1 + $0x1f00] ss:$16 sps:$4 sm:$0xff]   ;;  %v10808_v30 = vld [vmem:[%s14303_s1 + $0x1f08] ss:$16 sps:$4 sm:$0xff]  }
 0x3ab   :  { %6999 = vmatpush1.bf16.msra.mxu0 %v10721_v13  ;;  %7655 = vmatpush1.bf16.msra.mxu1 %v10724_v31  ;;  %v10813_v13 = vld [vmem:[%s14303_s1 + $0x1f24] ss:$16 sps:$4 sm:$0xff]   ;;  %v10816_v31 = vld [vmem:[%s14303_s1 + $0x1f2c] ss:$16 sps:$4 sm:$0xff]  }
 0x3ac   :  { %7000 = vmatprep.subr.bf16.mxu0 %v10729_v33  ;;  %7656 = vmatprep.subr.bf16.mxu1 %v10732_v25  ;;  %v10811_v33 = vld [vmem:[%s14303_s1 + $0x1f20] ss:$16 sps:$4 sm:$0xff]   ;;  %v10814_v25 = vld [vmem:[%s14303_s1 + $0x1f28] ss:$16 sps:$4 sm:$0xff]  }
 0x3af   :  { %7001 = vmatpush1.bf16.msra.mxu0 %v10727_v34  ;;  %7657 = vmatpush1.bf16.msra.mxu1 %v10730_v35  ;;  %v10819_v34 = vld [vmem:[%s14303_s1 + $0x1f44] ss:$16 sps:$4 sm:$0xff]   ;;  %v10822_v35 = vld [vmem:[%s14303_s1 + $0x1f4c] ss:$16 sps:$4 sm:$0xff]  }
 0x3b0   :  { %7002 = vmatprep.subr.bf16.mxu0 %v10735_v22  ;;  %7658 = vmatprep.subr.bf16.mxu1 %v10738_v37  ;;  %v10817_v22 = vld [vmem:[%s14303_s1 + $0x1f40] ss:$16 sps:$4 sm:$0xff]   ;;  %v10820_v37 = vld [vmem:[%s14303_s1 + $0x1f48] ss:$16 sps:$4 sm:$0xff]  }
 0x3b3   :  { %7003 = vmatpush1.bf16.msra.mxu0 %v10733_v20  ;;  %7659 = vmatpush1.bf16.msra.mxu1 %v10736_v28  ;;  %v10825_v20 = vld [vmem:[%s14303_s1 + $0x1f64] ss:$16 sps:$4 sm:$0xff]   ;;  %v10828_v28 = vld [vmem:[%s14303_s1 + $0x1f6c] ss:$16 sps:$4 sm:$0xff]  }
 0x3b4   :  { %7004 = vmatprep.subr.bf16.mxu0 %v10741_v40  ;;  %7660 = vmatprep.subr.bf16.mxu1 %v10744_v41  ;;  %v10823_v40 = vld [vmem:[%s14303_s1 + $0x1f60] ss:$16 sps:$4 sm:$0xff]   ;;  %v10826_v41 = vld [vmem:[%s14303_s1 + $0x1f68] ss:$16 sps:$4 sm:$0xff]  }
 0x3b7   :  { %7005 = vmatpush1.bf16.msra.mxu0 %v10739_v24  ;;  %7661 = vmatpush1.bf16.msra.mxu1 %v10742_v45  ;;  %v10831_v24 = vld [vmem:[%s14303_s1 + $0x1f84] ss:$16 sps:$4 sm:$0xff]   ;;  %v10834_v45 = vld [vmem:[%s14303_s1 + $0x1f8c] ss:$16 sps:$4 sm:$0xff]  }
 0x3b8   :  { %7006 = vmatprep.subr.bf16.mxu0 %v10747_v29  ;;  %7662 = vmatprep.subr.bf16.mxu1 %v10750_v46  ;;  %v10829_v29 = vld [vmem:[%s14303_s1 + $0x1f80] ss:$16 sps:$4 sm:$0xff]   ;;  %v10832_v46 = vld [vmem:[%s14303_s1 + $0x1f88] ss:$16 sps:$4 sm:$0xff]  }
 0x3bb   :  { %7007 = vmatpush1.bf16.msra.mxu0 %v10745_v32  ;;  %7663 = vmatpush1.bf16.msra.mxu1 %v10748_v50  ;;  %v10840_v32 = vld [vmem:[%s14303_s1 + $0x1fac] ss:$16 sps:$4 sm:$0xff]   ;;  %v10835_v50 = vld [vmem:[%s14303_s1 + $0x1fa0] ss:$16 sps:$4 sm:$0xff]  }
 0x3bc   :  { %7008 = vmatprep.subr.bf16.mxu0 %v10753_v51  ;;  %7664 = vmatprep.subr.bf16.mxu1 %v10756_v38  ;;  %v10838_v51 = vld [vmem:[%s14303_s1 + $0x1fa8] ss:$16 sps:$4 sm:$0xff]   ;;  %v10843_v38 = vld [vmem:[%s14303_s1 + $0x1fc4] ss:$16 sps:$4 sm:$0xff]  }
 0x3bf   :  { %7009 = vmatpush1.bf16.msra.mxu0 %v10751_v53  ;;  %7665 = vmatpush1.bf16.msra.mxu1 %v10754_v36  ;;  %v10846_v53 = vld [vmem:[%s14303_s1 + $0x1fcc] ss:$16 sps:$4 sm:$0xff]   ;;  %v10841_v36 = vld [vmem:[%s14303_s1 + $0x1fc0] ss:$16 sps:$4 sm:$0xff]  }
 0x3c0   :  { %7019 = vmatprep.subr.bf16.mxu0 %v10759_v54  ;;  %7675 = vmatprep.subr.bf16.mxu1 %v10762_v49  ;;  %v10844_v54 = vld [vmem:[%s14303_s1 + $0x1fc8] ss:$16 sps:$4 sm:$0xff]   ;;  %v10849_v49 = vld [vmem:[%s14303_s1 + $0x1fe4] ss:$16 sps:$4 sm:$0xff]  }
 0x3c2   :  { %7011 = vmatmul.mubr.bf16.vlgmr.msra.gmra.mrb[0].mxu0 %v234_v56  ;;  %7667 = vmatmul.mubr.bf16.vlgmr.msra.gmra.mrb[0].mxu1 %v234_v56  ;;  %v10847_v56 = vld [vmem:[%s14303_s1 + $0x1fe0] ss:$16 sps:$4 sm:$0xff]  }
 0x3c3   :  { %7020 = vmatpush1.bf16.msra.mxu0 %v10757_v39  ;;  %7676 = vmatpush1.bf16.msra.mxu1 %v10760_v58  ;;  %v10850_v39 = vld [vmem:[%s14303_s1 + $0x1fe8] ss:$16 sps:$4 sm:$0xff]   ;;  %v10854_v58 = vld [vmem:[%s14305_s3 + $0x40] sm:$0xff]  }
 0x3c4   :  { %7021 = vmatprep.subr.bf16.mxu0 %v10765_v59  ;;  %7677 = vmatprep.subr.bf16.mxu1 %v10768_v44  ;;  %v10855_v59 = vld [vmem:[%s14305_s3 + $0xc0] sm:$0xff]   ;;  %v236_v44 = vpack.c.bf16 %v13978_v52, %v13978_v52  ;;  %v10859_v52 = vld [vmem:[%s14305_s3 + $0xc8] sm:$0xff]  }
 0x3c5   :  { %7051 = vmatprep.mubr.bf16.mxu0 %v237_v60  ;;  %7707 = vmatprep.mubr.bf16.mxu1 %v237_v60  ;;  %v10856_v60 = vld [vmem:[%s14305_s3] sm:$0xff]  }
 0x3c7   :  { %7022 = vmatpush1.bf16.msra.mxu0 %v10763_v61  ;;  %7678 = vmatpush1.bf16.msra.mxu1 %v10766_v63  ;;  %v10857_v61 = vld [vmem:[%s14305_s3 + $0x80] sm:$0xff]   ;;  %v10858_v63 = vld [vmem:[%s14305_s3 + $0x48] sm:$0xff]  }
 0x3c8   :  { %7023 = vmatprep.subr.bf16.mxu0 %v10771_v47  ;;  %7679 = vmatprep.subr.bf16.mxu1 %v10774_v0  ;;  %v10860_v47 = vld [vmem:[%s14305_s3 + $0x8] sm:$0xff]  }
 0x3c9   :  { %v10861_v0 = vld [vmem:[%s14305_s3 + $0x88] sm:$0xff]  }
 0x3cb   :  { %7024 = vmatpush1.bf16.msra.mxu0 %v10769_v1  ;;  %7680 = vmatpush1.bf16.msra.mxu1 %v10772_v2  ;;  %v10862_v1 = vld [vmem:[%s14305_s3 + $0x50] sm:$0xff]  }
 0x3cc   :  { %7025 = vmatprep.subr.bf16.mxu0 %v10777_v3  ;;  %7681 = vmatprep.subr.bf16.mxu1 %v10780_v4  ;;  %v10863_v2 = vld [vmem:[%s14305_s3 + $0xd0] sm:$0xff]  }
 0x3cd   :  { %v10864_v3 = vld [vmem:[%s14305_s3 + $0x10] sm:$0xff]  }
 0x3ce   :  { %v10865_v4 = vld [vmem:[%s14305_s3 + $0x90] sm:$0xff]  }
 0x3cf   :  { %7026 = vmatpush1.bf16.msra.mxu0 %v10775_v57  ;;  %7682 = vmatpush1.bf16.msra.mxu1 %v10778_v6  ;;  %v10866_v57 = vld [vmem:[%s14305_s3 + $0x58] sm:$0xff]  }
 0x3d0   :  { %7027 = vmatprep.subr.bf16.mxu0 %v10783_v55  ;;  %7683 = vmatprep.subr.bf16.mxu1 %v10786_v8  ;;  %v10867_v6 = vld [vmem:[%s14305_s3 + $0xd8] sm:$0xff]  }
 0x3d1   :  { %v10868_v55 = vld [vmem:[%s14305_s3 + $0x18] sm:$0xff]  }
 0x3d2   :  { %v10869_v8 = vld [vmem:[%s14305_s3 + $0x98] sm:$0xff]  }
 0x3d3   :  { %7028 = vmatpush1.bf16.msra.mxu0 %v10781_v10  ;;  %7684 = vmatpush1.bf16.msra.mxu1 %v10784_v11  ;;  %v10870_v10 = vld [vmem:[%s14305_s3 + $0x60] sm:$0xff]  }
 0x3d4   :  { %7029 = vmatprep.subr.bf16.mxu0 %v10789_v12  ;;  %7685 = vmatprep.subr.bf16.mxu1 %v10792_v14  ;;  %v10871_v11 = vld [vmem:[%s14305_s3 + $0xe0] sm:$0xff]  }
 0x3d5   :  { %v10872_v12 = vld [vmem:[%s14305_s3 + $0x20] sm:$0xff]  }
 0x3d6   :  { %v10873_v14 = vld [vmem:[%s14305_s3 + $0xa0] sm:$0xff]  }
 0x3d7   :  { %7030 = vmatpush1.bf16.msra.mxu0 %v10787_v62  ;;  %7686 = vmatpush1.bf16.msra.mxu1 %v10790_v15  ;;  %v10874_v62 = vld [vmem:[%s14305_s3 + $0x68] sm:$0xff]  }
 0x3d8   :  { %7031 = vmatprep.subr.bf16.mxu0 %v10795_v16  ;;  %7687 = vmatprep.subr.bf16.mxu1 %v10798_v17  ;;  %v10875_v15 = vld [vmem:[%s14305_s3 + $0xe8] sm:$0xff]  }
 0x3d9   :  { %v10876_v16 = vld [vmem:[%s14305_s3 + $0x28] sm:$0xff]  }
 0x3da   :  { %v10877_v17 = vld [vmem:[%s14305_s3 + $0xa8] sm:$0xff]  }
 0x3db   :  { %7032 = vmatpush1.bf16.msra.mxu0 %v10793_v18  ;;  %7688 = vmatpush1.bf16.msra.mxu1 %v10796_v19  ;;  %v10878_v18 = vld [vmem:[%s14305_s3 + $0x70] sm:$0xff]  }
 0x3dc   :  { %7033 = vmatprep.subr.bf16.mxu0 %v10801_v7  ;;  %7689 = vmatprep.subr.bf16.mxu1 %v10804_v21  ;;  %v10879_v19 = vld [vmem:[%s14305_s3 + $0xf0] sm:$0xff]  }
 0x3dd   :  { %v10880_v7 = vld [vmem:[%s14305_s3 + $0x30] sm:$0xff]  }
 0x3de   :  { %v10881_v21 = vld [vmem:[%s14305_s3 + $0xb0] sm:$0xff]  }
 0x3df   :  { %7034 = vmatpush1.bf16.msra.mxu0 %v10799_v5  ;;  %7690 = vmatpush1.bf16.msra.mxu1 %v10802_v23  ;;  %v10882_v5 = vld [vmem:[%s14305_s3 + $0x78] sm:$0xff]  }
 0x3e0   :  { %7035 = vmatprep.subr.bf16.mxu0 %v10807_v9  ;;  %7691 = vmatprep.subr.bf16.mxu1 %v10810_v26  ;;  %v10883_v23 = vld [vmem:[%s14305_s3 + $0xf8] sm:$0xff]  }
 0x3e1   :  { %v10884_v9 = vld [vmem:[%s14305_s3 + $0x38] sm:$0xff]  }
 0x3e2   :  { %v10885_v26 = vld [vmem:[%s14305_s3 + $0xb8] sm:$0xff]  }
 0x3e3   :  { %7036 = vmatpush1.bf16.msra.mxu0 %v10805_v27  ;;  %7692 = vmatpush1.bf16.msra.mxu1 %v10808_v30  ;;  %v1266_v27 = vsub.s32 0, %v11059_v43  ;;  %v1274_v30 = vsub.s32 2, %v11059_v43 }
 0x3e4   :  { %7037 = vmatprep.subr.bf16.mxu0 %v10813_v13  ;;  %7693 = vmatprep.subr.bf16.mxu1 %v10816_v31  ;;  %v1262_v13 = vld [vmem:[%s14304_s2] sm:$0xf]  ;;  %v1270_v31 = vsub.s32 1, %v11059_v43 }
 0x3e7   :  { %7038 = vmatpush1.bf16.msra.mxu0 %v10811_v33  ;;  %7694 = vmatpush1.bf16.msra.mxu1 %v10814_v25  ;;  %v1278_v33 = vsub.s32 3, %v11059_v43  ;;  %v1267_v25 = vrot.slane %v1262_v13, %v1266_v27 }
 0x3e8   :  { %7039 = vmatprep.subr.bf16.mxu0 %v10819_v34  ;;  %7695 = vmatprep.subr.bf16.mxu1 %v10822_v35  ;;  %v1275_v34 = vrot.slane %v1262_v13, %v1274_v30  ;;  %v1271_v35 = vrot.slane %v1262_v13, %v1270_v31 }
 0x3eb   :  { %7040 = vmatpush1.bf16.msra.mxu0 %v10817_v22  ;;  %7696 = vmatpush1.bf16.msra.mxu1 %v10820_v37  ;;  %v1279_v22 = vrot.slane %v1262_v13, %v1278_v33 }
 0x3ec   :  { %7041 = vmatprep.subr.bf16.mxu0 %v10825_v20  ;;  %7697 = vmatprep.subr.bf16.mxu1 %v10828_v28 }
 0x3ef   :  { %7042 = vmatpush1.bf16.msra.mxu0 %v10823_v40  ;;  %7698 = vmatpush1.bf16.msra.mxu1 %v10826_v41 }
 0x3f0   :  { %7043 = vmatprep.subr.bf16.mxu0 %v10831_v24  ;;  %7699 = vmatprep.subr.bf16.mxu1 %v10834_v45 }
 0x3f3   :  { %7044 = vmatpush1.bf16.msra.mxu0 %v10829_v29  ;;  %7700 = vmatpush1.bf16.msra.mxu1 %v10832_v46 }
 0x3f4   :  { %7045 = vmatprep.subr.bf16.mxu0 %v10837_v48  ;;  %7701 = vmatprep.subr.bf16.mxu1 %v10840_v32 }
 0x3f7   :  { %7046 = vmatpush1.bf16.msra.mxu0 %v10835_v50  ;;  %7702 = vmatpush1.bf16.msra.mxu1 %v10838_v51 }
 0x3f8   :  { %7047 = vmatprep.subr.bf16.mxu0 %v10843_v38  ;;  %7703 = vmatprep.subr.bf16.mxu1 %v10846_v53 }
 0x3fb   :  { %7048 = vmatpush1.bf16.msra.mxu0 %v10841_v36  ;;  %7704 = vmatpush1.bf16.msra.mxu1 %v10844_v54 }
 0x3fc   :  { %7049 = vmatprep.subr.bf16.mxu0 %v10849_v49  ;;  %7705 = vmatprep.subr.bf16.mxu1 %v10852_v42 }
 0x3ff   :  { %7050 = vmatpush1.bf16.msra.mxu0 %v10847_v56  ;;  %7706 = vmatpush1.bf16.msra.mxu1 %v10850_v39 }
 0x400   :  { %9140 = vmatprep.subr.bf16.mxu0 %v10854_v58  ;;  %9162 = vmatprep.subr.bf16.mxu1 %v10855_v59  ;;  %v9107_v58 = vld [vmem:[%s14306_s4] ss:$0 sm:$0xff] }
 0x402   :  { %7052 = vmatmul.mubr.bf16.vlgmr.msra.gmra.mrb[0].mxu0 %v236_v44  ;;  %7708 = vmatmul.mubr.bf16.vlgmr.msra.gmra.mrb[0].mxu1 %v236_v44 }
 0x403   :  { %9141 = vmatpush3.bf16.msra.mxu0 %v10856_v60  ;;  %9163 = vmatpush3.bf16.msra.mxu1 %v10857_v61 }
 0x404   :  { %9142 = vmatprep.subr.bf16.mxu0 %v10858_v63  ;;  %9164 = vmatprep.subr.bf16.mxu1 %v10859_v52 }
 0x407   :  { %9143 = vmatpush3.bf16.msra.mxu0 %v10860_v47  ;;  %9165 = vmatpush3.bf16.msra.mxu1 %v10861_v0 }
 0x408   :  { %9144 = vmatprep.subr.bf16.mxu0 %v10862_v1  ;;  %9166 = vmatprep.subr.bf16.mxu1 %v10863_v2 }
 0x40b   :  { %9145 = vmatpush3.bf16.msra.mxu0 %v10864_v3  ;;  %9167 = vmatpush3.bf16.msra.mxu1 %v10865_v4 }
 0x40c   :  { %9146 = vmatprep.subr.bf16.mxu0 %v10866_v57  ;;  %9168 = vmatprep.subr.bf16.mxu1 %v10867_v6 }
 0x40f   :  { %9147 = vmatpush3.bf16.msra.mxu0 %v10868_v55  ;;  %9169 = vmatpush3.bf16.msra.mxu1 %v10869_v8 }
 0x410   :  { %9148 = vmatprep.subr.bf16.mxu0 %v10870_v10  ;;  %9170 = vmatprep.subr.bf16.mxu1 %v10871_v11 }
 0x413   :  { %9149 = vmatpush3.bf16.msra.mxu0 %v10872_v12  ;;  %9171 = vmatpush3.bf16.msra.mxu1 %v10873_v14 }
 0x414   :  { %9150 = vmatprep.subr.bf16.mxu0 %v10874_v62  ;;  %9172 = vmatprep.subr.bf16.mxu1 %v10875_v15 }
 0x417   :  { %9151 = vmatpush3.bf16.msra.mxu0 %v10876_v16  ;;  %9173 = vmatpush3.bf16.msra.mxu1 %v10877_v17 }
 0x418   :  { %9152 = vmatprep.subr.bf16.mxu0 %v10878_v18  ;;  %9174 = vmatprep.subr.bf16.mxu1 %v10879_v19 }
 0x41b   :  { %9153 = vmatpush3.bf16.msra.mxu0 %v10880_v7  ;;  %9175 = vmatpush3.bf16.msra.mxu1 %v10881_v21 }
 0x41c   :  { %9154 = vmatprep.subr.bf16.mxu0 %v10882_v5  ;;  %9176 = vmatprep.subr.bf16.mxu1 %v10883_v23 }
 0x41f   :  { %9155 = vmatpush3.bf16.msra.mxu0 %v10884_v9  ;;  %9177 = vmatpush3.bf16.msra.mxu1 %v10885_v26 }
 0x4d5   :  { %v7053_v37 = vpop.f32.mrb[0].mxu0  ;;  %v7709_v20 = vpop.f32.mrb[0].mxu1 }
 0x4d6   :  { %v9184_v28 = vadd.f32 %v7053_v37, %v1267_v25  ;;  %v9186_v40 = vadd.f32 %v7709_v20, %v1275_v34  ;;  %v7055_v41 = vpop.f32.mrb[1].mxu0  ;;  %v7711_v24 = vpop.f32.mrb[1].mxu1 }
 0x4d7   :  { %v9185_v45 = vadd.f32 %v7055_v41, %v1271_v35  ;;  %v9187_v29 = vadd.f32 %v7711_v24, %v1279_v22  ;;  %v7057_v46 = vpop.f32.mrb[2].mxu0  ;;  %v7713_v48 = vpop.f32.mrb[2].mxu1 }
 0x4d8   :  { %v7716_v32 = vmax.f32 %v9184_v28, 0.0  ;;  %v7718_v50 = vmax.f32 %v9186_v40, 0.0  ;;  %v7058_v51 = vpop.f32.mrb[3].mxu0  ;;  %v7714_v38 = vpop.f32.mrb[3].mxu1 }
 0x4d9   :  { %v7717_v53 = vmax.f32 %v9185_v45, 0.0  ;;  %v7719_v43 = vmax.f32 %v9187_v29, 0.0 }
 0x4da   :  { %v7720_v49 = vpack.c.bf16 %v7716_v32, %v7716_v32  ;;  %v7722_v42 = vpack.c.bf16 %v7718_v50, %v7718_v50 }
 0x4db   :  { %v7721_v36 = vpack.c.bf16 %v7717_v53, %v7717_v53  ;;  %v7723_v54 = vpack.c.bf16 %v7719_v43, %v7719_v43 }
 0x4dd   :  { %8019 = vmatprep.mubr.bf16.mxu0 %v7721_v36  ;;  %8059 = vmatprep.mubr.bf16.mxu1 %v7723_v54 }
 0x4de   :  { %8020 = vmatmul.mubr.bf16.vlgmr.msra.gmra.mrb[4].mxu0 %v7720_v49  ;;  %8060 = vmatmul.mubr.bf16.vlgmr.msra.gmra.mrb[4].mxu1 %v7722_v42 }
 0x5b1   :  { %v9156_v56 = vpop.f32.mrb[4].mxu0  ;;  %v9178_v39 = vpop.f32.mrb[4].mxu1 }
 0x5b2   :  { %v9157_v59 = vpop.f32.mrb[5].mxu0  ;;  %v9179_v44 = vpop.f32.mrb[5].mxu1 }
 0x5b3   :  { %v9158_v60 = vadd.f32 %v9157_v59, %v9156_v56  ;;  %v9180_v61 = vadd.f32 %v9179_v44, %v9178_v39  ;;  %v9159_v63 = vpop.f32.mrb[6].mxu0  ;;  %v9181_v52 = vpop.f32.mrb[6].mxu1 }
 0x5b4   :  { %v9160_v47 = vpop.f32.mrb[7].mxu0  ;;  %v9182_v0 = vpop.f32.mrb[7].mxu1 }
 0x5b5   :  { %v8022_v1 = vadd.f32 %v9158_v60, %v9107_v58 }
 0x5b7   :  { %v8062_v2 = vadd.f32 %v9180_v61, %v8022_v1 }
 0x5b9   :  { %8068 = vst.msk [vmem:[#allocation2] sm:$0x3] %vm8067_vm0, %v8062_v2 }
 0x5ba   :  { %10897 = shalt.err (!%p10894_p4)
}
 0x5bb   :  { %s10898_s11 = scalar_lea.hbm %s14307_s5, 32 }
 0x5bc   :  { %p10899_p5 = scmp.ne.s32.totalorder %s14307_s5, %s10898_s11  ;;  %p10902_p6 = scmp.lt.u32.totalorder %s10898_s11, %s14307_s5 }
 0x5be   :  { %p10904_p7 = pnand %p10902_p6, %p10899_p5 }
 0x5c0   :  { %10907 = shalt.err (!%p10904_p7)
}
 0x5c1   :  { %8078 = dma.vmem_to_hbm [thread:$0]  %s8076_s8, 32, %s14307_s5, [#allocation3]  }
 0x5c2   :  { %10908 = dma.done.wait [#allocation3], 32  }
 0x5c3   :  { %10909 = vsyncadd [#allocation3], 4294967264 }
 0x5c4   :  { %8082 = vsyncpa [#allocation3], 1 }

</bundles_post_ra>
